<compile_context>
chip_gen: v5e
topology: v5e:2x2
jax: 0.10.0
libtpu: 0.0.40
codegen_flags: <defaults>
</compile_context>

<pallas_src>
import functools

import jax
import jax.numpy as jnp
from jax.experimental import pallas as pl
from jax.experimental.pallas import tpu as pltpu


NEG_SLOPE = 0.2  # PyG GATConv default negative_slope


# ----------------------------------------------------------------------------
# Fused Pallas kernel
# ----------------------------------------------------------------------------
def _gat_block(x, w_ref, att_ref, b_ref, mask_bias, head_mask, *, n_heads):
    """One GATConv (concat=True) + ReLU, computed on values held in VMEM/vregs.

    x:         [N, Fin]            f32
    w_ref:     [Fin, H*F]          bf16   (lin.weight.T)
    att_ref:   [H*F, 2H]           bf16   block-diagonal [att_src | att_dst]
    b_ref:     [1, H*F]            f32
    mask_bias: [N, N]              f32    log(edge multiplicity) or -1e30
    head_mask: [H, H*F] f32 (ones in that head's columns) or None when H == 1
    """
    # Feature transform on the MXU (bf16 operands, f32 accumulation).
    h = jnp.dot(x.astype(jnp.bfloat16), w_ref[...],
                preferred_element_type=jnp.float32)                 # [N, H*F]
    # All per-head attention logits with one MXU matmul:
    #   alphas[:, 0:H] = alpha_src, alphas[:, H:2H] = alpha_dst
    alphas = jnp.dot(h.astype(jnp.bfloat16), att_ref[...],
                     preferred_element_type=jnp.float32)             # [N, 2H]
    alphas_t = alphas.T                                              # [2H, N]

    out = None
    for hd in range(n_heads):
        # s[i, j] = alpha_dst[i] + alpha_src[j]   (edge j -> i)
        s = alphas[:, n_heads + hd:n_heads + hd + 1] + alphas_t[hd:hd + 1, :]
        s = jnp.where(s > 0, s, NEG_SLOPE * s)                       # leaky relu
        s = s + mask_bias                                            # mask + edge multiplicity
        m = jnp.max(s, axis=-1, keepdims=True)
        p = jnp.exp(s - m)
        denom = jnp.sum(p, axis=-1, keepdims=True)
        p = p * pl.reciprocal(denom, approx=True)                    # divide on EUP
        # Lane-dense aggregation: zero out other heads' columns instead of
        # slicing 16-lane chunks; MXU cost is identical (lanes pad to 128).
        if head_mask is None:
            hh = h
        else:
            hh = h * head_mask[hd:hd + 1, :]
        o = jnp.dot(p.astype(jnp.bfloat16), hh.astype(jnp.bfloat16),
                    preferred_element_type=jnp.float32)              # [N, H*F]
        out = o if out is None else out + o

    out = out + b_ref[...]                                           # single lane-dense bias add
    return jnp.maximum(out, 0.0)                                     # relu


def _gat_classifier_kernel(x_ref, mask_ref, hm_ref,
                           w1_ref, a1_ref, b1_ref,
                           w2_ref, a2_ref, b2_ref,
                           w3_ref, a3_ref, b3_ref,
                           wl_ref, bl_ref,
                           wc_ref, bc_ref,
                           out_ref, *, heads):
    mask_bias = mask_ref[...]                                        # hoisted, shared by all layers
    hm = hm_ref[...]
    x = x_ref[...]
    # conv1 + relu (dropout = identity in eval mode)
    x = _gat_block(x, w1_ref, a1_ref, b1_ref, mask_bias, hm, n_heads=heads)
    # conv2 + relu
    x = _gat_block(x, w2_ref, a2_ref, b2_ref, mask_bias, hm, n_heads=heads)
    # conv3 (heads=1) + relu
    x = _gat_block(x, w3_ref, a3_ref, b3_ref, mask_bias, None, n_heads=1)
    # integration_linear + relu
    x = jnp.dot(x.astype(jnp.bfloat16), wl_ref[...],
                preferred_element_type=jnp.float32) + bl_ref[...]
    x = jnp.maximum(x, 0.0)
    # classifier (columns zero-padded to 128 lanes -> lane-dense store)
    out_ref[...] = jnp.dot(x.astype(jnp.bfloat16), wc_ref[...],
                           preferred_element_type=jnp.float32) + bc_ref[...]


# ----------------------------------------------------------------------------
# Wrapper
# ----------------------------------------------------------------------------
def gat_classifier_forward(x, adj_bias, params, *, heads, output_dim):
    n = x.shape[0]
    out_pad = params["wc"].shape[1]
    vmem = pl.BlockSpec(memory_space=pltpu.MemorySpace.VMEM)
    kern = functools.partial(_gat_classifier_kernel, heads=heads)
    out = pl.pallas_call(
        kern,
        out_shape=jax.ShapeDtypeStruct((n, out_pad), jnp.float32),
        in_specs=[vmem] * 16,
        out_specs=vmem,
    )(x, adj_bias, params["hm"],
      params["w1"], params["a1"], params["b1"],
      params["w2"], params["a2"], params["b2"],
      params["w3"], params["a3"], params["b3"],
      params["wl"], params["bl"],
      params["wc"], params["bc"])
    return out[:, :output_dim]


# ----------------------------------------------------------------------------
# Host-side parameter / adjacency preparation
# ----------------------------------------------------------------------------
def _glorot(key, shape):
    fan_in, fan_out = shape[0], shape[-1]
    lim = jnp.sqrt(6.0 / (fan_in + fan_out))
    return jax.random.uniform(key, shape, jnp.float32, -lim, lim)


def _att_blockdiag(att_src, att_dst):
    """[H, F] x 2  ->  block-diagonal [H*F, 2H] so alphas = h @ att_bd on the MXU."""
    h, f = att_src.shape
    eye = jnp.eye(h, dtype=jnp.float32)
    src_bd = (att_src[:, :, None] * eye[:, None, :]).reshape(h * f, h)
    dst_bd = (att_dst[:, :, None] * eye[:, None, :]).reshape(h * f, h)
    return jnp.concatenate([src_bd, dst_bd], axis=1)


def init_params(key, input_dim, hidden_dim, heads, integration_dim, output_dim,
                out_pad=128):
    ks = jax.random.split(key, 16)
    bf = jnp.bfloat16
    p = {}
    # conv1: GATConv(input_dim, hidden_dim, heads=8)
    p["w1"] = _glorot(ks[0], (input_dim, heads * hidden_dim)).astype(bf)
    p["a1"] = _att_blockdiag(_glorot(ks[1], (heads, hidden_dim)),
                             _glorot(ks[2], (heads, hidden_dim))).astype(bf)
    p["b1"] = jnp.zeros((1, heads * hidden_dim), jnp.float32)
    # conv2: GATConv(hidden_dim*8, hidden_dim, heads=8)
    p["w2"] = _glorot(ks[3], (heads * hidden_dim, heads * hidden_dim)).astype(bf)
    p["a2"] = _att_blockdiag(_glorot(ks[4], (heads, hidden_dim)),
                             _glorot(ks[5], (heads, hidden_dim))).astype(bf)
    p["b2"] = jnp.zeros((1, heads * hidden_dim), jnp.float32)
    # conv3: GATConv(hidden_dim*8, integration_dim)  (heads=1)
    p["w3"] = _glorot(ks[6], (heads * hidden_dim, integration_dim)).astype(bf)
    p["a3"] = _att_blockdiag(_glorot(ks[7], (1, integration_dim)),
                             _glorot(ks[8], (1, integration_dim))).astype(bf)
    p["b3"] = jnp.zeros((1, integration_dim), jnp.float32)
    # integration_linear: Linear(integration_dim, integration_dim)
    p["wl"] = _glorot(ks[9], (integration_dim, integration_dim)).astype(bf)
    p["bl"] = jax.random.uniform(ks[10], (1, integration_dim), jnp.float32, -0.05, 0.05)
    # classifier: Linear(integration_dim, output_dim), padded to out_pad lanes
    wc = _glorot(ks[11], (integration_dim, output_dim))
    bc = jax.random.uniform(ks[12], (1, output_dim), jnp.float32, -0.05, 0.05)
    p["wc"] = jnp.zeros((integration_dim, out_pad), jnp.float32
                        ).at[:, :output_dim].set(wc).astype(bf)
    p["bc"] = jnp.zeros((1, out_pad), jnp.float32).at[:, :output_dim].set(bc)
    # 0/1 head masks [H, H*F] used for lane-dense per-head aggregation
    p["hm"] = jnp.repeat(jnp.eye(heads, dtype=jnp.float32), hidden_dim, axis=1)
    return p


def build_adj_bias(src, dst, n):
    """adj_bias[i, j] = log(#edges j->i) (self loop forced to exactly 1), -1e30 otherwise."""
    cnt = jnp.zeros((n, n), jnp.float32).at[dst, src].add(1.0)
    eye = jnp.eye(n, dtype=bool)
    cnt = jnp.where(eye, 1.0, cnt)          # remove_self_loops + add_self_loops
    return jnp.where(cnt > 0, jnp.log(jnp.maximum(cnt, 1.0)), -1e30)


# ----------------------------------------------------------------------------
if __name__ == "__main__":
    key = jax.random.PRNGKey(0)
    kx, ke_src, ke_dst, kp = jax.random.split(key, 4)

    # small shapes consistent with the module
    N = 64              # number of graph nodes
    E = 256             # number of edges
    input_dim = 16
    hidden_dim = 16     # per-head dim; heads=8 -> 128 concat
    heads = 8
    integration_dim = 128
    output_dim = 3

    # node features  (data.x[0] -> [N, input_dim])
    x = jax.random.normal(kx, (N, input_dim), jnp.float32)

    # random edge_index [2, E]  (data.edge_index[0]); densify to additive bias
    src = jax.random.randint(ke_src, (E,), 0, N)
    dst = jax.random.randint(ke_dst, (E,), 0, N)
    adj_bias = build_adj_bias(src, dst, N)

    params = init_params(kp, input_dim, hidden_dim, heads, integration_dim, output_dim)

    out = gat_classifier_forward(x, adj_bias, params, heads=heads, output_dim=output_dim)
    out = jax.block_until_ready(out)
    assert out.shape == (N, output_dim)
    assert bool(jnp.all(jnp.isfinite(out)))
    print("KERNEL_OK")
</pallas_src>

<mosaic_0001>
module attributes {stable_mosaic.version = 11 : i64} {
  func.func @_gat_classifier_kernel(%arg0: memref<64x16xf32, #tpu.memory_space<vmem>>, %arg1: memref<64x64xf32, #tpu.memory_space<vmem>>, %arg2: memref<8x128xf32, #tpu.memory_space<vmem>>, %arg3: memref<16x128xbf16, #tpu.memory_space<vmem>>, %arg4: memref<128x16xbf16, #tpu.memory_space<vmem>>, %arg5: memref<1x128xf32, #tpu.memory_space<vmem>>, %arg6: memref<128x128xbf16, #tpu.memory_space<vmem>>, %arg7: memref<128x16xbf16, #tpu.memory_space<vmem>>, %arg8: memref<1x128xf32, #tpu.memory_space<vmem>>, %arg9: memref<128x128xbf16, #tpu.memory_space<vmem>>, %arg10: memref<128x2xbf16, #tpu.memory_space<vmem>>, %arg11: memref<1x128xf32, #tpu.memory_space<vmem>>, %arg12: memref<128x128xbf16, #tpu.memory_space<vmem>>, %arg13: memref<1x128xf32, #tpu.memory_space<vmem>>, %arg14: memref<128x128xbf16, #tpu.memory_space<vmem>>, %arg15: memref<1x128xf32, #tpu.memory_space<vmem>>, %arg16: memref<64x128xf32, #tpu.memory_space<vmem>>) attributes {dimension_semantics = [], scalar_prefetch = 0 : i64, scratch_operands = 0 : i64, tpu.core_type = #tpu.core_type<tc>} {
    %c0 = arith.constant 0 : index
    %c0_0 = arith.constant 0 : index
    %0 = vector.load %arg1[%c0, %c0_0] : memref<64x64xf32, #tpu.memory_space<vmem>>, vector<64x64xf32>
    %c0_1 = arith.constant 0 : index
    %c0_2 = arith.constant 0 : index
    %1 = vector.load %arg2[%c0_1, %c0_2] : memref<8x128xf32, #tpu.memory_space<vmem>>, vector<8x128xf32>
    %c0_3 = arith.constant 0 : index
    %c0_4 = arith.constant 0 : index
    %2 = vector.load %arg0[%c0_3, %c0_4] : memref<64x16xf32, #tpu.memory_space<vmem>>, vector<64x16xf32>
    %3 = arith.truncf %2 : vector<64x16xf32> to vector<64x16xbf16>
    %c0_5 = arith.constant 0 : index
    %c0_6 = arith.constant 0 : index
    %4 = vector.load %arg3[%c0_5, %c0_6] : memref<16x128xbf16, #tpu.memory_space<vmem>>, vector<16x128xbf16>
    %cst = arith.constant dense<0.000000e+00> : vector<64x128xf32>
    %5 = tpu.matmul %3, %4, %cst {dimension_numbers = #tpu.dot_dimension_numbers<[1], [0], [0], [1], [0, 0, 1, 1], [], []>} : vector<64x16xbf16>, vector<16x128xbf16>, vector<64x128xf32> -> vector<64x128xf32>
    %6 = arith.truncf %5 : vector<64x128xf32> to vector<64x128xbf16>
    %c0_7 = arith.constant 0 : index
    %c0_8 = arith.constant 0 : index
    %7 = vector.load %arg4[%c0_7, %c0_8] : memref<128x16xbf16, #tpu.memory_space<vmem>>, vector<128x16xbf16>
    %cst_9 = arith.constant dense<0.000000e+00> : vector<64x16xf32>
    %8 = tpu.matmul %6, %7, %cst_9 {dimension_numbers = #tpu.dot_dimension_numbers<[1], [0], [0], [1], [0, 0, 1, 1], [], []>} : vector<64x128xbf16>, vector<128x16xbf16>, vector<64x16xf32> -> vector<64x16xf32>
    %9 = tpu.transpose %8, [1, 0] : vector<64x16xf32> -> vector<16x64xf32>
    %10 = vector.extract_strided_slice %8 {offsets = [0, 8], sizes = [64, 1], strides = [1, 1]} : vector<64x16xf32> to vector<64x1xf32>
    %11 = vector.extract_strided_slice %9 {offsets = [0, 0], sizes = [1, 64], strides = [1, 1]} : vector<16x64xf32> to vector<1x64xf32>
    %12 = vector.broadcast %10 : vector<64x1xf32> to vector<64x64xf32>
    %13 = vector.broadcast %11 : vector<1x64xf32> to vector<64x64xf32>
    %14 = arith.addf %12, %13 : vector<64x64xf32>
    %cst_10 = arith.constant 0.000000e+00 : f32
    %15 = vector.broadcast %cst_10 : f32 to vector<64x64xf32>
    %16 = arith.cmpf ogt, %14, %15 : vector<64x64xf32>
    %cst_11 = arith.constant 2.000000e-01 : f32
    %17 = vector.broadcast %cst_11 : f32 to vector<64x64xf32>
    %18 = arith.mulf %17, %14 : vector<64x64xf32>
    %19 = arith.select %16, %14, %18 : vector<64x64xi1>, vector<64x64xf32>
    %20 = arith.addf %19, %0 : vector<64x64xf32>
    %cst_12 = arith.constant dense<0xFF800000> : vector<64xf32>
    %21 = vector.multi_reduction <maximumf>, %20, %cst_12 [1] : vector<64x64xf32> to vector<64xf32>
    %22 = vector.shape_cast %21 : vector<64xf32> to vector<64x1xf32>
    %23 = vector.broadcast %22 : vector<64x1xf32> to vector<64x64xf32>
    %24 = arith.subf %20, %23 : vector<64x64xf32>
    %25 = math.exp %24 : vector<64x64xf32>
    %cst_13 = arith.constant dense<0.000000e+00> : vector<64xf32>
    %26 = vector.multi_reduction <add>, %25, %cst_13 [1] : vector<64x64xf32> to vector<64xf32>
    %27 = vector.shape_cast %26 : vector<64xf32> to vector<64x1xf32>
    %28 = tpu.reciprocal %27 {approx = true} : vector<64x1xf32> -> vector<64x1xf32>
    %29 = vector.broadcast %28 : vector<64x1xf32> to vector<64x64xf32>
    %30 = arith.mulf %25, %29 : vector<64x64xf32>
    %31 = vector.extract_strided_slice %1 {offsets = [0, 0], sizes = [1, 128], strides = [1, 1]} : vector<8x128xf32> to vector<1x128xf32>
    %32 = vector.broadcast %31 : vector<1x128xf32> to vector<64x128xf32>
    %33 = arith.mulf %5, %32 : vector<64x128xf32>
    %34 = arith.truncf %30 : vector<64x64xf32> to vector<64x64xbf16>
    %35 = arith.truncf %33 : vector<64x128xf32> to vector<64x128xbf16>
    %cst_14 = arith.constant dense<0.000000e+00> : vector<64x128xf32>
    %36 = tpu.matmul %34, %35, %cst_14 {dimension_numbers = #tpu.dot_dimension_numbers<[1], [0], [0], [1], [0, 0, 1, 1], [], []>} : vector<64x64xbf16>, vector<64x128xbf16>, vector<64x128xf32> -> vector<64x128xf32>
    %37 = vector.extract_strided_slice %8 {offsets = [0, 9], sizes = [64, 1], strides = [1, 1]} : vector<64x16xf32> to vector<64x1xf32>
    %38 = vector.extract_strided_slice %9 {offsets = [1, 0], sizes = [1, 64], strides = [1, 1]} : vector<16x64xf32> to vector<1x64xf32>
    %39 = vector.broadcast %37 : vector<64x1xf32> to vector<64x64xf32>
    %40 = vector.broadcast %38 : vector<1x64xf32> to vector<64x64xf32>
    %41 = arith.addf %39, %40 : vector<64x64xf32>
    %cst_15 = arith.constant 0.000000e+00 : f32
    %42 = vector.broadcast %cst_15 : f32 to vector<64x64xf32>
    %43 = arith.cmpf ogt, %41, %42 : vector<64x64xf32>
    %cst_16 = arith.constant 2.000000e-01 : f32
    %44 = vector.broadcast %cst_16 : f32 to vector<64x64xf32>
    %45 = arith.mulf %44, %41 : vector<64x64xf32>
    %46 = arith.select %43, %41, %45 : vector<64x64xi1>, vector<64x64xf32>
    %47 = arith.addf %46, %0 : vector<64x64xf32>
    %cst_17 = arith.constant dense<0xFF800000> : vector<64xf32>
    %48 = vector.multi_reduction <maximumf>, %47, %cst_17 [1] : vector<64x64xf32> to vector<64xf32>
    %49 = vector.shape_cast %48 : vector<64xf32> to vector<64x1xf32>
    %50 = vector.broadcast %49 : vector<64x1xf32> to vector<64x64xf32>
    %51 = arith.subf %47, %50 : vector<64x64xf32>
    %52 = math.exp %51 : vector<64x64xf32>
    %cst_18 = arith.constant dense<0.000000e+00> : vector<64xf32>
    %53 = vector.multi_reduction <add>, %52, %cst_18 [1] : vector<64x64xf32> to vector<64xf32>
    %54 = vector.shape_cast %53 : vector<64xf32> to vector<64x1xf32>
    %55 = tpu.reciprocal %54 {approx = true} : vector<64x1xf32> -> vector<64x1xf32>
    %56 = vector.broadcast %55 : vector<64x1xf32> to vector<64x64xf32>
    %57 = arith.mulf %52, %56 : vector<64x64xf32>
    %58 = vector.extract_strided_slice %1 {offsets = [1, 0], sizes = [1, 128], strides = [1, 1]} : vector<8x128xf32> to vector<1x128xf32>
    %59 = vector.broadcast %58 : vector<1x128xf32> to vector<64x128xf32>
    %60 = arith.mulf %5, %59 : vector<64x128xf32>
    %61 = arith.truncf %57 : vector<64x64xf32> to vector<64x64xbf16>
    %62 = arith.truncf %60 : vector<64x128xf32> to vector<64x128xbf16>
    %cst_19 = arith.constant dense<0.000000e+00> : vector<64x128xf32>
    %63 = tpu.matmul %61, %62, %cst_19 {dimension_numbers = #tpu.dot_dimension_numbers<[1], [0], [0], [1], [0, 0, 1, 1], [], []>} : vector<64x64xbf16>, vector<64x128xbf16>, vector<64x128xf32> -> vector<64x128xf32>
    %64 = arith.addf %36, %63 : vector<64x128xf32>
    %65 = vector.extract_strided_slice %8 {offsets = [0, 10], sizes = [64, 1], strides = [1, 1]} : vector<64x16xf32> to vector<64x1xf32>
    %66 = vector.extract_strided_slice %9 {offsets = [2, 0], sizes = [1, 64], strides = [1, 1]} : vector<16x64xf32> to vector<1x64xf32>
    %67 = vector.broadcast %65 : vector<64x1xf32> to vector<64x64xf32>
    %68 = vector.broadcast %66 : vector<1x64xf32> to vector<64x64xf32>
    %69 = arith.addf %67, %68 : vector<64x64xf32>
    %cst_20 = arith.constant 0.000000e+00 : f32
    %70 = vector.broadcast %cst_20 : f32 to vector<64x64xf32>
    %71 = arith.cmpf ogt, %69, %70 : vector<64x64xf32>
    %cst_21 = arith.constant 2.000000e-01 : f32
    %72 = vector.broadcast %cst_21 : f32 to vector<64x64xf32>
    %73 = arith.mulf %72, %69 : vector<64x64xf32>
    %74 = arith.select %71, %69, %73 : vector<64x64xi1>, vector<64x64xf32>
    %75 = arith.addf %74, %0 : vector<64x64xf32>
    %cst_22 = arith.constant dense<0xFF800000> : vector<64xf32>
    %76 = vector.multi_reduction <maximumf>, %75, %cst_22 [1] : vector<64x64xf32> to vector<64xf32>
    %77 = vector.shape_cast %76 : vector<64xf32> to vector<64x1xf32>
    %78 = vector.broadcast %77 : vector<64x1xf32> to vector<64x64xf32>
    %79 = arith.subf %75, %78 : vector<64x64xf32>
    %80 = math.exp %79 : vector<64x64xf32>
    %cst_23 = arith.constant dense<0.000000e+00> : vector<64xf32>
    %81 = vector.multi_reduction <add>, %80, %cst_23 [1] : vector<64x64xf32> to vector<64xf32>
    %82 = vector.shape_cast %81 : vector<64xf32> to vector<64x1xf32>
    %83 = tpu.reciprocal %82 {approx = true} : vector<64x1xf32> -> vector<64x1xf32>
    %84 = vector.broadcast %83 : vector<64x1xf32> to vector<64x64xf32>
    %85 = arith.mulf %80, %84 : vector<64x64xf32>
    %86 = vector.extract_strided_slice %1 {offsets = [2, 0], sizes = [1, 128], strides = [1, 1]} : vector<8x128xf32> to vector<1x128xf32>
    %87 = vector.broadcast %86 : vector<1x128xf32> to vector<64x128xf32>
    %88 = arith.mulf %5, %87 : vector<64x128xf32>
    %89 = arith.truncf %85 : vector<64x64xf32> to vector<64x64xbf16>
    %90 = arith.truncf %88 : vector<64x128xf32> to vector<64x128xbf16>
    %cst_24 = arith.constant dense<0.000000e+00> : vector<64x128xf32>
    %91 = tpu.matmul %89, %90, %cst_24 {dimension_numbers = #tpu.dot_dimension_numbers<[1], [0], [0], [1], [0, 0, 1, 1], [], []>} : vector<64x64xbf16>, vector<64x128xbf16>, vector<64x128xf32> -> vector<64x128xf32>
    %92 = arith.addf %64, %91 : vector<64x128xf32>
    %93 = vector.extract_strided_slice %8 {offsets = [0, 11], sizes = [64, 1], strides = [1, 1]} : vector<64x16xf32> to vector<64x1xf32>
    %94 = vector.extract_strided_slice %9 {offsets = [3, 0], sizes = [1, 64], strides = [1, 1]} : vector<16x64xf32> to vector<1x64xf32>
    %95 = vector.broadcast %93 : vector<64x1xf32> to vector<64x64xf32>
    %96 = vector.broadcast %94 : vector<1x64xf32> to vector<64x64xf32>
    %97 = arith.addf %95, %96 : vector<64x64xf32>
    %cst_25 = arith.constant 0.000000e+00 : f32
    %98 = vector.broadcast %cst_25 : f32 to vector<64x64xf32>
    %99 = arith.cmpf ogt, %97, %98 : vector<64x64xf32>
    %cst_26 = arith.constant 2.000000e-01 : f32
    %100 = vector.broadcast %cst_26 : f32 to vector<64x64xf32>
    %101 = arith.mulf %100, %97 : vector<64x64xf32>
    %102 = arith.select %99, %97, %101 : vector<64x64xi1>, vector<64x64xf32>
    %103 = arith.addf %102, %0 : vector<64x64xf32>
    %cst_27 = arith.constant dense<0xFF800000> : vector<64xf32>
    %104 = vector.multi_reduction <maximumf>, %103, %cst_27 [1] : vector<64x64xf32> to vector<64xf32>
    %105 = vector.shape_cast %104 : vector<64xf32> to vector<64x1xf32>
    %106 = vector.broadcast %105 : vector<64x1xf32> to vector<64x64xf32>
    %107 = arith.subf %103, %106 : vector<64x64xf32>
    %108 = math.exp %107 : vector<64x64xf32>
    %cst_28 = arith.constant dense<0.000000e+00> : vector<64xf32>
    %109 = vector.multi_reduction <add>, %108, %cst_28 [1] : vector<64x64xf32> to vector<64xf32>
    %110 = vector.shape_cast %109 : vector<64xf32> to vector<64x1xf32>
    %111 = tpu.reciprocal %110 {approx = true} : vector<64x1xf32> -> vector<64x1xf32>
    %112 = vector.broadcast %111 : vector<64x1xf32> to vector<64x64xf32>
    %113 = arith.mulf %108, %112 : vector<64x64xf32>
    %114 = vector.extract_strided_slice %1 {offsets = [3, 0], sizes = [1, 128], strides = [1, 1]} : vector<8x128xf32> to vector<1x128xf32>
    %115 = vector.broadcast %114 : vector<1x128xf32> to vector<64x128xf32>
    %116 = arith.mulf %5, %115 : vector<64x128xf32>
    %117 = arith.truncf %113 : vector<64x64xf32> to vector<64x64xbf16>
    %118 = arith.truncf %116 : vector<64x128xf32> to vector<64x128xbf16>
    %cst_29 = arith.constant dense<0.000000e+00> : vector<64x128xf32>
    %119 = tpu.matmul %117, %118, %cst_29 {dimension_numbers = #tpu.dot_dimension_numbers<[1], [0], [0], [1], [0, 0, 1, 1], [], []>} : vector<64x64xbf16>, vector<64x128xbf16>, vector<64x128xf32> -> vector<64x128xf32>
    %120 = arith.addf %92, %119 : vector<64x128xf32>
    %121 = vector.extract_strided_slice %8 {offsets = [0, 12], sizes = [64, 1], strides = [1, 1]} : vector<64x16xf32> to vector<64x1xf32>
    %122 = vector.extract_strided_slice %9 {offsets = [4, 0], sizes = [1, 64], strides = [1, 1]} : vector<16x64xf32> to vector<1x64xf32>
    %123 = vector.broadcast %121 : vector<64x1xf32> to vector<64x64xf32>
    %124 = vector.broadcast %122 : vector<1x64xf32> to vector<64x64xf32>
    %125 = arith.addf %123, %124 : vector<64x64xf32>
    %cst_30 = arith.constant 0.000000e+00 : f32
    %126 = vector.broadcast %cst_30 : f32 to vector<64x64xf32>
    %127 = arith.cmpf ogt, %125, %126 : vector<64x64xf32>
    %cst_31 = arith.constant 2.000000e-01 : f32
    %128 = vector.broadcast %cst_31 : f32 to vector<64x64xf32>
    %129 = arith.mulf %128, %125 : vector<64x64xf32>
    %130 = arith.select %127, %125, %129 : vector<64x64xi1>, vector<64x64xf32>
    %131 = arith.addf %130, %0 : vector<64x64xf32>
    %cst_32 = arith.constant dense<0xFF800000> : vector<64xf32>
    %132 = vector.multi_reduction <maximumf>, %131, %cst_32 [1] : vector<64x64xf32> to vector<64xf32>
    %133 = vector.shape_cast %132 : vector<64xf32> to vector<64x1xf32>
    %134 = vector.broadcast %133 : vector<64x1xf32> to vector<64x64xf32>
    %135 = arith.subf %131, %134 : vector<64x64xf32>
    %136 = math.exp %135 : vector<64x64xf32>
    %cst_33 = arith.constant dense<0.000000e+00> : vector<64xf32>
    %137 = vector.multi_reduction <add>, %136, %cst_33 [1] : vector<64x64xf32> to vector<64xf32>
    %138 = vector.shape_cast %137 : vector<64xf32> to vector<64x1xf32>
    %139 = tpu.reciprocal %138 {approx = true} : vector<64x1xf32> -> vector<64x1xf32>
    %140 = vector.broadcast %139 : vector<64x1xf32> to vector<64x64xf32>
    %141 = arith.mulf %136, %140 : vector<64x64xf32>
    %142 = vector.extract_strided_slice %1 {offsets = [4, 0], sizes = [1, 128], strides = [1, 1]} : vector<8x128xf32> to vector<1x128xf32>
    %143 = vector.broadcast %142 : vector<1x128xf32> to vector<64x128xf32>
    %144 = arith.mulf %5, %143 : vector<64x128xf32>
    %145 = arith.truncf %141 : vector<64x64xf32> to vector<64x64xbf16>
    %146 = arith.truncf %144 : vector<64x128xf32> to vector<64x128xbf16>
    %cst_34 = arith.constant dense<0.000000e+00> : vector<64x128xf32>
    %147 = tpu.matmul %145, %146, %cst_34 {dimension_numbers = #tpu.dot_dimension_numbers<[1], [0], [0], [1], [0, 0, 1, 1], [], []>} : vector<64x64xbf16>, vector<64x128xbf16>, vector<64x128xf32> -> vector<64x128xf32>
    %148 = arith.addf %120, %147 : vector<64x128xf32>
    %149 = vector.extract_strided_slice %8 {offsets = [0, 13], sizes = [64, 1], strides = [1, 1]} : vector<64x16xf32> to vector<64x1xf32>
    %150 = vector.extract_strided_slice %9 {offsets = [5, 0], sizes = [1, 64], strides = [1, 1]} : vector<16x64xf32> to vector<1x64xf32>
    %151 = vector.broadcast %149 : vector<64x1xf32> to vector<64x64xf32>
    %152 = vector.broadcast %150 : vector<1x64xf32> to vector<64x64xf32>
    %153 = arith.addf %151, %152 : vector<64x64xf32>
    %cst_35 = arith.constant 0.000000e+00 : f32
    %154 = vector.broadcast %cst_35 : f32 to vector<64x64xf32>
    %155 = arith.cmpf ogt, %153, %154 : vector<64x64xf32>
    %cst_36 = arith.constant 2.000000e-01 : f32
    %156 = vector.broadcast %cst_36 : f32 to vector<64x64xf32>
    %157 = arith.mulf %156, %153 : vector<64x64xf32>
    %158 = arith.select %155, %153, %157 : vector<64x64xi1>, vector<64x64xf32>
    %159 = arith.addf %158, %0 : vector<64x64xf32>
    %cst_37 = arith.constant dense<0xFF800000> : vector<64xf32>
    %160 = vector.multi_reduction <maximumf>, %159, %cst_37 [1] : vector<64x64xf32> to vector<64xf32>
    %161 = vector.shape_cast %160 : vector<64xf32> to vector<64x1xf32>
    %162 = vector.broadcast %161 : vector<64x1xf32> to vector<64x64xf32>
    %163 = arith.subf %159, %162 : vector<64x64xf32>
    %164 = math.exp %163 : vector<64x64xf32>
    %cst_38 = arith.constant dense<0.000000e+00> : vector<64xf32>
    %165 = vector.multi_reduction <add>, %164, %cst_38 [1] : vector<64x64xf32> to vector<64xf32>
    %166 = vector.shape_cast %165 : vector<64xf32> to vector<64x1xf32>
    %167 = tpu.reciprocal %166 {approx = true} : vector<64x1xf32> -> vector<64x1xf32>
    %168 = vector.broadcast %167 : vector<64x1xf32> to vector<64x64xf32>
    %169 = arith.mulf %164, %168 : vector<64x64xf32>
    %170 = vector.extract_strided_slice %1 {offsets = [5, 0], sizes = [1, 128], strides = [1, 1]} : vector<8x128xf32> to vector<1x128xf32>
    %171 = vector.broadcast %170 : vector<1x128xf32> to vector<64x128xf32>
    %172 = arith.mulf %5, %171 : vector<64x128xf32>
    %173 = arith.truncf %169 : vector<64x64xf32> to vector<64x64xbf16>
    %174 = arith.truncf %172 : vector<64x128xf32> to vector<64x128xbf16>
    %cst_39 = arith.constant dense<0.000000e+00> : vector<64x128xf32>
    %175 = tpu.matmul %173, %174, %cst_39 {dimension_numbers = #tpu.dot_dimension_numbers<[1], [0], [0], [1], [0, 0, 1, 1], [], []>} : vector<64x64xbf16>, vector<64x128xbf16>, vector<64x128xf32> -> vector<64x128xf32>
    %176 = arith.addf %148, %175 : vector<64x128xf32>
    %177 = vector.extract_strided_slice %8 {offsets = [0, 14], sizes = [64, 1], strides = [1, 1]} : vector<64x16xf32> to vector<64x1xf32>
    %178 = vector.extract_strided_slice %9 {offsets = [6, 0], sizes = [1, 64], strides = [1, 1]} : vector<16x64xf32> to vector<1x64xf32>
    %179 = vector.broadcast %177 : vector<64x1xf32> to vector<64x64xf32>
    %180 = vector.broadcast %178 : vector<1x64xf32> to vector<64x64xf32>
    %181 = arith.addf %179, %180 : vector<64x64xf32>
    %cst_40 = arith.constant 0.000000e+00 : f32
    %182 = vector.broadcast %cst_40 : f32 to vector<64x64xf32>
    %183 = arith.cmpf ogt, %181, %182 : vector<64x64xf32>
    %cst_41 = arith.constant 2.000000e-01 : f32
    %184 = vector.broadcast %cst_41 : f32 to vector<64x64xf32>
    %185 = arith.mulf %184, %181 : vector<64x64xf32>
    %186 = arith.select %183, %181, %185 : vector<64x64xi1>, vector<64x64xf32>
    %187 = arith.addf %186, %0 : vector<64x64xf32>
    %cst_42 = arith.constant dense<0xFF800000> : vector<64xf32>
    %188 = vector.multi_reduction <maximumf>, %187, %cst_42 [1] : vector<64x64xf32> to vector<64xf32>
    %189 = vector.shape_cast %188 : vector<64xf32> to vector<64x1xf32>
    %190 = vector.broadcast %189 : vector<64x1xf32> to vector<64x64xf32>
    %191 = arith.subf %187, %190 : vector<64x64xf32>
    %192 = math.exp %191 : vector<64x64xf32>
    %cst_43 = arith.constant dense<0.000000e+00> : vector<64xf32>
    %193 = vector.multi_reduction <add>, %192, %cst_43 [1] : vector<64x64xf32> to vector<64xf32>
    %194 = vector.shape_cast %193 : vector<64xf32> to vector<64x1xf32>
    %195 = tpu.reciprocal %194 {approx = true} : vector<64x1xf32> -> vector<64x1xf32>
    %196 = vector.broadcast %195 : vector<64x1xf32> to vector<64x64xf32>
    %197 = arith.mulf %192, %196 : vector<64x64xf32>
    %198 = vector.extract_strided_slice %1 {offsets = [6, 0], sizes = [1, 128], strides = [1, 1]} : vector<8x128xf32> to vector<1x128xf32>
    %199 = vector.broadcast %198 : vector<1x128xf32> to vector<64x128xf32>
    %200 = arith.mulf %5, %199 : vector<64x128xf32>
    %201 = arith.truncf %197 : vector<64x64xf32> to vector<64x64xbf16>
    %202 = arith.truncf %200 : vector<64x128xf32> to vector<64x128xbf16>
    %cst_44 = arith.constant dense<0.000000e+00> : vector<64x128xf32>
    %203 = tpu.matmul %201, %202, %cst_44 {dimension_numbers = #tpu.dot_dimension_numbers<[1], [0], [0], [1], [0, 0, 1, 1], [], []>} : vector<64x64xbf16>, vector<64x128xbf16>, vector<64x128xf32> -> vector<64x128xf32>
    %204 = arith.addf %176, %203 : vector<64x128xf32>
    %205 = vector.extract_strided_slice %8 {offsets = [0, 15], sizes = [64, 1], strides = [1, 1]} : vector<64x16xf32> to vector<64x1xf32>
    %206 = vector.extract_strided_slice %9 {offsets = [7, 0], sizes = [1, 64], strides = [1, 1]} : vector<16x64xf32> to vector<1x64xf32>
    %207 = vector.broadcast %205 : vector<64x1xf32> to vector<64x64xf32>
    %208 = vector.broadcast %206 : vector<1x64xf32> to vector<64x64xf32>
    %209 = arith.addf %207, %208 : vector<64x64xf32>
    %cst_45 = arith.constant 0.000000e+00 : f32
    %210 = vector.broadcast %cst_45 : f32 to vector<64x64xf32>
    %211 = arith.cmpf ogt, %209, %210 : vector<64x64xf32>
    %cst_46 = arith.constant 2.000000e-01 : f32
    %212 = vector.broadcast %cst_46 : f32 to vector<64x64xf32>
    %213 = arith.mulf %212, %209 : vector<64x64xf32>
    %214 = arith.select %211, %209, %213 : vector<64x64xi1>, vector<64x64xf32>
    %215 = arith.addf %214, %0 : vector<64x64xf32>
    %cst_47 = arith.constant dense<0xFF800000> : vector<64xf32>
    %216 = vector.multi_reduction <maximumf>, %215, %cst_47 [1] : vector<64x64xf32> to vector<64xf32>
    %217 = vector.shape_cast %216 : vector<64xf32> to vector<64x1xf32>
    %218 = vector.broadcast %217 : vector<64x1xf32> to vector<64x64xf32>
    %219 = arith.subf %215, %218 : vector<64x64xf32>
    %220 = math.exp %219 : vector<64x64xf32>
    %cst_48 = arith.constant dense<0.000000e+00> : vector<64xf32>
    %221 = vector.multi_reduction <add>, %220, %cst_48 [1] : vector<64x64xf32> to vector<64xf32>
    %222 = vector.shape_cast %221 : vector<64xf32> to vector<64x1xf32>
    %223 = tpu.reciprocal %222 {approx = true} : vector<64x1xf32> -> vector<64x1xf32>
    %224 = vector.broadcast %223 : vector<64x1xf32> to vector<64x64xf32>
    %225 = arith.mulf %220, %224 : vector<64x64xf32>
    %226 = vector.extract_strided_slice %1 {offsets = [7, 0], sizes = [1, 128], strides = [1, 1]} : vector<8x128xf32> to vector<1x128xf32>
    %227 = vector.broadcast %226 : vector<1x128xf32> to vector<64x128xf32>
    %228 = arith.mulf %5, %227 : vector<64x128xf32>
    %229 = arith.truncf %225 : vector<64x64xf32> to vector<64x64xbf16>
    %230 = arith.truncf %228 : vector<64x128xf32> to vector<64x128xbf16>
    %cst_49 = arith.constant dense<0.000000e+00> : vector<64x128xf32>
    %231 = tpu.matmul %229, %230, %cst_49 {dimension_numbers = #tpu.dot_dimension_numbers<[1], [0], [0], [1], [0, 0, 1, 1], [], []>} : vector<64x64xbf16>, vector<64x128xbf16>, vector<64x128xf32> -> vector<64x128xf32>
    %232 = arith.addf %204, %231 : vector<64x128xf32>
    %c0_50 = arith.constant 0 : index
    %c0_51 = arith.constant 0 : index
    %233 = vector.load %arg5[%c0_50, %c0_51] : memref<1x128xf32, #tpu.memory_space<vmem>>, vector<1x128xf32>
    %234 = vector.broadcast %233 : vector<1x128xf32> to vector<64x128xf32>
    %235 = arith.addf %232, %234 : vector<64x128xf32>
    %cst_52 = arith.constant 0.000000e+00 : f32
    %236 = vector.broadcast %cst_52 : f32 to vector<64x128xf32>
    %237 = arith.maximumf %235, %236 : vector<64x128xf32>
    %238 = arith.truncf %237 : vector<64x128xf32> to vector<64x128xbf16>
    %c0_53 = arith.constant 0 : index
    %c0_54 = arith.constant 0 : index
    %239 = vector.load %arg6[%c0_53, %c0_54] : memref<128x128xbf16, #tpu.memory_space<vmem>>, vector<128x128xbf16>
    %cst_55 = arith.constant dense<0.000000e+00> : vector<64x128xf32>
    %240 = tpu.matmul %238, %239, %cst_55 {dimension_numbers = #tpu.dot_dimension_numbers<[1], [0], [0], [1], [0, 0, 1, 1], [], []>} : vector<64x128xbf16>, vector<128x128xbf16>, vector<64x128xf32> -> vector<64x128xf32>
    %241 = arith.truncf %240 : vector<64x128xf32> to vector<64x128xbf16>
    %c0_56 = arith.constant 0 : index
    %c0_57 = arith.constant 0 : index
    %242 = vector.load %arg7[%c0_56, %c0_57] : memref<128x16xbf16, #tpu.memory_space<vmem>>, vector<128x16xbf16>
    %cst_58 = arith.constant dense<0.000000e+00> : vector<64x16xf32>
    %243 = tpu.matmul %241, %242, %cst_58 {dimension_numbers = #tpu.dot_dimension_numbers<[1], [0], [0], [1], [0, 0, 1, 1], [], []>} : vector<64x128xbf16>, vector<128x16xbf16>, vector<64x16xf32> -> vector<64x16xf32>
    %244 = tpu.transpose %243, [1, 0] : vector<64x16xf32> -> vector<16x64xf32>
    %245 = vector.extract_strided_slice %243 {offsets = [0, 8], sizes = [64, 1], strides = [1, 1]} : vector<64x16xf32> to vector<64x1xf32>
    %246 = vector.extract_strided_slice %244 {offsets = [0, 0], sizes = [1, 64], strides = [1, 1]} : vector<16x64xf32> to vector<1x64xf32>
    %247 = vector.broadcast %245 : vector<64x1xf32> to vector<64x64xf32>
    %248 = vector.broadcast %246 : vector<1x64xf32> to vector<64x64xf32>
    %249 = arith.addf %247, %248 : vector<64x64xf32>
    %cst_59 = arith.constant 0.000000e+00 : f32
    %250 = vector.broadcast %cst_59 : f32 to vector<64x64xf32>
    %251 = arith.cmpf ogt, %249, %250 : vector<64x64xf32>
    %cst_60 = arith.constant 2.000000e-01 : f32
    %252 = vector.broadcast %cst_60 : f32 to vector<64x64xf32>
    %253 = arith.mulf %252, %249 : vector<64x64xf32>
    %254 = arith.select %251, %249, %253 : vector<64x64xi1>, vector<64x64xf32>
    %255 = arith.addf %254, %0 : vector<64x64xf32>
    %cst_61 = arith.constant dense<0xFF800000> : vector<64xf32>
    %256 = vector.multi_reduction <maximumf>, %255, %cst_61 [1] : vector<64x64xf32> to vector<64xf32>
    %257 = vector.shape_cast %256 : vector<64xf32> to vector<64x1xf32>
    %258 = vector.broadcast %257 : vector<64x1xf32> to vector<64x64xf32>
    %259 = arith.subf %255, %258 : vector<64x64xf32>
    %260 = math.exp %259 : vector<64x64xf32>
    %cst_62 = arith.constant dense<0.000000e+00> : vector<64xf32>
    %261 = vector.multi_reduction <add>, %260, %cst_62 [1] : vector<64x64xf32> to vector<64xf32>
    %262 = vector.shape_cast %261 : vector<64xf32> to vector<64x1xf32>
    %263 = tpu.reciprocal %262 {approx = true} : vector<64x1xf32> -> vector<64x1xf32>
    %264 = vector.broadcast %263 : vector<64x1xf32> to vector<64x64xf32>
    %265 = arith.mulf %260, %264 : vector<64x64xf32>
    %266 = vector.extract_strided_slice %1 {offsets = [0, 0], sizes = [1, 128], strides = [1, 1]} : vector<8x128xf32> to vector<1x128xf32>
    %267 = vector.broadcast %266 : vector<1x128xf32> to vector<64x128xf32>
    %268 = arith.mulf %240, %267 : vector<64x128xf32>
    %269 = arith.truncf %265 : vector<64x64xf32> to vector<64x64xbf16>
    %270 = arith.truncf %268 : vector<64x128xf32> to vector<64x128xbf16>
    %cst_63 = arith.constant dense<0.000000e+00> : vector<64x128xf32>
    %271 = tpu.matmul %269, %270, %cst_63 {dimension_numbers = #tpu.dot_dimension_numbers<[1], [0], [0], [1], [0, 0, 1, 1], [], []>} : vector<64x64xbf16>, vector<64x128xbf16>, vector<64x128xf32> -> vector<64x128xf32>
    %272 = vector.extract_strided_slice %243 {offsets = [0, 9], sizes = [64, 1], strides = [1, 1]} : vector<64x16xf32> to vector<64x1xf32>
    %273 = vector.extract_strided_slice %244 {offsets = [1, 0], sizes = [1, 64], strides = [1, 1]} : vector<16x64xf32> to vector<1x64xf32>
    %274 = vector.broadcast %272 : vector<64x1xf32> to vector<64x64xf32>
    %275 = vector.broadcast %273 : vector<1x64xf32> to vector<64x64xf32>
    %276 = arith.addf %274, %275 : vector<64x64xf32>
    %cst_64 = arith.constant 0.000000e+00 : f32
    %277 = vector.broadcast %cst_64 : f32 to vector<64x64xf32>
    %278 = arith.cmpf ogt, %276, %277 : vector<64x64xf32>
    %cst_65 = arith.constant 2.000000e-01 : f32
    %279 = vector.broadcast %cst_65 : f32 to vector<64x64xf32>
    %280 = arith.mulf %279, %276 : vector<64x64xf32>
    %281 = arith.select %278, %276, %280 : vector<64x64xi1>, vector<64x64xf32>
    %282 = arith.addf %281, %0 : vector<64x64xf32>
    %cst_66 = arith.constant dense<0xFF800000> : vector<64xf32>
    %283 = vector.multi_reduction <maximumf>, %282, %cst_66 [1] : vector<64x64xf32> to vector<64xf32>
    %284 = vector.shape_cast %283 : vector<64xf32> to vector<64x1xf32>
    %285 = vector.broadcast %284 : vector<64x1xf32> to vector<64x64xf32>
    %286 = arith.subf %282, %285 : vector<64x64xf32>
    %287 = math.exp %286 : vector<64x64xf32>
    %cst_67 = arith.constant dense<0.000000e+00> : vector<64xf32>
    %288 = vector.multi_reduction <add>, %287, %cst_67 [1] : vector<64x64xf32> to vector<64xf32>
    %289 = vector.shape_cast %288 : vector<64xf32> to vector<64x1xf32>
    %290 = tpu.reciprocal %289 {approx = true} : vector<64x1xf32> -> vector<64x1xf32>
    %291 = vector.broadcast %290 : vector<64x1xf32> to vector<64x64xf32>
    %292 = arith.mulf %287, %291 : vector<64x64xf32>
    %293 = vector.extract_strided_slice %1 {offsets = [1, 0], sizes = [1, 128], strides = [1, 1]} : vector<8x128xf32> to vector<1x128xf32>
    %294 = vector.broadcast %293 : vector<1x128xf32> to vector<64x128xf32>
    %295 = arith.mulf %240, %294 : vector<64x128xf32>
    %296 = arith.truncf %292 : vector<64x64xf32> to vector<64x64xbf16>
    %297 = arith.truncf %295 : vector<64x128xf32> to vector<64x128xbf16>
    %cst_68 = arith.constant dense<0.000000e+00> : vector<64x128xf32>
    %298 = tpu.matmul %296, %297, %cst_68 {dimension_numbers = #tpu.dot_dimension_numbers<[1], [0], [0], [1], [0, 0, 1, 1], [], []>} : vector<64x64xbf16>, vector<64x128xbf16>, vector<64x128xf32> -> vector<64x128xf32>
    %299 = arith.addf %271, %298 : vector<64x128xf32>
    %300 = vector.extract_strided_slice %243 {offsets = [0, 10], sizes = [64, 1], strides = [1, 1]} : vector<64x16xf32> to vector<64x1xf32>
    %301 = vector.extract_strided_slice %244 {offsets = [2, 0], sizes = [1, 64], strides = [1, 1]} : vector<16x64xf32> to vector<1x64xf32>
    %302 = vector.broadcast %300 : vector<64x1xf32> to vector<64x64xf32>
    %303 = vector.broadcast %301 : vector<1x64xf32> to vector<64x64xf32>
    %304 = arith.addf %302, %303 : vector<64x64xf32>
    %cst_69 = arith.constant 0.000000e+00 : f32
    %305 = vector.broadcast %cst_69 : f32 to vector<64x64xf32>
    %306 = arith.cmpf ogt, %304, %305 : vector<64x64xf32>
    %cst_70 = arith.constant 2.000000e-01 : f32
    %307 = vector.broadcast %cst_70 : f32 to vector<64x64xf32>
    %308 = arith.mulf %307, %304 : vector<64x64xf32>
    %309 = arith.select %306, %304, %308 : vector<64x64xi1>, vector<64x64xf32>
    %310 = arith.addf %309, %0 : vector<64x64xf32>
    %cst_71 = arith.constant dense<0xFF800000> : vector<64xf32>
    %311 = vector.multi_reduction <maximumf>, %310, %cst_71 [1] : vector<64x64xf32> to vector<64xf32>
    %312 = vector.shape_cast %311 : vector<64xf32> to vector<64x1xf32>
    %313 = vector.broadcast %312 : vector<64x1xf32> to vector<64x64xf32>
    %314 = arith.subf %310, %313 : vector<64x64xf32>
    %315 = math.exp %314 : vector<64x64xf32>
    %cst_72 = arith.constant dense<0.000000e+00> : vector<64xf32>
    %316 = vector.multi_reduction <add>, %315, %cst_72 [1] : vector<64x64xf32> to vector<64xf32>
    %317 = vector.shape_cast %316 : vector<64xf32> to vector<64x1xf32>
    %318 = tpu.reciprocal %317 {approx = true} : vector<64x1xf32> -> vector<64x1xf32>
    %319 = vector.broadcast %318 : vector<64x1xf32> to vector<64x64xf32>
    %320 = arith.mulf %315, %319 : vector<64x64xf32>
    %321 = vector.extract_strided_slice %1 {offsets = [2, 0], sizes = [1, 128], strides = [1, 1]} : vector<8x128xf32> to vector<1x128xf32>
    %322 = vector.broadcast %321 : vector<1x128xf32> to vector<64x128xf32>
    %323 = arith.mulf %240, %322 : vector<64x128xf32>
    %324 = arith.truncf %320 : vector<64x64xf32> to vector<64x64xbf16>
    %325 = arith.truncf %323 : vector<64x128xf32> to vector<64x128xbf16>
    %cst_73 = arith.constant dense<0.000000e+00> : vector<64x128xf32>
    %326 = tpu.matmul %324, %325, %cst_73 {dimension_numbers = #tpu.dot_dimension_numbers<[1], [0], [0], [1], [0, 0, 1, 1], [], []>} : vector<64x64xbf16>, vector<64x128xbf16>, vector<64x128xf32> -> vector<64x128xf32>
    %327 = arith.addf %299, %326 : vector<64x128xf32>
    %328 = vector.extract_strided_slice %243 {offsets = [0, 11], sizes = [64, 1], strides = [1, 1]} : vector<64x16xf32> to vector<64x1xf32>
    %329 = vector.extract_strided_slice %244 {offsets = [3, 0], sizes = [1, 64], strides = [1, 1]} : vector<16x64xf32> to vector<1x64xf32>
    %330 = vector.broadcast %328 : vector<64x1xf32> to vector<64x64xf32>
    %331 = vector.broadcast %329 : vector<1x64xf32> to vector<64x64xf32>
    %332 = arith.addf %330, %331 : vector<64x64xf32>
    %cst_74 = arith.constant 0.000000e+00 : f32
    %333 = vector.broadcast %cst_74 : f32 to vector<64x64xf32>
    %334 = arith.cmpf ogt, %332, %333 : vector<64x64xf32>
    %cst_75 = arith.constant 2.000000e-01 : f32
    %335 = vector.broadcast %cst_75 : f32 to vector<64x64xf32>
    %336 = arith.mulf %335, %332 : vector<64x64xf32>
    %337 = arith.select %334, %332, %336 : vector<64x64xi1>, vector<64x64xf32>
    %338 = arith.addf %337, %0 : vector<64x64xf32>
    %cst_76 = arith.constant dense<0xFF800000> : vector<64xf32>
    %339 = vector.multi_reduction <maximumf>, %338, %cst_76 [1] : vector<64x64xf32> to vector<64xf32>
    %340 = vector.shape_cast %339 : vector<64xf32> to vector<64x1xf32>
    %341 = vector.broadcast %340 : vector<64x1xf32> to vector<64x64xf32>
    %342 = arith.subf %338, %341 : vector<64x64xf32>
    %343 = math.exp %342 : vector<64x64xf32>
    %cst_77 = arith.constant dense<0.000000e+00> : vector<64xf32>
    %344 = vector.multi_reduction <add>, %343, %cst_77 [1] : vector<64x64xf32> to vector<64xf32>
    %345 = vector.shape_cast %344 : vector<64xf32> to vector<64x1xf32>
    %346 = tpu.reciprocal %345 {approx = true} : vector<64x1xf32> -> vector<64x1xf32>
    %347 = vector.broadcast %346 : vector<64x1xf32> to vector<64x64xf32>
    %348 = arith.mulf %343, %347 : vector<64x64xf32>
    %349 = vector.extract_strided_slice %1 {offsets = [3, 0], sizes = [1, 128], strides = [1, 1]} : vector<8x128xf32> to vector<1x128xf32>
    %350 = vector.broadcast %349 : vector<1x128xf32> to vector<64x128xf32>
    %351 = arith.mulf %240, %350 : vector<64x128xf32>
    %352 = arith.truncf %348 : vector<64x64xf32> to vector<64x64xbf16>
    %353 = arith.truncf %351 : vector<64x128xf32> to vector<64x128xbf16>
    %cst_78 = arith.constant dense<0.000000e+00> : vector<64x128xf32>
    %354 = tpu.matmul %352, %353, %cst_78 {dimension_numbers = #tpu.dot_dimension_numbers<[1], [0], [0], [1], [0, 0, 1, 1], [], []>} : vector<64x64xbf16>, vector<64x128xbf16>, vector<64x128xf32> -> vector<64x128xf32>
    %355 = arith.addf %327, %354 : vector<64x128xf32>
    %356 = vector.extract_strided_slice %243 {offsets = [0, 12], sizes = [64, 1], strides = [1, 1]} : vector<64x16xf32> to vector<64x1xf32>
    %357 = vector.extract_strided_slice %244 {offsets = [4, 0], sizes = [1, 64], strides = [1, 1]} : vector<16x64xf32> to vector<1x64xf32>
    %358 = vector.broadcast %356 : vector<64x1xf32> to vector<64x64xf32>
    %359 = vector.broadcast %357 : vector<1x64xf32> to vector<64x64xf32>
    %360 = arith.addf %358, %359 : vector<64x64xf32>
    %cst_79 = arith.constant 0.000000e+00 : f32
    %361 = vector.broadcast %cst_79 : f32 to vector<64x64xf32>
    %362 = arith.cmpf ogt, %360, %361 : vector<64x64xf32>
    %cst_80 = arith.constant 2.000000e-01 : f32
    %363 = vector.broadcast %cst_80 : f32 to vector<64x64xf32>
    %364 = arith.mulf %363, %360 : vector<64x64xf32>
    %365 = arith.select %362, %360, %364 : vector<64x64xi1>, vector<64x64xf32>
    %366 = arith.addf %365, %0 : vector<64x64xf32>
    %cst_81 = arith.constant dense<0xFF800000> : vector<64xf32>
    %367 = vector.multi_reduction <maximumf>, %366, %cst_81 [1] : vector<64x64xf32> to vector<64xf32>
    %368 = vector.shape_cast %367 : vector<64xf32> to vector<64x1xf32>
    %369 = vector.broadcast %368 : vector<64x1xf32> to vector<64x64xf32>
    %370 = arith.subf %366, %369 : vector<64x64xf32>
    %371 = math.exp %370 : vector<64x64xf32>
    %cst_82 = arith.constant dense<0.000000e+00> : vector<64xf32>
    %372 = vector.multi_reduction <add>, %371, %cst_82 [1] : vector<64x64xf32> to vector<64xf32>
    %373 = vector.shape_cast %372 : vector<64xf32> to vector<64x1xf32>
    %374 = tpu.reciprocal %373 {approx = true} : vector<64x1xf32> -> vector<64x1xf32>
    %375 = vector.broadcast %374 : vector<64x1xf32> to vector<64x64xf32>
    %376 = arith.mulf %371, %375 : vector<64x64xf32>
    %377 = vector.extract_strided_slice %1 {offsets = [4, 0], sizes = [1, 128], strides = [1, 1]} : vector<8x128xf32> to vector<1x128xf32>
    %378 = vector.broadcast %377 : vector<1x128xf32> to vector<64x128xf32>
    %379 = arith.mulf %240, %378 : vector<64x128xf32>
    %380 = arith.truncf %376 : vector<64x64xf32> to vector<64x64xbf16>
    %381 = arith.truncf %379 : vector<64x128xf32> to vector<64x128xbf16>
    %cst_83 = arith.constant dense<0.000000e+00> : vector<64x128xf32>
    %382 = tpu.matmul %380, %381, %cst_83 {dimension_numbers = #tpu.dot_dimension_numbers<[1], [0], [0], [1], [0, 0, 1, 1], [], []>} : vector<64x64xbf16>, vector<64x128xbf16>, vector<64x128xf32> -> vector<64x128xf32>
    %383 = arith.addf %355, %382 : vector<64x128xf32>
    %384 = vector.extract_strided_slice %243 {offsets = [0, 13], sizes = [64, 1], strides = [1, 1]} : vector<64x16xf32> to vector<64x1xf32>
    %385 = vector.extract_strided_slice %244 {offsets = [5, 0], sizes = [1, 64], strides = [1, 1]} : vector<16x64xf32> to vector<1x64xf32>
    %386 = vector.broadcast %384 : vector<64x1xf32> to vector<64x64xf32>
    %387 = vector.broadcast %385 : vector<1x64xf32> to vector<64x64xf32>
    %388 = arith.addf %386, %387 : vector<64x64xf32>
    %cst_84 = arith.constant 0.000000e+00 : f32
    %389 = vector.broadcast %cst_84 : f32 to vector<64x64xf32>
    %390 = arith.cmpf ogt, %388, %389 : vector<64x64xf32>
    %cst_85 = arith.constant 2.000000e-01 : f32
    %391 = vector.broadcast %cst_85 : f32 to vector<64x64xf32>
    %392 = arith.mulf %391, %388 : vector<64x64xf32>
    %393 = arith.select %390, %388, %392 : vector<64x64xi1>, vector<64x64xf32>
    %394 = arith.addf %393, %0 : vector<64x64xf32>
    %cst_86 = arith.constant dense<0xFF800000> : vector<64xf32>
    %395 = vector.multi_reduction <maximumf>, %394, %cst_86 [1] : vector<64x64xf32> to vector<64xf32>
    %396 = vector.shape_cast %395 : vector<64xf32> to vector<64x1xf32>
    %397 = vector.broadcast %396 : vector<64x1xf32> to vector<64x64xf32>
    %398 = arith.subf %394, %397 : vector<64x64xf32>
    %399 = math.exp %398 : vector<64x64xf32>
    %cst_87 = arith.constant dense<0.000000e+00> : vector<64xf32>
    %400 = vector.multi_reduction <add>, %399, %cst_87 [1] : vector<64x64xf32> to vector<64xf32>
    %401 = vector.shape_cast %400 : vector<64xf32> to vector<64x1xf32>
    %402 = tpu.reciprocal %401 {approx = true} : vector<64x1xf32> -> vector<64x1xf32>
    %403 = vector.broadcast %402 : vector<64x1xf32> to vector<64x64xf32>
    %404 = arith.mulf %399, %403 : vector<64x64xf32>
    %405 = vector.extract_strided_slice %1 {offsets = [5, 0], sizes = [1, 128], strides = [1, 1]} : vector<8x128xf32> to vector<1x128xf32>
    %406 = vector.broadcast %405 : vector<1x128xf32> to vector<64x128xf32>
    %407 = arith.mulf %240, %406 : vector<64x128xf32>
    %408 = arith.truncf %404 : vector<64x64xf32> to vector<64x64xbf16>
    %409 = arith.truncf %407 : vector<64x128xf32> to vector<64x128xbf16>
    %cst_88 = arith.constant dense<0.000000e+00> : vector<64x128xf32>
    %410 = tpu.matmul %408, %409, %cst_88 {dimension_numbers = #tpu.dot_dimension_numbers<[1], [0], [0], [1], [0, 0, 1, 1], [], []>} : vector<64x64xbf16>, vector<64x128xbf16>, vector<64x128xf32> -> vector<64x128xf32>
    %411 = arith.addf %383, %410 : vector<64x128xf32>
    %412 = vector.extract_strided_slice %243 {offsets = [0, 14], sizes = [64, 1], strides = [1, 1]} : vector<64x16xf32> to vector<64x1xf32>
    %413 = vector.extract_strided_slice %244 {offsets = [6, 0], sizes = [1, 64], strides = [1, 1]} : vector<16x64xf32> to vector<1x64xf32>
    %414 = vector.broadcast %412 : vector<64x1xf32> to vector<64x64xf32>
    %415 = vector.broadcast %413 : vector<1x64xf32> to vector<64x64xf32>
    %416 = arith.addf %414, %415 : vector<64x64xf32>
    %cst_89 = arith.constant 0.000000e+00 : f32
    %417 = vector.broadcast %cst_89 : f32 to vector<64x64xf32>
    %418 = arith.cmpf ogt, %416, %417 : vector<64x64xf32>
    %cst_90 = arith.constant 2.000000e-01 : f32
    %419 = vector.broadcast %cst_90 : f32 to vector<64x64xf32>
    %420 = arith.mulf %419, %416 : vector<64x64xf32>
    %421 = arith.select %418, %416, %420 : vector<64x64xi1>, vector<64x64xf32>
    %422 = arith.addf %421, %0 : vector<64x64xf32>
    %cst_91 = arith.constant dense<0xFF800000> : vector<64xf32>
    %423 = vector.multi_reduction <maximumf>, %422, %cst_91 [1] : vector<64x64xf32> to vector<64xf32>
    %424 = vector.shape_cast %423 : vector<64xf32> to vector<64x1xf32>
    %425 = vector.broadcast %424 : vector<64x1xf32> to vector<64x64xf32>
    %426 = arith.subf %422, %425 : vector<64x64xf32>
    %427 = math.exp %426 : vector<64x64xf32>
    %cst_92 = arith.constant dense<0.000000e+00> : vector<64xf32>
    %428 = vector.multi_reduction <add>, %427, %cst_92 [1] : vector<64x64xf32> to vector<64xf32>
    %429 = vector.shape_cast %428 : vector<64xf32> to vector<64x1xf32>
    %430 = tpu.reciprocal %429 {approx = true} : vector<64x1xf32> -> vector<64x1xf32>
    %431 = vector.broadcast %430 : vector<64x1xf32> to vector<64x64xf32>
    %432 = arith.mulf %427, %431 : vector<64x64xf32>
    %433 = vector.extract_strided_slice %1 {offsets = [6, 0], sizes = [1, 128], strides = [1, 1]} : vector<8x128xf32> to vector<1x128xf32>
    %434 = vector.broadcast %433 : vector<1x128xf32> to vector<64x128xf32>
    %435 = arith.mulf %240, %434 : vector<64x128xf32>
    %436 = arith.truncf %432 : vector<64x64xf32> to vector<64x64xbf16>
    %437 = arith.truncf %435 : vector<64x128xf32> to vector<64x128xbf16>
    %cst_93 = arith.constant dense<0.000000e+00> : vector<64x128xf32>
    %438 = tpu.matmul %436, %437, %cst_93 {dimension_numbers = #tpu.dot_dimension_numbers<[1], [0], [0], [1], [0, 0, 1, 1], [], []>} : vector<64x64xbf16>, vector<64x128xbf16>, vector<64x128xf32> -> vector<64x128xf32>
    %439 = arith.addf %411, %438 : vector<64x128xf32>
    %440 = vector.extract_strided_slice %243 {offsets = [0, 15], sizes = [64, 1], strides = [1, 1]} : vector<64x16xf32> to vector<64x1xf32>
    %441 = vector.extract_strided_slice %244 {offsets = [7, 0], sizes = [1, 64], strides = [1, 1]} : vector<16x64xf32> to vector<1x64xf32>
    %442 = vector.broadcast %440 : vector<64x1xf32> to vector<64x64xf32>
    %443 = vector.broadcast %441 : vector<1x64xf32> to vector<64x64xf32>
    %444 = arith.addf %442, %443 : vector<64x64xf32>
    %cst_94 = arith.constant 0.000000e+00 : f32
    %445 = vector.broadcast %cst_94 : f32 to vector<64x64xf32>
    %446 = arith.cmpf ogt, %444, %445 : vector<64x64xf32>
    %cst_95 = arith.constant 2.000000e-01 : f32
    %447 = vector.broadcast %cst_95 : f32 to vector<64x64xf32>
    %448 = arith.mulf %447, %444 : vector<64x64xf32>
    %449 = arith.select %446, %444, %448 : vector<64x64xi1>, vector<64x64xf32>
    %450 = arith.addf %449, %0 : vector<64x64xf32>
    %cst_96 = arith.constant dense<0xFF800000> : vector<64xf32>
    %451 = vector.multi_reduction <maximumf>, %450, %cst_96 [1] : vector<64x64xf32> to vector<64xf32>
    %452 = vector.shape_cast %451 : vector<64xf32> to vector<64x1xf32>
    %453 = vector.broadcast %452 : vector<64x1xf32> to vector<64x64xf32>
    %454 = arith.subf %450, %453 : vector<64x64xf32>
    %455 = math.exp %454 : vector<64x64xf32>
    %cst_97 = arith.constant dense<0.000000e+00> : vector<64xf32>
    %456 = vector.multi_reduction <add>, %455, %cst_97 [1] : vector<64x64xf32> to vector<64xf32>
    %457 = vector.shape_cast %456 : vector<64xf32> to vector<64x1xf32>
    %458 = tpu.reciprocal %457 {approx = true} : vector<64x1xf32> -> vector<64x1xf32>
    %459 = vector.broadcast %458 : vector<64x1xf32> to vector<64x64xf32>
    %460 = arith.mulf %455, %459 : vector<64x64xf32>
    %461 = vector.extract_strided_slice %1 {offsets = [7, 0], sizes = [1, 128], strides = [1, 1]} : vector<8x128xf32> to vector<1x128xf32>
    %462 = vector.broadcast %461 : vector<1x128xf32> to vector<64x128xf32>
    %463 = arith.mulf %240, %462 : vector<64x128xf32>
    %464 = arith.truncf %460 : vector<64x64xf32> to vector<64x64xbf16>
    %465 = arith.truncf %463 : vector<64x128xf32> to vector<64x128xbf16>
    %cst_98 = arith.constant dense<0.000000e+00> : vector<64x128xf32>
    %466 = tpu.matmul %464, %465, %cst_98 {dimension_numbers = #tpu.dot_dimension_numbers<[1], [0], [0], [1], [0, 0, 1, 1], [], []>} : vector<64x64xbf16>, vector<64x128xbf16>, vector<64x128xf32> -> vector<64x128xf32>
    %467 = arith.addf %439, %466 : vector<64x128xf32>
    %c0_99 = arith.constant 0 : index
    %c0_100 = arith.constant 0 : index
    %468 = vector.load %arg8[%c0_99, %c0_100] : memref<1x128xf32, #tpu.memory_space<vmem>>, vector<1x128xf32>
    %469 = vector.broadcast %468 : vector<1x128xf32> to vector<64x128xf32>
    %470 = arith.addf %467, %469 : vector<64x128xf32>
    %cst_101 = arith.constant 0.000000e+00 : f32
    %471 = vector.broadcast %cst_101 : f32 to vector<64x128xf32>
    %472 = arith.maximumf %470, %471 : vector<64x128xf32>
    %473 = arith.truncf %472 : vector<64x128xf32> to vector<64x128xbf16>
    %c0_102 = arith.constant 0 : index
    %c0_103 = arith.constant 0 : index
    %474 = vector.load %arg9[%c0_102, %c0_103] : memref<128x128xbf16, #tpu.memory_space<vmem>>, vector<128x128xbf16>
    %cst_104 = arith.constant dense<0.000000e+00> : vector<64x128xf32>
    %475 = tpu.matmul %473, %474, %cst_104 {dimension_numbers = #tpu.dot_dimension_numbers<[1], [0], [0], [1], [0, 0, 1, 1], [], []>} : vector<64x128xbf16>, vector<128x128xbf16>, vector<64x128xf32> -> vector<64x128xf32>
    %476 = arith.truncf %475 : vector<64x128xf32> to vector<64x128xbf16>
    %c0_105 = arith.constant 0 : index
    %c0_106 = arith.constant 0 : index
    %477 = vector.load %arg10[%c0_105, %c0_106] : memref<128x2xbf16, #tpu.memory_space<vmem>>, vector<128x2xbf16>
    %cst_107 = arith.constant dense<0.000000e+00> : vector<64x2xf32>
    %478 = tpu.matmul %476, %477, %cst_107 {dimension_numbers = #tpu.dot_dimension_numbers<[1], [0], [0], [1], [0, 0, 1, 1], [], []>} : vector<64x128xbf16>, vector<128x2xbf16>, vector<64x2xf32> -> vector<64x2xf32>
    %479 = tpu.transpose %478, [1, 0] : vector<64x2xf32> -> vector<2x64xf32>
    %480 = vector.extract_strided_slice %478 {offsets = [0, 1], sizes = [64, 1], strides = [1, 1]} : vector<64x2xf32> to vector<64x1xf32>
    %481 = vector.extract_strided_slice %479 {offsets = [0, 0], sizes = [1, 64], strides = [1, 1]} : vector<2x64xf32> to vector<1x64xf32>
    %482 = vector.broadcast %480 : vector<64x1xf32> to vector<64x64xf32>
    %483 = vector.broadcast %481 : vector<1x64xf32> to vector<64x64xf32>
    %484 = arith.addf %482, %483 : vector<64x64xf32>
    %cst_108 = arith.constant 0.000000e+00 : f32
    %485 = vector.broadcast %cst_108 : f32 to vector<64x64xf32>
    %486 = arith.cmpf ogt, %484, %485 : vector<64x64xf32>
    %cst_109 = arith.constant 2.000000e-01 : f32
    %487 = vector.broadcast %cst_109 : f32 to vector<64x64xf32>
    %488 = arith.mulf %487, %484 : vector<64x64xf32>
    %489 = arith.select %486, %484, %488 : vector<64x64xi1>, vector<64x64xf32>
    %490 = arith.addf %489, %0 : vector<64x64xf32>
    %cst_110 = arith.constant dense<0xFF800000> : vector<64xf32>
    %491 = vector.multi_reduction <maximumf>, %490, %cst_110 [1] : vector<64x64xf32> to vector<64xf32>
    %492 = vector.shape_cast %491 : vector<64xf32> to vector<64x1xf32>
    %493 = vector.broadcast %492 : vector<64x1xf32> to vector<64x64xf32>
    %494 = arith.subf %490, %493 : vector<64x64xf32>
    %495 = math.exp %494 : vector<64x64xf32>
    %cst_111 = arith.constant dense<0.000000e+00> : vector<64xf32>
    %496 = vector.multi_reduction <add>, %495, %cst_111 [1] : vector<64x64xf32> to vector<64xf32>
    %497 = vector.shape_cast %496 : vector<64xf32> to vector<64x1xf32>
    %498 = tpu.reciprocal %497 {approx = true} : vector<64x1xf32> -> vector<64x1xf32>
    %499 = vector.broadcast %498 : vector<64x1xf32> to vector<64x64xf32>
    %500 = arith.mulf %495, %499 : vector<64x64xf32>
    %501 = arith.truncf %500 : vector<64x64xf32> to vector<64x64xbf16>
    %502 = arith.truncf %475 : vector<64x128xf32> to vector<64x128xbf16>
    %cst_112 = arith.constant dense<0.000000e+00> : vector<64x128xf32>
    %503 = tpu.matmul %501, %502, %cst_112 {dimension_numbers = #tpu.dot_dimension_numbers<[1], [0], [0], [1], [0, 0, 1, 1], [], []>} : vector<64x64xbf16>, vector<64x128xbf16>, vector<64x128xf32> -> vector<64x128xf32>
    %c0_113 = arith.constant 0 : index
    %c0_114 = arith.constant 0 : index
    %504 = vector.load %arg11[%c0_113, %c0_114] : memref<1x128xf32, #tpu.memory_space<vmem>>, vector<1x128xf32>
    %505 = vector.broadcast %504 : vector<1x128xf32> to vector<64x128xf32>
    %506 = arith.addf %503, %505 : vector<64x128xf32>
    %cst_115 = arith.constant 0.000000e+00 : f32
    %507 = vector.broadcast %cst_115 : f32 to vector<64x128xf32>
    %508 = arith.maximumf %506, %507 : vector<64x128xf32>
    %509 = arith.truncf %508 : vector<64x128xf32> to vector<64x128xbf16>
    %c0_116 = arith.constant 0 : index
    %c0_117 = arith.constant 0 : index
    %510 = vector.load %arg12[%c0_116, %c0_117] : memref<128x128xbf16, #tpu.memory_space<vmem>>, vector<128x128xbf16>
    %cst_118 = arith.constant dense<0.000000e+00> : vector<64x128xf32>
    %511 = tpu.matmul %509, %510, %cst_118 {dimension_numbers = #tpu.dot_dimension_numbers<[1], [0], [0], [1], [0, 0, 1, 1], [], []>} : vector<64x128xbf16>, vector<128x128xbf16>, vector<64x128xf32> -> vector<64x128xf32>
    %c0_119 = arith.constant 0 : index
    %c0_120 = arith.constant 0 : index
    %512 = vector.load %arg13[%c0_119, %c0_120] : memref<1x128xf32, #tpu.memory_space<vmem>>, vector<1x128xf32>
    %513 = vector.broadcast %512 : vector<1x128xf32> to vector<64x128xf32>
    %514 = arith.addf %511, %513 : vector<64x128xf32>
    %cst_121 = arith.constant 0.000000e+00 : f32
    %515 = vector.broadcast %cst_121 : f32 to vector<64x128xf32>
    %516 = arith.maximumf %514, %515 : vector<64x128xf32>
    %517 = arith.truncf %516 : vector<64x128xf32> to vector<64x128xbf16>
    %c0_122 = arith.constant 0 : index
    %c0_123 = arith.constant 0 : index
    %518 = vector.load %arg14[%c0_122, %c0_123] : memref<128x128xbf16, #tpu.memory_space<vmem>>, vector<128x128xbf16>
    %cst_124 = arith.constant dense<0.000000e+00> : vector<64x128xf32>
    %519 = tpu.matmul %517, %518, %cst_124 {dimension_numbers = #tpu.dot_dimension_numbers<[1], [0], [0], [1], [0, 0, 1, 1], [], []>} : vector<64x128xbf16>, vector<128x128xbf16>, vector<64x128xf32> -> vector<64x128xf32>
    %c0_125 = arith.constant 0 : index
    %c0_126 = arith.constant 0 : index
    %520 = vector.load %arg15[%c0_125, %c0_126] : memref<1x128xf32, #tpu.memory_space<vmem>>, vector<1x128xf32>
    %521 = vector.broadcast %520 : vector<1x128xf32> to vector<64x128xf32>
    %522 = arith.addf %519, %521 : vector<64x128xf32>
    %c0_127 = arith.constant 0 : index
    %c0_128 = arith.constant 0 : index
    %523 = vector.load %arg16[%c0_127, %c0_128] : memref<64x128xf32, #tpu.memory_space<vmem>>, vector<64x128xf32>
    tpu.vector_store %arg16[%c0_127, %c0_128], %522 {strides = array<i32>} : memref<64x128xf32, #tpu.memory_space<vmem>>, vector<64x128xf32>,
    return
  }
}

</mosaic_0001>

<bundles_post_ra>
// kernel: tpu_custom_call.1
= control target key start
LH: loop header
LB: loop body
LE: loop exit
PB: predicated region body
PF: predicated region fallthrough
CT: control target
= control target key end

     0   :  { %s9272_s0 = inlined_call_operand.vmem [shape: f32[64,16], index: 0, kind: input, shape index: {}]   ;;  %s9273_s1 = inlined_call_operand.vmem [shape: f32[64,64], index: 1, kind: input, shape index: {}]   ;;  %s9274_s2 = inlined_call_operand.vmem [shape: f32[8,128], index: 2, kind: input, shape index: {}]   ;;  %s9275_s3 = inlined_call_operand.vmem [shape: bf16[16,128], index: 3, kind: input, shape index: {}]   ;;  %s9276_s4 = inlined_call_operand.vmem [shape: bf16[128,16], index: 4, kind: input, shape index: {}]   ;;  %s9277_s5 = inlined_call_operand.vmem [shape: f32[1,128], index: 5, kind: input, shape index: {}]   ;;  %s9278_s6 = inlined_call_operand.vmem [shape: bf16[128,128], index: 6, kind: input, shape index: {}]   ;;  %s9279_s7 = inlined_call_operand.vmem [shape: bf16[128,16], index: 7, kind: input, shape index: {}]   ;;  %s9280_s8 = inlined_call_operand.vmem [shape: f32[1,128], index: 8, kind: input, shape index: {}]   ;;  %s9281_s9 = inlined_call_operand.vmem [shape: bf16[128,128], index: 9, kind: input, shape index: {}]   ;;  %s9282_s10 = inlined_call_operand.vmem [shape: bf16[128,2], index: 10, kind: input, shape index: {}]   ;;  %s9283_s11 = inlined_call_operand.vmem [shape: f32[1,128], index: 11, kind: input, shape index: {}]   ;;  %s9284_s12 = inlined_call_operand.vmem [shape: bf16[128,128], index: 12, kind: input, shape index: {}]   ;;  %s9285_s13 = inlined_call_operand.vmem [shape: f32[1,128], index: 13, kind: input, shape index: {}]   ;;  %s9286_s14 = inlined_call_operand.hbm [shape: bf16[128,128], index: 14, kind: input, shape index: {}]   ;;  %s9287_s15 = inlined_call_operand.vmem [shape: f32[1,128], index: 15, kind: input, shape index: {}]   ;;  %s9288_s16 = inlined_call_operand.hbm [shape: f32[64,128], index: 16, kind: output, shape index: {}]  }
   0x1   :  { %9374 = sst [smem:[#allocation38_spill]] %s9272_s0 }
   0x2   :  { %21 = vsyncpa [#allocation3], 0 }
   0x3   :  { %22 = vsyncpa [#allocation4], 0  ;;  %s55_s23 = sshll.u32 %s9286_s14, 4  ;;  %s5923_s24 = smov [#allocation2]   ;;  %s56_s23 = int_to_ptr.hbm [resolvable:$true] %s55_s23 }
   0x4   :  { %s57_s25 = sshll.u32 %s5923_s24, 4  ;;  %s5924_s26 = smov 64   ;;  %s58_s25 = int_to_ptr.vmem [resolvable:$true] %s57_s25 }
   0x5   :  { %s5925_s27 = smov 4  }
   0x6   :  { %63 = dma.hbm_to_vmem [thread:$0]  %s56_s23, 1024, %s58_s25, [#allocation3], %s5924_s26, %s5924_s26, %s5925_s27  }
   0x7   :  { %5919 = dma.done.wait [#allocation3], 1024  }
   0x8   :  { %5920 = vsyncadd [#allocation3], 4294966272  ;;  %v5135_v0 = vld [vmem:[%s9275_s3] sm:$0xff]  ;;  %s9375_s17 = sld [smem:[#allocation38_spill]]  ;;  %vm100_vm0 = vcmask 130048   ;;  %v5143_v10 = vld [vmem:[%s9276_s4 + $0x38] sm:$0xff] }
   0x9   :  { %120 = vmatpush.bf16.msra.mxu0 %v5135_v0  ;;  %5192 = vmatpush.bf16.msra.mxu2 %v5135_v0  ;;  %v5142_v11 = vld [vmem:[%s9276_s4 + $0x30] sm:$0xff]  ;;  %v5141_v12 = vld [vmem:[%s9276_s4 + $0x28] sm:$0xff]  ;;  %v5140_v15 = vld [vmem:[%s9276_s4 + $0x20] sm:$0xff]  ;;  %v9292_v47 = vmov 10   ;;  %v9296_v48 = vmov 8   ;;  %vm352_vm3 = vcmask 523264  }
   0xa   :  { %5193 = vmatpush.bf16.msra.mxu3 %v5135_v0  ;;  %210 = vmatpush.bf16.msra.mxu1 %v5143_v10  ;;  %v5139_v17 = vld [vmem:[%s9276_s4 + $0x18] sm:$0xff]  ;;  %v5138_v18 = vld [vmem:[%s9276_s4 + $0x10] sm:$0xff]  ;;  %v5137_v19 = vld [vmem:[%s9276_s4 + $0x8] sm:$0xff]  ;;  %s5937_s26 = smov 8  }
   0xb   :  { %v5136_v20 = vld [vmem:[%s9276_s4] sm:$0xff]  ;;  %5213 = vset.pattern.permute.xlu0 %v9292_v47  ;;  %5210 = vset.pattern.permute.xlu1 %v9296_v48 }
   0xc   :  { %v79_v26 = vld [vmem:[%s9274_s2] sm:$0xff] }
   0xd   :  { %v6094_v27 = vperm.slane %v79_v26, 1  ;;  %v6096_v28 = vperm.slane %v79_v26, 0  ;;  %v6098_v29 = vperm.slane %v79_v26, 2  ;;  %v6100_v30 = vperm.slane %v79_v26, 5 }
   0xe   :  { %v80_v1 = vld [vmem:[%s9375_s17] sm:$0xff]  ;;  %v81_v2 = vld [vmem:[%s9375_s17 + $0x8] sm:$0xff]  ;;  %v82_v4 = vld [vmem:[%s9375_s17 + $0x10] sm:$0xff]  ;;  %211 = vmatpush.bf16.msra.mxu1 %v5142_v11  ;;  %v6138_v54 = vperm.slane %v79_v26, 3  ;;  %v6140_v55 = vperm.slane %v79_v26, 4  ;;  %v6172_v11 = vperm.slane %v79_v26, 6 }
   0xf   :  { %v88_v3 = vpack.c.bf16 %v81_v2, %v80_v1  ;;  %v83_v5 = vld [vmem:[%s9375_s17 + $0x18] sm:$0xff]  ;;  %v86_v6 = vld [vmem:[%s9375_s17 + $0x30] sm:$0xff]  ;;  %v84_v13 = vld [vmem:[%s9375_s17 + $0x20] sm:$0xff]  ;;  %9376 = vst [vmem:[#allocation8_spill] sm:$0xff] %v6094_v27 }
  0x10   :  { %v89_v7 = vpack.c.bf16 %v83_v5, %v82_v4  ;;  %v87_v8 = vld [vmem:[%s9375_s17 + $0x38] sm:$0xff]  ;;  %v85_v14 = vld [vmem:[%s9375_s17 + $0x28] sm:$0xff]  ;;  %9377 = vst [vmem:[#allocation9_spill] sm:$0xff] %v6096_v28  ;;  %s4822_s17 = sshll.u32 %s9288_s16, 4  ;;  %s4823_s17 = int_to_ptr.hbm [resolvable:$true] %s4822_s17 }
  0x11   :  { %v91_v9 = vpack.c.bf16 %v87_v8, %v86_v6  ;;  %4839 = vmatmul.msk.bf16.vlgmr.msra.gmra.mxu0 %vm100_vm0, %v88_v3  ;;  %v90_v16 = vpack.c.bf16 %v85_v14, %v84_v13  ;;  %9378 = vst [vmem:[#allocation10_spill] sm:$0xff] %v6098_v29 }
  0x12   :  { %4840 = vmatmul.msk.bf16.vlgmr.msra.gmra.mxu2 %vm100_vm0, %v89_v7  ;;  %212 = vmatpush.bf16.msra.mxu1 %v5141_v12  ;;  %9379 = vst [vmem:[#allocation11_spill] sm:$0xff] %v6100_v30 }
  0x13   :  { %4842 = vmatmul.msk.bf16.vlgmr.msra.gmra.mxu3 %vm100_vm0, %v91_v9  ;;  %9380 = vst [vmem:[#allocation12_spill] sm:$0xff] %v6138_v54 }
  0x14   :  { %9381 = vst [vmem:[#allocation13_spill] sm:$0xff] %v6140_v55 }
  0x15   :  { %9382 = vst [vmem:[#allocation14_spill] sm:$0xff] %v6172_v11 }
  0x16   :  { %213 = vmatpush.bf16.msra.mxu1 %v5140_v15 }
  0x1a   :  { %214 = vmatpush.bf16.msra.mxu1 %v5139_v17 }
  0x1e   :  { %215 = vmatpush.bf16.msra.mxu1 %v5138_v18 }
  0x22   :  { %4841 = vmatmul.msk.bf16.gmra.mxu2 %vm100_vm0, %v90_v16  ;;  %216 = vmatpush.bf16.msra.mxu1 %v5137_v19 }
  0x26   :  { %217 = vmatpush.bf16.msra.mxu1 %v5136_v20 }
  0x8e   :  { %v6081_v21 = vpop.f32.mrf.mxu0 }
  0x95   :  { %v6083_v22 = vpop.f32.mrf.mxu2 }
  0x96   :  { %v6085_v23 = vpop.f32.mrf.mxu3  ;;  %v6087_v24 = vpop.f32.mrf.mxu0  ;;  %v622_v60 = vmul.f32 %v6094_v27, %v6083_v22  ;;  %v444_v62 = vmul.f32 %v6096_v28, %v6083_v22  ;;  %v882_v4 = vmul.f32 %v6098_v29, %v6083_v22  ;;  %v1563_v6 = vmul.f32 %v6100_v30, %v6083_v22 }
  0x97   :  { %v142_v25 = vpack.c.bf16 %v6087_v24, %v6081_v21  ;;  %v626_v32 = vmul.f32 %v6094_v27, %v6085_v23  ;;  %v448_v33 = vmul.f32 %v6096_v28, %v6085_v23  ;;  %v886_v34 = vmul.f32 %v6098_v29, %v6085_v23 }
  0x98   :  { %v1567_v35 = vmul.f32 %v6100_v30, %v6085_v23  ;;  %v621_v8 = vmul.f32 %v6094_v27, %v6087_v24  ;;  %v443_v9 = vmul.f32 %v6096_v28, %v6087_v24  ;;  %v881_v10 = vmul.f32 %v6098_v29, %v6087_v24 }
  0x99   :  { %218 = vmatmul.bf16.vlgmr.msra.gmra.mxu1 %v142_v25  ;;  %v1562_v12 = vmul.f32 %v6100_v30, %v6087_v24  ;;  %v1113_v13 = vmul.f32 %v6138_v54, %v6085_v23  ;;  %v1340_v14 = vmul.f32 %v6140_v55, %v6085_v23  ;;  %v1794_v18 = vmul.f32 %v6172_v11, %v6085_v23 }
  0x9d   :  { %v6102_v31 = vpop.f32.mrf.mxu2 }
  0x9e   :  { %v6112_v36 = vpop.f32.mrf.mxu3  ;;  %v143_v46 = vpack.c.bf16 %v6102_v31, %v6083_v22  ;;  %v623_v61 = vmul.f32 %v6094_v27, %v6102_v31  ;;  %v445_v63 = vmul.f32 %v6096_v28, %v6102_v31  ;;  %v883_v5 = vmul.f32 %v6098_v29, %v6102_v31 }
  0x9f   :  { %v627_v37 = vmul.f32 %v6094_v27, %v6112_v36  ;;  %v449_v38 = vmul.f32 %v6096_v28, %v6112_v36  ;;  %v887_v39 = vmul.f32 %v6098_v29, %v6112_v36  ;;  %v1568_v40 = vmul.f32 %v6100_v30, %v6112_v36 }
  0xa0   :  { %v1564_v7 = vmul.f32 %v6100_v30, %v6102_v31  ;;  %v633_v15 = vpack.c.bf16 %v623_v61, %v622_v60  ;;  %v455_v16 = vpack.c.bf16 %v445_v63, %v444_v62  ;;  %v1114_v17 = vmul.f32 %v6138_v54, %v6112_v36 }
  0xa1   :  { %v635_v41 = vpack.c.bf16 %v627_v37, %v626_v32  ;;  %v457_v42 = vpack.c.bf16 %v449_v38, %v448_v33  ;;  %v895_v43 = vpack.c.bf16 %v887_v39, %v886_v34  ;;  %v1576_v44 = vpack.c.bf16 %v1568_v40, %v1567_v35 }
  0xa2   :  { %v893_v19 = vpack.c.bf16 %v883_v5, %v882_v4  ;;  %v1574_v20 = vpack.c.bf16 %v1564_v7, %v1563_v6  ;;  %v1341_v25 = vmul.f32 %v6140_v55, %v6112_v36  ;;  %v1795_v26 = vmul.f32 %v6172_v11, %v6112_v36 }
  0xa3   :  { %652 = vmatpush.bf16.msrb.mxu2 %v635_v41  ;;  %693 = vmatpush.bf16.msrb.mxu3 %v457_v42  ;;  %v620_v32 = vmul.f32 %v6094_v27, %v6081_v21  ;;  %v442_v33 = vmul.f32 %v6096_v28, %v6081_v21  ;;  %v880_v34 = vmul.f32 %v6098_v29, %v6081_v21 }
  0xa4   :  { %912 = vmatpush.bf16.msrb.mxu0 %v895_v43  ;;  %1593 = vmatpush.bf16.msrb.mxu1 %v1576_v44  ;;  %v1561_v35 = vmul.f32 %v6100_v30, %v6081_v21  ;;  %v1122_v40 = vpack.c.bf16 %v1114_v17, %v1113_v13  ;;  %v1349_v43 = vpack.c.bf16 %v1341_v25, %v1340_v14 }
  0xa5   :  { %v6122_v45 = vpop.f32.mrf.mxu2  ;;  %v632_v38 = vpack.c.bf16 %v621_v8, %v620_v32  ;;  %v454_v39 = vpack.c.bf16 %v443_v9, %v442_v33  ;;  %v892_v41 = vpack.c.bf16 %v881_v10, %v880_v34  ;;  %v1803_v44 = vpack.c.bf16 %v1795_v26, %v1794_v18 }
  0xa6   :  { %v624_v49 = vmul.f32 %v6094_v27, %v6122_v45  ;;  %v446_v50 = vmul.f32 %v6096_v28, %v6122_v45  ;;  %v884_v51 = vmul.f32 %v6098_v29, %v6122_v45  ;;  %v1565_v52 = vmul.f32 %v6100_v30, %v6122_v45 }
  0xa7   :  { %v1573_v42 = vpack.c.bf16 %v1562_v12, %v1561_v35  ;;  %v1336_v60 = vmul.f32 %v6140_v55, %v6083_v22  ;;  %v1790_v61 = vmul.f32 %v6172_v11, %v6083_v22  ;;  %v1335_v6 = vmul.f32 %v6140_v55, %v6087_v24 }
  0xa8   :  { %v1789_v7 = vmul.f32 %v6172_v11, %v6087_v24  ;;  %v1107_v8 = vmul.f32 %v6138_v54, %v6081_v21  ;;  %v1334_v9 = vmul.f32 %v6140_v55, %v6081_v21  ;;  %v1788_v10 = vmul.f32 %v6172_v11, %v6081_v21 }
  0xa9   :  { %223 = vmatmul.bf16.gmra.mxu1 %v143_v46  ;;  %v1111_v46 = vmul.f32 %v6138_v54, %v6122_v45  ;;  %v145_v13 = vpack.c.bf16 %v6112_v36, %v6085_v23 }
  0xaa   :  { %v1346_v14 = vpack.c.bf16 %v1335_v6, %v1334_v9  ;;  %v6365_v6 = vld [vmem:[%s9273_s1] sm:$0xff] }
  0xad   :  { %v6136_v53 = vpop.f32.mrf.mxu2 }
  0xae   :  { %v625_v56 = vmul.f32 %v6094_v27, %v6136_v53  ;;  %v447_v57 = vmul.f32 %v6096_v28, %v6136_v53  ;;  %v885_v58 = vmul.f32 %v6098_v29, %v6136_v53  ;;  %v1566_v59 = vmul.f32 %v6100_v30, %v6136_v53 }
  0xaf   :  { %v144_v37 = vpack.c.bf16 %v6136_v53, %v6122_v45  ;;  %v9312_v29 = vmov 13  }
  0xb0   :  { %v634_v0 = vpack.c.bf16 %v625_v56, %v624_v49  ;;  %v456_v1 = vpack.c.bf16 %v447_v57, %v446_v50  ;;  %v894_v2 = vpack.c.bf16 %v885_v58, %v884_v51  ;;  %v1575_v3 = vpack.c.bf16 %v1566_v59, %v1565_v52 }
  0xb1   :  { %v1112_v49 = vmul.f32 %v6138_v54, %v6136_v53  ;;  %v1338_v50 = vmul.f32 %v6140_v55, %v6122_v45  ;;  %v1339_v51 = vmul.f32 %v6140_v55, %v6136_v53  ;;  %v1792_v52 = vmul.f32 %v6172_v11, %v6122_v45 }
  0xb2   :  { %653 = vmatpush.bf16.msrb.mxu2 %v634_v0  ;;  %694 = vmatpush.bf16.msrb.mxu3 %v456_v1  ;;  %v1793_v56 = vmul.f32 %v6172_v11, %v6136_v53  ;;  %v1109_v57 = vmul.f32 %v6138_v54, %v6083_v22  ;;  %v1110_v59 = vmul.f32 %v6138_v54, %v6102_v31 }
  0xb3   :  { %913 = vmatpush.bf16.msrb.mxu0 %v894_v2  ;;  %1594 = vmatpush.bf16.msrb.mxu1 %v1575_v3  ;;  %v1121_v58 = vpack.c.bf16 %v1112_v49, %v1111_v46  ;;  %v1348_v62 = vpack.c.bf16 %v1339_v51, %v1338_v50  ;;  %v1337_v0 = vmul.f32 %v6140_v55, %v6102_v31 }
  0xb4   :  { %v1802_v63 = vpack.c.bf16 %v1793_v56, %v1792_v52  ;;  %v1791_v1 = vmul.f32 %v6172_v11, %v6102_v31  ;;  %v1120_v2 = vpack.c.bf16 %v1110_v59, %v1109_v57  ;;  %v1108_v3 = vmul.f32 %v6138_v54, %v6087_v24 }
  0xb5   :  { %v1347_v4 = vpack.c.bf16 %v1337_v0, %v1336_v60 }
  0xb6   :  { %654 = vmatpush.bf16.msrb.mxu2 %v633_v15  ;;  %695 = vmatpush.bf16.msrb.mxu3 %v455_v16  ;;  %v1801_v5 = vpack.c.bf16 %v1791_v1, %v1790_v61  ;;  %v1119_v12 = vpack.c.bf16 %v1108_v3, %v1107_v8  ;;  %v1800_v15 = vpack.c.bf16 %v1789_v7, %v1788_v10  ;;  %v9294_v16 = vmov 9  }
  0xb7   :  { %914 = vmatpush.bf16.msrb.mxu0 %v893_v19  ;;  %1595 = vmatpush.bf16.msrb.mxu1 %v1574_v20  ;;  %v9290_v19 = vmov 11  }
  0xb8   :  { %5215 = vset.pattern.permute.xlu2 %v9294_v16 }
  0xb9   :  { %228 = vmatmul.bf16.gmra.mxu1 %v144_v37 }
  0xba   :  { %655 = vmatpush.bf16.msrb.mxu2 %v632_v38  ;;  %696 = vmatpush.bf16.msrb.mxu3 %v454_v39 }
  0xbb   :  { %915 = vmatpush.bf16.msrb.mxu0 %v892_v41  ;;  %1596 = vmatpush.bf16.msrb.mxu1 %v1573_v42 }
  0xbe   :  { %1139 = vmatpush.bf16.msra.mxu2 %v1122_v40  ;;  %1366 = vmatpush.bf16.msra.mxu3 %v1349_v43 }
  0xbf   :  { %1820 = vmatpush.bf16.msra.mxu0 %v1803_v44 }
  0xc2   :  { %1140 = vmatpush.bf16.msra.mxu2 %v1121_v58  ;;  %1367 = vmatpush.bf16.msra.mxu3 %v1348_v62 }
  0xc3   :  { %1821 = vmatpush.bf16.msra.mxu0 %v1802_v63 }
  0xc6   :  { %1141 = vmatpush.bf16.msra.mxu2 %v1120_v2  ;;  %1368 = vmatpush.bf16.msra.mxu3 %v1347_v4 }
  0xc7   :  { %1822 = vmatpush.bf16.msra.mxu0 %v1801_v5  ;;  %v6360_v5 = vld [vmem:[%s9273_s1 + $0x8] sm:$0xff] }
  0xc8   :  { %9385 = vst [vmem:[#allocation17_spill] sm:$0xff] %v6360_v5 }
  0xc9   :  { %233 = vmatmul.bf16.gmra.mxu1 %v145_v13 }
  0xca   :  { %1142 = vmatpush.bf16.msra.mxu2 %v1119_v12  ;;  %1369 = vmatpush.bf16.msra.mxu3 %v1346_v14 }
  0xcb   :  { %1823 = vmatpush.bf16.msra.mxu0 %v1800_v15 }
 0x116   :  { %v6237_v17 = vpop.f32.mrf.mxu1 }
 0x117   :  { %719 = vperm.xlu0 %5213, %v6237_v17   ;;  %273 = vperm.xlu1 %5210, %v6237_v17  }
 0x11e   :  { %v6241_v18 = vpop.f32.mrf.mxu1 }
 0x11f   :  { %5211 = vset.pattern.permute.xlu1 %v9294_v16  ;;  %463 = vperm.xlu2 %5215, %v6241_v18  }
 0x120   :  { %459 = vperm.xlu1 %5211, %v6237_v17   ;;  %5220 = vset.pattern.permute.xlu0 %v9290_v19 }
 0x126   :  { %v6247_v20 = vpop.f32.mrf.mxu1 }
 0x127   :  { %5216 = vset.pattern.permute.xlu2 %v9290_v19  ;;  %954 = vperm.xlu0 %5220, %v6247_v20  }
 0x128   :  { %5212 = vset.pattern.permute.xlu1 %v9290_v19  ;;  %950 = vperm.xlu2 %5216, %v6241_v18  }
 0x129   :  { %946 = vperm.xlu1 %5212, %v6237_v17  }
 0x12e   :  { %v6254_v25 = vpop.f32.mrf.mxu1 }
 0x12f   :  { %5221 = vset.pattern.permute.xlu0 %v9292_v47 }
 0x130   :  { %5218 = vset.pattern.permute.xlu2 %v9296_v48  ;;  %727 = vperm.xlu0 %5221, %v6247_v20  }
 0x131   :  { %5214 = vset.pattern.permute.xlu1 %v9296_v48  ;;  %283 = vperm.xlu2 %5218, %v6247_v20  }
 0x132   :  { %278 = vperm.xlu1 %5214, %v6241_v18  }
 0x136   :  { %v6262_v26 = vpop.f32.mrf.mxu1 }
 0x138   :  { %735 = vperm.xlu0 %5221, %v6262_v26  }
 0x139   :  { %288 = vperm.xlu2 %5218, %v6254_v25  }
 0x13a   :  { %5217 = vset.pattern.permute.xlu1 %v9292_v47 }
 0x13b   :  { %723 = vperm.xlu1 %5217, %v6241_v18  }
 0x13e   :  { %v6282_v32 = vpop.f32.mrf.mxu1 }
 0x141   :  { %5222 = vset.pattern.permute.xlu2 %v9294_v16 }
 0x142   :  { %471 = vperm.xlu2 %5222, %v6254_v25  }
 0x143   :  { %5219 = vset.pattern.permute.xlu1 %v9294_v16 }
 0x144   :  { %467 = vperm.xlu1 %5219, %v6247_v20  }
 0x146   :  { %v6289_v33 = vpop.f32.mrf.mxu1 }
 0x147   :  { %9383 = vst [vmem:[#allocation15_spill] sm:$0xff] %v6289_v33 }
 0x14a   :  { %5224 = vset.pattern.permute.xlu2 %v9292_v47 }
 0x14b   :  { %731 = vperm.xlu2 %5224, %v6254_v25  }
 0x14c   :  { %5223 = vset.pattern.permute.xlu1 %v9290_v19 }
 0x14d   :  { %958 = vperm.xlu1 %5223, %v6254_v25  }
 0x14e   :  { %v6307_v34 = vpop.f32.mrf.mxu1 }
 0x14f   :  { %9384 = vst [vmem:[#allocation16_spill] sm:$0xff] %v6307_v34 }
 0x153   :  { %5226 = vset.pattern.permute.xlu2 %v9294_v16 }
 0x154   :  { %475 = vperm.xlu2 %5226, %v6262_v26  }
 0x155   :  { %5225 = vset.pattern.permute.xlu1 %v9296_v48 }
 0x156   :  { %293 = vperm.xlu1 %5225, %v6262_v26  }
 0x15a   :  { %239 = vxpose.xlu0.b32.start [1/8] (short) (narrow) %v6237_v17, 8 }
 0x15c   :  { %5227 = vset.pattern.permute.xlu2 %v9290_v19 }
 0x15d   :  { %962 = vperm.xlu2 %5227, %v6262_v26  }
 0x15e   :  { %5231 = vset.pattern.permute.xlu1 %v9292_v47 }
 0x15f   :  { %739 = vperm.xlu1 %5231, %v6282_v32  }
 0x162   :  { %240 = vxpose.xlu0.b32.cont [2/8] (short) (narrow) %v6241_v18, 8 }
 0x165   :  { %5228 = vset.pattern.permute.xlu2 %v9296_v48 }
 0x166   :  { %298 = vperm.xlu2 %5228, %v6282_v32  }
 0x167   :  { %5232 = vset.pattern.permute.xlu1 %v9296_v48 }
 0x168   :  { %303 = vperm.xlu1 %5232, %v6289_v33  }
 0x16a   :  { %241 = vxpose.xlu0.b32.cont [3/8] (short) (narrow) %v6247_v20, 8 }
 0x16e   :  { %5229 = vset.pattern.permute.xlu2 %v9294_v16 }
 0x16f   :  { %479 = vperm.xlu2 %5229, %v6282_v32  }
 0x170   :  { %5233 = vset.pattern.permute.xlu1 %v9294_v16 }
 0x171   :  { %483 = vperm.xlu1 %5233, %v6289_v33  }
 0x172   :  { %242 = vxpose.xlu0.b32.cont [4/8] (short) (narrow) %v6254_v25, 8 }
 0x177   :  { %5230 = vset.pattern.permute.xlu2 %v9290_v19 }
 0x178   :  { %966 = vperm.xlu2 %5230, %v6282_v32  }
 0x179   :  { %5234 = vset.pattern.permute.xlu1 %v9292_v47  ;;  %v464_v35 = vpop.permute.xlu2 %463 }
 0x17a   :  { %243 = vxpose.xlu0.b32.cont [5/8] (short) (narrow) %v6262_v26, 8  ;;  %743 = vperm.xlu1 %5234, %v6289_v33  }
 0x180   :  { %970 = vperm.xlu2 %5230, %v6289_v33  }
 0x182   :  { %244 = vxpose.xlu0.b32.cont [6/8] (short) (narrow) %v6282_v32, 8  ;;  %v951_v37 = vpop.permute.xlu2 %950 }
 0x188   :  { %5235 = vset.pattern.permute.xlu2 %v9296_v48 }
 0x189   :  { %308 = vperm.xlu2 %5235, %v6307_v34   ;;  %v274_v41 = vpop.permute.xlu1 %273  ;;  %v720_v43 = vpop.permute.xlu0 %719 }
 0x18a   :  { %245 = vxpose.xlu0.b32.cont [7/8] (short) (narrow) %v6289_v33, 8 }
 0x18b   :  { %v6317_v38 = vpop.permute.xlu2 %283 }
 0x191   :  { %5236 = vset.pattern.permute.xlu2 %v9294_v16 }
 0x192   :  { %487 = vperm.xlu2 %5236, %v6307_v34   ;;  %246 = vxpose.xlu0.b32.end [8/8] (short) (narrow) %v6307_v34, 8  ;;  %v6321_v44 = vpop.permute.xlu1 %459 }
 0x193   :  { %v289_v39 = vpop.permute.xlu2 %288 }
 0x199   :  { %v6323_v46 = vpop.permute.xlu0 %954 }
 0x19a   :  { %5237 = vset.pattern.permute.xlu2 %v9290_v19 }
 0x19b   :  { %974 = vperm.xlu2 %5237, %v6307_v34   ;;  %v6327_v50 = vpop.permute.xlu1 %946 }
 0x19c   :  { %v472_v40 = vpop.permute.xlu2 %471 }
 0x1a2   :  { %v6329_v51 = vpop.permute.xlu0 %727 }
 0x1a3   :  { %5239 = vset.pattern.permute.xlu2 %v9312_v29  ;;  %v9314_v29 = vmov 15  }
 0x1a4   :  { %v279_v56 = vpop.permute.xlu1 %278  ;;  %5238 = vset.pattern.permute.xlu1 %v9314_v29 }
 0x1a5   :  { %v6319_v42 = vpop.permute.xlu2 %731 }
 0x1aa   :  { %v6333_v57 = vpop.permute.xlu0 %735 }
 0x1ad   :  { %v6339_v60 = vpop.permute.xlu1 %723 }
 0x1ae   :  { %v6325_v49 = vpop.permute.xlu2 %475 }
 0x1b7   :  { %v6331_v52 = vpop.permute.xlu2 %962 }
 0x1c0   :  { %v6335_v58 = vpop.permute.xlu2 %298 }
 0x1c9   :  { %v6350_v0 = vpop.permute.xlu2 %479 }
 0x1fe   :  { %v6337_v59 = vpop.trf.xlu0 }
 0x1ff   :  { %v6342_v61 = vperm.slane %v6337_v59, 0  ;;  %v6345_v62 = vperm.slane %v6337_v59, 1  ;;  %v6348_v63 = vperm.slane %v6337_v59, 2  ;;  %v6368_v9 = vperm.slane %v6337_v59, 3 }
 0x200   :  { %747 = vperm.xlu0 %5221, %v6307_v34  }
 0x201   :  { %v492_v1 = vadd.f32 %v6345_v62, %v464_v35  ;;  %v312_v2 = vadd.f32 %v6342_v61, %v274_v41  ;;  %v313_v3 = vadd.f32 %v6342_v61, %v279_v56  ;;  %v751_v4 = vadd.f32 %v6348_v63, %v720_v43 }
 0x202   :  { %v494_v56 = vadd.f32 %v6345_v62, %v472_v40  ;;  %v978_v54 = vadd.f32 %v6368_v9, %v6327_v50 }
 0x203   :  { %vm500_vm1 = vcmp.gt.f32.partialorder %v492_v1, 0.0  ;;  %v508_v7 = vmul.f32 0.2, %v492_v1  ;;  %vm320_vm2 = vcmp.gt.f32.partialorder %v312_v2, 0.0  ;;  %v328_v8 = vmul.f32 0.2, %v312_v2 }
 0x204   :  { %v329_v13 = vmul.f32 0.2, %v313_v3  ;;  %v767_v14 = vmul.f32 0.2, %v751_v4  ;;  %vm321_vm4 = vcmp.gt.f32.partialorder %v313_v3, 0.0  ;;  %vm759_vm5 = vcmp.gt.f32.partialorder %v751_v4, 0.0 }
 0x205   :  { %v516_v10 = vsel %vm500_vm1, %v492_v1, %v508_v7  ;;  %v336_v12 = vsel %vm320_vm2, %v312_v2, %v328_v8  ;;  %v468_v1 = vpop.permute.xlu1 %467  ;;  %v979_v8 = vadd.f32 %v6368_v9, %v951_v37  ;;  %v510_v47 = vmul.f32 0.2, %v494_v56 }
 0x206   :  { %v6371_v15 = vadd.f32 %v516_v10, %v6360_v5  ;;  %v6374_v35 = vadd.f32 %v336_v12, %v6365_v6  ;;  %v337_v2 = vsel %vm321_vm4, %v313_v3, %v329_v13  ;;  %v775_v7 = vsel %vm759_vm5, %v751_v4, %v767_v14  ;;  %v6382_v10 = vpop.permute.xlu2 %966  ;;  %v6398_v4 = vld [vmem:[%s9273_s1 + $0x18] sm:$0xff] }
 0x207   :  { %v6385_v12 = vadd.f32 %v337_v2, %v6360_v5  ;;  %v6388_v19 = vadd.f32 %v775_v7, %v6365_v6  ;;  %v995_v16 = vmul.f32 0.2, %v979_v8  ;;  %vm502_vm6 = vcmp.gt.f32.partialorder %v494_v56, 0.0 }
 0x208   :  { %v534_v41 = vsel %vm352_vm3, %v6371_v15, -inf  ;;  %v353_v43 = vsel %vm352_vm3, %v6374_v35, -inf  ;;  %vm987_vm7 = vcmp.gt.f32.partialorder %v979_v8, 0.0  ;;  %v315_v37 = vadd.f32 %v6342_v61, %v289_v39  ;;  %5243 = vset.pattern.permute.xlu0 %v9314_v29 }
 0x209   :  { %535 = vmax.xlane.f32.xlu2 %v534_v41  ;;  %354 = vmax.xlane.f32.xlu1 %v353_v43  ;;  %v356_v40 = vsel %vm352_vm3, %v6385_v12, -inf  ;;  %v791_v3 = vsel %vm352_vm3, %v6388_v19, -inf  ;;  %v518_v13 = vsel %vm502_vm6, %v494_v56, %v510_v47  ;;  %v1003_v14 = vsel %vm987_vm7, %v979_v8, %v995_v16  ;;  %v6416_v56 = vld [vmem:[%s9273_s1 + $0x10] sm:$0xff] }
 0x20a   :  { %v493_v41 = vadd.f32 %v6345_v62, %v468_v1  ;;  %v6404_v7 = vadd.f32 %v518_v13, %v6398_v4  ;;  %v6407_v48 = vadd.f32 %v1003_v14, %v6360_v5  ;;  %v331_v39 = vmul.f32 0.2, %v315_v37 }
 0x20b   :  { %vm323_vm8 = vcmp.gt.f32.partialorder %v315_v37, 0.0  ;;  %v980_v13 = vadd.f32 %v6368_v9, %v6323_v46  ;;  %v491_v14 = vadd.f32 %v6345_v62, %v6321_v44  ;;  %vm986_vm15 = vcmp.gt.f32.partialorder %v978_v54, 0.0 }
 0x20c   :  { %vm501_vm9 = vcmp.gt.f32.partialorder %v493_v41, 0.0  ;;  %v1021_v47 = vsel %vm352_vm3, %v6407_v48, -inf  ;;  %v339_v16 = vsel %vm323_vm8, %v315_v37, %v331_v39  ;;  %v314_v29 = vadd.f32 %v6342_v61, %v6317_v38 }
 0x20d   :  { %v959_v43 = vpop.permute.xlu1 %958  ;;  %v6424_v11 = vadd.f32 %v339_v16, %v6398_v4  ;;  %vm988_vm11 = vcmp.gt.f32.partialorder %v980_v13, 0.0  ;;  %vm499_vm12 = vcmp.gt.f32.partialorder %v491_v14, 0.0 }
 0x20e   :  { %v6401_v2 = vpop.permute.xlu2 %970  ;;  %v981_v8 = vadd.f32 %v6368_v9, %v959_v43  ;;  %v496_v43 = vadd.f32 %v6345_v62, %v6350_v0  ;;  %vm322_vm2 = vcmp.gt.f32.partialorder %v314_v29, 0.0 }
 0x20f   :  { %9386 = vst [vmem:[#allocation18_spill] sm:$0xff] %v6424_v11  ;;  %v362_v46 = vsel %vm352_vm3, %v6424_v11, -inf }
 0x210   :  { %vm989_vm10 = vcmp.gt.f32.partialorder %v981_v8, 0.0  ;;  %vm504_vm13 = vcmp.gt.f32.partialorder %v496_v43, 0.0 }
 0x211   :  { %357 = vmax.xlane.f32.xlu2 %v356_v40  ;;  %792 = vmax.xlane.f32.xlu1 %v791_v3  ;;  %v509_v40 = vmul.f32 0.2, %v493_v41  ;;  %v540_v3 = vsel %vm352_vm3, %v6404_v7, -inf }
 0x213   :  { %v517_v1 = vsel %vm501_vm9, %v493_v41, %v509_v40  ;;  %v507_v41 = vmul.f32 0.2, %v491_v14 }
 0x214   :  { %v6427_v37 = vadd.f32 %v517_v1, %v6416_v56  ;;  %v495_v1 = vadd.f32 %v6345_v62, %v6325_v49  ;;  %v994_v49 = vmul.f32 0.2, %v978_v54 }
 0x215   :  { %v6429_v39 = vpop.permute.xlu1 %293  ;;  %v515_v55 = vsel %vm499_vm12, %v491_v14, %v507_v41  ;;  %v6464_v41 = vld [vmem:[%s9273_s1 + $0x28] sm:$0xff] }
 0x216   :  { %v6431_v30 = vpop.permute.xlu2 %308  ;;  %v537_v44 = vsel %vm352_vm3, %v6427_v37, -inf  ;;  %v6451_v0 = vadd.f32 %v515_v55, %v6365_v6  ;;  %vm503_vm14 = vcmp.gt.f32.partialorder %v495_v1, 0.0 }
 0x218   :  { %v531_v55 = vsel %vm352_vm3, %v6451_v0, -inf }
 0x219   :  { %541 = vmax.xlane.f32.xlu2 %v540_v3  ;;  %1022 = vmax.xlane.f32.xlu1 %v1021_v47  ;;  %v997_v3 = vmul.f32 0.2, %v981_v8  ;;  %v996_v47 = vmul.f32 0.2, %v980_v13 }
 0x21b   :  { %v1005_v40 = vsel %vm989_vm10, %v981_v8, %v997_v3  ;;  %v1004_v16 = vsel %vm988_vm11, %v980_v13, %v996_v47  ;;  %v512_v8 = vmul.f32 0.2, %v496_v43  ;;  %v511_v13 = vmul.f32 0.2, %v495_v1 }
 0x21c   :  { %v6445_v28 = vadd.f32 %v1005_v40, %v6398_v4  ;;  %v6448_v27 = vadd.f32 %v1004_v16, %v6416_v56 }
 0x21d   :  { %v6453_v14 = vpop.permute.xlu1 %739  ;;  %v519_v40 = vsel %vm503_vm14, %v495_v1, %v511_v13 }
 0x21e   :  { %9387 = vst [vmem:[#allocation19_spill] sm:$0xff] %v6445_v28  ;;  %v488_v50 = vpop.permute.xlu2 %487  ;;  %v1027_v3 = vsel %vm352_vm3, %v6445_v28, -inf  ;;  %v1024_v47 = vsel %vm352_vm3, %v6448_v27, -inf }
 0x21f   :  { %9388 = vst [vmem:[#allocation20_spill] sm:$0xff] %v6448_v27  ;;  %v498_v16 = vadd.f32 %v6345_v62, %v488_v50 }
 0x221   :  { %363 = vmax.xlane.f32.xlu2 %v362_v46  ;;  %538 = vmax.xlane.f32.xlu1 %v537_v44  ;;  %v520_v46 = vsel %vm504_vm13, %v496_v43, %v512_v8  ;;  %v6469_v44 = vld [vmem:[%s9273_s1 + $0x20] sm:$0xff]  ;;  %v514_v13 = vmul.f32 0.2, %v498_v16  ;;  %vm506_vm0 = vcmp.gt.f32.partialorder %v498_v16, 0.0 }
 0x222   :  { %v6477_v43 = vadd.f32 %v520_v46, %v6464_v41  ;;  %v6480_v8 = vadd.f32 %v519_v40, %v6469_v44  ;;  %v6496_v46 = vld [vmem:[%s9273_s1 + $0x38] sm:$0xff] }
 0x223   :  { %v522_v40 = vsel %vm506_vm0, %v498_v16, %v514_v13 }
 0x224   :  { %v543_v50 = vsel %vm352_vm3, %v6480_v8, -inf  ;;  %v6501_v27 = vadd.f32 %v522_v40, %v6496_v46 }
 0x226   :  { %v552_v28 = vsel %vm352_vm3, %v6501_v27, -inf }
 0x229   :  { %1028 = vmax.xlane.f32.xlu2 %v1027_v3  ;;  %1025 = vmax.xlane.f32.xlu1 %v1024_v47  ;;  %v1002_v3 = vsel %vm986_vm15, %v978_v54, %v994_v49  ;;  %v752_v47 = vadd.f32 %v6348_v63, %v6339_v60  ;;  %v6485_v49 = vpop.permute.xlu1 %303  ;;  %v546_v60 = vsel %vm352_vm3, %v6477_v43, -inf }
 0x22a   :  { %532 = vmax.xlane.f32.xlu0 %v531_v55  ;;  %v6483_v1 = vadd.f32 %v1002_v3, %v6365_v6 }
 0x22b   :  { %v768_v54 = vmul.f32 0.2, %v752_v47  ;;  %vm760_vm1 = vcmp.gt.f32.partialorder %v752_v47, 0.0 }
 0x22c   :  { %v1018_v55 = vsel %vm352_vm3, %v6483_v1, -inf }
 0x22d   :  { %v776_v3 = vsel %vm760_vm1, %v752_v47, %v768_v54 }
 0x231   :  { %547 = vmax.xlane.f32.xlu2 %v546_v60  ;;  %544 = vmax.xlane.f32.xlu1 %v543_v50  ;;  %v6504_v60 = vadd.f32 %v776_v3, %v6360_v5  ;;  %v330_v50 = vmul.f32 0.2, %v314_v29  ;;  %v484_v11 = vpop.permute.xlu1 %483 }
 0x232   :  { %1019 = vmax.xlane.f32.xlu0 %v1018_v55  ;;  %v497_v38 = vadd.f32 %v6345_v62, %v484_v11 }
 0x233   :  { %v794_v16 = vsel %vm352_vm3, %v6504_v60, -inf  ;;  %v338_v47 = vsel %vm322_vm2, %v314_v29, %v330_v50  ;;  %v754_v29 = vadd.f32 %v6348_v63, %v6319_v42  ;;  %v9319_v42 = vmov 14  }
 0x234   :  { %v6512_v13 = vadd.f32 %v338_v47, %v6416_v56  ;;  %v513_v54 = vmul.f32 0.2, %v497_v38  ;;  %vm505_vm4 = vcmp.gt.f32.partialorder %v497_v38, 0.0 }
 0x235   :  { %v770_v62 = vmul.f32 0.2, %v754_v29  ;;  %vm762_vm5 = vcmp.gt.f32.partialorder %v754_v29, 0.0 }
 0x236   :  { %9389 = vst [vmem:[#allocation21_spill] sm:$0xff] %v6512_v13  ;;  %v359_v55 = vsel %vm352_vm3, %v6512_v13, -inf  ;;  %v521_v40 = vsel %vm505_vm4, %v497_v38, %v513_v54  ;;  %v753_v38 = vadd.f32 %v6348_v63, %v6329_v51 }
 0x237   :  { %v778_v50 = vsel %vm762_vm5, %v754_v29, %v770_v62 }
 0x238   :  { %v769_v54 = vmul.f32 0.2, %v753_v38  ;;  %vm761_vm6 = vcmp.gt.f32.partialorder %v753_v38, 0.0 }
 0x239   :  { %553 = vmax.xlane.f32.xlu1 %v552_v28  ;;  %v6519_v28 = vld [vmem:[%s9273_s1 + $0x30] sm:$0xff]  ;;  %v6548_v51 = vpop.permute.xlu1 %743 }
 0x23a   :  { %795 = vmax.xlane.f32.xlu0 %v794_v16  ;;  %v6524_v11 = vadd.f32 %v521_v40, %v6519_v28  ;;  %v6530_v16 = vadd.f32 %v778_v50, %v6398_v4  ;;  %v316_v4 = vadd.f32 %v6342_v61, %v6429_v39  ;;  %v317_v50 = vadd.f32 %v6342_v61, %v6335_v58 }
 0x23c   :  { %v549_v3 = vsel %vm352_vm3, %v6524_v11, -inf  ;;  %9390 = vst [vmem:[#allocation22_spill] sm:$0xff] %v6530_v16  ;;  %v800_v47 = vsel %vm352_vm3, %v6530_v16, -inf  ;;  %v332_v29 = vmul.f32 0.2, %v316_v4  ;;  %vm324_vm7 = vcmp.gt.f32.partialorder %v316_v4, 0.0 }
 0x23d   :  { %v333_v39 = vmul.f32 0.2, %v317_v50  ;;  %vm325_vm8 = vcmp.gt.f32.partialorder %v317_v50, 0.0 }
 0x242   :  { %360 = vmax.xlane.f32.xlu0 %v359_v55  ;;  %v777_v55 = vsel %vm761_vm6, %v753_v38, %v769_v54  ;;  %v341_v54 = vsel %vm325_vm8, %v317_v50, %v333_v39 }
 0x243   :  { %v6542_v40 = vadd.f32 %v777_v55, %v6416_v56  ;;  %v6561_v58 = vadd.f32 %v341_v54, %v6464_v41 }
 0x245   :  { %9391 = vst [vmem:[#allocation23_spill] sm:$0xff] %v6542_v40  ;;  %v797_v62 = vsel %vm352_vm3, %v6542_v40, -inf }
 0x246   :  { %9393 = vst [vmem:[#allocation25_spill] sm:$0xff] %v6561_v58 }
 0x249   :  { %1400 = vperm.xlu2 %5239, %v6237_v17  }
 0x24a   :  { %550 = vmax.xlane.f32.xlu0 %v549_v3  ;;  %v340_v3 = vsel %vm324_vm7, %v316_v4, %v332_v29 }
 0x24b   :  { %v6553_v38 = vadd.f32 %v340_v3, %v6469_v44  ;;  %v368_v3 = vsel %vm352_vm3, %v6561_v58, -inf }
 0x24d   :  { %9392 = vst [vmem:[#allocation24_spill] sm:$0xff] %v6553_v38  ;;  %v365_v56 = vsel %vm352_vm3, %v6553_v38, -inf }
 0x252   :  { %801 = vmax.xlane.f32.xlu0 %v800_v47  ;;  %1858 = vperm.xlu1 %5238, %v6241_v18   ;;  %v6550_v47 = vpop.permute.xlu2 %974 }
 0x25a   :  { %5240 = vset.pattern.permute.xlu1 %v9319_v42 }
 0x25b   :  { %1627 = vperm.xlu1 %5240, %v6237_v17  }
 0x272   :  { %798 = vmax.xlane.f32.xlu2 %v797_v62 }
 0x27a   :  { %366 = vmax.xlane.f32.xlu2 %v365_v56 }
 0x27c   :  { %v536_v55 = vpop.xlane.xlu2 %535  ;;  %v6557_v62 = vpop.xlane.xlu1 %354 }
 0x27d   :  { %v556_v4 = vsub.f32 %v6371_v15, %v536_v55 }
 0x27f   :  { %v565_v29 = vmul.f32 1.442695, %v556_v4 }
 0x281   :  { %5295 = vpow2.f32 %v565_v29 }
 0x282   :  { %369 = vmax.xlane.f32.xlu2 %v368_v3  ;;  %v6578_v3 = vpop.permute.xlu0 %747 }
 0x283   :  { %9395 = vst [vmem:[#allocation27_spill] sm:$0xff] %v6578_v3 }
 0x284   :  { %v6565_v42 = vpop.xlane.xlu2 %357  ;;  %v6567_v16 = vpop.xlane.xlu1 %792 }
 0x287   :  { %v6569_v56 = vpop.eup %5295 }
 0x288   :  { %v582_v50 = vsel %vm352_vm3, %v6569_v56, 0.0 }
 0x289   :  { %583 = vadd.xlane.f32.xlu0 %v582_v50 }
 0x28c   :  { %v542_v15 = vpop.xlane.xlu2 %541  ;;  %v6573_v39 = vpop.xlane.xlu1 %1022 }
 0x28d   :  { %v558_v54 = vsub.f32 %v6404_v7, %v542_v15 }
 0x28f   :  { %v569_v55 = vmul.f32 1.442695, %v558_v54 }
 0x291   :  { %5297 = vpow2.f32 %v569_v55 }
 0x294   :  { %v6576_v4 = vpop.xlane.xlu2 %363  ;;  %v539_v29 = vpop.xlane.xlu1 %538 }
 0x295   :  { %9394 = vst [vmem:[#allocation26_spill] sm:$0xff] %v6576_v4  ;;  %v557_v15 = vsub.f32 %v6427_v37, %v539_v29 }
 0x297   :  { %v6580_v38 = vpop.eup %5297  ;;  %v567_v55 = vmul.f32 1.442695, %v557_v15 }
 0x298   :  { %v588_v58 = vsel %vm352_vm3, %v6580_v38, 0.0 }
 0x299   :  { %589 = vadd.xlane.f32.xlu0 %v588_v58 }
 0x29c   :  { %v6584_v40 = vpop.xlane.xlu2 %1028  ;;  %v6586_v50 = vpop.xlane.xlu1 %1025 }
 0x29d   :  { %9396 = vst [vmem:[#allocation28_spill] sm:$0xff] %v6584_v40  ;;  %v533_v34 = vpop.xlane.xlu0 %532 }
 0x29e   :  { %v555_v7 = vsub.f32 %v6451_v0, %v533_v34  ;;  %v982_v34 = vadd.f32 %v6368_v9, %v6331_v52  ;;  %v983_v0 = vadd.f32 %v6368_v9, %v6382_v10 }
 0x2a0   :  { %v563_v54 = vmul.f32 1.442695, %v555_v7  ;;  %vm990_vm9 = vcmp.gt.f32.partialorder %v982_v34, 0.0  ;;  %vm991_vm10 = vcmp.gt.f32.partialorder %v983_v0, 0.0 }
 0x2a2   :  { %5299 = vpow2.f32 %v563_v54  ;;  %v755_v54 = vadd.f32 %v6348_v63, %v6333_v57 }
 0x2a3   :  { %5301 = vpow2.f32 %v567_v55 }
 0x2a4   :  { %v548_v4 = vpop.xlane.xlu2 %547  ;;  %v545_v13 = vpop.xlane.xlu1 %544  ;;  %vm763_vm12 = vcmp.gt.f32.partialorder %v755_v54, 0.0 }
 0x2a5   :  { %v560_v5 = vsub.f32 %v6477_v43, %v548_v4  ;;  %v559_v3 = vsub.f32 %v6480_v8, %v545_v13  ;;  %v9332_v43 = vmov 12  }
 0x2a6   :  { %5242 = vset.pattern.permute.xlu1 %v9332_v43  ;;  %5241 = vset.pattern.permute.xlu2 %v9332_v43 }
 0x2a7   :  { %v573_v33 = vmul.f32 1.442695, %v560_v5  ;;  %v571_v58 = vmul.f32 1.442695, %v559_v3  ;;  %v998_v5 = vmul.f32 0.2, %v982_v34  ;;  %v756_v3 = vadd.f32 %v6348_v63, %v6453_v14 }
 0x2a8   :  { %v6592_v40 = vpop.eup %5299 }
 0x2a9   :  { %5303 = vpow2.f32 %v573_v33  ;;  %v579_v37 = vsel %vm352_vm3, %v6592_v40, 0.0  ;;  %v6602_v8 = vpop.eup %5301  ;;  %v999_v33 = vmul.f32 0.2, %v983_v0  ;;  %v1006_v29 = vsel %vm990_vm9, %v982_v34, %v998_v5 }
 0x2aa   :  { %5305 = vpow2.f32 %v571_v58  ;;  %580 = vadd.xlane.f32.xlu2 %v579_v37  ;;  %v585_v7 = vsel %vm352_vm3, %v6602_v8, 0.0  ;;  %v6619_v55 = vadd.f32 %v1006_v29, %v6469_v44  ;;  %v772_v37 = vmul.f32 0.2, %v756_v3 }
 0x2ab   :  { %v1007_v15 = vsel %vm991_vm10, %v983_v0, %v999_v33  ;;  %vm764_vm11 = vcmp.gt.f32.partialorder %v756_v3, 0.0  ;;  %v771_v34 = vmul.f32 0.2, %v755_v54  ;;  %v318_v33 = vadd.f32 %v6342_v61, %v6485_v49 }
 0x2ac   :  { %v6622_v58 = vadd.f32 %v1007_v15, %v6464_v41  ;;  %v1030_v14 = vsel %vm352_vm3, %v6619_v55, -inf  ;;  %v780_v5 = vsel %vm764_vm11, %v756_v3, %v772_v37 }
 0x2ad   :  { %v779_v57 = vsel %vm763_vm12, %v755_v54, %v771_v34  ;;  %vm326_vm13 = vcmp.gt.f32.partialorder %v318_v33, 0.0 }
 0x2ae   :  { %v1033_v0 = vsel %vm352_vm3, %v6622_v58, -inf  ;;  %v6634_v29 = vadd.f32 %v779_v57, %v6469_v44  ;;  %v1020_v44 = vpop.xlane.xlu0 %1019 }
 0x2af   :  { %v6604_v13 = vpop.eup %5303 }
 0x2b0   :  { %v6606_v52 = vpop.eup %5305  ;;  %v594_v4 = vsel %vm352_vm3, %v6604_v13, 0.0  ;;  %v803_v3 = vsel %vm352_vm3, %v6634_v29, -inf }
 0x2b1   :  { %595 = vadd.xlane.f32.xlu1 %v594_v4  ;;  %v591_v10 = vsel %vm352_vm3, %v6606_v52, 0.0  ;;  %v6631_v4 = vadd.f32 %v780_v5, %v6464_v41  ;;  %v9397_v5 = vmov 14  }
 0x2b2   :  { %592 = vadd.xlane.f32.xlu0 %v591_v10  ;;  %586 = vadd.xlane.f32.xlu2 %v585_v7  ;;  %v554_v10 = vpop.xlane.xlu1 %553  ;;  %v334_v7 = vmul.f32 0.2, %v318_v33 }
 0x2b3   :  { %v562_v15 = vsub.f32 %v6501_v27, %v554_v10 }
 0x2b4   :  { %v342_v49 = vsel %vm326_vm13, %v318_v33, %v334_v7 }
 0x2b5   :  { %v577_v54 = vmul.f32 1.442695, %v562_v15  ;;  %v6642_v41 = vadd.f32 %v342_v49, %v6519_v28  ;;  %v9398_v15 = vmov 13  }
 0x2b7   :  { %5307 = vpow2.f32 %v577_v54  ;;  %v371_v37 = vsel %vm352_vm3, %v6642_v41, -inf }
 0x2b9   :  { %1031 = vmax.xlane.f32.xlu1 %v1030_v14  ;;  %v806_v14 = vsel %vm352_vm3, %v6631_v4, -inf }
 0x2ba   :  { %1034 = vmax.xlane.f32.xlu0 %v1033_v0  ;;  %v6651_v0 = vpop.xlane.xlu0 %795 }
 0x2bd   :  { %v6647_v27 = vpop.eup %5307 }
 0x2be   :  { %v600_v34 = vsel %vm352_vm3, %v6647_v27, 0.0 }
 0x2c1   :  { %807 = vmax.xlane.f32.xlu1 %v806_v14  ;;  %v319_v14 = vadd.f32 %v6342_v61, %v6431_v30  ;;  %v377_v30 = vsub.f32 %v6374_v35, %v6557_v62 }
 0x2c2   :  { %804 = vmax.xlane.f32.xlu0 %v803_v3  ;;  %v6656_v57 = vpop.xlane.xlu0 %360 }
 0x2c3   :  { %v335_v49 = vmul.f32 0.2, %v319_v14  ;;  %vm327_vm14 = vcmp.gt.f32.partialorder %v319_v14, 0.0 }
 0x2ca   :  { %372 = vmax.xlane.f32.xlu0 %v371_v37  ;;  %1177 = vperm.xlu2 %5241, %v6241_v18   ;;  %v551_v33 = vpop.xlane.xlu0 %550  ;;  %v343_v37 = vsel %vm327_vm14, %v319_v14, %v335_v49 }
 0x2cb   :  { %v561_v10 = vsub.f32 %v6524_v11, %v551_v33  ;;  %v6671_v11 = vpop.permute.xlu2 %1400  ;;  %v6676_v33 = vadd.f32 %v343_v37, %v6496_v46  ;;  %v985_v37 = vadd.f32 %v6368_v9, %v6550_v47 }
 0x2cd   :  { %v575_v7 = vmul.f32 1.442695, %v561_v10  ;;  %v385_v10 = vmul.f32 1.442695, %v377_v30  ;;  %vm993_vm0 = vcmp.gt.f32.partialorder %v985_v37, 0.0 }
 0x2cf   :  { %5309 = vpow2.f32 %v575_v7  ;;  %v1042_v7 = vsub.f32 %v6483_v1, %v1020_v44 }
 0x2d2   :  { %601 = vadd.xlane.f32.xlu0 %v600_v34  ;;  %1185 = vperm.xlu2 %5241, %v6254_v25  }
 0x2d5   :  { %v6667_v3 = vpop.eup %5309 }
 0x2d6   :  { %v597_v54 = vsel %vm352_vm3, %v6667_v3, 0.0 }
 0x2da   :  { %1173 = vperm.xlu1 %5242, %v6237_v17   ;;  %5245 = vset.pattern.permute.xlu2 %v9397_v5 }
 0x2e2   :  { %1181 = vperm.xlu1 %5242, %v6247_v20  }
 0x2e5   :  { %v6680_v61 = vpop.xlane.xlu2 %798 }
 0x2e6   :  { %1854 = vperm.xlu0 %5243, %v6237_v17   ;;  %v378_v17 = vsub.f32 %v6385_v12, %v6565_v42  ;;  %v374_v12 = vsel %vm352_vm3, %v6676_v33, -inf  ;;  %v984_v42 = vadd.f32 %v6368_v9, %v6401_v2  ;;  %v815_v2 = vsub.f32 %v6388_v19, %v6567_v16 }
 0x2e7   :  { %v757_v16 = vadd.f32 %v6348_v63, %v6548_v51 }
 0x2e8   :  { %v387_v34 = vmul.f32 1.442695, %v378_v17  ;;  %v1000_v49 = vmul.f32 0.2, %v984_v42  ;;  %vm992_vm15 = vcmp.gt.f32.partialorder %v984_v42, 0.0 }
 0x2e9   :  { %v1050_v17 = vmul.f32 1.442695, %v1042_v7  ;;  %v823_v30 = vmul.f32 1.442695, %v815_v2  ;;  %vm765_vm1 = vcmp.gt.f32.partialorder %v757_v16, 0.0 }
 0x2ea   :  { %1189 = vperm.xlu1 %5242, %v6262_v26   ;;  %5311 = vpow2.f32 %v387_v34  ;;  %v1001_v34 = vmul.f32 0.2, %v985_v37 }
 0x2eb   :  { %5313 = vpow2.f32 %v385_v10  ;;  %v816_v10 = vsub.f32 %v6504_v60, %v6651_v0 }
 0x2ec   :  { %5315 = vpow2.f32 %v1050_v17  ;;  %v1009_v19 = vsel %vm993_vm0, %v985_v37, %v1001_v34 }
 0x2ed   :  { %v6691_v62 = vpop.xlane.xlu2 %366  ;;  %5317 = vpow2.f32 %v823_v30  ;;  %v6719_v17 = vadd.f32 %v1009_v19, %v6496_v46  ;;  %v825_v37 = vmul.f32 1.442695, %v816_v10  ;;  %v6727_v30 = vpop.permute.xlu1 %1858 }
 0x2ee   :  { %1870 = vperm.xlu0 %5243, %v6262_v26  }
 0x2ef   :  { %v1039_v2 = vsel %vm352_vm3, %v6719_v17, -inf }
 0x2f0   :  { %v6687_v14 = vpop.eup %5311 }
 0x2f1   :  { %v404_v35 = vsel %vm352_vm3, %v6687_v14, 0.0  ;;  %v6700_v44 = vpop.eup %5313 }
 0x2f2   :  { %5244 = vset.pattern.permute.xlu1 %v9398_v15  ;;  %v401_v9 = vsel %vm352_vm3, %v6700_v44, 0.0  ;;  %v6708_v47 = vpop.eup %5315 }
 0x2f3   :  { %v6725_v60 = vpop.eup %5317 }
 0x2f5   :  { %v6714_v7 = vpop.xlane.xlu2 %369 }
 0x2f6   :  { %5246 = vset.pattern.permute.xlu0 %v9332_v43 }
 0x2fb   :  { %598 = vadd.xlane.f32.xlu2 %v597_v54  ;;  %v1008_v54 = vsel %vm992_vm15, %v984_v42, %v1000_v49  ;;  %v1066_v49 = vsel %vm352_vm3, %v6708_v47, 0.0 }
 0x2fc   :  { %v6698_v1 = vadd.f32 %v1008_v54, %v6519_v28  ;;  %v1043_v54 = vsub.f32 %v6407_v48, %v6573_v39 }
 0x2fe   :  { %v1036_v42 = vsel %vm352_vm3, %v6698_v1, -inf  ;;  %v1052_v34 = vmul.f32 1.442695, %v1043_v54 }
 0x303   :  { %375 = vmax.xlane.f32.xlu2 %v374_v12  ;;  %v6702_v12 = vpop.xlane.xlu0 %801 }
 0x30b   :  { %405 = vadd.xlane.f32.xlu2 %v404_v35  ;;  %v773_v35 = vmul.f32 0.2, %v757_v16  ;;  %v584_v51 = vpop.xlane.xlu0 %583 }
 0x30c   :  { %5319 = vrcp.f32 %v584_v51 }
 0x30d   :  { %v781_v0 = vsel %vm765_vm1, %v757_v16, %v773_v35  ;;  %5321 = vpow2.f32 %v825_v37  ;;  %v5839_v16 = vld [vmem:[%s9274_s2] sm:$0xff] }
 0x30e   :  { %v6732_v48 = vadd.f32 %v781_v0, %v6519_v28  ;;  %v6739_v10 = vperm.slane %v5839_v16, 7 }
 0x310   :  { %v809_v19 = vsel %vm352_vm3, %v6732_v48, -inf  ;;  %9399 = vst [vmem:[#allocation29_spill] sm:$0xff] %v6739_v10  ;;  %v2021_v28 = vmul.f32 %v6739_v10, %v6085_v23  ;;  %v2022_v54 = vmul.f32 %v6739_v10, %v6112_v36  ;;  %v2019_v23 = vmul.f32 %v6739_v10, %v6122_v45 }
 0x311   :  { %v2020_v36 = vmul.f32 %v6739_v10, %v6136_v53  ;;  %v2017_v16 = vmul.f32 %v6739_v10, %v6083_v22  ;;  %v2018_v45 = vmul.f32 %v6739_v10, %v6102_v31 }
 0x312   :  { %v5320_v39 = vpop.eup %5319 }
 0x313   :  { %1037 = vmax.xlane.f32.xlu2 %v1036_v42  ;;  %v612_v37 = vmul.f32 %v5320_v39, %v6569_v56  ;;  %v590_v56 = vpop.xlane.xlu0 %589  ;;  %v2029_v39 = vpack.c.bf16 %v2020_v36, %v2019_v23 }
 0x314   :  { %402 = vadd.xlane.f32.xlu1 %v401_v9  ;;  %v839_v9 = vsel %vm352_vm3, %v6725_v60, 0.0 }
 0x318   :  { %1067 = vadd.xlane.f32.xlu0 %v1066_v49  ;;  %v6741_v49 = vpop.eup %5321 }
 0x31b   :  { %1040 = vmax.xlane.f32.xlu2 %v1039_v2  ;;  %v842_v2 = vsel %vm352_vm3, %v6741_v49, 0.0 }
 0x31d   :  { %v581_v42 = vpop.xlane.xlu2 %580 }
 0x31e   :  { %5323 = vrcp.f32 %v581_v42 }
 0x31f   :  { %5325 = vpow2.f32 %v1052_v34  ;;  %v6753_v34 = vpop.permute.xlu1 %1627 }
 0x320   :  { %840 = vadd.xlane.f32.xlu0 %v839_v9 }
 0x323   :  { %810 = vmax.xlane.f32.xlu2 %v809_v19  ;;  %v2030_v19 = vpack.c.bf16 %v2022_v54, %v2021_v28  ;;  %v2028_v28 = vpack.c.bf16 %v2018_v45, %v2017_v16  ;;  %v2016_v54 = vmul.f32 %v6739_v10, %v6087_v24  ;;  %v6790_v16 = vperm.slane %v6337_v59, 4 }
 0x324   :  { %v5324_v35 = vpop.eup %5323 }
 0x325   :  { %v611_v51 = vmul.f32 %v5324_v35, %v6592_v40  ;;  %v6751_v0 = vpop.eup %5325  ;;  %v587_v42 = vpop.xlane.xlu2 %586 }
 0x326   :  { %5327 = vrcp.f32 %v587_v42  ;;  %v1069_v40 = vsel %vm352_vm3, %v6751_v0, 0.0 }
 0x327   :  { %v628_v9 = vpack.c.bf16 %v612_v37, %v611_v51  ;;  %5329 = vrcp.f32 %v590_v56  ;;  %v596_v53 = vpop.xlane.xlu1 %595  ;;  %v2015_v51 = vmul.f32 %v6739_v10, %v6081_v21  ;;  %v9400_v56 = vmov 15  }
 0x328   :  { %843 = vadd.xlane.f32.xlu0 %v842_v2  ;;  %v593_v2 = vpop.xlane.xlu0 %592  ;;  %5331 = vrcp.f32 %v596_v53 }
 0x329   :  { %4875 = vmatmul.msk.bf16.vlgmr.msrb.gmra.mxu2 %vm352_vm3, %v628_v9  ;;  %v2027_v9 = vpack.c.bf16 %v2016_v54, %v2015_v51  ;;  %5333 = vrcp.f32 %v593_v2  ;;  %v9402_v51 = vld [vmem:[#allocation27_spill] sm:$0xff] }
 0x32a   :  { %2047 = vmatpush.bf16.msrb.mxu2 %v2030_v19  ;;  %v758_v2 = vadd.f32 %v6348_v63, %v9402_v51  ;;  %v9404_v51 = vld [vmem:[#allocation21_spill] sm:$0xff] }
 0x32b   :  { %1070 = vadd.xlane.f32.xlu2 %v1069_v40 }
 0x32c   :  { %v5328_v35 = vpop.eup %5327  ;;  %vm766_vm4 = vcmp.gt.f32.partialorder %v758_v2, 0.0 }
 0x32d   :  { %1404 = vperm.xlu1 %5244, %v6241_v18   ;;  %v5330_v37 = vpop.eup %5329  ;;  %v613_v42 = vmul.f32 %v5328_v35, %v6602_v8 }
 0x32e   :  { %2048 = vmatpush.bf16.msrb.mxu2 %v2029_v39  ;;  %v614_v22 = vmul.f32 %v5330_v37, %v6580_v38  ;;  %v5332_v21 = vpop.eup %5331  ;;  %v9401_v37 = vld [vmem:[#allocation15_spill] sm:$0xff] }
 0x32f   :  { %v6774_v19 = vpop.xlane.xlu1 %1031  ;;  %v5334_v23 = vpop.eup %5333  ;;  %v616_v36 = vmul.f32 %v5332_v21, %v6604_v13 }
 0x330   :  { %v629_v31 = vpack.c.bf16 %v614_v22, %v613_v42  ;;  %v6778_v24 = vpop.xlane.xlu0 %1034  ;;  %v615_v38 = vmul.f32 %v5334_v23, %v6606_v52  ;;  %v774_v42 = vmul.f32 0.2, %v758_v2 }
 0x332   :  { %2049 = vmatpush.bf16.msrb.mxu2 %v2028_v28  ;;  %v630_v39 = vpack.c.bf16 %v616_v36, %v615_v38  ;;  %v782_v21 = vsel %vm766_vm4, %v758_v2, %v774_v42  ;;  %v379_v2 = vsub.f32 %v9404_v51, %v6656_v57 }
 0x333   :  { %v6808_v23 = vadd.f32 %v782_v21, %v6496_v46 }
 0x335   :  { %1412 = vperm.xlu1 %5244, %v6254_v25   ;;  %v812_v63 = vsel %vm352_vm3, %v6808_v23, -inf }
 0x336   :  { %2050 = vmatpush.bf16.msrb.mxu2 %v2027_v9  ;;  %v1178_v9 = vpop.permute.xlu2 %1177 }
 0x337   :  { %v6780_v8 = vpop.xlane.xlu1 %807 }
 0x338   :  { %v6786_v40 = vpop.xlane.xlu0 %804 }
 0x339   :  { %4876 = vmatmul.msk.bf16.gmra.mxu2 %vm352_vm3, %v629_v31  ;;  %v1206_v31 = vadd.f32 %v6790_v16, %v1178_v9 }
 0x33b   :  { %v1222_v38 = vmul.f32 0.2, %v1206_v31  ;;  %vm1214_vm5 = vcmp.gt.f32.partialorder %v1206_v31, 0.0 }
 0x33d   :  { %1416 = vperm.xlu1 %5244, %v6262_v26  }
 0x340   :  { %v6794_v28 = vpop.xlane.xlu0 %372 }
 0x343   :  { %1639 = vperm.xlu2 %5245, %v6254_v25  }
 0x345   :  { %5250 = vset.pattern.permute.xlu1 %v9400_v56 }
 0x348   :  { %v602_v22 = vpop.xlane.xlu0 %601 }
 0x349   :  { %4877 = vmatmul.msk.bf16.gmra.mxu2 %vm352_vm3, %v630_v39  ;;  %v6811_v39 = vperm.slane %v6337_v59, 7  ;;  %5335 = vrcp.f32 %v602_v22 }
 0x34b   :  { %1647 = vperm.xlu2 %5245, %v6282_v32   ;;  %v1887_v9 = vadd.f32 %v6811_v39, %v6727_v30 }
 0x34c   :  { %v1174_v45 = vpop.permute.xlu1 %1173 }
 0x34d   :  { %v1205_v53 = vadd.f32 %v6790_v16, %v1174_v45  ;;  %v6815_v45 = vpop.permute.xlu2 %1185  ;;  %vm1895_vm7 = vcmp.gt.f32.partialorder %v1887_v9, 0.0 }
 0x34f   :  { %v1221_v35 = vmul.f32 0.2, %v1205_v53  ;;  %vm1213_vm2 = vcmp.gt.f32.partialorder %v1205_v53, 0.0  ;;  %v5336_v57 = vpop.eup %5335 }
 0x351   :  { %v1229_v52 = vsel %vm1213_vm2, %v1205_v53, %v1221_v35  ;;  %v1230_v35 = vsel %vm1214_vm5, %v1206_v31, %v1222_v38  ;;  %v389_v38 = vmul.f32 1.442695, %v379_v2 }
 0x352   :  { %v6797_v13 = vadd.f32 %v1229_v52, %v6365_v6  ;;  %v9403_v52 = vld [vmem:[#allocation17_spill] sm:$0xff] }
 0x353   :  { %5247 = vset.pattern.permute.xlu2 %v9332_v43  ;;  %v6820_v46 = vadd.f32 %v1230_v35, %v9403_v52  ;;  %v1903_v35 = vmul.f32 0.2, %v1887_v9 }
 0x354   :  { %v1245_v54 = vsel %vm352_vm3, %v6797_v13, -inf  ;;  %1197 = vperm.xlu2 %5247, %v9401_v37   ;;  %v6832_v22 = vpop.permute.xlu1 %1181 }
 0x355   :  { %1246 = vmax.xlane.f32.xlu0 %v1245_v54  ;;  %v1248_v42 = vsel %vm352_vm3, %v6820_v46, -inf  ;;  %v1911_v2 = vsel %vm1895_vm7, %v1887_v9, %v1903_v35 }
 0x358   :  { %v1855_v36 = vpop.permute.xlu0 %1854 }
 0x359   :  { %v1886_v53 = vadd.f32 %v6811_v39, %v1855_v36  ;;  %v9405_v36 = vld [vmem:[#allocation16_spill] sm:$0xff] }
 0x35b   :  { %v1902_v54 = vmul.f32 0.2, %v1886_v53  ;;  %vm1894_vm6 = vcmp.gt.f32.partialorder %v1886_v53, 0.0 }
 0x35c   :  { %5248 = vset.pattern.permute.xlu2 %v9400_v56 }
 0x35d   :  { %v1910_v31 = vsel %vm1894_vm6, %v1886_v53, %v1902_v54  ;;  %v618_v54 = vmul.f32 %v5336_v57, %v6647_v27  ;;  %v9406_v57 = vld [vmem:[#allocation26_spill] sm:$0xff] }
 0x360   :  { %v6853_v9 = vpop.permute.xlu0 %1870 }
 0x367   :  { %813 = vmax.xlane.f32.xlu1 %v812_v63  ;;  %v6830_v63 = vadd.f32 %v1910_v31, %v6365_v6 }
 0x369   :  { %1193 = vperm.xlu0 %5246, %v6282_v32   ;;  %v1926_v30 = vsel %vm352_vm3, %v6830_v63, -inf }
 0x36e   :  { %v599_v21 = vpop.xlane.xlu2 %598 }
 0x36f   :  { %1249 = vmax.xlane.f32.xlu1 %v1248_v42  ;;  %5337 = vrcp.f32 %v599_v21  ;;  %v6844_v21 = vadd.f32 %v1911_v2, %v9403_v52 }
 0x370   :  { %5339 = vpow2.f32 %v389_v38  ;;  %v6851_v38 = vpop.permute.xlu1 %1189 }
 0x371   :  { %1201 = vperm.xlu0 %5246, %v9405_v36  }
 0x375   :  { %v5338_v51 = vpop.eup %5337 }
 0x376   :  { %v6836_v43 = vpop.xlane.xlu2 %375  ;;  %v617_v53 = vmul.f32 %v5338_v51, %v6667_v3  ;;  %v6841_v42 = vpop.eup %5339  ;;  %v1929_v3 = vsel %vm352_vm3, %v6844_v21, -inf  ;;  %v9407_v51 = vld [vmem:[#allocation18_spill] sm:$0xff] }
 0x377   :  { %1927 = vmax.xlane.f32.xlu1 %v1926_v30  ;;  %v407_v31 = vsel %vm352_vm3, %v6841_v42, 0.0  ;;  %v380_v30 = vsub.f32 %v9407_v51, %v9406_v57 }
 0x378   :  { %v631_v6 = vpack.c.bf16 %v618_v54, %v617_v53 }
 0x379   :  { %5249 = vset.pattern.permute.xlu0 %v9398_v15  ;;  %v391_v2 = vmul.f32 1.442695, %v380_v30 }
 0x37a   :  { %4878 = vmatmul.msk.bf16.gmra.mxu2 %vm352_vm3, %v631_v6 }
 0x37d   :  { %408 = vadd.xlane.f32.xlu2 %v407_v31 }
 0x37e   :  { %v406_v27 = vpop.xlane.xlu2 %405 }
 0x37f   :  { %1930 = vmax.xlane.f32.xlu1 %v1929_v3  ;;  %5341 = vrcp.f32 %v406_v27 }
 0x385   :  { %v5342_v54 = vpop.eup %5341 }
 0x386   :  { %v6855_v35 = vpop.xlane.xlu2 %1037  ;;  %v434_v31 = vmul.f32 %v5342_v54, %v6687_v14 }
 0x387   :  { %v403_v52 = vpop.xlane.xlu1 %402 }
 0x388   :  { %5343 = vrcp.f32 %v403_v52 }
 0x389   :  { %5345 = vpow2.f32 %v391_v2 }
 0x38b   :  { %v1068_v53 = vpop.xlane.xlu0 %1067 }
 0x38e   :  { %v5344_v6 = vpop.eup %5343  ;;  %v6861_v10 = vpop.xlane.xlu2 %1040 }
 0x38f   :  { %v433_v56 = vmul.f32 %v5344_v6, %v6700_v44  ;;  %v6865_v52 = vpop.eup %5345 }
 0x390   :  { %v410_v14 = vsel %vm352_vm3, %v6865_v52, 0.0 }
 0x391   :  { %v450_v3 = vpack.c.bf16 %v434_v31, %v433_v56 }
 0x393   :  { %v841_v27 = vpop.xlane.xlu0 %840  ;;  %4879 = vmatmul.msk.bf16.vlgmr.msrb.gmra.mxu3 %vm352_vm3, %v450_v3 }
 0x394   :  { %5347 = vrcp.f32 %v841_v27 }
 0x395   :  { %1862 = vperm.xlu2 %5248, %v6247_v20  }
 0x396   :  { %v6867_v57 = vpop.xlane.xlu2 %810 }
 0x398   :  { %1882 = vperm.xlu1 %5250, %v9405_v36  }
 0x39a   :  { %v5348_v51 = vpop.eup %5347 }
 0x39b   :  { %v844_v44 = vpop.xlane.xlu0 %843  ;;  %411 = vadd.xlane.f32.xlu0 %v410_v14  ;;  %v871_v2 = vmul.f32 %v5348_v51, %v6725_v60  ;;  %v6884_v60 = vperm.slane %v6337_v59, 5 }
 0x39c   :  { %5349 = vrcp.f32 %v844_v44 }
 0x39d   :  { %5351 = vrcp.f32 %v1068_v53  ;;  %1866 = vperm.xlu2 %5248, %v6254_v25  }
 0x39e   :  { %v1071_v56 = vpop.xlane.xlu2 %1070 }
 0x39f   :  { %5353 = vrcp.f32 %v1071_v56  ;;  %v1405_v14 = vpop.permute.xlu1 %1404 }
 0x3a0   :  { %5253 = vset.pattern.permute.xlu1 %v9397_v5 }
 0x3a2   :  { %v5350_v30 = vpop.eup %5349 }
 0x3a3   :  { %v5352_v54 = vpop.eup %5351  ;;  %v872_v6 = vmul.f32 %v5350_v30, %v6741_v49  ;;  %v1433_v49 = vadd.f32 %v6884_v60, %v1405_v14 }
 0x3a4   :  { %v1098_v27 = vmul.f32 %v5352_v54, %v6708_v47  ;;  %v9408_v47 = vld [vmem:[#allocation28_spill] sm:$0xff] }
 0x3a5   :  { %v5354_v31 = vpop.eup %5353  ;;  %1874 = vperm.xlu2 %5248, %v6282_v32   ;;  %v888_v3 = vpack.c.bf16 %v872_v6, %v871_v2  ;;  %v1449_v44 = vmul.f32 0.2, %v1433_v49  ;;  %vm1441_vm8 = vcmp.gt.f32.partialorder %v1433_v49, 0.0  ;;  %v6901_v2 = vperm.slane %v6337_v59, 6 }
 0x3a6   :  { %v1099_v53 = vmul.f32 %v5354_v31, %v6751_v0  ;;  %v9409_v0 = vld [vmem:[#allocation19_spill] sm:$0xff] }
 0x3a7   :  { %4883 = vmatmul.msk.bf16.vlgmr.msrb.gmra.mxu0 %vm352_vm3, %v888_v3  ;;  %v1045_v56 = vsub.f32 %v9409_v0, %v9408_v47  ;;  %v1457_v51 = vsel %vm1441_vm8, %v1433_v49, %v1449_v44  ;;  %v1659_v31 = vadd.f32 %v6901_v2, %v6753_v34  ;;  %v5841_v49 = vld [vmem:[%s9273_s1] sm:$0xff] }
 0x3a8   :  { %v1115_v25 = vpack.c.bf16 %v1099_v53, %v1098_v27  ;;  %v1432_v53 = vadd.f32 %v6884_v60, %v6671_v11  ;;  %v9410_v44 = vld [vmem:[#allocation20_spill] sm:$0xff] }
 0x3a9   :  { %v1056_v30 = vmul.f32 1.442695, %v1045_v56  ;;  %v1675_v27 = vmul.f32 0.2, %v1659_v31  ;;  %vm1667_vm9 = vcmp.gt.f32.partialorder %v1659_v31, 0.0  ;;  %v1044_v47 = vsub.f32 %v9410_v44, %v6586_v50 }
 0x3aa   :  { %4887 = vmatmul.msk.bf16.vlgmr.msra.gmra.mxu2 %vm352_vm3, %v1115_v25  ;;  %v1448_v14 = vmul.f32 0.2, %v1432_v53  ;;  %vm1440_vm10 = vcmp.gt.f32.partialorder %v1432_v53, 0.0 }
 0x3ab   :  { %5355 = vpow2.f32 %v1056_v30  ;;  %v1683_v59 = vsel %vm1667_vm9, %v1659_v31, %v1675_v27  ;;  %v6931_v27 = vpop.permute.xlu2 %1639 }
 0x3ac   :  { %v6916_v34 = vadd.f32 %v5841_v49, %v1683_v59  ;;  %v1456_v0 = vsel %vm1440_vm10, %v1432_v53, %v1448_v14  ;;  %v657_v50 = vpop.f32.mrf.mxu2 }
 0x3ad   :  { %1878 = vperm.xlu2 %5248, %v9401_v37   ;;  %v6922_v56 = vadd.f32 %v5841_v49, %v1456_v0  ;;  %v9414_v49 = vmov 8  }
 0x3ae   :  { %v1699_v11 = vsel %vm352_vm3, %v6916_v34, -inf }
 0x3af   :  { %1420 = vperm.xlu0 %5249, %v6282_v32   ;;  %v6894_v32 = vld [vmem:[%s9273_s1 + $0x8] sm:$0xff]  ;;  %9411 = vst [vmem:[#allocation15_spill] sm:$0xff] %v6922_v56  ;;  %v1472_v30 = vsel %vm352_vm3, %v6922_v56, -inf }
 0x3b0   :  { %v6897_v54 = vadd.f32 %v6894_v32, %v1457_v51  ;;  %v1054_v51 = vmul.f32 1.442695, %v1044_v47 }
 0x3b1   :  { %v6907_v3 = vpop.eup %5355 }
 0x3b2   :  { %v1475_v6 = vsel %vm352_vm3, %v6897_v54, -inf  ;;  %v1075_v25 = vsel %vm352_vm3, %v6907_v3, 0.0  ;;  %5357 = vpow2.f32 %v1054_v51  ;;  %v9417_v51 = vld [vmem:[#allocation23_spill] sm:$0xff] }
 0x3b3   :  { %v6940_v59 = vpop.permute.xlu2 %1647 }
 0x3b4   :  { %v6933_v53 = vpop.f32.mrf.mxu2 }
 0x3b5   :  { %5251 = vset.pattern.permute.xlu2 %v9398_v15  ;;  %9412 = vst [vmem:[#allocation27_spill] sm:$0xff] %v6933_v53 }
 0x3b7   :  { %1424 = vperm.xlu0 %5249, %v9401_v37  }
 0x3bb   :  { %v6949_v44 = vpop.permute.xlu2 %1197 }
 0x3bc   :  { %v6942_v14 = vpop.f32.mrf.mxu2 }
 0x3bd   :  { %9413 = vst [vmem:[#allocation17_spill] sm:$0xff] %v6942_v14 }
 0x3bf   :  { %5252 = vset.pattern.permute.xlu0 %v9397_v5 }
 0x3c2   :  { %1476 = vmax.xlane.f32.xlu1 %v1475_v6  ;;  %v6926_v6 = vpop.eup %5357 }
 0x3c3   :  { %v1072_v31 = vsel %vm352_vm3, %v6926_v6, 0.0 }
 0x3c4   :  { %v6951_v47 = vpop.f32.mrf.mxu2 }
 0x3c5   :  { %9415 = vst [vmem:[#allocation21_spill] sm:$0xff] %v6951_v47 }
 0x3ca   :  { %1076 = vadd.xlane.f32.xlu1 %v1075_v25  ;;  %v6937_v25 = vpop.xlane.xlu0 %1246 }
 0x3d2   :  { %1700 = vmax.xlane.f32.xlu1 %v1699_v11  ;;  %v6958_v11 = vpop.f32.mrf.mxu2 }
 0x3d3   :  { %9416 = vst [vmem:[#allocation16_spill] sm:$0xff] %v6958_v11 }
 0x3d6   :  { %1473 = vmax.xlane.f32.xlu2 %v1472_v30  ;;  %v817_v30 = vsub.f32 %v9417_v51, %v6680_v61 }
 0x3d8   :  { %v827_v5 = vmul.f32 1.442695, %v817_v30 }
 0x3e1   :  { %1073 = vadd.xlane.f32.xlu0 %v1072_v31  ;;  %v9418_v31 = vmov 9  }
 0x3eb   :  { %1643 = vperm.xlu1 %5253, %v6262_v26   ;;  %v6946_v26 = vpop.permute.xlu0 %1193 }
 0x3ee   :  { %1408 = vperm.xlu2 %5251, %v6247_v20  }
 0x3f0   :  { %v409_v0 = vpop.xlane.xlu2 %408 }
 0x3f1   :  { %5359 = vrcp.f32 %v409_v0 }
 0x3f3   :  { %1651 = vperm.xlu1 %5253, %v9401_v37   ;;  %v6954_v37 = vpop.permute.xlu1 %1412 }
 0x3f5   :  { %1631 = vperm.xlu0 %5252, %v6241_v18   ;;  %v6956_v18 = vpop.permute.xlu0 %1201 }
 0x3f6   :  { %1428 = vperm.xlu2 %5251, %v9405_v36  }
 0x3f7   :  { %v5360_v47 = vpop.eup %5359 }
 0x3f8   :  { %v435_v11 = vmul.f32 %v5360_v47, %v6841_v42 }
 0x3fb   :  { %5254 = vset.pattern.permute.xlu1 %v9414_v49  ;;  %v1417_v15 = vpop.permute.xlu1 %1416  ;;  %v1863_v49 = vpop.permute.xlu2 %1862 }
 0x3fc   :  { %v1888_v14 = vadd.f32 %v6811_v39, %v1863_v49  ;;  %v9422_v49 = vld [vmem:[#allocation25_spill] sm:$0xff] }
 0x3fd   :  { %1635 = vperm.xlu0 %5252, %v6247_v20  }
 0x3fe   :  { %v1904_v30 = vmul.f32 0.2, %v1888_v14  ;;  %vm1896_vm11 = vcmp.gt.f32.partialorder %v1888_v14, 0.0 }
 0x400   :  { %v1912_v42 = vsel %vm1896_vm11, %v1888_v14, %v1904_v30 }
 0x403   :  { %v6968_v61 = vpop.xlane.xlu1 %813 }
 0x405   :  { %1655 = vperm.xlu0 %5252, %v9405_v36   ;;  %v6963_v36 = vpop.f32.mrf.mxu2 }
 0x406   :  { %9419 = vst [vmem:[#allocation26_spill] sm:$0xff] %v6963_v36 }
 0x40d   :  { %5257 = vset.pattern.permute.xlu0 %v9418_v31  ;;  %v382_v31 = vsub.f32 %v9422_v49, %v6714_v7 }
 0x40e   :  { %v412_v20 = vpop.xlane.xlu0 %411 }
 0x40f   :  { %5361 = vrcp.f32 %v412_v20  ;;  %v6973_v20 = vpop.f32.mrf.mxu2 }
 0x410   :  { %5363 = vpow2.f32 %v827_v5  ;;  %9421 = vst [vmem:[#allocation28_spill] sm:$0xff] %v6973_v20 }
 0x415   :  { %v5362_v53 = vpop.eup %5361 }
 0x416   :  { %v436_v56 = vmul.f32 %v5362_v53, %v6865_v52  ;;  %v6970_v51 = vpop.eup %5363  ;;  %v6982_v52 = vld [vmem:[%s9273_s1 + $0x10] sm:$0xff]  ;;  %v395_v53 = vmul.f32 1.442695, %v382_v31  ;;  %v698_v47 = vpop.f32.mrf.mxu3 }
 0x417   :  { %9420 = vst [vmem:[#allocation18_spill] sm:$0xff] %v6970_v51  ;;  %v845_v5 = vsel %vm352_vm3, %v6970_v51, 0.0  ;;  %v6991_v14 = vpop.f32.mrf.mxu2 }
 0x418   :  { %v451_v0 = vpack.c.bf16 %v436_v56, %v435_v11  ;;  %v6985_v56 = vadd.f32 %v6982_v52, %v1912_v42  ;;  %v6987_v11 = vpop.xlane.xlu1 %1249  ;;  %5365 = vpow2.f32 %v395_v53  ;;  %9424 = vst [vmem:[#allocation20_spill] sm:$0xff] %v6991_v14 }
 0x41a   :  { %4880 = vmatmul.msk.bf16.gmra.mxu3 %vm352_vm3, %v451_v0  ;;  %9423 = vst [vmem:[#allocation19_spill] sm:$0xff] %v6985_v56  ;;  %v699_v0 = vadd.f32 %v698_v47, %v657_v50  ;;  %v1932_v36 = vsel %vm352_vm3, %v6985_v56, -inf  ;;  %v384_v50 = vsub.f32 %v6676_v33, %v6836_v43  ;;  %v7001_v47 = vpop.permute.xlu2 %1866 }
 0x41d   :  { %846 = vadd.xlane.f32.xlu1 %v845_v5  ;;  %v1209_v5 = vadd.f32 %v6790_v16, %v6851_v38  ;;  %v399_v38 = vmul.f32 1.442695, %v384_v50  ;;  %v1049_v50 = vsub.f32 %v6719_v17, %v6861_v10 }
 0x41e   :  { %v6995_v49 = vpop.eup %5365 }
 0x41f   :  { %9425 = vst [vmem:[#allocation23_spill] sm:$0xff] %v6995_v49  ;;  %v1225_v42 = vmul.f32 0.2, %v1209_v5  ;;  %vm1217_vm12 = vcmp.gt.f32.partialorder %v1209_v5, 0.0  ;;  %5367 = vpow2.f32 %v399_v38 }
 0x420   :  { %v6997_v31 = vpop.xlane.xlu1 %1927 }
 0x424   :  { %v917_v7 = vpop.f32.mrf.mxu0 }
 0x425   :  { %1933 = vmax.xlane.f32.xlu1 %v1932_v36  ;;  %v937_v30 = vadd.f32 %v917_v7, %v699_v0  ;;  %v416_v36 = vsel %vm352_vm3, %v6995_v49, 0.0  ;;  %v1233_v0 = vsel %vm1217_vm12, %v1209_v5, %v1225_v42  ;;  %v7010_v7 = vld [vmem:[%s9273_s1 + $0x20] sm:$0xff]  ;;  %v7022_v5 = vpop.eup %5367  ;;  %v821_v49 = vsub.f32 %v6732_v48, %v6867_v57 }
 0x426   :  { %v7013_v20 = vadd.f32 %v7010_v7, %v1233_v0  ;;  %9428 = vst [vmem:[#allocation31_spill] sm:$0xff] %v7022_v5  ;;  %v422_v0 = vsel %vm352_vm3, %v7022_v5, 0.0  ;;  %v1212_v48 = vadd.f32 %v6790_v16, %v6956_v18 }
 0x427   :  { %v835_v10 = vmul.f32 1.442695, %v821_v49 }
 0x428   :  { %9427 = vst [vmem:[#allocation30_spill] sm:$0xff] %v7013_v20  ;;  %v7015_v43 = vpop.xlane.xlu1 %1930  ;;  %v1257_v33 = vsel %vm352_vm3, %v7013_v20, -inf  ;;  %vm1220_vm14 = vcmp.gt.f32.partialorder %v1212_v48, 0.0 }
 0x42d   :  { %v1144_v53 = vpop.f32.mrf.mxu2 }
 0x42e   :  { %v7005_v14 = vadd.f32 %v1144_v53, %v937_v30  ;;  %v1436_v30 = vadd.f32 %v6884_v60, %v1417_v15  ;;  %v7020_v53 = vpop.permute.xlu2 %1874  ;;  %v7030_v15 = vpop.permute.xlu0 %1420 }
 0x42f   :  { %417 = vadd.xlane.f32.xlu0 %v416_v36 }
 0x430   :  { %9426 = vst [vmem:[#allocation25_spill] sm:$0xff] %v7005_v14  ;;  %v1452_v42 = vmul.f32 0.2, %v1436_v30  ;;  %vm1444_vm13 = vcmp.gt.f32.partialorder %v1436_v30, 0.0  ;;  %v7026_v36 = vpop.permute.xlu1 %1882  ;;  %v1064_v14 = vmul.f32 1.442695, %v1049_v50  ;;  %v1046_v50 = vsub.f32 %v6619_v55, %v6774_v19 }
 0x432   :  { %v1460_v38 = vsel %vm1444_vm13, %v1436_v30, %v1452_v42  ;;  %5369 = vpow2.f32 %v1064_v14 }
 0x433   :  { %5371 = vpow2.f32 %v835_v10  ;;  %v1058_v10 = vmul.f32 1.442695, %v1046_v50 }
 0x436   :  { %v1879_v20 = vpop.permute.xlu2 %1878  ;;  %v7045_v42 = vpop.permute.xlu0 %1424 }
 0x437   :  { %1258 = vmax.xlane.f32.xlu0 %v1257_v33  ;;  %v7033_v33 = vadd.f32 %v7010_v7, %v1460_v38 }
 0x438   :  { %v7037_v56 = vpop.xlane.xlu1 %1476  ;;  %v7043_v30 = vpop.eup %5369 }
 0x439   :  { %9429 = vst [vmem:[#allocation32_spill] sm:$0xff] %v7033_v33  ;;  %v1484_v17 = vsel %vm352_vm3, %v7033_v33, -inf  ;;  %v1087_v14 = vsel %vm352_vm3, %v7043_v30, 0.0  ;;  %v7053_v49 = vpop.eup %5371 }
 0x43a   :  { %9430 = vst [vmem:[#allocation33_spill] sm:$0xff] %v7043_v30  ;;  %v857_v18 = vsel %vm352_vm3, %v7053_v49, 0.0 }
 0x43b   :  { %9431 = vst [vmem:[#allocation34_spill] sm:$0xff] %v7053_v49 }
 0x43f   :  { %423 = vadd.xlane.f32.xlu0 %v422_v0 }
 0x440   :  { %v1077_v57 = vpop.xlane.xlu1 %1076 }
 0x441   :  { %5373 = vrcp.f32 %v1077_v57 }
 0x447   :  { %1485 = vmax.xlane.f32.xlu0 %v1484_v17  ;;  %v1228_v17 = vmul.f32 0.2, %v1212_v48  ;;  %v5374_v57 = vpop.eup %5373 }
 0x449   :  { %v7041_v0 = vpop.xlane.xlu2 %1473  ;;  %v1236_v19 = vsel %vm1220_vm14, %v1212_v48, %v1228_v17  ;;  %v1101_v48 = vmul.f32 %v5374_v57, %v6907_v3  ;;  %v7085_v3 = vld [vmem:[%s9273_s1 + $0x30] sm:$0xff] }
 0x44f   :  { %1088 = vadd.xlane.f32.xlu0 %v1087_v14  ;;  %v1892_v14 = vadd.f32 %v6811_v39, %v1879_v20 }
 0x451   :  { %v1409_v38 = vpop.permute.xlu2 %1408  ;;  %vm1900_vm0 = vcmp.gt.f32.partialorder %v1892_v14, 0.0 }
 0x452   :  { %v1434_v5 = vadd.f32 %v6884_v60, %v1409_v38 }
 0x454   :  { %v1074_v33 = vpop.xlane.xlu0 %1073  ;;  %v1450_v51 = vmul.f32 0.2, %v1434_v5  ;;  %vm1442_vm15 = vcmp.gt.f32.partialorder %v1434_v5, 0.0 }
 0x455   :  { %5375 = vrcp.f32 %v1074_v33  ;;  %v7067_v33 = vld [vmem:[%s9273_s1 + $0x38] sm:$0xff] }
 0x456   :  { %v1458_v55 = vsel %vm1442_vm15, %v1434_v5, %v1450_v51  ;;  %5377 = vpow2.f32 %v1058_v10  ;;  %v7070_v50 = vadd.f32 %v7067_v33, %v1236_v19 }
 0x457   :  { %858 = vadd.xlane.f32.xlu0 %v857_v18  ;;  %v7060_v30 = vadd.f32 %v6982_v52, %v1458_v55  ;;  %v1908_v18 = vmul.f32 0.2, %v1892_v14 }
 0x458   :  { %9432 = vst [vmem:[#allocation35_spill] sm:$0xff] %v7070_v50  ;;  %v1266_v17 = vsel %vm352_vm3, %v7070_v50, -inf }
 0x459   :  { %v1478_v38 = vsel %vm352_vm3, %v7060_v30, -inf  ;;  %v1429_v51 = vpop.permute.xlu2 %1428  ;;  %v1916_v19 = vsel %vm1900_vm0, %v1892_v14, %v1908_v18  ;;  %v9434_v14 = vld [vmem:[#allocation22_spill] sm:$0xff] }
 0x45a   :  { %1479 = vmax.xlane.f32.xlu1 %v1478_v38  ;;  %v1439_v49 = vadd.f32 %v6884_v60, %v1429_v51  ;;  %v818_v18 = vsub.f32 %v9434_v14, %v6702_v12  ;;  %v1497_v12 = vsub.f32 %v6897_v54, %v7037_v56 }
 0x45b   :  { %v5376_v20 = vpop.eup %5375 }
 0x45c   :  { %v1100_v5 = vmul.f32 %v5376_v20, %v6926_v6  ;;  %v7076_v55 = vpop.eup %5377  ;;  %v7088_v6 = vadd.f32 %v7085_v3, %v1916_v19  ;;  %v1455_v57 = vmul.f32 0.2, %v1439_v49  ;;  %vm1447_vm1 = vcmp.gt.f32.partialorder %v1439_v49, 0.0 }
 0x45d   :  { %9433 = vst [vmem:[#allocation36_spill] sm:$0xff] %v7076_v55  ;;  %v1078_v38 = vsel %vm352_vm3, %v7076_v55, 0.0  ;;  %v1950_v20 = vsub.f32 %v6830_v63, %v6997_v31  ;;  %v829_v19 = vmul.f32 1.442695, %v818_v18  ;;  %v819_v31 = vsub.f32 %v6634_v29, %v6786_v40 }
 0x45e   :  { %v1116_v10 = vpack.c.bf16 %v1101_v48, %v1100_v5  ;;  %v1944_v51 = vsel %vm352_vm3, %v7088_v6, -inf  ;;  %v1463_v48 = vsel %vm1447_vm1, %v1439_v49, %v1455_v57 }
 0x45f   :  { %1267 = vmax.xlane.f32.xlu0 %v1266_v17  ;;  %v831_v56 = vmul.f32 1.442695, %v819_v31 }
 0x460   :  { %4888 = vmatmul.msk.bf16.gmra.mxu2 %vm352_vm3, %v1116_v10  ;;  %v1958_v10 = vmul.f32 1.442695, %v1950_v20 }
 0x462   :  { %1079 = vadd.xlane.f32.xlu1 %v1078_v38  ;;  %v7098_v38 = vadd.f32 %v7067_v33, %v1463_v48  ;;  %5379 = vpow2.f32 %v1958_v10  ;;  %v1210_v10 = vadd.f32 %v6790_v16, %v6946_v26 }
 0x463   :  { %5381 = vpow2.f32 %v829_v19 }
 0x464   :  { %v1493_v49 = vsel %vm352_vm3, %v7098_v38, -inf  ;;  %vm1218_vm7 = vcmp.gt.f32.partialorder %v1210_v10, 0.0 }
 0x467   :  { %v1632_v5 = vpop.permute.xlu0 %1631  ;;  %1945 = vmax.xlane.f32.xlu0 %v1944_v51 }
 0x468   :  { %v1660_v17 = vadd.f32 %v6901_v2, %v1632_v5  ;;  %v7114_v14 = vpop.eup %5379 }
 0x469   :  { %v7116_v29 = vpop.eup %5381 }
 0x46a   :  { %v1676_v50 = vmul.f32 0.2, %v1660_v17  ;;  %vm1668_vm2 = vcmp.gt.f32.partialorder %v1660_v17, 0.0  ;;  %v848_v5 = vsel %vm352_vm3, %v7116_v29, 0.0 }
 0x46c   :  { %v1684_v55 = vsel %vm1668_vm2, %v1660_v17, %v1676_v50  ;;  %v1207_v50 = vadd.f32 %v6790_v16, %v6832_v22  ;;  %v1974_v22 = vsel %vm352_vm3, %v7114_v14, 0.0  ;;  %v1208_v17 = vadd.f32 %v6790_v16, %v6815_v45 }
 0x46d   :  { %v7103_v63 = vadd.f32 %v6894_v32, %v1684_v55  ;;  %v1506_v32 = vmul.f32 1.442695, %v1497_v12 }
 0x46e   :  { %v1223_v40 = vmul.f32 0.2, %v1207_v50  ;;  %vm1215_vm5 = vcmp.gt.f32.partialorder %v1207_v50, 0.0  ;;  %vm1216_vm6 = vcmp.gt.f32.partialorder %v1208_v17, 0.0 }
 0x46f   :  { %v1636_v57 = vpop.permute.xlu0 %1635  ;;  %1494 = vmax.xlane.f32.xlu0 %v1493_v49  ;;  %v1702_v20 = vsel %vm352_vm3, %v7103_v63, -inf  ;;  %5383 = vpow2.f32 %v1506_v32  ;;  %v1890_v32 = vadd.f32 %v6811_v39, %v6853_v9 }
 0x470   :  { %v1661_v54 = vadd.f32 %v6901_v2, %v1636_v57  ;;  %1703 = vmax.xlane.f32.xlu2 %v1702_v20  ;;  %5385 = vpow2.f32 %v831_v56  ;;  %v1231_v19 = vsel %vm1215_vm5, %v1207_v50, %v1223_v40  ;;  %v1224_v57 = vmul.f32 0.2, %v1208_v17 }
 0x471   :  { %v7134_v31 = vadd.f32 %v6982_v52, %v1231_v19  ;;  %v1226_v20 = vmul.f32 0.2, %v1210_v10  ;;  %vm1898_vm8 = vcmp.gt.f32.partialorder %v1890_v32, 0.0  ;;  %v1889_v19 = vadd.f32 %v6811_v39, %v7001_v47 }
 0x472   :  { %v1677_v55 = vmul.f32 0.2, %v1661_v54  ;;  %vm1669_vm4 = vcmp.gt.f32.partialorder %v1661_v54, 0.0  ;;  %v1232_v56 = vsel %vm1216_vm6, %v1208_v17, %v1224_v57  ;;  %v1437_v57 = vadd.f32 %v6884_v60, %v7030_v15 }
 0x473   :  { %v1251_v50 = vsel %vm352_vm3, %v7134_v31, -inf  ;;  %vm1897_vm9 = vcmp.gt.f32.partialorder %v1889_v19, 0.0 }
 0x474   :  { %v1685_v18 = vsel %vm1669_vm4, %v1661_v54, %v1677_v55  ;;  %v9435_v54 = vld [vmem:[#allocation24_spill] sm:$0xff]  ;;  %v1234_v55 = vsel %vm1218_vm7, %v1210_v10, %v1226_v20  ;;  %vm1445_vm10 = vcmp.gt.f32.partialorder %v1437_v57, 0.0 }
 0x475   :  { %v7119_v51 = vadd.f32 %v6982_v52, %v1685_v18  ;;  %v7131_v12 = vpop.eup %5383  ;;  %v381_v45 = vsub.f32 %v9435_v54, %v6691_v62  ;;  %v7151_v62 = vld [vmem:[%s9273_s1 + $0x18] sm:$0xff] }
 0x476   :  { %v7136_v49 = vpop.eup %5385  ;;  %v1523_v26 = vsel %vm352_vm3, %v7131_v12, 0.0  ;;  %v7154_v18 = vadd.f32 %v7151_v62, %v1232_v56  ;;  %v1435_v56 = vadd.f32 %v6884_v60, %v6954_v37 }
 0x477   :  { %1975 = vadd.xlane.f32.xlu0 %v1974_v22  ;;  %v1705_v48 = vsel %vm352_vm3, %v7119_v51, -inf  ;;  %v851_v52 = vsel %vm352_vm3, %v7136_v49, 0.0  ;;  %v393_v40 = vmul.f32 1.442695, %v381_v45  ;;  %v7159_v22 = vld [vmem:[%s9273_s1 + $0x28] sm:$0xff] }
 0x478   :  { %849 = vadd.xlane.f32.xlu2 %v848_v5  ;;  %1706 = vmax.xlane.f32.xlu1 %v1705_v48  ;;  %v7162_v9 = vadd.f32 %v7159_v22, %v1234_v55  ;;  %v1906_v5 = vmul.f32 0.2, %v1890_v32  ;;  %v7164_v48 = vpop.xlane.xlu1 %1700  ;;  %v1254_v17 = vsel %vm352_vm3, %v7154_v18, -inf  ;;  %vm1443_vm11 = vcmp.gt.f32.partialorder %v1435_v56, 0.0 }
 0x479   :  { %5387 = vpow2.f32 %v393_v40 }
 0x47a   :  { %v1260_v10 = vsel %vm352_vm3, %v7162_v9, -inf  ;;  %v1914_v20 = vsel %vm1898_vm8, %v1890_v32, %v1906_v5 }
 0x47b   :  { %v7175_v54 = vadd.f32 %v7010_v7, %v1914_v20  ;;  %v1047_v20 = vsub.f32 %v6622_v58, %v6778_v24  ;;  %v1269_v24 = vsub.f32 %v6797_v13, %v6937_v25  ;;  %v820_v13 = vsub.f32 %v6631_v4, %v6780_v8 }
 0x47d   :  { %v1938_v15 = vsel %vm352_vm3, %v7175_v54, -inf }
 0x47f   :  { %1524 = vadd.xlane.f32.xlu0 %v1523_v26  ;;  %v7177_v45 = vpop.eup %5387  ;;  %v1905_v26 = vmul.f32 0.2, %v1889_v19 }
 0x480   :  { %1252 = vmax.xlane.f32.xlu2 %v1251_v50  ;;  %852 = vadd.xlane.f32.xlu1 %v851_v52  ;;  %v1453_v50 = vmul.f32 0.2, %v1437_v57  ;;  %v1644_v52 = vpop.permute.xlu1 %1643  ;;  %v413_v47 = vsel %vm352_vm3, %v7177_v45, 0.0 }
 0x481   :  { %v1663_v32 = vadd.f32 %v6901_v2, %v1644_v52  ;;  %v1913_v55 = vsel %vm1897_vm9, %v1889_v19, %v1905_v26  ;;  %v822_v52 = vsub.f32 %v6808_v23, %v6968_v61 }
 0x482   :  { %v1461_v40 = vsel %vm1445_vm10, %v1437_v57, %v1453_v50  ;;  %v7187_v5 = vadd.f32 %v7151_v62, %v1913_v55 }
 0x483   :  { %v1679_v37 = vmul.f32 0.2, %v1663_v32  ;;  %vm1671_vm12 = vcmp.gt.f32.partialorder %v1663_v32, 0.0 }
 0x484   :  { %v1935_v19 = vsel %vm352_vm3, %v7187_v5, -inf }
 0x485   :  { %v1687_v50 = vsel %vm1671_vm12, %v1663_v32, %v1679_v37  ;;  %v1277_v32 = vmul.f32 1.442695, %v1269_v24 }
 0x486   :  { %v7204_v58 = vadd.f32 %v7010_v7, %v1687_v50 }
 0x488   :  { %1255 = vmax.xlane.f32.xlu2 %v1254_v17  ;;  %1261 = vmax.xlane.f32.xlu1 %v1260_v10  ;;  %v7190_v17 = vadd.f32 %v7159_v22, %v1461_v40  ;;  %v1451_v10 = vmul.f32 0.2, %v1435_v56  ;;  %v1711_v61 = vsel %vm352_vm3, %v7204_v58, -inf  ;;  %v1652_v8 = vpop.permute.xlu1 %1651 }
 0x48a   :  { %v1487_v57 = vsel %vm352_vm3, %v7190_v17, -inf  ;;  %v1459_v26 = vsel %vm1443_vm11, %v1435_v56, %v1451_v10  ;;  %v1662_v56 = vadd.f32 %v6901_v2, %v6931_v27  ;;  %v1893_v27 = vadd.f32 %v6811_v39, %v7026_v36 }
 0x48b   :  { %v7201_v55 = vadd.f32 %v7151_v62, %v1459_v26  ;;  %v383_v26 = vsub.f32 %v6642_v41, %v6794_v28  ;;  %v1951_v41 = vsub.f32 %v6844_v21, %v7015_v43  ;;  %v1048_v21 = vsub.f32 %v6698_v1, %v6855_v35 }
 0x48c   :  { %v1678_v10 = vmul.f32 0.2, %v1662_v56  ;;  %vm1670_vm13 = vcmp.gt.f32.partialorder %v1662_v56, 0.0  ;;  %v1909_v4 = vmul.f32 0.2, %v1893_v27  ;;  %vm1901_vm14 = vcmp.gt.f32.partialorder %v1893_v27, 0.0 }
 0x48d   :  { %v1481_v23 = vsel %vm352_vm3, %v7201_v55, -inf  ;;  %v1723_v43 = vsub.f32 %v6916_v34, %v7164_v48  ;;  %v1664_v48 = vadd.f32 %v6901_v2, %v6940_v59 }
 0x48f   :  { %vm1672_vm1 = vcmp.gt.f32.partialorder %v1664_v48, 0.0 }
 0x490   :  { %414 = vadd.xlane.f32.xlu2 %v413_v47  ;;  %1939 = vmax.xlane.f32.xlu1 %v1938_v15  ;;  %v1060_v47 = vmul.f32 1.442695, %v1047_v20  ;;  %v837_v15 = vmul.f32 1.442695, %v822_v52  ;;  %v1686_v20 = vsel %vm1670_vm13, %v1662_v56, %v1678_v10  ;;  %v833_v52 = vmul.f32 1.442695, %v820_v13 }
 0x491   :  { %v1960_v13 = vmul.f32 1.442695, %v1951_v41 }
 0x492   :  { %5389 = vpow2.f32 %v1060_v47  ;;  %v1665_v47 = vadd.f32 %v6901_v2, %v1652_v8 }
 0x493   :  { %5391 = vpow2.f32 %v837_v15  ;;  %v397_v15 = vmul.f32 1.442695, %v383_v26  ;;  %v847_v26 = vpop.xlane.xlu1 %846 }
 0x494   :  { %5393 = vpow2.f32 %v1277_v32  ;;  %vm1673_vm15 = vcmp.gt.f32.partialorder %v1665_v47, 0.0  ;;  %v1891_v32 = vadd.f32 %v6811_v39, %v7020_v53 }
 0x495   :  { %5395 = vpow2.f32 %v833_v52  ;;  %v1062_v52 = vmul.f32 1.442695, %v1048_v21  ;;  %v1438_v21 = vadd.f32 %v6884_v60, %v7045_v42 }
 0x496   :  { %5397 = vpow2.f32 %v397_v15  ;;  %vm1899_vm0 = vcmp.gt.f32.partialorder %v1891_v32, 0.0 }
 0x497   :  { %5399 = vpow2.f32 %v1960_v13  ;;  %vm1446_vm4 = vcmp.gt.f32.partialorder %v1438_v21, 0.0 }
 0x498   :  { %1936 = vmax.xlane.f32.xlu2 %v1935_v19  ;;  %1488 = vmax.xlane.f32.xlu1 %v1487_v57  ;;  %v7214_v40 = vpop.eup %5389  ;;  %v7227_v19 = vadd.f32 %v7151_v62, %v1686_v20  ;;  %v1917_v62 = vsel %vm1901_vm14, %v1893_v27, %v1909_v4  ;;  %v1907_v27 = vmul.f32 0.2, %v1891_v32  ;;  %v1731_v4 = vmul.f32 1.442695, %v1723_v43 }
 0x499   :  { %v7216_v7 = vpop.eup %5391  ;;  %v1081_v25 = vsel %vm352_vm3, %v7214_v40, 0.0  ;;  %v7239_v24 = vadd.f32 %v7067_v33, %v1917_v62  ;;  %5401 = vpow2.f32 %v1062_v52  ;;  %v1454_v43 = vmul.f32 0.2, %v1438_v21 }
 0x49a   :  { %v860_v37 = vsel %vm352_vm3, %v7216_v7, 0.0  ;;  %v7229_v57 = vpop.eup %5393  ;;  %v1708_v50 = vsel %vm352_vm3, %v7227_v19, -inf  ;;  %v1915_v20 = vsel %vm1899_vm0, %v1891_v32, %v1907_v27  ;;  %5403 = vpow2.f32 %v1731_v4 }
 0x49b   :  { %v1293_v36 = vsel %vm352_vm3, %v7229_v57, 0.0  ;;  %v1947_v56 = vsel %vm352_vm3, %v7239_v24, -inf  ;;  %v7265_v8 = vadd.f32 %v7159_v22, %v1915_v20  ;;  %v7285_v41 = vpop.xlane.xlu1 %1933  ;;  %v1270_v32 = vsub.f32 %v6820_v46, %v6987_v11 }
 0x49c   :  { %v1462_v4 = vsel %vm1446_vm4, %v1438_v21, %v1454_v43 }
 0x49d   :  { %v1941_v35 = vsel %vm352_vm3, %v7265_v8, -inf  ;;  %v1279_v27 = vmul.f32 1.442695, %v1270_v32  ;;  %v7311_v60 = vadd.f32 %v7085_v3, %v1462_v4  ;;  %v9438_v4 = vld [vmem:[#allocation19_spill] sm:$0xff] }
 0x49f   :  { %5405 = vpow2.f32 %v1279_v27 }
 0x4a0   :  { %1482 = vmax.xlane.f32.xlu2 %v1481_v23  ;;  %1712 = vmax.xlane.f32.xlu1 %v1711_v61  ;;  %v7241_v23 = vpop.eup %5395  ;;  %v1681_v61 = vmul.f32 0.2, %v1665_v47  ;;  %5407 = vrcp.f32 %v847_v26 }
 0x4a1   :  { %v854_v28 = vsel %vm352_vm3, %v7241_v23, 0.0 }
 0x4a2   :  { %v1689_v10 = vsel %vm1673_vm15, %v1665_v47, %v1681_v61  ;;  %v1680_v47 = vmul.f32 0.2, %v1664_v48  ;;  %v1211_v61 = vadd.f32 %v6790_v16, %v6949_v44 }
 0x4a4   :  { %v1688_v59 = vsel %vm1672_vm1, %v1664_v48, %v1680_v47  ;;  %vm1219_vm2 = vcmp.gt.f32.partialorder %v1211_v61, 0.0  ;;  %v9436_v48 = vld [vmem:[#allocation15_spill] sm:$0xff] }
 0x4a5   :  { %v1496_v47 = vsub.f32 %v9436_v48, %v7041_v0 }
 0x4a7   :  { %v1504_v26 = vmul.f32 1.442695, %v1496_v47 }
 0x4a8   :  { %1082 = vadd.xlane.f32.xlu2 %v1081_v25  ;;  %861 = vadd.xlane.f32.xlu1 %v860_v37  ;;  %v7252_v25 = vadd.f32 %v7085_v3, %v1689_v10  ;;  %v7254_v37 = vpop.eup %5397 }
 0x4a9   :  { %v419_v39 = vsel %vm352_vm3, %v7254_v37, 0.0  ;;  %v7267_v1 = vpop.eup %5399 }
 0x4aa   :  { %v1717_v53 = vsel %vm352_vm3, %v7252_v25, -inf  ;;  %v1977_v34 = vsel %vm352_vm3, %v7267_v1, 0.0 }
 0x4b0   :  { %1709 = vmax.xlane.f32.xlu2 %v1708_v50  ;;  %1294 = vadd.xlane.f32.xlu1 %v1293_v36  ;;  %v7275_v50 = vpop.eup %5401 }
 0x4b1   :  { %v7277_v36 = vpop.eup %5403  ;;  %v1084_v62 = vsel %vm352_vm3, %v7275_v50, 0.0 }
 0x4b2   :  { %v1747_v15 = vsel %vm352_vm3, %v7277_v36, 0.0  ;;  %v7303_v11 = vpop.eup %5405 }
 0x4b3   :  { %v1296_v20 = vsel %vm352_vm3, %v7303_v11, 0.0 }
 0x4b8   :  { %855 = vadd.xlane.f32.xlu2 %v854_v28  ;;  %1948 = vmax.xlane.f32.xlu1 %v1947_v56  ;;  %v7288_v28 = vadd.f32 %v7159_v22, %v1688_v59  ;;  %v1227_v56 = vmul.f32 0.2, %v1211_v61 }
 0x4ba   :  { %v1714_v10 = vsel %vm352_vm3, %v7288_v28, -inf  ;;  %v1235_v13 = vsel %vm1219_vm2, %v1211_v61, %v1227_v56  ;;  %v9437_v56 = vld [vmem:[#allocation18_spill] sm:$0xff] }
 0x4bb   :  { %v7297_v44 = vadd.f32 %v7085_v3, %v1235_v13 }
 0x4bd   :  { %v1263_v22 = vsel %vm352_vm3, %v7297_v44, -inf }
 0x4c0   :  { %420 = vadd.xlane.f32.xlu2 %v419_v39  ;;  %1718 = vmax.xlane.f32.xlu1 %v1717_v53  ;;  %v1656_v53 = vpop.permute.xlu0 %1655 }
 0x4c1   :  { %v1666_v52 = vadd.f32 %v6901_v2, %v1656_v53 }
 0x4c3   :  { %v1682_v42 = vmul.f32 0.2, %v1666_v52  ;;  %vm1674_vm5 = vcmp.gt.f32.partialorder %v1666_v52, 0.0 }
 0x4c5   :  { %v1690_v2 = vsel %vm1674_vm5, %v1666_v52, %v1682_v42 }
 0x4c8   :  { %1942 = vmax.xlane.f32.xlu2 %v1941_v35  ;;  %1978 = vadd.xlane.f32.xlu1 %v1977_v34  ;;  %v418_v0 = vpop.xlane.xlu0 %417 }
 0x4cd   :  { %v7294_v16 = vpop.xlane.xlu1 %1479 }
 0x4d0   :  { %1085 = vadd.xlane.f32.xlu2 %v1084_v62  ;;  %1748 = vadd.xlane.f32.xlu1 %v1747_v15  ;;  %v1490_v62 = vsel %vm352_vm3, %v7311_v60, -inf  ;;  %v5408_v15 = vpop.eup %5407  ;;  %v1259_v48 = vpop.xlane.xlu0 %1258 }
 0x4d1   :  { %v873_v3 = vmul.f32 %v5408_v15, %v9437_v56 }
 0x4d5   :  { %v7305_v39 = vpop.xlane.xlu1 %1079 }
 0x4d8   :  { %1715 = vmax.xlane.f32.xlu2 %v1714_v10  ;;  %v7322_v10 = vadd.f32 %v7067_v33, %v1690_v2  ;;  %v7354_v56 = vpop.xlane.xlu0 %423 }
 0x4da   :  { %v1720_v53 = vsel %vm352_vm3, %v7322_v10, -inf }
 0x4e0   :  { %1264 = vmax.xlane.f32.xlu2 %v1263_v22 }
 0x4e3   :  { %v1704_v46 = vpop.xlane.xlu2 %1703 }
 0x4e4   :  { %v1724_v21 = vsub.f32 %v7103_v63, %v1704_v46  ;;  %v1498_v63 = vsub.f32 %v7060_v30, %v7294_v16 }
 0x4e8   :  { %1297 = vadd.xlane.f32.xlu2 %v1296_v20 }
 0x4eb   :  { %v850_v35 = vpop.xlane.xlu2 %849  ;;  %v7313_v34 = vpop.xlane.xlu1 %1706 }
 0x4ec   :  { %5409 = vrcp.f32 %v850_v35  ;;  %v1952_v35 = vsub.f32 %v9438_v4, %v7285_v41  ;;  %v1508_v41 = vmul.f32 1.442695, %v1498_v63 }
 0x4ed   :  { %5411 = vpow2.f32 %v1504_v26 }
 0x4f0   :  { %1491 = vmax.xlane.f32.xlu2 %v1490_v62 }
 0x4f2   :  { %v5410_v61 = vpop.eup %5409 }
 0x4f3   :  { %v1253_v59 = vpop.xlane.xlu2 %1252  ;;  %v874_v32 = vmul.f32 %v5410_v61, %v7116_v29  ;;  %v7325_v27 = vpop.xlane.xlu1 %852  ;;  %v1733_v29 = vmul.f32 1.442695, %v1724_v21 }
 0x4f4   :  { %v1271_v13 = vsub.f32 %v7134_v31, %v1253_v59  ;;  %v7331_v20 = vpop.eup %5411 }
 0x4f5   :  { %v889_v22 = vpack.c.bf16 %v874_v32, %v873_v3  ;;  %v1520_v47 = vsel %vm352_vm3, %v7331_v20, 0.0 }
 0x4f6   :  { %v1281_v43 = vmul.f32 1.442695, %v1271_v13 }
 0x4f7   :  { %4884 = vmatmul.msk.bf16.gmra.mxu0 %vm352_vm3, %v889_v22  ;;  %v9439_v22 = vld [vmem:[#allocation23_spill] sm:$0xff] }
 0x4f8   :  { %5413 = vpow2.f32 %v1281_v43  ;;  %1721 = vmax.xlane.f32.xlu2 %v1720_v53 }
 0x4f9   :  { %5415 = vpow2.f32 %v1733_v29 }
 0x4fb   :  { %v1256_v33 = vpop.xlane.xlu2 %1255  ;;  %v1262_v52 = vpop.xlane.xlu1 %1261 }
 0x4fc   :  { %v1272_v31 = vsub.f32 %v7154_v18, %v1256_v33  ;;  %v1962_v18 = vmul.f32 1.442695, %v1952_v35  ;;  %v1725_v33 = vsub.f32 %v7119_v51, %v7313_v34  ;;  %v9440_v51 = vld [vmem:[#allocation30_spill] sm:$0xff] }
 0x4fd   :  { %v1273_v34 = vsub.f32 %v9440_v51, %v1259_v48 }
 0x4fe   :  { %v7336_v42 = vpop.eup %5413  ;;  %v1283_v46 = vmul.f32 1.442695, %v1272_v31  ;;  %v1735_v63 = vmul.f32 1.442695, %v1725_v33 }
 0x4ff   :  { %v1299_v62 = vsel %vm352_vm3, %v7336_v42, 0.0  ;;  %v7344_v2 = vpop.eup %5415 }
 0x500   :  { %5417 = vpow2.f32 %v1283_v46  ;;  %1521 = vadd.xlane.f32.xlu2 %v1520_v47  ;;  %1300 = vadd.xlane.f32.xlu0 %v1299_v62  ;;  %v1750_v61 = vsel %vm352_vm3, %v7344_v2, 0.0 }
 0x501   :  { %5419 = vrcp.f32 %v418_v0 }
 0x503   :  { %v415_v15 = vpop.xlane.xlu2 %414  ;;  %v7348_v16 = vpop.xlane.xlu1 %1939 }
 0x504   :  { %5421 = vrcp.f32 %v415_v15  ;;  %v1954_v51 = vsub.f32 %v7175_v54, %v7348_v16 }
 0x505   :  { %5423 = vpow2.f32 %v1962_v18  ;;  %v1274_v18 = vsub.f32 %v7162_v9, %v1262_v52  ;;  %v9441_v52 = vld [vmem:[#allocation32_spill] sm:$0xff] }
 0x506   :  { %v7346_v30 = vpop.eup %5417  ;;  %5425 = vpow2.f32 %v1508_v41 }
 0x507   :  { %v1302_v26 = vsel %vm352_vm3, %v7346_v30, 0.0  ;;  %v5420_v59 = vpop.eup %5419 }
 0x508   :  { %1751 = vadd.xlane.f32.xlu2 %v1750_v61  ;;  %1303 = vadd.xlane.f32.xlu1 %v1302_v26  ;;  %v438_v21 = vmul.f32 %v5420_v59, %v9439_v22  ;;  %v1285_v61 = vmul.f32 1.442695, %v1273_v34  ;;  %v1287_v26 = vmul.f32 1.442695, %v1274_v18 }
 0x50a   :  { %v5422_v3 = vpop.eup %5421 }
 0x50b   :  { %v7356_v32 = vpop.eup %5423  ;;  %v1937_v13 = vpop.xlane.xlu2 %1936  ;;  %v437_v0 = vmul.f32 %v5422_v3, %v7177_v45 }
 0x50c   :  { %v7360_v43 = vpop.eup %5425  ;;  %v1953_v53 = vsub.f32 %v7187_v5, %v1937_v13  ;;  %v1980_v4 = vsel %vm352_vm3, %v7356_v32, 0.0  ;;  %v7370_v45 = vpop.xlane.xlu1 %1488 }
 0x50d   :  { %v452_v29 = vpack.c.bf16 %v438_v21, %v437_v0  ;;  %v1526_v35 = vsel %vm352_vm3, %v7360_v43, 0.0  ;;  %v1486_v5 = vpop.xlane.xlu0 %1485  ;;  %v1501_v16 = vsub.f32 %v7190_v17, %v7370_v45 }
 0x50e   :  { %v1964_v31 = vmul.f32 1.442695, %v1953_v53  ;;  %v1500_v13 = vsub.f32 %v9441_v52, %v1486_v5 }
 0x50f   :  { %4881 = vmatmul.msk.bf16.gmra.mxu3 %vm352_vm3, %v452_v29 }
 0x510   :  { %5427 = vpow2.f32 %v1964_v31  ;;  %1981 = vadd.xlane.f32.xlu2 %v1980_v4  ;;  %1527 = vadd.xlane.f32.xlu1 %v1526_v35  ;;  %v1512_v53 = vmul.f32 1.442695, %v1500_v13  ;;  %v9442_v31 = vld [vmem:[#allocation36_spill] sm:$0xff] }
 0x511   :  { %5429 = vpow2.f32 %v1735_v63 }
 0x513   :  { %v1483_v46 = vpop.xlane.xlu2 %1482 }
 0x514   :  { %v1499_v47 = vsub.f32 %v7201_v55, %v1483_v46  ;;  %v7380_v59 = vpop.xlane.xlu1 %1712 }
 0x515   :  { %v7384_v48 = vpop.xlane.xlu0 %1088 }
 0x516   :  { %v7374_v62 = vpop.eup %5427  ;;  %v1510_v41 = vmul.f32 1.442695, %v1499_v47 }
 0x517   :  { %v1983_v15 = vsel %vm352_vm3, %v7374_v62, 0.0  ;;  %v7382_v3 = vpop.eup %5429 }
 0x518   :  { %5431 = vpow2.f32 %v1510_v41  ;;  %1984 = vadd.xlane.f32.xlu0 %v1983_v15 }
 0x519   :  { %5433 = vrcp.f32 %v7305_v39  ;;  %v1753_v39 = vsel %vm352_vm3, %v7382_v3, 0.0 }
 0x51b   :  { %v1083_v55 = vpop.xlane.xlu2 %1082 }
 0x51c   :  { %5435 = vrcp.f32 %v1083_v55  ;;  %v862_v5 = vpop.xlane.xlu1 %861 }
 0x51d   :  { %5437 = vpow2.f32 %v1285_v61  ;;  %v859_v18 = vpop.xlane.xlu0 %858 }
 0x51e   :  { %v7386_v9 = vpop.eup %5431  ;;  %5439 = vpow2.f32 %v1287_v26 }
 0x51f   :  { %v1529_v0 = vsel %vm352_vm3, %v7386_v9, 0.0  ;;  %v5434_v22 = vpop.eup %5433  ;;  %5441 = vpow2.f32 %v1512_v53 }
 0x520   :  { %1530 = vadd.xlane.f32.xlu2 %v1529_v0  ;;  %1754 = vadd.xlane.f32.xlu0 %v1753_v39  ;;  %v1102_v4 = vmul.f32 %v5434_v22, %v9442_v31  ;;  %v1514_v39 = vmul.f32 1.442695, %v1501_v16 }
 0x522   :  { %v5436_v21 = vpop.eup %5435 }
 0x523   :  { %v7393_v29 = vpop.eup %5437  ;;  %v1710_v33 = vpop.xlane.xlu2 %1709  ;;  %v1103_v35 = vmul.f32 %v5436_v21, %v7214_v40 }
 0x524   :  { %v7397_v63 = vpop.eup %5439  ;;  %v1726_v46 = vsub.f32 %v7227_v19, %v1710_v33  ;;  %v1305_v41 = vsel %vm352_vm3, %v7393_v29, 0.0  ;;  %v1966_v19 = vmul.f32 1.442695, %v1954_v51  ;;  %v7414_v26 = vpop.xlane.xlu1 %1294 }
 0x525   :  { %v1117_v47 = vpack.c.bf16 %v1103_v35, %v1102_v4  ;;  %v1308_v40 = vsel %vm352_vm3, %v7397_v63, 0.0  ;;  %v7408_v61 = vpop.eup %5441  ;;  %v1268_v13 = vpop.xlane.xlu0 %1267 }
 0x526   :  { %v1737_v34 = vmul.f32 1.442695, %v1726_v46  ;;  %v1532_v52 = vsel %vm352_vm3, %v7408_v61, 0.0  ;;  %v9443_v46 = vld [vmem:[#allocation31_spill] sm:$0xff] }
 0x527   :  { %4889 = vmatmul.msk.bf16.gmra.mxu2 %vm352_vm3, %v1117_v47 }
 0x528   :  { %5443 = vpow2.f32 %v1737_v34  ;;  %1306 = vadd.xlane.f32.xlu2 %v1305_v41  ;;  %1309 = vadd.xlane.f32.xlu0 %v1308_v40 }
 0x529   :  { %5445 = vrcp.f32 %v7325_v27 }
 0x52b   :  { %v856_v15 = vpop.xlane.xlu2 %855 }
 0x52c   :  { %5447 = vrcp.f32 %v856_v15  ;;  %v7428_v4 = vpop.xlane.xlu1 %1948 }
 0x52d   :  { %5449 = vpow2.f32 %v1966_v19 }
 0x52e   :  { %v7410_v54 = vpop.eup %5443  ;;  %5451 = vrcp.f32 %v7354_v56 }
 0x52f   :  { %v1756_v55 = vsel %vm352_vm3, %v7410_v54, 0.0  ;;  %v5446_v27 = vpop.eup %5445 }
 0x530   :  { %1757 = vadd.xlane.f32.xlu1 %v1756_v55  ;;  %1533 = vadd.xlane.f32.xlu0 %v1532_v52  ;;  %v875_v21 = vmul.f32 %v5446_v27, %v7136_v49  ;;  %v1946_v49 = vpop.xlane.xlu0 %1945  ;;  %v9444_v52 = vld [vmem:[#allocation34_spill] sm:$0xff] }
 0x532   :  { %v5448_v0 = vpop.eup %5447 }
 0x533   :  { %v421_v22 = vpop.xlane.xlu2 %420  ;;  %v876_v17 = vmul.f32 %v5448_v0, %v7241_v23  ;;  %v7423_v45 = vpop.eup %5449 }
 0x534   :  { %5453 = vrcp.f32 %v421_v22  ;;  %v1986_v33 = vsel %vm352_vm3, %v7423_v45, 0.0  ;;  %v5452_v31 = vpop.eup %5451 }
 0x535   :  { %v890_v53 = vpack.c.bf16 %v876_v17, %v875_v21  ;;  %5455 = vpow2.f32 %v1514_v39  ;;  %v440_v47 = vmul.f32 %v5452_v31, %v9443_v46  ;;  %v9445_v39 = vld [vmem:[#allocation35_spill] sm:$0xff]  ;;  %v9446_v31 = vld [vmem:[#allocation33_spill] sm:$0xff] }
 0x536   :  { %5457 = vrcp.f32 %v862_v5  ;;  %v1727_v5 = vsub.f32 %v7204_v58, %v7380_v59  ;;  %v1276_v22 = vsub.f32 %v9445_v39, %v1268_v13 }
 0x537   :  { %4885 = vmatmul.msk.bf16.gmra.mxu0 %vm352_vm3, %v890_v53  ;;  %5459 = vrcp.f32 %v859_v18 }
 0x538   :  { %1987 = vadd.xlane.f32.xlu1 %v1986_v33  ;;  %v1739_v16 = vmul.f32 1.442695, %v1727_v5  ;;  %v1495_v58 = vpop.xlane.xlu0 %1494  ;;  %v1291_v17 = vmul.f32 1.442695, %v1276_v22 }
 0x53a   :  { %v5454_v56 = vpop.eup %5453 }
 0x53b   :  { %v1943_v35 = vpop.xlane.xlu2 %1942  ;;  %v439_v23 = vmul.f32 %v5454_v56, %v7254_v37  ;;  %v7432_v51 = vpop.eup %5455 }
 0x53c   :  { %v1955_v34 = vsub.f32 %v7265_v8, %v1943_v35  ;;  %v5458_v40 = vpop.eup %5457  ;;  %v1535_v18 = vsel %vm352_vm3, %v7432_v51, 0.0  ;;  %v7442_v8 = vpop.xlane.xlu1 %1718 }
 0x53d   :  { %v453_v41 = vpack.c.bf16 %v440_v47, %v439_v23  ;;  %v5460_v15 = vpop.eup %5459  ;;  %v878_v37 = vmul.f32 %v5458_v40, %v7216_v7  ;;  %v1956_v47 = vsub.f32 %v7088_v6, %v1946_v49  ;;  %v1503_v6 = vsub.f32 %v7098_v38, %v1495_v58 }
 0x53e   :  { %v1968_v19 = vmul.f32 1.442695, %v1955_v34  ;;  %v877_v27 = vmul.f32 %v5460_v15, %v9444_v52  ;;  %v1957_v15 = vsub.f32 %v7239_v24, %v7428_v4  ;;  %v1729_v22 = vsub.f32 %v7252_v25, %v7442_v8 }
 0x53f   :  { %4882 = vmatmul.msk.bf16.gmra.mxu3 %vm352_vm3, %v453_v41 }
 0x540   :  { %5461 = vpow2.f32 %v1968_v19  ;;  %1536 = vadd.xlane.f32.xlu1 %v1535_v18  ;;  %v891_v59 = vpack.c.bf16 %v878_v37, %v877_v27  ;;  %v1976_v41 = vpop.xlane.xlu0 %1975  ;;  %v1972_v27 = vmul.f32 1.442695, %v1957_v15 }
 0x541   :  { %5463 = vrcp.f32 %v7384_v48 }
 0x543   :  { %v1086_v55 = vpop.xlane.xlu2 %1085 }
 0x544   :  { %5465 = vrcp.f32 %v1086_v55  ;;  %v1979_v23 = vpop.xlane.xlu1 %1978 }
 0x545   :  { %5467 = vpow2.f32 %v1739_v16 }
 0x546   :  { %v7445_v0 = vpop.eup %5461  ;;  %5469 = vpow2.f32 %v1291_v17 }
 0x547   :  { %4886 = vmatmul.msk.bf16.gmra.mxu0 %vm352_vm3, %v891_v59  ;;  %v1989_v7 = vsel %vm352_vm3, %v7445_v0, 0.0  ;;  %v5464_v48 = vpop.eup %5463  ;;  %5471 = vrcp.f32 %v1979_v23 }
 0x548   :  { %1990 = vadd.xlane.f32.xlu2 %v1989_v7  ;;  %v1105_v56 = vmul.f32 %v5464_v48, %v9446_v31  ;;  %v1743_v48 = vmul.f32 1.442695, %v1729_v22 }
 0x54a   :  { %v5466_v21 = vpop.eup %5465 }
 0x54b   :  { %v1716_v53 = vpop.xlane.xlu2 %1715  ;;  %v1104_v33 = vmul.f32 %v5466_v21, %v7275_v50  ;;  %v7453_v35 = vpop.eup %5467  ;;  %v1970_v50 = vmul.f32 1.442695, %v1956_v47 }
 0x54c   :  { %v1728_v13 = vsub.f32 %v7288_v28, %v1716_v53  ;;  %v1759_v40 = vsel %vm352_vm3, %v7453_v35, 0.0  ;;  %v7460_v19 = vpop.eup %5469  ;;  %v1749_v15 = vpop.xlane.xlu1 %1748 }
 0x54d   :  { %v1118_v46 = vpack.c.bf16 %v1105_v56, %v1104_v33  ;;  %v5472_v18 = vpop.eup %5471  ;;  %v1314_v55 = vsel %vm352_vm3, %v7460_v19, 0.0 }
 0x54e   :  { %v1741_v34 = vmul.f32 1.442695, %v1728_v13  ;;  %v2007_v38 = vmul.f32 %v5472_v18, %v7267_v1  ;;  %v9447_v18 = vld [vmem:[#allocation17_spill] sm:$0xff] }
 0x54f   :  { %4890 = vmatmul.msk.bf16.gmra.mxu2 %vm352_vm3, %v1118_v46  ;;  %v7498_v46 = vpop.f32.mrf.mxu3 }
 0x550   :  { %5473 = vpow2.f32 %v1741_v34  ;;  %1760 = vadd.xlane.f32.xlu2 %v1759_v40  ;;  %v1525_v40 = vpop.xlane.xlu0 %1524 }
 0x551   :  { %5475 = vrcp.f32 %v1976_v41 }
 0x552   :  { %5477 = vpow2.f32 %v1970_v50 }
 0x553   :  { %v1265_v5 = vpop.xlane.xlu2 %1264 }
 0x554   :  { %v1275_v28 = vsub.f32 %v7297_v44, %v1265_v5  ;;  %v1518_v44 = vmul.f32 1.442695, %v1503_v6 }
 0x556   :  { %v7464_v49 = vpop.eup %5473  ;;  %v1289_v37 = vmul.f32 1.442695, %v1275_v28 }
 0x557   :  { %v1762_v16 = vsel %vm352_vm3, %v7464_v49, 0.0  ;;  %v5476_v52 = vpop.eup %5475  ;;  %v703_v28 = vpop.f32.mrf.mxu3 }
 0x558   :  { %5479 = vpow2.f32 %v1289_v37  ;;  %1763 = vadd.xlane.f32.xlu0 %v1762_v16  ;;  %1315 = vadd.xlane.f32.xlu2 %v1314_v55  ;;  %v2006_v58 = vmul.f32 %v5476_v52, %v7114_v14  ;;  %v7475_v4 = vpop.eup %5477  ;;  %v704_v6 = vadd.f32 %v703_v28, %v9447_v18 }
 0x559   :  { %5481 = vrcp.f32 %v7414_v26  ;;  %v1992_v1 = vsel %vm352_vm3, %v7475_v4, 0.0 }
 0x55a   :  { %v2023_v59 = vpack.c.bf16 %v2007_v38, %v2006_v58 }
 0x55b   :  { %v1298_v24 = vpop.xlane.xlu2 %1297 }
 0x55c   :  { %5483 = vrcp.f32 %v1298_v24 }
 0x55d   :  { %5485 = vpow2.f32 %v1518_v44 }
 0x55e   :  { %v7477_v39 = vpop.eup %5479  ;;  %5487 = vpow2.f32 %v1972_v27 }
 0x55f   :  { %4903 = vmatmul.msk.bf16.vlgmr.msrb.gmra.mxu2 %vm352_vm3, %v2023_v59  ;;  %v1311_v14 = vsel %vm352_vm3, %v7477_v39, 0.0  ;;  %v5482_v26 = vpop.eup %5481  ;;  %5489 = vpow2.f32 %v1743_v48 }
 0x560   :  { %1993 = vadd.xlane.f32.xlu0 %v1992_v1  ;;  %1312 = vadd.xlane.f32.xlu1 %v1311_v14  ;;  %v1325_v17 = vmul.f32 %v5482_v26, %v7229_v57 }
 0x562   :  { %v5484_v7 = vpop.eup %5483 }
 0x563   :  { %v7486_v21 = vpop.eup %5485  ;;  %v1326_v53 = vmul.f32 %v5484_v7, %v7303_v11  ;;  %v1492_v25 = vpop.xlane.xlu2 %1491 }
 0x564   :  { %v7490_v8 = vpop.eup %5487  ;;  %v1502_v33 = vsub.f32 %v7311_v60, %v1492_v25  ;;  %v1541_v23 = vsel %vm352_vm3, %v7486_v21, 0.0  ;;  %v7502_v60 = vpop.f32.mrf.mxu0 }
 0x565   :  { %v1342_v31 = vpack.c.bf16 %v1326_v53, %v1325_v17  ;;  %v1995_v13 = vsel %vm352_vm3, %v7490_v8, 0.0  ;;  %v7500_v11 = vpop.eup %5489 }
 0x566   :  { %v1516_v56 = vmul.f32 1.442695, %v1502_v33  ;;  %v1765_v5 = vsel %vm352_vm3, %v7500_v11, 0.0 }
 0x567   :  { %4891 = vmatmul.msk.bf16.vlgmr.msra.gmra.mxu3 %vm352_vm3, %v1342_v31 }
 0x568   :  { %5491 = vpow2.f32 %v1516_v56  ;;  %1542 = vadd.xlane.f32.xlu0 %v1541_v23  ;;  %1996 = vadd.xlane.f32.xlu1 %v1995_v13 }
 0x56b   :  { %v1722_v57 = vpop.xlane.xlu2 %1721 }
 0x56c   :  { %v1730_v47 = vsub.f32 %v7322_v10, %v1722_v57 }
 0x56e   :  { %v7505_v34 = vpop.eup %5491  ;;  %v1745_v41 = vmul.f32 1.442695, %v1730_v47 }
 0x56f   :  { %v1538_v50 = vsel %vm352_vm3, %v7505_v34, 0.0 }
 0x570   :  { %5493 = vpow2.f32 %v1745_v41  ;;  %1539 = vadd.xlane.f32.xlu2 %v1538_v50  ;;  %1766 = vadd.xlane.f32.xlu1 %v1765_v5 }
 0x571   :  { %5495 = vrcp.f32 %v1525_v40 }
 0x573   :  { %v1522_v37 = vpop.xlane.xlu2 %1521  ;;  %v1301_v38 = vpop.xlane.xlu0 %1300 }
 0x574   :  { %5497 = vrcp.f32 %v1522_v37  ;;  %v922_v10 = vpop.f32.mrf.mxu0 }
 0x575   :  { %v7512_v16 = vadd.f32 %v922_v10, %v704_v6  ;;  %5499 = vrcp.f32 %v1749_v15 }
 0x576   :  { %v7514_v55 = vpop.eup %5493  ;;  %5501 = vrcp.f32 %v1301_v38 }
 0x577   :  { %v1768_v52 = vsel %vm352_vm3, %v7514_v55, 0.0  ;;  %v5496_v44 = vpop.eup %5495 }
 0x578   :  { %1769 = vadd.xlane.f32.xlu2 %v1768_v52  ;;  %v1553_v58 = vmul.f32 %v5496_v44, %v7131_v12  ;;  %v7535_v52 = vpop.f32.mrf.mxu2 }
 0x57a   :  { %v5498_v27 = vpop.eup %5497 }
 0x57b   :  { %v1552_v24 = vmul.f32 %v5498_v27, %v7331_v20  ;;  %v1752_v59 = vpop.xlane.xlu2 %1751  ;;  %v1304_v22 = vpop.xlane.xlu1 %1303 }
 0x57c   :  { %5503 = vrcp.f32 %v1752_v59  ;;  %v5500_v14 = vpop.eup %5499 }
 0x57d   :  { %5505 = vrcp.f32 %v1304_v22  ;;  %v1569_v1 = vpack.c.bf16 %v1553_v58, %v1552_v24  ;;  %v5502_v26 = vpop.eup %5501  ;;  %v1779_v17 = vmul.f32 %v5500_v14, %v7277_v36  ;;  %v7540_v58 = vpop.f32.mrf.mxu0  ;;  %v9448_v14 = vld [vmem:[#allocation16_spill] sm:$0xff] }
 0x57e   :  { %v1327_v12 = vmul.f32 %v5502_v26, %v7336_v42 }
 0x57f   :  { %4895 = vmatmul.msk.bf16.vlgmr.msrb.gmra.mxu1 %vm352_vm3, %v1569_v1 }
 0x582   :  { %v5504_v7 = vpop.eup %5503 }
 0x583   :  { %v5506_v48 = vpop.eup %5505  ;;  %v1780_v53 = vmul.f32 %v5504_v7, %v7344_v2  ;;  %v1982_v31 = vpop.xlane.xlu2 %1981 }
 0x584   :  { %v1328_v20 = vmul.f32 %v5506_v48, %v7346_v30  ;;  %5507 = vrcp.f32 %v1982_v31  ;;  %v1528_v23 = vpop.xlane.xlu1 %1527 }
 0x585   :  { %v1796_v25 = vpack.c.bf16 %v1780_v53, %v1779_v17 }
 0x586   :  { %v1343_v33 = vpack.c.bf16 %v1328_v20, %v1327_v12 }
 0x587   :  { %4899 = vmatmul.msk.bf16.vlgmr.msra.gmra.mxu0 %vm352_vm3, %v1796_v25 }
 0x588   :  { %4892 = vmatmul.msk.bf16.gmra.mxu3 %vm352_vm3, %v1343_v33 }
 0x58a   :  { %v5508_v13 = vpop.eup %5507 }
 0x58b   :  { %v1985_v56 = vpop.xlane.xlu0 %1984  ;;  %v2008_v42 = vmul.f32 %v5508_v13, %v7356_v32 }
 0x58c   :  { %5509 = vrcp.f32 %v1985_v56 }
 0x58d   :  { %5511 = vrcp.f32 %v1528_v23 }
 0x592   :  { %v5510_v57 = vpop.eup %5509 }
 0x593   :  { %v1531_v36 = vpop.xlane.xlu2 %1530  ;;  %v1755_v2 = vpop.xlane.xlu0 %1754  ;;  %v2009_v30 = vmul.f32 %v5510_v57, %v7374_v62 }
 0x594   :  { %5513 = vrcp.f32 %v1531_v36  ;;  %v5512_v41 = vpop.eup %5511 }
 0x595   :  { %v2024_v47 = vpack.c.bf16 %v2009_v30, %v2008_v42  ;;  %v1554_v28 = vmul.f32 %v5512_v41, %v7360_v43  ;;  %v7537_v43 = vpop.f32.mrf.mxu3 }
 0x597   :  { %4904 = vmatmul.msk.bf16.gmra.mxu2 %vm352_vm3, %v2024_v47  ;;  %v9449_v47 = vld [vmem:[#allocation28_spill] sm:$0xff] }
 0x59a   :  { %v5514_v40 = vpop.eup %5513 }
 0x59b   :  { %v1307_v50 = vpop.xlane.xlu2 %1306  ;;  %v1310_v5 = vpop.xlane.xlu0 %1309  ;;  %v1555_v18 = vmul.f32 %v5514_v40, %v7386_v9 }
 0x59c   :  { %5515 = vrcp.f32 %v1307_v50 }
 0x59d   :  { %5517 = vrcp.f32 %v1310_v5  ;;  %v1570_v6 = vpack.c.bf16 %v1555_v18, %v1554_v28  ;;  %v708_v1 = vpop.f32.mrf.mxu3 }
 0x59e   :  { %5519 = vrcp.f32 %v1755_v2  ;;  %v709_v26 = vadd.f32 %v708_v1, %v9448_v14  ;;  %v5149_v1 = vld [vmem:[%s9278_s6 + $0x28] sm:$0xff] }
 0x59f   :  { %4896 = vmatmul.msk.bf16.gmra.mxu1 %vm352_vm3, %v1570_v6 }
 0x5a2   :  { %v5516_v32 = vpop.eup %5515 }
 0x5a3   :  { %v5518_v15 = vpop.eup %5517  ;;  %v1758_v62 = vpop.xlane.xlu1 %1757  ;;  %v1329_v37 = vmul.f32 %v5516_v32, %v7393_v29 }
 0x5a4   :  { %v1330_v10 = vmul.f32 %v5518_v15, %v7397_v63  ;;  %5521 = vrcp.f32 %v1758_v62  ;;  %v5520_v9 = vpop.eup %5519  ;;  %v7544_v29 = vpop.f32.mrf.mxu2 }
 0x5a5   :  { %v1781_v24 = vmul.f32 %v5520_v9, %v7382_v3  ;;  %v1534_v22 = vpop.xlane.xlu0 %1533  ;;  %v7550_v20 = vpop.f32.mrf.mxu3  ;;  %v5151_v9 = vld [vmem:[%s9278_s6 + $0x38] sm:$0xff] }
 0x5a6   :  { %v1344_v44 = vpack.c.bf16 %v1330_v10, %v1329_v37  ;;  %5523 = vrcp.f32 %v1534_v22  ;;  %2168 = vmatpush.bf16.msrb.mxu3 %v5151_v9 }
 0x5a8   :  { %4893 = vmatmul.msk.bf16.gmra.mxu3 %vm352_vm3, %v1344_v44 }
 0x5aa   :  { %v5522_v38 = vpop.eup %5521 }
 0x5ab   :  { %v1988_v27 = vpop.xlane.xlu1 %1987  ;;  %v1782_v59 = vmul.f32 %v5522_v38, %v7410_v54 }
 0x5ac   :  { %v5524_v53 = vpop.eup %5523  ;;  %v7548_v12 = vpop.f32.mrf.mxu2 }
 0x5ad   :  { %v1797_v63 = vpack.c.bf16 %v1782_v59, %v1781_v24  ;;  %v1556_v25 = vmul.f32 %v5524_v53, %v7408_v61 }
 0x5af   :  { %4900 = vmatmul.msk.bf16.gmra.mxu0 %vm352_vm3, %v1797_v63 }
 0x5b3   :  { %v1537_v7 = vpop.xlane.xlu1 %1536 }
 0x5b4   :  { %5525 = vrcp.f32 %v1537_v7  ;;  %v927_v48 = vpop.f32.mrf.mxu0  ;;  %v1154_v13 = vpop.f32.mrf.mxu2 }
 0x5b5   :  { %v941_v17 = vadd.f32 %v927_v48, %v709_v26  ;;  %5527 = vrcp.f32 %v1988_v27 }
 0x5b7   :  { %v7557_v2 = vadd.f32 %v1154_v13, %v941_v17 }
 0x5ba   :  { %v5526_v3 = vpop.eup %5525 }
 0x5bb   :  { %v1991_v54 = vpop.xlane.xlu2 %1990  ;;  %v1557_v33 = vmul.f32 %v5526_v3, %v7432_v51  ;;  %v5528_v23 = vpop.eup %5527 }
 0x5bc   :  { %5529 = vrcp.f32 %v1991_v54  ;;  %v7554_v31 = vpop.f32.mrf.mxu0  ;;  %v2010_v42 = vmul.f32 %v5528_v23, %v7423_v45  ;;  %v7563_v5 = vpop.f32.mrf.mxu2 }
 0x5bd   :  { %v1571_v56 = vpack.c.bf16 %v1557_v33, %v1556_v25 }
 0x5bf   :  { %4897 = vmatmul.msk.bf16.gmra.mxu1 %vm352_vm3, %v1571_v56  ;;  %v5148_v56 = vld [vmem:[%s9278_s6 + $0x20] sm:$0xff] }
 0x5c2   :  { %v5530_v57 = vpop.eup %5529  ;;  %v713_v36 = vpop.f32.mrf.mxu3 }
 0x5c3   :  { %v2011_v30 = vmul.f32 %v5530_v57, %v7445_v0  ;;  %v714_v61 = vadd.f32 %v713_v36, %v9449_v47  ;;  %v1761_v50 = vpop.xlane.xlu2 %1760  ;;  %v5146_v57 = vld [vmem:[%s9278_s6 + $0x10] sm:$0xff] }
 0x5c4   :  { %v932_v41 = vpop.f32.mrf.mxu0  ;;  %5531 = vrcp.f32 %v1761_v50  ;;  %v9451_v50 = vld [vmem:[#allocation25_spill] sm:$0xff] }
 0x5c5   :  { %v943_v51 = vadd.f32 %v932_v41, %v714_v61  ;;  %v2025_v40 = vpack.c.bf16 %v2011_v30, %v2010_v42  ;;  %v5145_v30 = vld [vmem:[%s9278_s6 + $0x8] sm:$0xff] }
 0x5c7   :  { %4905 = vmatmul.msk.bf16.gmra.mxu2 %vm352_vm3, %v2025_v40 }
 0x5ca   :  { %v5532_v18 = vpop.eup %5531  ;;  %v7599_v36 = vpop.f32.mrf.mxu3 }
 0x5cb   :  { %v1764_v28 = vpop.xlane.xlu0 %1763  ;;  %v1316_v6 = vpop.xlane.xlu2 %1315  ;;  %v1783_v62 = vmul.f32 %v5532_v18, %v7453_v35 }
 0x5cc   :  { %5533 = vrcp.f32 %v1764_v28  ;;  %v7610_v47 = vpop.f32.mrf.mxu0 }
 0x5cd   :  { %5535 = vrcp.f32 %v1316_v6 }
 0x5d2   :  { %v5534_v32 = vpop.eup %5533  ;;  %v1159_v15 = vpop.f32.mrf.mxu2 }
 0x5d3   :  { %v7565_v45 = vadd.f32 %v1159_v15, %v943_v51  ;;  %v1313_v0 = vpop.xlane.xlu1 %1312  ;;  %v1784_v37 = vmul.f32 %v5534_v32, %v7464_v49  ;;  %v1994_v10 = vpop.xlane.xlu0 %1993  ;;  %v5150_v49 = vld [vmem:[%s9278_s6 + $0x30] sm:$0xff]  ;;  %v9450_v51 = vld [vmem:[#allocation27_spill] sm:$0xff] }
 0x5d4   :  { %5537 = vrcp.f32 %v1313_v0  ;;  %v5536_v38 = vpop.eup %5535  ;;  %2169 = vmatpush.bf16.msrb.mxu3 %v5150_v49  ;;  %v701_v40 = vadd.f32 %v7498_v46, %v9450_v51 }
 0x5d5   :  { %v1798_v44 = vpack.c.bf16 %v1784_v37, %v1783_v62  ;;  %5539 = vrcp.f32 %v1994_v10  ;;  %v1332_v35 = vmul.f32 %v5536_v38, %v7460_v19 }
 0x5d6   :  { %v938_v32 = vadd.f32 %v7502_v60, %v701_v40 }
 0x5d7   :  { %4901 = vmatmul.msk.bf16.gmra.mxu0 %vm352_vm3, %v1798_v44 }
 0x5d8   :  { %2170 = vmatpush.bf16.msrb.mxu3 %v5149_v1  ;;  %v1165_v62 = vadd.f32 %v7535_v52, %v938_v32 }
 0x5da   :  { %v5538_v27 = vpop.eup %5537 }
 0x5db   :  { %v1997_v24 = vpop.xlane.xlu1 %1996  ;;  %v1331_v59 = vmul.f32 %v5538_v27, %v7477_v39  ;;  %v1543_v22 = vpop.xlane.xlu0 %1542  ;;  %v7620_v27 = vld [vmem:[%s9277_s5] ss:$0 sm:$0xff]  ;;  %s5936_s5 = smov 128  }
 0x5dc   :  { %5541 = vrcp.f32 %v1997_v24  ;;  %v5540_v14 = vpop.eup %5539  ;;  %2171 = vmatpush.bf16.msrb.mxu3 %v5148_v56 }
 0x5dd   :  { %v1345_v63 = vpack.c.bf16 %v1332_v35, %v1331_v59  ;;  %5543 = vrcp.f32 %v1543_v22  ;;  %v2012_v19 = vmul.f32 %v5540_v14, %v7475_v4 }
 0x5df   :  { %4894 = vmatmul.msk.bf16.gmra.mxu3 %vm352_vm3, %v1345_v63 }
 0x5e2   :  { %v5542_v26 = vpop.eup %5541 }
 0x5e3   :  { %v1540_v39 = vpop.xlane.xlu2 %1539  ;;  %v2013_v7 = vmul.f32 %v5542_v26, %v7490_v8  ;;  %v1767_v17 = vpop.xlane.xlu1 %1766  ;;  %v5147_v8 = vld [vmem:[%s9278_s6 + $0x18] sm:$0xff]  ;;  %v9452_v26 = vld [vmem:[#allocation21_spill] sm:$0xff] }
 0x5e4   :  { %5545 = vrcp.f32 %v1540_v39  ;;  %v5544_v53 = vpop.eup %5543  ;;  %2172 = vmatpush.bf16.msrb.mxu3 %v5147_v8  ;;  %v706_v39 = vadd.f32 %v7537_v43, %v9452_v26 }
 0x5e5   :  { %v2026_v48 = vpack.c.bf16 %v2013_v7, %v2012_v19  ;;  %5547 = vrcp.f32 %v1767_v17  ;;  %v1559_v33 = vmul.f32 %v5544_v53, %v7486_v21  ;;  %v1166_v19 = vadd.f32 %v7544_v29, %v7512_v16 }
 0x5e6   :  { %v940_v7 = vadd.f32 %v7540_v58, %v706_v39 }
 0x5e7   :  { %4906 = vmatmul.msk.bf16.gmra.mxu2 %vm352_vm3, %v2026_v48 }
 0x5e8   :  { %2173 = vmatpush.bf16.msrb.mxu3 %v5146_v57 }
 0x5ea   :  { %v5546_v3 = vpop.eup %5545  ;;  %v1371_v61 = vpop.f32.mrf.mxu3 }
 0x5eb   :  { %v1770_v54 = vpop.xlane.xlu2 %1769  ;;  %v1558_v25 = vmul.f32 %v5546_v3, %v7505_v34  ;;  %v5548_v23 = vpop.eup %5547  ;;  %v1391_v28 = vadd.f32 %v1371_v61, %v9451_v50 }
 0x5ec   :  { %5549 = vrcp.f32 %v1770_v54  ;;  %v1785_v34 = vmul.f32 %v5548_v23, %v7500_v11  ;;  %2174 = vmatpush.bf16.msrb.mxu3 %v5145_v30  ;;  %v5144_v11 = vld [vmem:[%s9278_s6] sm:$0xff] }
 0x5ed   :  { %v1572_v4 = vpack.c.bf16 %v1559_v33, %v1558_v25  ;;  %v1167_v25 = vadd.f32 %v7548_v12, %v940_v7  ;;  %v9453_v12 = vld [vmem:[#allocation26_spill] sm:$0xff] }
 0x5ee   :  { %v711_v61 = vadd.f32 %v7550_v20, %v9453_v12 }
 0x5ef   :  { %4898 = vmatmul.msk.bf16.gmra.mxu1 %vm352_vm3, %v1572_v4 }
 0x5f0   :  { %2175 = vmatpush.bf16.msrb.mxu3 %v5144_v11 }
 0x5f2   :  { %v5550_v13 = vpop.eup %5549  ;;  %v1373_v0 = vpop.f32.mrf.mxu3 }
 0x5f3   :  { %v1786_v21 = vmul.f32 %v5550_v13, %v7514_v55  ;;  %v7608_v55 = vpop.f32.mrf.mxu2  ;;  %v1392_v44 = vadd.f32 %v1373_v0, %v1165_v62 }
 0x5f5   :  { %v1799_v42 = vpack.c.bf16 %v1786_v21, %v1785_v34 }
 0x5f7   :  { %4902 = vmatmul.msk.bf16.gmra.mxu0 %vm352_vm3, %v1799_v42 }
 0x5fb   :  { %v2052_v18 = vpop.f32.mrf.mxu2 }
 0x5fc   :  { %v1598_v41 = vpop.f32.mrf.mxu1 }
 0x5fd   :  { %v1618_v15 = vadd.f32 %v1598_v41, %v1391_v28  ;;  %v942_v41 = vadd.f32 %v7554_v31, %v711_v61 }
 0x603   :  { %v2054_v59 = vpop.f32.mrf.mxu2 }
 0x604   :  { %v1825_v6 = vpop.f32.mrf.mxu0  ;;  %v1600_v10 = vpop.f32.mrf.mxu1 }
 0x605   :  { %v1845_v37 = vadd.f32 %v1825_v6, %v1618_v15  ;;  %v1619_v9 = vadd.f32 %v1600_v10, %v1392_v44  ;;  %v1169_v6 = vadd.f32 %v7563_v5, %v942_v41 }
 0x607   :  { %v2072_v38 = vadd.f32 %v2052_v18, %v1845_v37 }
 0x609   :  { %v2084_v35 = vadd.f32 %v7620_v27, %v2072_v38 }
 0x60b   :  { %v2092_v63 = vmax.f32 %v2084_v35, 0.0  ;;  %v1376_v1 = vpop.f32.mrf.mxu3  ;;  %v5157_v35 = vld [vmem:[%s9279_s7 + $0x28] sm:$0xff] }
 0x60c   :  { %v1827_v46 = vpop.f32.mrf.mxu0  ;;  %v1393_v48 = vadd.f32 %v1376_v1, %v1166_v19  ;;  %v5155_v1 = vld [vmem:[%s9279_s7 + $0x18] sm:$0xff] }
 0x60d   :  { %v1846_v24 = vadd.f32 %v1827_v46, %v1619_v9 }
 0x60f   :  { %v2073_v60 = vadd.f32 %v2054_v59, %v1846_v24  ;;  %v5158_v59 = vld [vmem:[%s9279_s7 + $0x30] sm:$0xff] }
 0x611   :  { %v2085_v49 = vadd.f32 %v7620_v27, %v2073_v60 }
 0x613   :  { %v2093_v52 = vmax.f32 %v2085_v49, 0.0  ;;  %v1378_v54 = vpop.f32.mrf.mxu3  ;;  %v5156_v49 = vld [vmem:[%s9279_s7 + $0x20] sm:$0xff] }
 0x614   :  { %v1394_v4 = vadd.f32 %v1378_v54, %v1167_v25 }
 0x615   :  { %v2100_v22 = vpack.c.bf16 %v2093_v52, %v2092_v63  ;;  %v9454_v52 = vld [vmem:[#allocation20_spill] sm:$0xff] }
 0x617   :  { %2176 = vmatmul.bf16.vlgmr.msrb.gmra.mxu3 %v2100_v22  ;;  %v716_v22 = vadd.f32 %v7599_v36, %v9454_v52  ;;  %v5154_v36 = vld [vmem:[%s9279_s7 + $0x10] sm:$0xff] }
 0x619   :  { %v944_v19 = vadd.f32 %v7610_v47, %v716_v22 }
 0x61a   :  { %v2057_v17 = vpop.f32.mrf.mxu2 }
 0x61c   :  { %v1603_v14 = vpop.f32.mrf.mxu1 }
 0x61d   :  { %v1620_v3 = vadd.f32 %v1603_v14, %v1393_v48 }
 0x622   :  { %v2059_v43 = vpop.f32.mrf.mxu2 }
 0x624   :  { %v1605_v56 = vpop.f32.mrf.mxu1 }
 0x625   :  { %v1621_v8 = vadd.f32 %v1605_v56, %v1394_v4 }
 0x62b   :  { %v1381_v30 = vpop.f32.mrf.mxu3 }
 0x62c   :  { %v1830_v53 = vpop.f32.mrf.mxu0  ;;  %v1395_v51 = vadd.f32 %v1381_v30, %v7557_v2  ;;  %v5159_v2 = vld [vmem:[%s9279_s7 + $0x38] sm:$0xff] }
 0x62d   :  { %v1847_v33 = vadd.f32 %v1830_v53, %v1620_v3  ;;  %2265 = vmatpush.bf16.msra.mxu1 %v5159_v2 }
 0x62f   :  { %v2074_v23 = vadd.f32 %v2057_v17, %v1847_v33  ;;  %v1171_v17 = vadd.f32 %v7608_v55, %v944_v19 }
 0x631   :  { %v2086_v16 = vadd.f32 %v7620_v27, %v2074_v23  ;;  %2266 = vmatpush.bf16.msra.mxu1 %v5158_v59 }
 0x633   :  { %v2094_v29 = vmax.f32 %v2086_v16, 0.0  ;;  %v1383_v18 = vpop.f32.mrf.mxu3 }
 0x634   :  { %v1832_v13 = vpop.f32.mrf.mxu0  ;;  %v1396_v0 = vadd.f32 %v1383_v18, %v1169_v6  ;;  %v9457_v18 = vld [vmem:[#allocation10_spill] sm:$0xff] }
 0x635   :  { %v1848_v34 = vadd.f32 %v1832_v13, %v1621_v8  ;;  %2267 = vmatpush.bf16.msra.mxu1 %v5157_v35  ;;  %v5152_v13 = vld [vmem:[%s9279_s7] sm:$0xff] }
 0x637   :  { %v2075_v21 = vadd.f32 %v2059_v43, %v1848_v34 }
 0x639   :  { %v2087_v58 = vadd.f32 %v7620_v27, %v2075_v21  ;;  %2268 = vmatpush.bf16.msra.mxu1 %v5156_v49 }
 0x63b   :  { %v2095_v57 = vmax.f32 %v2087_v58, 0.0 }
 0x63c   :  { %v1608_v11 = vpop.f32.mrf.mxu1 }
 0x63d   :  { %v2101_v42 = vpack.c.bf16 %v2095_v57, %v2094_v29  ;;  %v1622_v28 = vadd.f32 %v1608_v11, %v1395_v51  ;;  %2269 = vmatpush.bf16.msra.mxu1 %v5155_v1  ;;  %v9455_v51 = vld [vmem:[#allocation8_spill] sm:$0xff] }
 0x63f   :  { %2181 = vmatmul.bf16.gmra.mxu3 %v2101_v42 }
 0x641   :  { %2270 = vmatpush.bf16.msra.mxu1 %v5154_v36 }
 0x644   :  { %v1610_v15 = vpop.f32.mrf.mxu1 }
 0x645   :  { %v1623_v62 = vadd.f32 %v1610_v15, %v1396_v0 }
 0x64a   :  { %v2062_v40 = vpop.f32.mrf.mxu2 }
 0x652   :  { %v2064_v9 = vpop.f32.mrf.mxu2 }
 0x654   :  { %v1835_v50 = vpop.f32.mrf.mxu0 }
 0x655   :  { %v1849_v32 = vadd.f32 %v1835_v50, %v1622_v28  ;;  %v9456_v50 = vld [vmem:[#allocation9_spill] sm:$0xff] }
 0x657   :  { %v2076_v37 = vadd.f32 %v2062_v40, %v1849_v32 }
 0x659   :  { %v2088_v20 = vadd.f32 %v7620_v27, %v2076_v37  ;;  %v9458_v37 = vld [vmem:[#allocation12_spill] sm:$0xff] }
 0x65b   :  { %v2096_v46 = vmax.f32 %v2088_v20, 0.0 }
 0x65c   :  { %v1837_v10 = vpop.f32.mrf.mxu0 }
 0x65d   :  { %v1850_v44 = vadd.f32 %v1837_v10, %v1623_v62 }
 0x65f   :  { %v2077_v38 = vadd.f32 %v2064_v9, %v1850_v44 }
 0x661   :  { %v2089_v31 = vadd.f32 %v7620_v27, %v2077_v38 }
 0x662   :  { %v1386_v60 = vpop.f32.mrf.mxu3 }
 0x663   :  { %v2097_v24 = vmax.f32 %v2089_v31, 0.0  ;;  %v1397_v14 = vadd.f32 %v1386_v60, %v7565_v45  ;;  %v5153_v45 = vld [vmem:[%s9279_s7 + $0x8] sm:$0xff] }
 0x664   :  { %2271 = vmatpush.bf16.msra.mxu1 %v5153_v45 }
 0x665   :  { %v2102_v5 = vpack.c.bf16 %v2097_v24, %v2096_v46 }
 0x667   :  { %2186 = vmatmul.bf16.gmra.mxu3 %v2102_v5 }
 0x668   :  { %2272 = vmatpush.bf16.msra.mxu1 %v5152_v13  ;;  %v9459_v13 = vld [vmem:[#allocation13_spill] sm:$0xff] }
 0x66a   :  { %v2067_v26 = vpop.f32.mrf.mxu2  ;;  %v1388_v48 = vpop.f32.mrf.mxu3 }
 0x66b   :  { %v1398_v54 = vadd.f32 %v1388_v48, %v1171_v17 }
 0x66c   :  { %v1613_v63 = vpop.f32.mrf.mxu1 }
 0x66d   :  { %v1624_v7 = vadd.f32 %v1613_v63, %v1397_v14 }
 0x672   :  { %v2069_v4 = vpop.f32.mrf.mxu2 }
 0x674   :  { %v1840_v39 = vpop.f32.mrf.mxu0  ;;  %v1615_v3 = vpop.f32.mrf.mxu1 }
 0x675   :  { %v1851_v53 = vadd.f32 %v1840_v39, %v1624_v7  ;;  %v1625_v25 = vadd.f32 %v1615_v3, %v1398_v54 }
 0x677   :  { %v2078_v33 = vadd.f32 %v2067_v26, %v1851_v53 }
 0x679   :  { %v2090_v8 = vadd.f32 %v7620_v27, %v2078_v33 }
 0x67b   :  { %v2098_v34 = vmax.f32 %v2090_v8, 0.0 }
 0x67c   :  { %v1842_v56 = vpop.f32.mrf.mxu0 }
 0x67d   :  { %v1852_v47 = vadd.f32 %v1842_v56, %v1625_v25 }
 0x67f   :  { %v2079_v55 = vadd.f32 %v2069_v4, %v1852_v47 }
 0x681   :  { %v2091_v23 = vadd.f32 %v7620_v27, %v2079_v55 }
 0x683   :  { %v2099_v43 = vmax.f32 %v2091_v23, 0.0 }
 0x685   :  { %v2103_v21 = vpack.c.bf16 %v2099_v43, %v2098_v34 }
 0x687   :  { %2191 = vmatmul.bf16.gmra.mxu3 %v2103_v21  ;;  %v9460_v21 = vld [vmem:[#allocation11_spill] sm:$0xff] }
 0x69a   :  { %v7670_v16 = vpop.f32.mrf.mxu3 }
 0x69b   :  { %v2672_v17 = vmul.f32 %v7670_v16, %v9455_v51  ;;  %v2495_v4 = vmul.f32 %v7670_v16, %v9456_v50  ;;  %v2931_v55 = vmul.f32 %v7670_v16, %v9457_v18  ;;  %v3157_v23 = vmul.f32 %v7670_v16, %v9458_v37 }
 0x6a2   :  { %v7672_v58 = vpop.f32.mrf.mxu3 }
 0x6a3   :  { %v2197_v29 = vpack.c.bf16 %v7672_v58, %v7670_v16  ;;  %v2673_v54 = vmul.f32 %v7672_v58, %v9455_v51  ;;  %v2496_v33 = vmul.f32 %v7672_v58, %v9456_v50  ;;  %v2932_v56 = vmul.f32 %v7672_v58, %v9457_v18 }
 0x6a4   :  { %v3158_v8 = vmul.f32 %v7672_v58, %v9458_v37 }
 0x6a5   :  { %2273 = vmatmul.bf16.vlgmr.msra.gmra.mxu1 %v2197_v29  ;;  %v2684_v43 = vpack.c.bf16 %v2673_v54, %v2672_v17  ;;  %v3609_v54 = vmul.f32 %v7670_v16, %v9460_v21 }
 0x6c2   :  { %v7676_v57 = vpop.f32.mrf.mxu3 }
 0x6c3   :  { %v2674_v7 = vmul.f32 %v7676_v57, %v9455_v51  ;;  %v2497_v48 = vmul.f32 %v7676_v57, %v9456_v50  ;;  %v2933_v53 = vmul.f32 %v7676_v57, %v9457_v18  ;;  %v3159_v3 = vmul.f32 %v7676_v57, %v9458_v37 }
 0x6ca   :  { %v7678_v27 = vpop.f32.mrf.mxu3 }
 0x6cb   :  { %v2198_v42 = vpack.c.bf16 %v7678_v27, %v7676_v57  ;;  %v2675_v22 = vmul.f32 %v7678_v27, %v9455_v51  ;;  %v2498_v1 = vmul.f32 %v7678_v27, %v9456_v50  ;;  %v2934_v39 = vmul.f32 %v7678_v27, %v9457_v18 }
 0x6cc   :  { %v3160_v19 = vmul.f32 %v7678_v27, %v9458_v37 }
 0x6cd   :  { %2278 = vmatmul.bf16.gmra.mxu1 %v2198_v42  ;;  %v2685_v36 = vpack.c.bf16 %v2675_v22, %v2674_v7  ;;  %v2508_v25 = vpack.c.bf16 %v2498_v1, %v2497_v48  ;;  %v2944_v45 = vpack.c.bf16 %v2934_v39, %v2933_v53  ;;  %v9461_v42 = vld [vmem:[#allocation14_spill] sm:$0xff]  ;;  %v3611_v1 = vmul.f32 %v7676_v57, %v9460_v21 }
 0x6ce   :  { %v3170_v47 = vpack.c.bf16 %v3160_v19, %v3159_v3  ;;  %v3610_v48 = vmul.f32 %v7672_v58, %v9460_v21  ;;  %v3836_v17 = vmul.f32 %v7672_v58, %v9461_v42  ;;  %v3383_v3 = vmul.f32 %v7670_v16, %v9459_v13 }
 0x6ea   :  { %v7682_v30 = vpop.f32.mrf.mxu3 }
 0x6eb   :  { %v2676_v59 = vmul.f32 %v7682_v30, %v9455_v51  ;;  %v2499_v35 = vmul.f32 %v7682_v30, %v9456_v50  ;;  %v2935_v60 = vmul.f32 %v7682_v30, %v9457_v18  ;;  %v3161_v49 = vmul.f32 %v7682_v30, %v9458_v37 }
 0x6f2   :  { %v7684_v11 = vpop.f32.mrf.mxu3 }
 0x6f3   :  { %v2199_v12 = vpack.c.bf16 %v7684_v11, %v7682_v30  ;;  %v2677_v9 = vmul.f32 %v7684_v11, %v9455_v51  ;;  %v2500_v2 = vmul.f32 %v7684_v11, %v9456_v50  ;;  %v2936_v24 = vmul.f32 %v7684_v11, %v9457_v18 }
 0x6f4   :  { %v3162_v5 = vmul.f32 %v7684_v11, %v9458_v37 }
 0x6f5   :  { %2283 = vmatmul.bf16.gmra.mxu1 %v2199_v12  ;;  %v2686_v63 = vpack.c.bf16 %v2677_v9, %v2676_v59  ;;  %v2509_v52 = vpack.c.bf16 %v2500_v2, %v2499_v35  ;;  %v2945_v14 = vpack.c.bf16 %v2936_v24, %v2935_v60  ;;  %v3386_v59 = vmul.f32 %v7678_v27, %v9459_v13 }
 0x6f6   :  { %v3171_v26 = vpack.c.bf16 %v3162_v5, %v3161_v49  ;;  %v3838_v49 = vmul.f32 %v7678_v27, %v9461_v42 }
 0x70a   :  { %v7688_v61 = vpop.f32.mrf.mxu3 }
 0x70b   :  { %v2678_v40 = vmul.f32 %v7688_v61, %v9455_v51  ;;  %v2501_v28 = vmul.f32 %v7688_v61, %v9456_v50  ;;  %v2937_v6 = vmul.f32 %v7688_v61, %v9457_v18  ;;  %v3163_v10 = vmul.f32 %v7688_v61, %v9458_v37 }
 0x712   :  { %v7690_v41 = vpop.f32.mrf.mxu3 }
 0x713   :  { %v2200_v32 = vpack.c.bf16 %v7690_v41, %v7688_v61  ;;  %v2679_v15 = vmul.f32 %v7690_v41, %v9455_v51  ;;  %v2502_v0 = vmul.f32 %v7690_v41, %v9456_v50  ;;  %v2938_v62 = vmul.f32 %v7690_v41, %v9457_v18 }
 0x714   :  { %v3164_v44 = vmul.f32 %v7690_v41, %v9458_v37  ;;  %v3390_v34 = vmul.f32 %v7690_v41, %v9459_v13  ;;  %v3616_v29 = vmul.f32 %v7690_v41, %v9460_v21  ;;  %v3842_v12 = vmul.f32 %v7690_v41, %v9461_v42 }
 0x715   :  { %2288 = vmatmul.bf16.gmra.mxu1 %v2200_v32  ;;  %v2687_v38 = vpack.c.bf16 %v2679_v15, %v2678_v40  ;;  %v2510_v20 = vpack.c.bf16 %v2502_v0, %v2501_v28  ;;  %v2946_v31 = vpack.c.bf16 %v2938_v62, %v2937_v6  ;;  %v2507_v51 = vpack.c.bf16 %v2496_v33, %v2495_v4  ;;  %v9462_v28 = vld [vmem:[#allocation29_spill] sm:$0xff] }
 0x716   :  { %v3172_v46 = vpack.c.bf16 %v3164_v44, %v3163_v10  ;;  %v2943_v40 = vpack.c.bf16 %v2932_v56, %v2931_v55  ;;  %v3389_v50 = vmul.f32 %v7688_v61, %v9459_v13  ;;  %v4068_v18 = vmul.f32 %v7690_v41, %v9462_v28 }
 0x717   :  { %2704 = vmatpush.bf16.msrb.mxu0 %v2687_v38  ;;  %2745 = vmatpush.bf16.msra.mxu2 %v2510_v20  ;;  %v3169_v32 = vpack.c.bf16 %v3158_v8, %v3157_v23  ;;  %v3615_v15 = vmul.f32 %v7688_v61, %v9460_v21  ;;  %v3841_v0 = vmul.f32 %v7688_v61, %v9461_v42  ;;  %v9464_v4 = vmov 8  }
 0x718   :  { %2963 = vmatpush.bf16.msra.mxu3 %v2946_v31  ;;  %3189 = vmatpush.bf16.msrb.mxu1 %v3172_v46  ;;  %v3388_v62 = vmul.f32 %v7684_v11, %v9459_v13  ;;  %v3398_v37 = vpack.c.bf16 %v3390_v34, %v3389_v50  ;;  %v4067_v10 = vmul.f32 %v7688_v61, %v9462_v28  ;;  %v9465_v55 = vmov 11  }
 0x719   :  { %v3614_v41 = vmul.f32 %v7684_v11, %v9460_v21  ;;  %v3624_v44 = vpack.c.bf16 %v3616_v29, %v3615_v15  ;;  %v3850_v9 = vpack.c.bf16 %v3842_v12, %v3841_v0  ;;  %v3840_v38 = vmul.f32 %v7684_v11, %v9461_v42  ;;  %v7880_v0 = vld [vmem:[%s9273_s1] sm:$0xff] }
 0x71a   :  { %v4076_v20 = vpack.c.bf16 %v4068_v18, %v4067_v10  ;;  %v3387_v31 = vmul.f32 %v7682_v30, %v9459_v13  ;;  %v4066_v2 = vmul.f32 %v7684_v11, %v9462_v28  ;;  %v3613_v61 = vmul.f32 %v7682_v30, %v9460_v21  ;;  %v7888_v10 = vld [vmem:[%s9273_s1 + $0x8] sm:$0xff] }
 0x71b   :  { %2705 = vmatpush.bf16.msrb.mxu0 %v2686_v63  ;;  %2746 = vmatpush.bf16.msra.mxu2 %v2509_v52  ;;  %v3839_v46 = vmul.f32 %v7682_v30, %v9461_v42  ;;  %v4065_v5 = vmul.f32 %v7682_v30, %v9462_v28  ;;  %v3612_v11 = vmul.f32 %v7678_v27, %v9460_v21 }
 0x71c   :  { %2964 = vmatpush.bf16.msra.mxu3 %v2945_v14  ;;  %3190 = vmatpush.bf16.msrb.mxu1 %v3171_v26  ;;  %v3397_v24 = vpack.c.bf16 %v3388_v62, %v3387_v31  ;;  %v3623_v35 = vpack.c.bf16 %v3614_v41, %v3613_v61  ;;  %v3385_v52 = vmul.f32 %v7676_v57, %v9459_v13 }
 0x71d   :  { %v3849_v60 = vpack.c.bf16 %v3840_v38, %v3839_v46  ;;  %v4075_v63 = vpack.c.bf16 %v4066_v2, %v4065_v5  ;;  %v4064_v22 = vmul.f32 %v7678_v27, %v9462_v28  ;;  %v3837_v14 = vmul.f32 %v7676_v57, %v9461_v42 }
 0x71e   :  { %v3396_v26 = vpack.c.bf16 %v3386_v59, %v3385_v52  ;;  %v4063_v39 = vmul.f32 %v7676_v57, %v9462_v28  ;;  %v3384_v27 = vmul.f32 %v7672_v58, %v9459_v13  ;;  %v3622_v19 = vpack.c.bf16 %v3612_v11, %v3611_v1 }
 0x71f   :  { %2706 = vmatpush.bf16.msrb.mxu0 %v2685_v36  ;;  %2747 = vmatpush.bf16.msra.mxu2 %v2508_v25  ;;  %v3848_v7 = vpack.c.bf16 %v3838_v49, %v3837_v14  ;;  %v4062_v57 = vmul.f32 %v7672_v58, %v9462_v28  ;;  %v3835_v36 = vmul.f32 %v7670_v16, %v9461_v42  ;;  %v9463_v58 = vmov 10  }
 0x720   :  { %2965 = vmatpush.bf16.msra.mxu3 %v2944_v45  ;;  %3191 = vmatpush.bf16.msrb.mxu1 %v3170_v47  ;;  %v4074_v53 = vpack.c.bf16 %v4064_v22, %v4063_v39  ;;  %v3395_v25 = vpack.c.bf16 %v3384_v27, %v3383_v3  ;;  %v4061_v33 = vmul.f32 %v7670_v16, %v9462_v28  ;;  %v9466_v38 = vmov 9  }
 0x721   :  { %v3621_v56 = vpack.c.bf16 %v3610_v48, %v3609_v54  ;;  %v3847_v45 = vpack.c.bf16 %v3836_v17, %v3835_v36 }
 0x722   :  { %v7768_v6 = vpop.f32.mrf.mxu1  ;;  %v4073_v47 = vpack.c.bf16 %v4062_v57, %v4061_v33 }
 0x723   :  { %2294 = vxpose.xlu2.b32.start [1/8] (short) (narrow) %v7768_v6, 8  ;;  %2707 = vmatpush.bf16.msrb.mxu0 %v2684_v43 }
 0x724   :  { %2748 = vmatpush.bf16.msra.mxu2 %v2507_v51  ;;  %2966 = vmatpush.bf16.msra.mxu3 %v2943_v40 }
 0x725   :  { %3192 = vmatpush.bf16.msrb.mxu1 %v3169_v32 }
 0x727   :  { %3415 = vmatpush.bf16.msra.mxu0 %v3398_v37 }
 0x728   :  { %3641 = vmatpush.bf16.msrb.mxu2 %v3624_v44  ;;  %3867 = vmatpush.bf16.msrb.mxu3 %v3850_v9 }
 0x729   :  { %4093 = vmatpush.bf16.msra.mxu1 %v4076_v20  ;;  %v9467_v20 = vmov 13  }
 0x72a   :  { %v7803_v30 = vpop.f32.mrf.mxu1 }
 0x72b   :  { %3416 = vmatpush.bf16.msra.mxu0 %v3397_v24  ;;  %2295 = vxpose.xlu2.b32.cont [2/8] (short) (narrow) %v7803_v30, 8 }
 0x72c   :  { %3642 = vmatpush.bf16.msrb.mxu2 %v3623_v35  ;;  %3868 = vmatpush.bf16.msrb.mxu3 %v3849_v60 }
 0x72d   :  { %4094 = vmatpush.bf16.msra.mxu1 %v4075_v63  ;;  %2333 = vperm.xlu1 %5254, %v7803_v30  }
 0x72f   :  { %3417 = vmatpush.bf16.msra.mxu0 %v3396_v26 }
 0x730   :  { %3643 = vmatpush.bf16.msrb.mxu2 %v3622_v19  ;;  %3869 = vmatpush.bf16.msrb.mxu3 %v3848_v7 }
 0x731   :  { %4095 = vmatpush.bf16.msra.mxu1 %v4074_v53 }
 0x733   :  { %3418 = vmatpush.bf16.msra.mxu0 %v3395_v25 }
 0x734   :  { %3644 = vmatpush.bf16.msrb.mxu2 %v3621_v56  ;;  %3870 = vmatpush.bf16.msrb.mxu3 %v3847_v45 }
 0x735   :  { %4096 = vmatpush.bf16.msra.mxu1 %v4073_v47  ;;  %5255 = vset.pattern.permute.xlu1 %v9463_v58 }
 0x736   :  { %2775 = vperm.xlu1 %5255, %v7803_v30  }
 0x73e   :  { %5256 = vset.pattern.permute.xlu1 %v9464_v4 }
 0x74a   :  { %v7832_v8 = vpop.f32.mrf.mxu1 }
 0x74b   :  { %2296 = vxpose.xlu2.b32.cont [3/8] (short) (narrow) %v7832_v8, 8  ;;  %2520 = vperm.xlu0 %5257, %v7832_v8  }
 0x74c   :  { %2338 = vperm.xlu1 %5256, %v7832_v8  }
 0x752   :  { %v7837_v16 = vpop.f32.mrf.mxu1 }
 0x753   :  { %2297 = vxpose.xlu2.b32.cont [4/8] (short) (narrow) %v7837_v16, 8 }
 0x754   :  { %5263 = vset.pattern.permute.xlu1 %v9465_v55 }
 0x755   :  { %3005 = vperm.xlu1 %5263, %v7832_v8  }
 0x75d   :  { %5264 = vset.pattern.permute.xlu1 %v9464_v4 }
 0x772   :  { %v7843_v23 = vpop.f32.mrf.mxu1 }
 0x773   :  { %2348 = vperm.xlu1 %5264, %v7843_v23   ;;  %2298 = vxpose.xlu2.b32.cont [5/8] (short) (narrow) %v7843_v23, 8 }
 0x77a   :  { %v7847_v13 = vpop.f32.mrf.mxu1 }
 0x77b   :  { %2532 = vperm.xlu0 %5257, %v7847_v13   ;;  %2353 = vperm.xlu1 %5264, %v7847_v13  }
 0x77c   :  { %2299 = vxpose.xlu2.b32.cont [6/8] (short) (narrow) %v7847_v13, 8 }
 0x783   :  { %5265 = vset.pattern.permute.xlu0 %v9464_v4  ;;  %5266 = vset.pattern.permute.xlu1 %v9465_v55 }
 0x784   :  { %2328 = vperm.xlu0 %5265, %v7768_v6   ;;  %3013 = vperm.xlu1 %5266, %v7843_v23  }
 0x78c   :  { %3017 = vperm.xlu1 %5266, %v7847_v13  }
 0x792   :  { %v7857_v34 = vpop.f32.mrf.mxu1 }
 0x793   :  { %2300 = vxpose.xlu2.b32.cont [7/8] (short) (narrow) %v7857_v34, 8 }
 0x794   :  { %5269 = vset.pattern.permute.xlu1 %v9463_v58 }
 0x79a   :  { %v7861_v43 = vpop.f32.mrf.mxu1 }
 0x79b   :  { %2301 = vxpose.xlu2.b32.end [8/8] (short) (narrow) %v7861_v43, 8 }
 0x79f   :  { %v2334_v51 = vpop.permute.xlu1 %2333 }
 0x7a8   :  { %v2776_v2 = vpop.permute.xlu1 %2775 }
 0x7bd   :  { %v7864_v21 = vpop.permute.xlu0 %2520 }
 0x7be   :  { %v2339_v7 = vpop.permute.xlu1 %2338 }
 0x7c7   :  { %v7944_v48 = vpop.permute.xlu1 %3005 }
 0x7e5   :  { %v7947_v17 = vpop.permute.xlu1 %2348 }
 0x7ed   :  { %v7866_v29 = vpop.permute.xlu0 %2532  ;;  %v7950_v53 = vpop.permute.xlu1 %2353 }
 0x7f6   :  { %v2329_v40 = vpop.permute.xlu0 %2328  ;;  %v7955_v3 = vpop.permute.xlu1 %3013 }
 0x7fc   :  { %v7868_v42 = vpop.trf.xlu2 }
 0x7fd   :  { %v7871_v12 = vperm.slane %v7868_v42, 0  ;;  %5258 = vset.pattern.permute.xlu2 %v9463_v58  ;;  %v7916_v31 = vperm.slane %v7868_v42, 2  ;;  %v7935_v1 = vperm.slane %v7868_v42, 1 }
 0x7fe   :  { %v7958_v57 = vpop.permute.xlu1 %3017 }
 0x7ff   :  { %v2367_v50 = vadd.f32 %v7871_v12, %v2329_v40  ;;  %v2368_v28 = vadd.f32 %v7871_v12, %v2334_v51  ;;  %v2804_v24 = vadd.f32 %v7916_v31, %v2776_v2  ;;  %v2369_v33 = vadd.f32 %v7871_v12, %v2339_v7  ;;  %v7971_v51 = vld [vmem:[%s9273_s1 + $0x10] sm:$0xff] }
 0x801   :  { %vm2375_vm6 = vcmp.gt.f32.partialorder %v2367_v50, 0.0  ;;  %v2383_v18 = vmul.f32 0.2, %v2367_v50  ;;  %vm2376_vm7 = vcmp.gt.f32.partialorder %v2368_v28, 0.0  ;;  %v2384_v32 = vmul.f32 0.2, %v2368_v28 }
 0x802   :  { %v2820_v35 = vmul.f32 0.2, %v2804_v24  ;;  %vm2812_vm9 = vcmp.gt.f32.partialorder %v2804_v24, 0.0  ;;  %v2385_v45 = vmul.f32 0.2, %v2369_v33  ;;  %vm2377_vm11 = vcmp.gt.f32.partialorder %v2369_v33, 0.0 }
 0x803   :  { %v2391_v15 = vsel %vm2375_vm6, %v2367_v50, %v2383_v18  ;;  %v2392_v37 = vsel %vm2376_vm7, %v2368_v28, %v2384_v32  ;;  %v2546_v32 = vadd.f32 %v7935_v1, %v7864_v21 }
 0x804   :  { %2771 = vperm.xlu2 %5258, %v7768_v6   ;;  %v7883_v62 = vadd.f32 %v7880_v0, %v2391_v15  ;;  %v7891_v41 = vadd.f32 %v7888_v10, %v2392_v37  ;;  %v2828_v49 = vsel %vm2812_vm9, %v2804_v24, %v2820_v35  ;;  %v7985_v37 = vld [vmem:[%s9273_s1 + $0x18] sm:$0xff] }
 0x805   :  { %v7926_v63 = vadd.f32 %v7888_v10, %v2828_v49  ;;  %vm2554_vm13 = vcmp.gt.f32.partialorder %v2546_v32, 0.0 }
 0x806   :  { %v2407_v44 = vsel %vm352_vm3, %v7883_v62, -inf  ;;  %v2410_v9 = vsel %vm352_vm3, %v7891_v41, -inf }
 0x807   :  { %2408 = vmax.xlane.f32.xlu0 %v2407_v44  ;;  %2411 = vmax.xlane.f32.xlu1 %v2410_v9  ;;  %v2846_v52 = vsel %vm352_vm3, %v7926_v63, -inf  ;;  %v2562_v9 = vmul.f32 0.2, %v2546_v32 }
 0x809   :  { %v2570_v2 = vsel %vm2554_vm13, %v2546_v32, %v2562_v9 }
 0x80c   :  { %5259 = vset.pattern.permute.xlu2 %v9466_v38 }
 0x80d   :  { %2512 = vperm.xlu2 %5259, %v7768_v6  }
 0x815   :  { %5260 = vset.pattern.permute.xlu2 %v9465_v55 }
 0x816   :  { %2997 = vperm.xlu2 %5260, %v7768_v6  }
 0x81b   :  { %2363 = vperm.xlu0 %5265, %v7861_v43  }
 0x81e   :  { %5261 = vset.pattern.permute.xlu2 %v9464_v4 }
 0x81f   :  { %2343 = vperm.xlu2 %5261, %v7837_v16  }
 0x823   :  { %5268 = vset.pattern.permute.xlu0 %v9463_v58 }
 0x824   :  { %2787 = vperm.xlu0 %5268, %v7843_v23  }
 0x827   :  { %5262 = vset.pattern.permute.xlu2 %v9463_v58 }
 0x828   :  { %2783 = vperm.xlu2 %5262, %v7837_v16  }
 0x82c   :  { %2799 = vperm.xlu0 %5268, %v7861_v43  }
 0x830   :  { %5267 = vset.pattern.permute.xlu2 %v9464_v4  ;;  %v2393_v4 = vsel %vm2377_vm11, %v2369_v33, %v2385_v45  ;;  %v9468_v33 = vmov 14  }
 0x831   :  { %2358 = vperm.xlu2 %5267, %v7857_v34   ;;  %v7974_v40 = vadd.f32 %v7971_v51, %v2393_v4 }
 0x833   :  { %v2413_v28 = vsel %vm352_vm3, %v7974_v40, -inf }
 0x834   :  { %5272 = vset.pattern.permute.xlu0 %v9465_v55 }
 0x839   :  { %5271 = vset.pattern.permute.xlu2 %v9466_v38 }
 0x83a   :  { %2540 = vperm.xlu2 %5271, %v7861_v43  }
 0x842   :  { %5274 = vset.pattern.permute.xlu2 %v9467_v20 }
 0x85e   :  { %v2772_v61 = vpop.permute.xlu2 %2771 }
 0x85f   :  { %v2803_v46 = vadd.f32 %v7916_v31, %v2772_v61  ;;  %v7993_v61 = vadd.f32 %v7971_v51, %v2570_v2 }
 0x861   :  { %vm2811_vm8 = vcmp.gt.f32.partialorder %v2803_v46, 0.0  ;;  %v2819_v5 = vmul.f32 0.2, %v2803_v46 }
 0x863   :  { %v2827_v59 = vsel %vm2811_vm8, %v2803_v46, %v2819_v5  ;;  %v2590_v46 = vsel %vm352_vm3, %v7993_v61, -inf }
 0x864   :  { %v7921_v60 = vadd.f32 %v7880_v0, %v2827_v59  ;;  %v8002_v59 = vperm.slane %v7868_v42, 3 }
 0x866   :  { %v2843_v11 = vsel %vm352_vm3, %v7921_v60, -inf }
 0x867   :  { %2844 = vmax.xlane.f32.xlu1 %v2843_v11  ;;  %v2513_v22 = vpop.permute.xlu2 %2512 }
 0x868   :  { %v2544_v14 = vadd.f32 %v7935_v1, %v2513_v22 }
 0x86a   :  { %v2560_v26 = vmul.f32 0.2, %v2544_v14  ;;  %vm2552_vm10 = vcmp.gt.f32.partialorder %v2544_v14, 0.0 }
 0x86c   :  { %v2568_v39 = vsel %vm2552_vm10, %v2544_v14, %v2560_v26 }
 0x86d   :  { %v7939_v27 = vadd.f32 %v7880_v0, %v2568_v39 }
 0x86f   :  { %2847 = vmax.xlane.f32.xlu1 %v2846_v52  ;;  %v2584_v19 = vsel %vm352_vm3, %v7939_v27, -inf }
 0x870   :  { %v2998_v54 = vpop.permute.xlu2 %2997 }
 0x871   :  { %v3029_v11 = vadd.f32 %v8002_v59, %v2998_v54 }
 0x873   :  { %v3045_v22 = vmul.f32 0.2, %v3029_v11  ;;  %vm3037_vm15 = vcmp.gt.f32.partialorder %v3029_v11, 0.0 }
 0x879   :  { %v2344_v25 = vpop.permute.xlu2 %2343 }
 0x87a   :  { %v7960_v36 = vpop.xlane.xlu1 %2411  ;;  %v8020_v45 = vpop.xlane.xlu0 %2408 }
 0x882   :  { %v2784_v47 = vpop.permute.xlu2 %2783 }
 0x883   :  { %v2806_v58 = vadd.f32 %v7916_v31, %v2784_v47  ;;  %v2370_v47 = vadd.f32 %v7871_v12, %v2344_v25 }
 0x885   :  { %v2822_v50 = vmul.f32 0.2, %v2806_v58  ;;  %vm2814_vm12 = vcmp.gt.f32.partialorder %v2806_v58, 0.0  ;;  %v2386_v4 = vmul.f32 0.2, %v2370_v47  ;;  %vm2378_vm0 = vcmp.gt.f32.partialorder %v2370_v47, 0.0 }
 0x887   :  { %v2830_v18 = vsel %vm2814_vm12, %v2806_v58, %v2822_v50 }
 0x888   :  { %2779 = vperm.xlu1 %5269, %v7832_v8   ;;  %v7988_v44 = vadd.f32 %v7985_v37, %v2830_v18  ;;  %v2394_v18 = vsel %vm2378_vm0, %v2370_v47, %v2386_v4 }
 0x889   :  { %v8027_v32 = vadd.f32 %v7985_v37, %v2394_v18 }
 0x88b   :  { %v2416_v2 = vsel %vm352_vm3, %v8027_v32, -inf }
 0x88d   :  { %v8023_v58 = vpop.permute.xlu0 %2363 }
 0x890   :  { %2791 = vperm.xlu1 %5269, %v7847_v13  }
 0x898   :  { %2795 = vperm.xlu1 %5269, %v7857_v34  }
 0x8a0   :  { %5270 = vset.pattern.permute.xlu1 %v9466_v38  ;;  %v2852_v38 = vsel %vm352_vm3, %v7988_v44, -inf }
 0x8c2   :  { %2585 = vmax.xlane.f32.xlu1 %v2584_v19  ;;  %v3053_v19 = vsel %vm3037_vm15, %v3029_v11, %v3045_v22 }
 0x8c3   :  { %v8012_v7 = vadd.f32 %v7880_v0, %v3053_v19 }
 0x8c5   :  { %v3069_v54 = vsel %vm352_vm3, %v8012_v7, -inf }
 0x8da   :  { %v7963_v56 = vpop.xlane.xlu1 %2844 }
 0x8db   :  { %2516 = vperm.xlu1 %5270, %v7803_v30  }
 0x8e3   :  { %2524 = vperm.xlu1 %5270, %v7837_v16  }
 0x8eb   :  { %2528 = vperm.xlu1 %5270, %v7843_v23  }
 0x8f3   :  { %2536 = vperm.xlu1 %5270, %v7857_v34  }
 0x8fb   :  { %5273 = vset.pattern.permute.xlu1 %v9465_v55  ;;  %v7966_v55 = vpop.xlane.xlu1 %2847 }
 0x8fc   :  { %3025 = vperm.xlu1 %5273, %v7861_v43  }
 0x903   :  { %v7980_v15 = vpop.permute.xlu1 %2779 }
 0x904   :  { %5275 = vset.pattern.permute.xlu1 %v9467_v20 }
 0x90b   :  { %v7995_v21 = vpop.permute.xlu1 %2791 }
 0x913   :  { %v2796_v24 = vpop.permute.xlu1 %2795 }
 0x914   :  { %v2809_v4 = vadd.f32 %v7916_v31, %v2796_v24 }
 0x916   :  { %vm2817_vm5 = vcmp.gt.f32.partialorder %v2809_v4, 0.0 }
 0x926   :  { %2414 = vmax.xlane.f32.xlu1 %v2413_v28 }
 0x92e   :  { %2853 = vmax.xlane.f32.xlu1 %v2852_v38  ;;  %v2788_v38 = vpop.permute.xlu0 %2787 }
 0x935   :  { %v7999_v5 = vpop.xlane.xlu1 %2585 }
 0x936   :  { %2591 = vmax.xlane.f32.xlu1 %v2590_v46  ;;  %v2807_v46 = vadd.f32 %v7916_v31, %v2788_v38  ;;  %v8062_v24 = vpop.permute.xlu0 %2799 }
 0x938   :  { %v2823_v11 = vmul.f32 0.2, %v2807_v46  ;;  %vm2815_vm2 = vcmp.gt.f32.partialorder %v2807_v46, 0.0 }
 0x94d   :  { %v2517_v35 = vpop.permute.xlu1 %2516 }
 0x94e   :  { %v2545_v49 = vadd.f32 %v7935_v1, %v2517_v35 }
 0x950   :  { %vm2553_vm14 = vcmp.gt.f32.partialorder %v2545_v49, 0.0  ;;  %v2561_v52 = vmul.f32 0.2, %v2545_v49 }
 0x952   :  { %v2569_v14 = vsel %vm2553_vm14, %v2545_v49, %v2561_v52  ;;  %v2359_v49 = vpop.permute.xlu2 %2358 }
 0x953   :  { %v8007_v26 = vadd.f32 %v7888_v10, %v2569_v14  ;;  %v2373_v22 = vadd.f32 %v7871_v12, %v2359_v49  ;;  %v2831_v14 = vsel %vm2815_vm2, %v2807_v46, %v2823_v11 }
 0x955   :  { %v2587_v39 = vsel %vm352_vm3, %v8007_v26, -inf  ;;  %v2525_v50 = vpop.permute.xlu1 %2524  ;;  %vm2381_vm4 = vcmp.gt.f32.partialorder %v2373_v22, 0.0 }
 0x956   :  { %2588 = vmax.xlane.f32.xlu0 %v2587_v39  ;;  %v2547_v28 = vadd.f32 %v7935_v1, %v2525_v50  ;;  %v8041_v39 = vld [vmem:[%s9273_s1 + $0x20] sm:$0xff] }
 0x957   :  { %v8044_v19 = vadd.f32 %v8041_v39, %v2831_v14 }
 0x958   :  { %v2563_v9 = vmul.f32 0.2, %v2547_v28  ;;  %vm2555_vm1 = vcmp.gt.f32.partialorder %v2547_v28, 0.0 }
 0x959   :  { %9469 = vst [vmem:[#allocation22_spill] sm:$0xff] %v8044_v19  ;;  %v2855_v47 = vsel %vm352_vm3, %v8044_v19, -inf }
 0x95a   :  { %v2571_v25 = vsel %vm2555_vm1, %v2547_v28, %v2563_v9  ;;  %v8052_v28 = vld [vmem:[%s9273_s1 + $0x30] sm:$0xff]  ;;  %v2825_v9 = vmul.f32 0.2, %v2809_v4 }
 0x95b   :  { %v8033_v35 = vadd.f32 %v7985_v37, %v2571_v25 }
 0x95d   :  { %v2593_v52 = vsel %vm352_vm3, %v8033_v35, -inf }
 0x95e   :  { %3070 = vmax.xlane.f32.xlu0 %v3069_v54  ;;  %v2389_v54 = vmul.f32 0.2, %v2373_v22 }
 0x960   :  { %v2397_v50 = vsel %vm2381_vm4, %v2373_v22, %v2389_v54 }
 0x961   :  { %v8055_v18 = vadd.f32 %v8052_v28, %v2397_v50 }
 0x963   :  { %9470 = vst [vmem:[#allocation24_spill] sm:$0xff] %v8055_v18  ;;  %v2425_v38 = vsel %vm352_vm3, %v8055_v18, -inf }
 0x972   :  { %3001 = vperm.xlu0 %5272, %v7803_v30  }
 0x97a   :  { %3009 = vperm.xlu0 %5272, %v7837_v16  }
 0x982   :  { %3021 = vperm.xlu0 %5272, %v7857_v34  }
 0x98a   :  { %5277 = vset.pattern.permute.xlu0 %v9468_v33 }
 0x9ac   :  { %2417 = vmax.xlane.f32.xlu0 %v2416_v2  ;;  %v2833_v2 = vsel %vm2817_vm5, %v2809_v4, %v2825_v9 }
 0x9ad   :  { %v8060_v46 = vadd.f32 %v8052_v28, %v2833_v2 }
 0x9af   :  { %9471 = vst [vmem:[#allocation15_spill] sm:$0xff] %v8060_v46  ;;  %v2861_v25 = vsel %vm352_vm3, %v8060_v46, -inf }
 0x9b4   :  { %2594 = vmax.xlane.f32.xlu0 %v2593_v52 }
 0x9bc   :  { %2856 = vmax.xlane.f32.xlu0 %v2855_v47 }
 0x9c4   :  { %2426 = vmax.xlane.f32.xlu0 %v2425_v38  ;;  %v2371_v38 = vadd.f32 %v7871_v12, %v7947_v17 }
 0x9c6   :  { %vm2379_vm8 = vcmp.gt.f32.partialorder %v2371_v38, 0.0 }
 0x9c9   :  { %v8066_v11 = vpop.xlane.xlu0 %2588 }
 0x9cc   :  { %2862 = vmax.xlane.f32.xlu0 %v2861_v25 }
 0x9d1   :  { %v8068_v49 = vpop.xlane.xlu0 %3070 }
 0x9e0   :  { %3675 = vperm.xlu0 %5277, %v7768_v6  }
 0x9e4   :  { %v3002_v52 = vpop.permute.xlu0 %3001 }
 0x9e5   :  { %v3030_v22 = vadd.f32 %v8002_v59, %v3002_v52  ;;  %v2387_v52 = vmul.f32 0.2, %v2371_v38 }
 0x9e7   :  { %vm3038_vm6 = vcmp.gt.f32.partialorder %v3030_v22, 0.0  ;;  %v3046_v14 = vmul.f32 0.2, %v3030_v22 }
 0x9e8   :  { %3687 = vperm.xlu0 %5277, %v7837_v16  }
 0x9e9   :  { %v3054_v54 = vsel %vm3038_vm6, %v3030_v22, %v3046_v14 }
 0x9ea   :  { %v8074_v47 = vadd.f32 %v7888_v10, %v3054_v54  ;;  %v2808_v54 = vadd.f32 %v7916_v31, %v7995_v21  ;;  %v8102_v21 = vld [vmem:[%s9273_s1 + $0x28] sm:$0xff] }
 0x9ec   :  { %v3010_v4 = vpop.permute.xlu0 %3009  ;;  %v3072_v50 = vsel %vm352_vm3, %v8074_v47, -inf  ;;  %v2824_v18 = vmul.f32 0.2, %v2808_v54  ;;  %vm2816_vm9 = vcmp.gt.f32.partialorder %v2808_v54, 0.0 }
 0x9ed   :  { %v3032_v9 = vadd.f32 %v8002_v59, %v3010_v4  ;;  %3073 = vmax.xlane.f32.xlu2 %v3072_v50  ;;  %v2395_v4 = vsel %vm2379_vm8, %v2371_v38, %v2387_v52  ;;  %v9472_v50 = vmov 15  }
 0x9ee   :  { %v8090_v17 = vadd.f32 %v8041_v39, %v2395_v4 }
 0x9ef   :  { %vm3040_vm7 = vcmp.gt.f32.partialorder %v3032_v9, 0.0  ;;  %v3048_v2 = vmul.f32 0.2, %v3032_v9 }
 0x9f0   :  { %3695 = vperm.xlu0 %5277, %v7847_v13  }
 0x9f1   :  { %v3056_v25 = vsel %vm3040_vm7, %v3032_v9, %v3048_v2  ;;  %v8095_v9 = vpop.permute.xlu1 %2528  ;;  %v2832_v2 = vsel %vm2816_vm9, %v2808_v54, %v2824_v18 }
 0x9f2   :  { %v8083_v22 = vadd.f32 %v7985_v37, %v3056_v25  ;;  %v2419_v37 = vsel %vm352_vm3, %v8090_v17, -inf  ;;  %v2549_v25 = vadd.f32 %v7935_v1, %v7866_v29  ;;  %v8105_v38 = vadd.f32 %v8102_v21, %v2832_v2 }
 0x9f3   :  { %v3033_v29 = vadd.f32 %v8002_v59, %v7955_v3  ;;  %v2868_v3 = vsub.f32 %v7926_v63, %v7966_v55 }
 0x9f4   :  { %v3078_v14 = vsel %vm352_vm3, %v8083_v22, -inf  ;;  %v2565_v52 = vmul.f32 0.2, %v2549_v25  ;;  %vm2557_vm10 = vcmp.gt.f32.partialorder %v2549_v25, 0.0 }
 0x9f5   :  { %3079 = vmax.xlane.f32.xlu1 %v3078_v14  ;;  %v2858_v14 = vsel %vm352_vm3, %v8105_v38, -inf  ;;  %vm3041_vm11 = vcmp.gt.f32.partialorder %v3033_v29, 0.0 }
 0x9f6   :  { %v2573_v18 = vsel %vm2557_vm10, %v2549_v25, %v2565_v52 }
 0x9f7   :  { %v8113_v4 = vadd.f32 %v8102_v21, %v2573_v18  ;;  %v2877_v18 = vmul.f32 1.442695, %v2868_v3 }
 0x9f8   :  { %5279 = vset.pattern.permute.xlu0 %v9472_v50 }
 0x9f9   :  { %v2537_v54 = vpop.permute.xlu1 %2536  ;;  %9473 = vst [vmem:[#allocation18_spill] sm:$0xff] %v8113_v4  ;;  %v2599_v19 = vsel %vm352_vm3, %v8113_v4, -inf  ;;  %5551 = vpow2.f32 %v2877_v18  ;;  %v3031_v18 = vadd.f32 %v8002_v59, %v7944_v48 }
 0x9fa   :  { %v2550_v2 = vadd.f32 %v7935_v1, %v2537_v54 }
 0x9fb   :  { %vm3039_vm15 = vcmp.gt.f32.partialorder %v3031_v18, 0.0 }
 0x9fc   :  { %vm2558_vm12 = vcmp.gt.f32.partialorder %v2550_v2, 0.0 }
 0x9fd   :  { %2420 = vmax.xlane.f32.xlu1 %v2419_v37  ;;  %v3049_v37 = vmul.f32 0.2, %v3033_v29 }
 0x9ff   :  { %v3057_v46 = vsel %vm3041_vm11, %v3033_v29, %v3049_v37  ;;  %v8133_v55 = vpop.eup %5551  ;;  %v3022_v37 = vpop.permute.xlu0 %3021 }
 0xa00   :  { %v8122_v25 = vadd.f32 %v8041_v39, %v3057_v46  ;;  %v2805_v46 = vadd.f32 %v7916_v31, %v7980_v15  ;;  %v3035_v3 = vadd.f32 %v8002_v59, %v3022_v37  ;;  %v3047_v37 = vmul.f32 0.2, %v3031_v18 }
 0xa02   :  { %9474 = vst [vmem:[#allocation19_spill] sm:$0xff] %v8122_v25  ;;  %v3081_v54 = vsel %vm352_vm3, %v8122_v25, -inf  ;;  %vm2813_vm13 = vcmp.gt.f32.partialorder %v2805_v46, 0.0  ;;  %vm3043_vm14 = vcmp.gt.f32.partialorder %v3035_v3, 0.0 }
 0xa05   :  { %3449 = vperm.xlu2 %5274, %v7768_v6   ;;  %2859 = vmax.xlane.f32.xlu1 %v2858_v14  ;;  %v2566_v14 = vmul.f32 0.2, %v2550_v2 }
 0xa07   :  { %v2574_v52 = vsel %vm2558_vm12, %v2550_v2, %v2566_v14  ;;  %v2894_v2 = vsel %vm352_vm3, %v8133_v55, 0.0  ;;  %v2821_v14 = vmul.f32 0.2, %v2805_v46 }
 0xa08   :  { %v8127_v4 = vadd.f32 %v8052_v28, %v2574_v52 }
 0xa09   :  { %v2829_v52 = vsel %vm2813_vm13, %v2805_v46, %v2821_v14  ;;  %v3055_v14 = vsel %vm3039_vm15, %v3031_v18, %v3047_v37  ;;  %v8168_v18 = vld [vmem:[%s9273_s1 + $0x38] sm:$0xff] }
 0xa0a   :  { %9475 = vst [vmem:[#allocation23_spill] sm:$0xff] %v8127_v4  ;;  %v2602_v29 = vsel %vm352_vm3, %v8127_v4, -inf }
 0xa0b   :  { %9477 = vst [vmem:[#allocation32_spill] sm:$0xff] %v8168_v18 }
 0xa0d   :  { %2600 = vmax.xlane.f32.xlu1 %v2599_v19  ;;  %5276 = vset.pattern.permute.xlu2 %v9468_v33  ;;  %v2609_v19 = vsub.f32 %v8007_v26, %v8066_v11  ;;  %v3051_v11 = vmul.f32 0.2, %v3035_v3 }
 0xa0f   :  { %v2618_v63 = vmul.f32 1.442695, %v2609_v19  ;;  %v8147_v19 = vadd.f32 %v7971_v51, %v2829_v52  ;;  %v2372_v52 = vadd.f32 %v7871_v12, %v7950_v53 }
 0xa11   :  { %5553 = vpow2.f32 %v2618_v63  ;;  %v3059_v63 = vsel %vm3043_vm14, %v3035_v3, %v3051_v11  ;;  %v2849_v46 = vsel %vm352_vm3, %v8147_v19, -inf  ;;  %v8161_v11 = vadd.f32 %v7971_v51, %v3055_v14 }
 0xa12   :  { %vm2380_vm1 = vcmp.gt.f32.partialorder %v2372_v52, 0.0 }
 0xa15   :  { %3082 = vmax.xlane.f32.xlu1 %v3081_v54  ;;  %v3026_v54 = vpop.permute.xlu1 %3025 }
 0xa17   :  { %v8140_v26 = vpop.eup %5553 }
 0xa18   :  { %v2635_v15 = vsel %vm352_vm3, %v8140_v26, 0.0 }
 0xa1a   :  { %2603 = vmax.xlane.f32.xlu0 %v2602_v29  ;;  %v3036_v29 = vadd.f32 %v8002_v59, %v3026_v54 }
 0xa1c   :  { %v3052_v48 = vmul.f32 0.2, %v3036_v29  ;;  %vm3044_vm0 = vcmp.gt.f32.partialorder %v3036_v29, 0.0 }
 0xa1e   :  { %v3060_v54 = vsel %vm3044_vm0, %v3036_v29, %v3052_v48 }
 0xa1f   :  { %v8171_v53 = vadd.f32 %v8168_v18, %v3060_v54 }
 0xa21   :  { %9478 = vst [vmem:[#allocation36_spill] sm:$0xff] %v8171_v53  ;;  %v3090_v37 = vsel %vm352_vm3, %v8171_v53, -inf  ;;  %v2431_v53 = vsub.f32 %v7883_v62, %v8020_v45 }
 0xa22   :  { %2895 = vadd.xlane.f32.xlu0 %v2894_v2  ;;  %v8153_v2 = vadd.f32 %v8052_v28, %v3059_v63  ;;  %v3075_v28 = vsel %vm352_vm3, %v8161_v11, -inf  ;;  %v2548_v63 = vadd.f32 %v7935_v1, %v8095_v9 }
 0xa24   :  { %9476 = vst [vmem:[#allocation30_spill] sm:$0xff] %v8153_v2  ;;  %v3087_v3 = vsel %vm352_vm3, %v8153_v2, -inf  ;;  %v2564_v48 = vmul.f32 0.2, %v2548_v63  ;;  %vm2556_vm2 = vcmp.gt.f32.partialorder %v2548_v63, 0.0 }
 0xa26   :  { %v2572_v9 = vsel %vm2556_vm2, %v2548_v63, %v2564_v48  ;;  %v8206_v48 = vpop.xlane.xlu0 %2417 }
 0xa2a   :  { %2636 = vadd.xlane.f32.xlu0 %v2635_v15  ;;  %v2388_v15 = vmul.f32 0.2, %v2372_v52 }
 0xa2c   :  { %v2396_v29 = vsel %vm2380_vm1, %v2372_v52, %v2388_v15  ;;  %v8187_v52 = vadd.f32 %v8041_v39, %v2572_v9  ;;  %v2432_v9 = vsub.f32 %v7891_v41, %v7960_v36 }
 0xa2e   :  { %2850 = vmax.xlane.f32.xlu2 %v2849_v46  ;;  %3453 = vperm.xlu1 %5275, %v7803_v30   ;;  %v8179_v46 = vadd.f32 %v8102_v21, %v2396_v29  ;;  %9479 = vst [vmem:[#allocation31_spill] sm:$0xff] %v8187_v52  ;;  %v2596_v15 = vsel %vm352_vm3, %v8187_v52, -inf }
 0xa30   :  { %v2422_v14 = vsel %vm352_vm3, %v8179_v46, -inf }
 0xa32   :  { %3088 = vmax.xlane.f32.xlu0 %v3087_v3  ;;  %v3034_v3 = vadd.f32 %v8002_v59, %v7958_v57 }
 0xa34   :  { %v3050_v54 = vmul.f32 0.2, %v3034_v3  ;;  %vm3042_vm4 = vcmp.gt.f32.partialorder %v3034_v3, 0.0 }
 0xa36   :  { %3076 = vmax.xlane.f32.xlu2 %v3075_v28  ;;  %3457 = vperm.xlu1 %5275, %v7832_v8   ;;  %v2374_v28 = vadd.f32 %v7871_v12, %v8023_v58  ;;  %v3058_v29 = vsel %vm3042_vm4, %v3034_v3, %v3050_v54 }
 0xa37   :  { %v8195_v57 = vadd.f32 %v8102_v21, %v3058_v29  ;;  %v2810_v21 = vadd.f32 %v7916_v31, %v8062_v24 }
 0xa38   :  { %v2390_v59 = vmul.f32 0.2, %v2374_v28  ;;  %vm2382_vm5 = vcmp.gt.f32.partialorder %v2374_v28, 0.0 }
 0xa39   :  { %v3084_v39 = vsel %vm352_vm3, %v8195_v57, -inf  ;;  %v2826_v3 = vmul.f32 0.2, %v2810_v21  ;;  %vm2818_vm6 = vcmp.gt.f32.partialorder %v2810_v21, 0.0 }
 0xa3a   :  { %3091 = vmax.xlane.f32.xlu0 %v3090_v37  ;;  %v2398_v63 = vsel %vm2382_vm5, %v2374_v28, %v2390_v59  ;;  %v9480_v37 = vmov 12   ;;  %v2541_v59 = vpop.permute.xlu2 %2540 }
 0xa3b   :  { %v8202_v12 = vadd.f32 %v8168_v18, %v2398_v63  ;;  %v2834_v54 = vsel %vm2818_vm6, %v2810_v21, %v2826_v3  ;;  %v2551_v31 = vadd.f32 %v7935_v1, %v2541_v59  ;;  %v2415_v1 = vpop.xlane.xlu1 %2414  ;;  %v8248_v59 = vperm.slane %v7868_v42, 6 }
 0xa3c   :  { %v8221_v29 = vadd.f32 %v8168_v18, %v2834_v54 }
 0xa3d   :  { %v2428_v58 = vsel %vm352_vm3, %v8202_v12, -inf  ;;  %v2567_v24 = vmul.f32 0.2, %v2551_v31  ;;  %vm2559_vm7 = vcmp.gt.f32.partialorder %v2551_v31, 0.0 }
 0xa3e   :  { %2423 = vmax.xlane.f32.xlu2 %v2422_v14  ;;  %3465 = vperm.xlu1 %5275, %v7843_v23   ;;  %v8212_v14 = vpop.xlane.xlu0 %2594  ;;  %9482 = vst [vmem:[#allocation35_spill] sm:$0xff] %v8221_v29  ;;  %v2864_v41 = vsel %vm352_vm3, %v8221_v29, -inf }
 0xa43   :  { %v8244_v54 = vpop.xlane.xlu1 %2853 }
 0xa44   :  { %v2870_v52 = vsub.f32 %v7988_v44, %v8244_v54  ;;  %v2611_v44 = vsub.f32 %v8033_v35, %v8212_v14  ;;  %v8398_v14 = vperm.slane %v7868_v42, 7 }
 0xa46   :  { %3469 = vperm.xlu1 %5275, %v7847_v13   ;;  %2597 = vmax.xlane.f32.xlu2 %v2596_v15  ;;  %v2441_v15 = vmul.f32 1.442695, %v2432_v9  ;;  %v8218_v28 = vpop.xlane.xlu0 %2856  ;;  %v2881_v2 = vmul.f32 1.442695, %v2870_v52 }
 0xa47   :  { %9481 = vst [vmem:[#allocation34_spill] sm:$0xff] %v8218_v28 }
 0xa48   :  { %5555 = vpow2.f32 %v2441_v15 }
 0xa4e   :  { %3085 = vmax.xlane.f32.xlu2 %v3084_v39  ;;  %3901 = vperm.xlu0 %5279, %v7768_v6   ;;  %v8228_v36 = vpop.eup %5555  ;;  %v8230_v39 = vpop.xlane.xlu0 %2426 }
 0xa4f   :  { %5278 = vset.pattern.permute.xlu1 %v9480_v37  ;;  %9483 = vst [vmem:[#allocation33_spill] sm:$0xff] %v8230_v39  ;;  %v2458_v63 = vsel %vm352_vm3, %v8228_v36, 0.0  ;;  %v2439_v39 = vmul.f32 1.442695, %v2431_v53 }
 0xa56   :  { %2429 = vmax.xlane.f32.xlu2 %v2428_v58  ;;  %3913 = vperm.xlu0 %5279, %v7837_v16   ;;  %v2575_v58 = vsel %vm2559_vm7, %v2551_v31, %v2567_v24  ;;  %v8239_v3 = vpop.xlane.xlu0 %2862  ;;  %v2433_v24 = vsub.f32 %v7974_v40, %v2415_v1  ;;  %v2608_v1 = vsub.f32 %v7939_v27, %v7999_v5 }
 0xa57   :  { %v8237_v21 = vadd.f32 %v8168_v18, %v2575_v58  ;;  %9485 = vst [vmem:[#allocation16_spill] sm:$0xff] %v8239_v3 }
 0xa58   :  { %v2443_v4 = vmul.f32 1.442695, %v2433_v24  ;;  %v2616_v62 = vmul.f32 1.442695, %v2608_v1  ;;  %v8291_v1 = vperm.slane %v7868_v42, 5 }
 0xa59   :  { %9484 = vst [vmem:[#allocation17_spill] sm:$0xff] %v8237_v21  ;;  %v2605_v9 = vsel %vm352_vm3, %v8237_v21, -inf }
 0xa5a   :  { %5557 = vpow2.f32 %v2443_v4 }
 0xa5b   :  { %5559 = vpow2.f32 %v2439_v39 }
 0xa5c   :  { %5561 = vpow2.f32 %v2616_v62 }
 0xa5e   :  { %3917 = vperm.xlu0 %5279, %v7843_v23   ;;  %v3676_v15 = vpop.permute.xlu0 %3675 }
 0xa60   :  { %v8264_v40 = vpop.eup %5557  ;;  %v3074_v39 = vpop.xlane.xlu2 %3073 }
 0xa61   :  { %v8273_v4 = vpop.eup %5559  ;;  %v3094_v24 = vsub.f32 %v8074_v47, %v3074_v39 }
 0xa62   :  { %v2455_v53 = vsel %vm352_vm3, %v8273_v4, 0.0  ;;  %v8280_v5 = vpop.eup %5561 }
 0xa66   :  { %5280 = vset.pattern.permute.xlu0 %v9467_v20 }
 0xa67   :  { %3461 = vperm.xlu0 %5280, %v7837_v16  }
 0xa6e   :  { %3679 = vperm.xlu2 %5276, %v7803_v30  }
 0xa6f   :  { %3477 = vperm.xlu0 %5280, %v7861_v43  }
 0xa70   :  { %2865 = vmax.xlane.f32.xlu1 %v2864_v41  ;;  %v3707_v41 = vadd.f32 %v8248_v59, %v3676_v15 }
 0xa72   :  { %v3723_v31 = vmul.f32 0.2, %v3707_v41  ;;  %vm3715_vm8 = vcmp.gt.f32.partialorder %v3707_v41, 0.0 }
 0xa74   :  { %v3731_v58 = vsel %vm3715_vm8, %v3707_v41, %v3723_v31  ;;  %v2461_v41 = vsel %vm352_vm3, %v8264_v40, 0.0 }
 0xa76   :  { %3683 = vperm.xlu2 %5276, %v7832_v8  }
 0xa77   :  { %5284 = vset.pattern.permute.xlu0 %v9480_v37 }
 0xa78   :  { %2459 = vadd.xlane.f32.xlu1 %v2458_v63  ;;  %v8252_v63 = vpop.xlane.xlu1 %2591 }
 0xa7e   :  { %3691 = vperm.xlu2 %5276, %v7843_v23  }
 0xa80   :  { %2606 = vmax.xlane.f32.xlu1 %v2605_v9  ;;  %v8255_v9 = vadd.f32 %v7880_v0, %v3731_v58  ;;  %v2632_v58 = vsel %vm352_vm3, %v8280_v5, 0.0 }
 0xa82   :  { %9486 = vst [vmem:[#allocation28_spill] sm:$0xff] %v8255_v9  ;;  %v3747_v15 = vsel %vm352_vm3, %v8255_v9, -inf }
 0xa86   :  { %5281 = vset.pattern.permute.xlu2 %v9467_v20  ;;  %v8259_v20 = vpop.xlane.xlu1 %3079 }
 0xa8e   :  { %v8271_v45 = vpop.xlane.xlu1 %2420 }
 0xa96   :  { %v8282_v31 = vpop.xlane.xlu1 %2859 }
 0xa99   :  { %3223 = vperm.xlu1 %5278, %v7768_v6   ;;  %3748 = vmax.xlane.f32.xlu0 %v3747_v15  ;;  %v3093_v6 = vsub.f32 %v8012_v7, %v8068_v49  ;;  %v3103_v7 = vmul.f32 1.442695, %v3094_v24  ;;  %v3450_v49 = vpop.permute.xlu2 %3449  ;;  %v2867_v24 = vsub.f32 %v7921_v60, %v7963_v56 }
 0xa9a   :  { %v3481_v47 = vadd.f32 %v8291_v1, %v3450_v49 }
 0xa9b   :  { %v3101_v27 = vmul.f32 1.442695, %v3093_v6  ;;  %v2875_v49 = vmul.f32 1.442695, %v2867_v24 }
 0xa9c   :  { %vm3489_vm9 = vcmp.gt.f32.partialorder %v3481_v47, 0.0 }
 0xa9d   :  { %5563 = vpow2.f32 %v3101_v27 }
 0xa9e   :  { %5565 = vpow2.f32 %v3103_v7 }
 0xa9f   :  { %5567 = vpow2.f32 %v2875_v49 }
 0xaa1   :  { %3231 = vperm.xlu1 %5278, %v7832_v8   ;;  %2462 = vadd.xlane.f32.xlu0 %v2461_v41  ;;  %v8298_v62 = vpop.xlane.xlu2 %2850 }
 0xaa3   :  { %v8288_v15 = vpop.eup %5563 }
 0xaa4   :  { %v3117_v41 = vsel %vm352_vm3, %v8288_v15, 0.0  ;;  %v8300_v6 = vpop.eup %5565 }
 0xaa7   :  { %2456 = vadd.xlane.f32.xlu2 %v2455_v53  ;;  %v3497_v53 = vmul.f32 0.2, %v3481_v47 }
 0xaa9   :  { %3239 = vperm.xlu1 %5278, %v7843_v23   ;;  %v8293_v23 = vpop.xlane.xlu1 %2600  ;;  %v3505_v39 = vsel %vm3489_vm9, %v3481_v47, %v3497_v53  ;;  %v8311_v7 = vpop.xlane.xlu2 %3076 }
 0xaaa   :  { %9487 = vst [vmem:[#allocation27_spill] sm:$0xff] %v8293_v23  ;;  %v8318_v53 = vpop.eup %5567 }
 0xaab   :  { %v2891_v60 = vsel %vm352_vm3, %v8318_v53, 0.0 }
 0xaaf   :  { %2633 = vadd.xlane.f32.xlu2 %v2632_v58  ;;  %v8309_v58 = vadd.f32 %v7880_v0, %v3505_v39 }
 0xab1   :  { %5282 = vset.pattern.permute.xlu1 %v9468_v33  ;;  %v3120_v33 = vsel %vm352_vm3, %v8300_v6, 0.0  ;;  %v8304_v27 = vpop.xlane.xlu1 %3082  ;;  %9489 = vst [vmem:[#allocation21_spill] sm:$0xff] %v8309_v58  ;;  %v8316_v47 = vpop.xlane.xlu2 %2423 }
 0xab2   :  { %9488 = vst [vmem:[#allocation25_spill] sm:$0xff] %v8304_v27 }
 0xab7   :  { %3118 = vadd.xlane.f32.xlu2 %v3117_v41  ;;  %v3521_v41 = vsel %vm352_vm3, %v8309_v58, -inf }
 0xab9   :  { %v3454_v9 = vpop.permute.xlu1 %3453  ;;  %v8325_v24 = vpop.xlane.xlu2 %2597 }
 0xaba   :  { %9491 = vst [vmem:[#allocation20_spill] sm:$0xff] %v8325_v24 }
 0xabf   :  { %3121 = vadd.xlane.f32.xlu2 %v3120_v33  ;;  %v3482_v33 = vadd.f32 %v8291_v1, %v3454_v9 }
 0xac1   :  { %v3498_v29 = vmul.f32 0.2, %v3482_v33  ;;  %vm3490_vm10 = vcmp.gt.f32.partialorder %v3482_v33, 0.0  ;;  %v8329_v9 = vpop.permute.xlu1 %3457 }
 0xac3   :  { %v3506_v56 = vsel %vm3490_vm10, %v3482_v33, %v3498_v29  ;;  %v8337_v29 = vpop.permute.xlu0 %3687 }
 0xac4   :  { %v8323_v39 = vadd.f32 %v7888_v10, %v3506_v56 }
 0xac6   :  { %9490 = vst [vmem:[#allocation26_spill] sm:$0xff] %v8323_v39  ;;  %v3524_v49 = vsel %vm352_vm3, %v8323_v39, -inf }
 0xac7   :  { %3522 = vmax.xlane.f32.xlu2 %v3521_v41  ;;  %v8332_v41 = vpop.xlane.xlu2 %3085 }
 0xac9   :  { %v8334_v58 = vpop.permute.xlu1 %3465 }
 0xaca   :  { %9492 = vst [vmem:[#allocation8_spill] sm:$0xff] %v8334_v58 }
 0xacb   :  { %v8343_v56 = vpop.permute.xlu0 %3695 }
 0xacc   :  { %9494 = vst [vmem:[#allocation10_spill] sm:$0xff] %v8343_v56 }
 0xacf   :  { %v8339_v33 = vpop.xlane.xlu2 %2429 }
 0xad3   :  { %2892 = vadd.xlane.f32.xlu1 %v2891_v60  ;;  %v8341_v60 = vpop.permute.xlu1 %3469  ;;  %v8349_v23 = vpop.xlane.xlu0 %2603 }
 0xad4   :  { %9493 = vst [vmem:[#allocation9_spill] sm:$0xff] %v8341_v60 }
 0xad5   :  { %9496 = vst [vmem:[#allocation13_spill] sm:$0xff] %v8349_v23 }
 0xad7   :  { %v3680_v25 = vpop.permute.xlu2 %3679 }
 0xad8   :  { %v3708_v27 = vadd.f32 %v8248_v59, %v3680_v25 }
 0xada   :  { %v3724_v58 = vmul.f32 0.2, %v3708_v27  ;;  %vm3716_vm11 = vcmp.gt.f32.partialorder %v3708_v27, 0.0 }
 0xadb   :  { %3525 = vmax.xlane.f32.xlu1 %v3524_v49 }
 0xadc   :  { %v3732_v28 = vsel %vm3716_vm11, %v3708_v27, %v3724_v58  ;;  %v8373_v58 = vperm.slane %v7868_v42, 4 }
 0xadd   :  { %v8355_v56 = vadd.f32 %v7888_v10, %v3732_v28 }
 0xadf   :  { %3473 = vperm.xlu2 %5281, %v7857_v34   ;;  %9497 = vst [vmem:[#allocation11_spill] sm:$0xff] %v8355_v56  ;;  %v3750_v25 = vsel %vm352_vm3, %v8355_v56, -inf  ;;  %v8362_v23 = vpop.permute.xlu2 %3683 }
 0xae3   :  { %v8346_v49 = vpop.xlane.xlu1 %2865 }
 0xae4   :  { %9495 = vst [vmem:[#allocation12_spill] sm:$0xff] %v8346_v49  ;;  %v8358_v49 = vpop.xlane.xlu0 %2895 }
 0xae7   :  { %5283 = vset.pattern.permute.xlu2 %v9480_v37  ;;  %v2434_v37 = vsub.f32 %v8027_v32, %v8206_v48  ;;  %v8370_v28 = vpop.permute.xlu2 %3691 }
 0xae9   :  { %v2445_v39 = vmul.f32 1.442695, %v2434_v37 }
 0xaeb   :  { %v2460_v60 = vpop.xlane.xlu1 %2459  ;;  %5569 = vpow2.f32 %v2445_v39 }
 0xaec   :  { %v2637_v48 = vpop.xlane.xlu0 %2636  ;;  %5571 = vrcp.f32 %v2460_v60 }
 0xaf1   :  { %v8366_v32 = vpop.eup %5569 }
 0xaf2   :  { %v2464_v10 = vsel %vm352_vm3, %v8366_v32, 0.0 }
 0xaf3   :  { %v8364_v18 = vpop.xlane.xlu1 %2606 }
 0xaf4   :  { %3699 = vperm.xlu1 %5282, %v7857_v34   ;;  %9498 = vst [vmem:[#allocation14_spill] sm:$0xff] %v8364_v18  ;;  %v8376_v37 = vpop.xlane.xlu0 %3088 }
 0xaf5   :  { %9499 = vst [vmem:[#allocation29_spill] sm:$0xff] %v8376_v37 }
 0xafc   :  { %3703 = vperm.xlu1 %5282, %v7861_v43   ;;  %v8385_v3 = vpop.xlane.xlu0 %3091 }
 0xb04   :  { %5286 = vset.pattern.permute.xlu1 %v9472_v50  ;;  %v3902_v35 = vpop.permute.xlu0 %3901 }
 0xb08   :  { %3751 = vmax.xlane.f32.xlu2 %v3750_v25 }
 0xb0b   :  { %v3224_v27 = vpop.permute.xlu1 %3223 }
 0xb0c   :  { %v3255_v39 = vadd.f32 %v8373_v58, %v3224_v27 }
 0xb0e   :  { %v3271_v25 = vmul.f32 0.2, %v3255_v39  ;;  %vm3263_vm12 = vcmp.gt.f32.partialorder %v3255_v39, 0.0 }
 0xb10   :  { %2465 = vadd.xlane.f32.xlu2 %v2464_v10  ;;  %v3279_v24 = vsel %vm3263_vm12, %v3255_v39, %v3271_v25  ;;  %v5572_v10 = vpop.eup %5571  ;;  %v3933_v25 = vadd.f32 %v8398_v14, %v3902_v35 }
 0xb11   :  { %v8381_v18 = vadd.f32 %v7880_v0, %v3279_v24  ;;  %v2488_v27 = vmul.f32 %v5572_v10, %v8228_v36 }
 0xb12   :  { %vm3941_vm13 = vcmp.gt.f32.partialorder %v3933_v25, 0.0 }
 0xb13   :  { %v3295_v52 = vsel %vm352_vm3, %v8381_v18, -inf  ;;  %v8407_v42 = vpop.permute.xlu1 %3231 }
 0xb1a   :  { %v2457_v56 = vpop.xlane.xlu2 %2456 }
 0xb1b   :  { %5573 = vrcp.f32 %v2457_v56  ;;  %v2622_v56 = vmul.f32 1.442695, %v2611_v44 }
 0xb1c   :  { %5575 = vrcp.f32 %v2637_v48 }
 0xb21   :  { %v5574_v21 = vpop.eup %5573 }
 0xb22   :  { %v2487_v37 = vmul.f32 %v5574_v21, %v8273_v4  ;;  %v2634_v60 = vpop.xlane.xlu2 %2633  ;;  %v5576_v24 = vpop.eup %5575 }
 0xb23   :  { %5577 = vrcp.f32 %v2634_v60  ;;  %v2665_v4 = vmul.f32 %v5576_v24, %v8140_v26 }
 0xb24   :  { %5579 = vpow2.f32 %v2881_v2  ;;  %v2503_v54 = vpack.c.bf16 %v2488_v27, %v2487_v37 }
 0xb25   :  { %5581 = vpow2.f32 %v2622_v56 }
 0xb26   :  { %4975 = vmatmul.msk.bf16.vlgmr.msra.gmra.mxu2 %vm352_vm3, %v2503_v54  ;;  %3296 = vmax.xlane.f32.xlu1 %v3295_v52 }
 0xb28   :  { %3227 = vperm.xlu2 %5283, %v7803_v30  }
 0xb29   :  { %v5578_v36 = vpop.eup %5577 }
 0xb2a   :  { %v8393_v21 = vpop.eup %5579  ;;  %v2664_v2 = vmul.f32 %v5578_v36, %v8280_v5  ;;  %v3119_v48 = vpop.xlane.xlu2 %3118  ;;  %v3949_v5 = vmul.f32 0.2, %v3933_v25 }
 0xb2b   :  { %v2900_v37 = vsel %vm352_vm3, %v8393_v21, 0.0  ;;  %5583 = vrcp.f32 %v3119_v48  ;;  %v8405_v26 = vpop.eup %5581 }
 0xb2c   :  { %v2680_v39 = vpack.c.bf16 %v2665_v4, %v2664_v2  ;;  %v2641_v27 = vsel %vm352_vm3, %v8405_v26, 0.0  ;;  %v3957_v60 = vsel %vm3941_vm13, %v3933_v25, %v3949_v5  ;;  %v8419_v2 = vpop.permute.xlu1 %3239 }
 0xb2d   :  { %v8413_v52 = vadd.f32 %v7880_v0, %v3957_v60 }
 0xb2e   :  { %4971 = vmatmul.msk.bf16.vlgmr.msrb.gmra.mxu0 %vm352_vm3, %v2680_v39  ;;  %2901 = vadd.xlane.f32.xlu1 %v2900_v37  ;;  %v2869_v39 = vsub.f32 %v8147_v19, %v8298_v62  ;;  %v8428_v37 = vpop.permute.xlu0 %3913 }
 0xb2f   :  { %v3973_v4 = vsel %vm352_vm3, %v8413_v52, -inf }
 0xb30   :  { %3243 = vperm.xlu2 %5283, %v7847_v13   ;;  %v2879_v5 = vmul.f32 1.442695, %v2869_v39  ;;  %v3257_v39 = vadd.f32 %v8373_v58, %v8407_v42 }
 0xb31   :  { %v5584_v44 = vpop.eup %5583 }
 0xb32   :  { %v3122_v10 = vpop.xlane.xlu2 %3121  ;;  %v3149_v24 = vmul.f32 %v5584_v44, %v8288_v15  ;;  %vm3265_vm15 = vcmp.gt.f32.partialorder %v3257_v39, 0.0 }
 0xb33   :  { %5585 = vrcp.f32 %v3122_v10 }
 0xb34   :  { %5587 = vrcp.f32 %v8358_v49 }
 0xb36   :  { %2642 = vadd.xlane.f32.xlu1 %v2641_v27 }
 0xb38   :  { %3247 = vperm.xlu2 %5283, %v7857_v34  }
 0xb39   :  { %v5586_v54 = vpop.eup %5585 }
 0xb3a   :  { %v3150_v56 = vmul.f32 %v5586_v54, %v8300_v6  ;;  %v5588_v0 = vpop.eup %5587 }
 0xb3b   :  { %v2924_v15 = vmul.f32 %v5588_v0, %v8133_v55 }
 0xb3c   :  { %v3165_v36 = vpack.c.bf16 %v3150_v56, %v3149_v24 }
 0xb3e   :  { %4983 = vmatmul.msk.bf16.vlgmr.msrb.gmra.mxu1 %vm352_vm3, %v3165_v36  ;;  %3974 = vmax.xlane.f32.xlu1 %v3973_v4 }
 0xb40   :  { %5285 = vset.pattern.permute.xlu2 %v9472_v50  ;;  %v8431_v50 = vpop.permute.xlu0 %3917 }
 0xb46   :  { %v2893_v48 = vpop.xlane.xlu1 %2892 }
 0xb47   :  { %5589 = vrcp.f32 %v2893_v48 }
 0xb48   :  { %5591 = vpow2.f32 %v2879_v5  ;;  %v8437_v55 = vpop.permute.xlu0 %3461 }
 0xb4d   :  { %v5590_v35 = vpop.eup %5589 }
 0xb4e   :  { %v2923_v6 = vmul.f32 %v5590_v35, %v8318_v53  ;;  %v8433_v49 = vpop.eup %5591  ;;  %v8439_v53 = vpop.xlane.xlu2 %3522 }
 0xb4f   :  { %v2897_v10 = vsel %vm352_vm3, %v8433_v49, 0.0 }
 0xb50   :  { %v2939_v25 = vpack.c.bf16 %v2924_v15, %v2923_v6  ;;  %v8441_v19 = vpop.permute.xlu0 %3477  ;;  %v8459_v15 = vld [vmem:[%s9273_s1 + $0x8] sm:$0xff] }
 0xb52   :  { %4979 = vmatmul.msk.bf16.vlgmr.msra.gmra.mxu3 %vm352_vm3, %v2939_v25 }
 0xb56   :  { %v8443_v62 = vpop.permute.xlu2 %3473 }
 0xb58   :  { %v8445_v27 = vpop.xlane.xlu0 %3748 }
 0xb60   :  { %v2463_v44 = vpop.xlane.xlu0 %2462 }
 0xb61   :  { %2898 = vadd.xlane.f32.xlu2 %v2897_v10  ;;  %5593 = vrcp.f32 %v2463_v44  ;;  %v8471_v10 = vpop.xlane.xlu1 %3525 }
 0xb67   :  { %v5594_v24 = vpop.eup %5593 }
 0xb68   :  { %v2489_v36 = vmul.f32 %v5594_v24, %v8264_v40  ;;  %v3273_v24 = vmul.f32 0.2, %v3257_v39 }
 0xb69   :  { %v8480_v42 = vpop.permute.xlu1 %3699 }
 0xb79   :  { %3905 = vperm.xlu2 %5285, %v7803_v30  }
 0xb7b   :  { %v8448_v60 = vpop.xlane.xlu2 %3751 }
 0xb81   :  { %3909 = vperm.xlu2 %5285, %v7832_v8  }
 0xb83   :  { %v2466_v54 = vpop.xlane.xlu2 %2465 }
 0xb84   :  { %5595 = vrcp.f32 %v2466_v54 }
 0xb89   :  { %3925 = vperm.xlu2 %5285, %v7857_v34  }
 0xb8a   :  { %v5596_v56 = vpop.eup %5595 }
 0xb8b   :  { %v2490_v4 = vmul.f32 %v5596_v56, %v8366_v32  ;;  %v3228_v48 = vpop.permute.xlu2 %3227  ;;  %v3096_v32 = vsub.f32 %v8083_v22, %v8259_v20  ;;  %v2872_v56 = vsub.f32 %v8105_v38, %v8282_v31  ;;  %v3281_v22 = vsel %vm3265_vm15, %v3257_v39, %v3273_v24  ;;  %v8489_v38 = vpop.permute.xlu1 %3703 }
 0xb8c   :  { %v3256_v0 = vadd.f32 %v8373_v58, %v3228_v48 }
 0xb8d   :  { %v2504_v30 = vpack.c.bf16 %v2490_v4, %v2489_v36  ;;  %v3107_v6 = vmul.f32 1.442695, %v3096_v32  ;;  %v2885_v20 = vmul.f32 1.442695, %v2872_v56  ;;  %v8483_v36 = vadd.f32 %v7971_v51, %v3281_v22 }
 0xb8e   :  { %vm3264_vm14 = vcmp.gt.f32.partialorder %v3256_v0, 0.0  ;;  %v3272_v35 = vmul.f32 0.2, %v3256_v0  ;;  %v2610_v51 = vsub.f32 %v7993_v61, %v8252_v63  ;;  %v3483_v63 = vadd.f32 %v8291_v1, %v8329_v9 }
 0xb8f   :  { %4976 = vmatmul.msk.bf16.gmra.mxu2 %vm352_vm3, %v2504_v30  ;;  %5597 = vpow2.f32 %v3107_v6  ;;  %v3301_v4 = vsel %vm352_vm3, %v8483_v36, -inf }
 0xb90   :  { %v3280_v8 = vsel %vm3264_vm14, %v3256_v0, %v3272_v35  ;;  %5599 = vpow2.f32 %v2885_v20  ;;  %v2620_v35 = vmul.f32 1.442695, %v2610_v51  ;;  %vm3491_vm0 = vcmp.gt.f32.partialorder %v3483_v63, 0.0 }
 0xb91   :  { %v8462_v34 = vadd.f32 %v8459_v15, %v3280_v8 }
 0xb92   :  { %5601 = vpow2.f32 %v2620_v35 }
 0xb93   :  { %v3298_v40 = vsel %vm352_vm3, %v8462_v34, -inf  ;;  %v8493_v0 = vpop.permute.xlu2 %3243 }
 0xb94   :  { %3299 = vmax.xlane.f32.xlu0 %v3298_v40  ;;  %v3095_v40 = vsub.f32 %v8161_v11, %v8311_v7 }
 0xb95   :  { %v8473_v54 = vpop.eup %5597 }
 0xb96   :  { %v8487_v48 = vpop.eup %5599  ;;  %v3105_v6 = vmul.f32 1.442695, %v3095_v40 }
 0xb97   :  { %v2906_v31 = vsel %vm352_vm3, %v8487_v48, 0.0 }
 0xb99   :  { %v8495_v30 = vpop.xlane.xlu1 %3296 }
 0xb9b   :  { %v8499_v8 = vpop.permute.xlu2 %3247 }
 0xba1   :  { %v2902_v32 = vpop.xlane.xlu1 %2901 }
 0xba2   :  { %5603 = vrcp.f32 %v2902_v32 }
 0xba8   :  { %3235 = vperm.xlu0 %5284, %v7837_v16   ;;  %v3126_v16 = vsel %vm352_vm3, %v8473_v54, 0.0 }
 0xba9   :  { %v2750_v25 = vpop.f32.mrf.mxu2 }
 0xbab   :  { %v2709_v5 = vpop.f32.mrf.mxu0 }
 0xbac   :  { %v2751_v44 = vadd.f32 %v2750_v25, %v2709_v5  ;;  %v8503_v5 = vpop.eup %5601 }
 0xbad   :  { %v5604_v56 = vpop.eup %5603  ;;  %v2638_v61 = vsel %vm352_vm3, %v8503_v5, 0.0 }
 0xbae   :  { %v2926_v11 = vmul.f32 %v5604_v56, %v8393_v21  ;;  %v3709_v21 = vadd.f32 %v8248_v59, %v8362_v23  ;;  %v5857_v23 = vld [vmem:[%s9273_s1 + $0x10] sm:$0xff] }
 0xbb0   :  { %3251 = vperm.xlu0 %5284, %v7861_v43   ;;  %vm3717_vm2 = vcmp.gt.f32.partialorder %v3709_v21, 0.0 }
 0xbb2   :  { %3127 = vadd.xlane.f32.xlu2 %v3126_v16 }
 0xbba   :  { %3302 = vmax.xlane.f32.xlu2 %v3301_v4 }
 0xbc2   :  { %2907 = vadd.xlane.f32.xlu2 %v2906_v31 }
 0xbd4   :  { %v2899_v39 = vpop.xlane.xlu2 %2898 }
 0xbd5   :  { %5605 = vrcp.f32 %v2899_v39  ;;  %v2968_v25 = vpop.f32.mrf.mxu3 }
 0xbd6   :  { %v2988_v24 = vadd.f32 %v2968_v25, %v2751_v44  ;;  %5607 = vpow2.f32 %v3105_v6  ;;  %v3499_v44 = vmul.f32 0.2, %v3483_v63  ;;  %v3098_v6 = vsub.f32 %v8195_v57, %v8332_v41 }
 0xbd8   :  { %v3507_v32 = vsel %vm3491_vm0, %v3483_v63, %v3499_v44  ;;  %v3111_v63 = vmul.f32 1.442695, %v3098_v6  ;;  %v3711_v44 = vadd.f32 %v8248_v59, %v8370_v28  ;;  %v2438_v28 = vsub.f32 %v8202_v12, %v8339_v33  ;;  %v8569_v12 = vld [vmem:[%s9273_s1 + $0x20] sm:$0xff] }
 0xbda   :  { %2639 = vadd.xlane.f32.xlu0 %v2638_v61  ;;  %5609 = vpow2.f32 %v3111_v63  ;;  %vm3719_vm6 = vcmp.gt.f32.partialorder %v3711_v44, 0.0  ;;  %v9502_v63 = vld [vmem:[#allocation15_spill] sm:$0xff] }
 0xbdb   :  { %v5606_v16 = vpop.eup %5605 }
 0xbdc   :  { %v2925_v7 = vmul.f32 %v5606_v16, %v8433_v49  ;;  %v3906_v22 = vpop.permute.xlu2 %3905  ;;  %v8512_v4 = vpop.eup %5607  ;;  %v8532_v16 = vadd.f32 %v5857_v23, %v3507_v32 }
 0xbdd   :  { %v3934_v20 = vadd.f32 %v8398_v14, %v3906_v22  ;;  %v3123_v9 = vsel %vm352_vm3, %v8512_v4, 0.0  ;;  %v3194_v49 = vpop.f32.mrf.mxu1 }
 0xbde   :  { %v2940_v31 = vpack.c.bf16 %v2926_v11, %v2925_v7  ;;  %v8524_v39 = vadd.f32 %v3194_v49, %v2988_v24  ;;  %v3527_v41 = vsel %vm352_vm3, %v8532_v16, -inf  ;;  %v3710_v11 = vadd.f32 %v8248_v59, %v8337_v29 }
 0xbdf   :  { %vm3942_vm1 = vcmp.gt.f32.partialorder %v3934_v20, 0.0  ;;  %v3950_v51 = vmul.f32 0.2, %v3934_v20 }
 0xbe0   :  { %4980 = vmatmul.msk.bf16.gmra.mxu3 %vm352_vm3, %v2940_v31  ;;  %9500 = vst [vmem:[#allocation37_spill] sm:$0xff] %v8524_v39  ;;  %vm3718_vm5 = vcmp.gt.f32.partialorder %v3710_v11, 0.0  ;;  %v8548_v29 = vpop.eup %5609  ;;  %v9530_v39 = vld [vmem:[#allocation24_spill] sm:$0xff] }
 0xbe1   :  { %v3958_v35 = vsel %vm3942_vm1, %v3934_v20, %v3950_v51  ;;  %v3726_v51 = vmul.f32 0.2, %v3710_v11  ;;  %v3132_v6 = vsel %vm352_vm3, %v8548_v29, 0.0 }
 0xbe2   :  { %3124 = vadd.xlane.f32.xlu0 %v3123_v9  ;;  %v8520_v40 = vadd.f32 %v8459_v15, %v3958_v35  ;;  %v3725_v15 = vmul.f32 0.2, %v3709_v21  ;;  %v2435_v9 = vsub.f32 %v8090_v17, %v8271_v45  ;;  %v3727_v35 = vmul.f32 0.2, %v3711_v44  ;;  %v8559_v17 = vld [vmem:[%s9273_s1 + $0x18] sm:$0xff] }
 0xbe3   :  { %v3734_v49 = vsel %vm3718_vm5, %v3710_v11, %v3726_v51 }
 0xbe4   :  { %v3910_v25 = vpop.permute.xlu2 %3909  ;;  %v3976_v56 = vsel %vm352_vm3, %v8520_v40, -inf  ;;  %v3733_v22 = vsel %vm3717_vm2, %v3709_v21, %v3725_v15  ;;  %v2447_v32 = vmul.f32 1.442695, %v2435_v9  ;;  %v8562_v45 = vadd.f32 %v8559_v17, %v3734_v49  ;;  %v9501_v15 = vld [vmem:[#allocation16_spill] sm:$0xff] }
 0xbe5   :  { %v3935_v61 = vadd.f32 %v8398_v14, %v3910_v25  ;;  %3977 = vmax.xlane.f32.xlu1 %v3976_v56  ;;  %v8544_v31 = vadd.f32 %v5857_v23, %v3733_v22  ;;  %v3735_v25 = vsel %vm3719_vm6, %v3711_v44, %v3727_v35  ;;  %v2453_v56 = vmul.f32 1.442695, %v2438_v28  ;;  %v9505_v44 = vld [vmem:[#allocation17_spill] sm:$0xff] }
 0xbe6   :  { %5611 = vpow2.f32 %v2447_v32  ;;  %v8572_v33 = vadd.f32 %v8569_v12, %v3735_v25  ;;  %v9506_v28 = vld [vmem:[#allocation29_spill] sm:$0xff]  ;;  %v9507_v32 = vld [vmem:[#allocation30_spill] sm:$0xff] }
 0xbe7   :  { %vm3943_vm4 = vcmp.gt.f32.partialorder %v3935_v61, 0.0  ;;  %v3951_v57 = vmul.f32 0.2, %v3935_v61  ;;  %v3753_v21 = vsel %vm352_vm3, %v8544_v31, -inf  ;;  %5613 = vpow2.f32 %v2453_v56 }
 0xbe9   :  { %v3959_v24 = vsel %vm3943_vm4, %v3935_v61, %v3951_v57  ;;  %v2436_v61 = vsub.f32 %v8179_v46, %v8316_v47  ;;  %v2873_v57 = vsub.f32 %v9502_v63, %v9501_v15  ;;  %v3759_v46 = vsel %vm352_vm3, %v8572_v33, -inf  ;;  %v9509_v63 = vld [vmem:[#allocation20_spill] sm:$0xff] }
 0xbea   :  { %3528 = vmax.xlane.f32.xlu0 %v3527_v41  ;;  %v8538_v7 = vadd.f32 %v5857_v23, %v3959_v24  ;;  %v3756_v23 = vsel %vm352_vm3, %v8562_v45, -inf  ;;  %v3488_v15 = vadd.f32 %v8291_v1, %v8441_v19 }
 0xbeb   :  { %v2449_v41 = vmul.f32 1.442695, %v2436_v61  ;;  %v2887_v24 = vmul.f32 1.442695, %v2873_v57  ;;  %v9510_v57 = vld [vmem:[#allocation31_spill] sm:$0xff] }
 0xbec   :  { %v3979_v20 = vsel %vm352_vm3, %v8538_v7, -inf  ;;  %v8580_v47 = vpop.eup %5611  ;;  %vm3496_vm7 = vcmp.gt.f32.partialorder %v3488_v15, 0.0 }
 0xbed   :  { %3980 = vmax.xlane.f32.xlu2 %v3979_v20  ;;  %5615 = vpow2.f32 %v2449_v41  ;;  %v8583_v11 = vpop.eup %5613  ;;  %v2467_v22 = vsel %vm352_vm3, %v8580_v47, 0.0  ;;  %v9504_v20 = vld [vmem:[#allocation14_spill] sm:$0xff]  ;;  %v2612_v41 = vsub.f32 %v9510_v57, %v9509_v63 }
 0xbee   :  { %9503 = vst [vmem:[#allocation16_spill] sm:$0xff] %v8583_v11  ;;  %5617 = vpow2.f32 %v2887_v24  ;;  %v2615_v51 = vsub.f32 %v9505_v44, %v9504_v20  ;;  %v2476_v9 = vsel %vm352_vm3, %v8583_v11, 0.0  ;;  %v3504_v24 = vmul.f32 0.2, %v3488_v15 }
 0xbef   :  { %v2624_v44 = vmul.f32 1.442695, %v2612_v41 }
 0xbf2   :  { %3754 = vmax.xlane.f32.xlu0 %v3753_v21 }
 0xbf3   :  { %v8591_v35 = vpop.eup %5615 }
 0xbf4   :  { %v8594_v21 = vpop.eup %5617  ;;  %v2470_v49 = vsel %vm352_vm3, %v8591_v35, 0.0 }
 0xbf5   :  { %3133 = vadd.xlane.f32.xlu2 %v3132_v6  ;;  %v3099_v6 = vsub.f32 %v9507_v32, %v9506_v28  ;;  %v2909_v25 = vsel %vm352_vm3, %v8594_v21, 0.0  ;;  %v3484_v28 = vadd.f32 %v8291_v1, %v8437_v55 }
 0xbf7   :  { %v3113_v56 = vmul.f32 1.442695, %v3099_v6  ;;  %v9512_v6 = vld [vmem:[#allocation32_spill] sm:$0xff]  ;;  %v3500_v55 = vmul.f32 0.2, %v3484_v28  ;;  %vm3492_vm10 = vcmp.gt.f32.partialorder %v3484_v28, 0.0 }
 0xbfa   :  { %3757 = vmax.xlane.f32.xlu0 %v3756_v23 }
 0xbfd   :  { %3760 = vmax.xlane.f32.xlu2 %v3759_v46 }
 0xbfe   :  { %3921 = vperm.xlu1 %5286, %v7847_v13   ;;  %v2630_v13 = vmul.f32 1.442695, %v2615_v51 }
 0xc00   :  { %5619 = vpow2.f32 %v2630_v13  ;;  %v3512_v13 = vsel %vm3496_vm7, %v3488_v15, %v3504_v24  ;;  %v9514_v15 = vld [vmem:[#allocation26_spill] sm:$0xff] }
 0xc01   :  { %5621 = vpow2.f32 %v3113_v56  ;;  %v3546_v63 = vsub.f32 %v9514_v15, %v8471_v10  ;;  %v9515_v24 = vld [vmem:[#allocation34_spill] sm:$0xff] }
 0xc02   :  { %2468 = vadd.xlane.f32.xlu0 %v2467_v22  ;;  %5623 = vpow2.f32 %v2624_v44 }
 0xc05   :  { %2477 = vadd.xlane.f32.xlu2 %v2476_v9  ;;  %v3261_v9 = vadd.f32 %v8373_v58, %v8499_v8 }
 0xc06   :  { %3929 = vperm.xlu1 %5286, %v7861_v43   ;;  %v8602_v61 = vpop.eup %5619 }
 0xc07   :  { %9508 = vst [vmem:[#allocation15_spill] sm:$0xff] %v8602_v61  ;;  %v8604_v23 = vpop.xlane.xlu0 %3299  ;;  %v2653_v43 = vsel %vm352_vm3, %v8602_v61, 0.0  ;;  %v8612_v46 = vpop.eup %5621  ;;  %v3277_v56 = vmul.f32 0.2, %v3261_v9  ;;  %vm3269_vm9 = vcmp.gt.f32.partialorder %v3261_v9, 0.0 }
 0xc08   :  { %9511 = vst [vmem:[#allocation14_spill] sm:$0xff] %v8612_v46  ;;  %v3135_v51 = vsel %vm352_vm3, %v8612_v46, 0.0  ;;  %v8637_v44 = vpop.eup %5623 }
 0xc09   :  { %v3285_v41 = vsel %vm3269_vm9, %v3261_v9, %v3277_v56  ;;  %v2644_v56 = vsel %vm352_vm3, %v8637_v44, 0.0 }
 0xc0a   :  { %2471 = vadd.xlane.f32.xlu0 %v2470_v49 }
 0xc0d   :  { %2910 = vadd.xlane.f32.xlu2 %v2909_v25  ;;  %v8625_v25 = vadd.f32 %v9512_v6, %v3512_v13  ;;  %v3508_v13 = vsel %vm3492_vm10, %v3484_v28, %v3500_v55  ;;  %v9518_v6 = vld [vmem:[#allocation8_spill] sm:$0xff]  ;;  %v9519_v28 = vld [vmem:[#allocation27_spill] sm:$0xff]  ;;  %v9520_v55 = vld [vmem:[#allocation18_spill] sm:$0xff] }
 0xc0e   :  { %v3485_v9 = vadd.f32 %v8291_v1, %v9518_v6  ;;  %v8654_v15 = vadd.f32 %v8559_v17, %v3508_v13 }
 0xc0f   :  { %9513 = vst [vmem:[#allocation17_spill] sm:$0xff] %v8625_v25  ;;  %v3542_v57 = vsel %vm352_vm3, %v8625_v25, -inf }
 0xc10   :  { %vm3493_vm12 = vcmp.gt.f32.partialorder %v3485_v9, 0.0 }
 0xc15   :  { %2654 = vadd.xlane.f32.xlu2 %v2653_v43  ;;  %v3936_v43 = vadd.f32 %v8398_v14, %v8428_v37  ;;  %v8642_v37 = vld [vmem:[%s9273_s1 + $0x30] sm:$0xff] }
 0xc16   :  { %v8645_v10 = vadd.f32 %v8642_v37, %v3285_v41  ;;  %v2613_v41 = vsub.f32 %v9520_v55, %v9519_v28 }
 0xc17   :  { %vm3944_vm11 = vcmp.gt.f32.partialorder %v3936_v43, 0.0 }
 0xc18   :  { %9517 = vst [vmem:[#allocation29_spill] sm:$0xff] %v8645_v10 }
 0xc1a   :  { %v3236_v22 = vpop.permute.xlu0 %3235 }
 0xc1b   :  { %v3258_v20 = vadd.f32 %v8373_v58, %v3236_v22  ;;  %v9516_v22 = vld [vmem:[#allocation22_spill] sm:$0xff] }
 0xc1d   :  { %vm3266_vm8 = vcmp.gt.f32.partialorder %v3258_v20, 0.0  ;;  %v3274_v19 = vmul.f32 0.2, %v3258_v20  ;;  %3136 = vadd.xlane.f32.xlu2 %v3135_v51  ;;  %v3952_v51 = vmul.f32 0.2, %v3936_v43 }
 0xc1f   :  { %v3282_v49 = vsel %vm3266_vm8, %v3258_v20, %v3274_v19  ;;  %v2871_v20 = vsub.f32 %v9516_v22, %v9515_v24  ;;  %v3555_v19 = vmul.f32 1.442695, %v3546_v63  ;;  %v3960_v63 = vsel %vm3944_vm11, %v3936_v43, %v3952_v51 }
 0xc20   :  { %v8622_v32 = vadd.f32 %v8559_v17, %v3282_v49  ;;  %v8661_v24 = vadd.f32 %v8559_v17, %v3960_v63  ;;  %v3501_v22 = vmul.f32 0.2, %v3485_v9  ;;  %v2626_v43 = vmul.f32 1.442695, %v2613_v41 }
 0xc21   :  { %v2883_v49 = vmul.f32 1.442695, %v2871_v20  ;;  %5625 = vpow2.f32 %v3555_v19  ;;  %v9522_v19 = vld [vmem:[#allocation10_spill] sm:$0xff] }
 0xc22   :  { %v3304_v8 = vsel %vm352_vm3, %v8622_v32, -inf  ;;  %v3982_v51 = vsel %vm352_vm3, %v8661_v24, -inf  ;;  %v3712_v13 = vadd.f32 %v8248_v59, %v9522_v19  ;;  %v3509_v17 = vsel %vm3493_vm12, %v3485_v9, %v3501_v22  ;;  %v8695_v19 = vld [vmem:[%s9273_s1 + $0x28] sm:$0xff]  ;;  %v8712_v61 = vpop.permute.xlu0 %3251 }
 0xc23   :  { %3305 = vmax.xlane.f32.xlu0 %v3304_v8  ;;  %v3319_v8 = vsub.f32 %v8381_v18, %v8495_v30  ;;  %5627 = vpow2.f32 %v2883_v49  ;;  %v3530_v18 = vsel %vm352_vm3, %v8654_v15, -inf }
 0xc24   :  { %v3728_v28 = vmul.f32 0.2, %v3712_v13  ;;  %vm3720_vm13 = vcmp.gt.f32.partialorder %v3712_v13, 0.0 }
 0xc25   :  { %3543 = vmax.xlane.f32.xlu2 %v3542_v57  ;;  %v3313_v57 = vsel %vm352_vm3, %v8645_v10, -inf  ;;  %v3327_v20 = vmul.f32 1.442695, %v3319_v8  ;;  %v9524_v8 = vld [vmem:[#allocation19_spill] sm:$0xff] }
 0xc27   :  { %v8665_v30 = vpop.eup %5625  ;;  %5629 = vpow2.f32 %v3327_v20  ;;  %v3259_v20 = vadd.f32 %v8373_v58, %v8419_v2 }
 0xc28   :  { %9521 = vst [vmem:[#allocation30_spill] sm:$0xff] %v8665_v30  ;;  %v3572_v6 = vsel %vm352_vm3, %v8665_v30, 0.0  ;;  %5631 = vpow2.f32 %v2626_v43 }
 0xc29   :  { %v8671_v49 = vpop.eup %5627  ;;  %vm3267_vm14 = vcmp.gt.f32.partialorder %v3259_v20, 0.0 }
 0xc2a   :  { %v2903_v55 = vsel %vm352_vm3, %v8671_v49, 0.0 }
 0xc2b   :  { %2645 = vadd.xlane.f32.xlu0 %v2644_v56  ;;  %v9523_v56 = vld [vmem:[#allocation25_spill] sm:$0xff] }
 0xc2c   :  { %v3097_v63 = vsub.f32 %v9524_v8, %v9523_v56  ;;  %v9527_v8 = vld [vmem:[#allocation12_spill] sm:$0xff] }
 0xc2d   :  { %3314 = vmax.xlane.f32.xlu2 %v3313_v57  ;;  %v8678_v57 = vadd.f32 %v8569_v12, %v3509_v17  ;;  %v8682_v9 = vpop.eup %5629 }
 0xc2e   :  { %9525 = vst [vmem:[#allocation20_spill] sm:$0xff] %v8682_v9  ;;  %v3109_v41 = vmul.f32 1.442695, %v3097_v63  ;;  %v8688_v43 = vpop.eup %5631  ;;  %v9528_v63 = vld [vmem:[#allocation35_spill] sm:$0xff] }
 0xc2f   :  { %v3533_v22 = vsel %vm352_vm3, %v8678_v57, -inf  ;;  %v2647_v2 = vsel %vm352_vm3, %v8688_v43, 0.0 }
 0xc30   :  { %3531 = vmax.xlane.f32.xlu1 %v3530_v18  ;;  %v3736_v18 = vsel %vm3720_vm13, %v3712_v13, %v3728_v28  ;;  %5633 = vpow2.f32 %v3109_v41  ;;  %v9526_v13 = vld [vmem:[#allocation9_spill] sm:$0xff]  ;;  %v2874_v28 = vsub.f32 %v9528_v63, %v9527_v8 }
 0xc31   :  { %v8698_v17 = vadd.f32 %v8695_v19, %v3736_v18  ;;  %v3486_v56 = vadd.f32 %v8291_v1, %v9526_v13 }
 0xc33   :  { %3983 = vmax.xlane.f32.xlu0 %v3982_v51  ;;  %v3343_v51 = vsel %vm352_vm3, %v8682_v9, 0.0  ;;  %v3502_v18 = vmul.f32 0.2, %v3486_v56  ;;  %vm3494_vm15 = vcmp.gt.f32.partialorder %v3486_v56, 0.0  ;;  %v2889_v9 = vmul.f32 1.442695, %v2874_v28 }
 0xc34   :  { %v3937_v28 = vadd.f32 %v8398_v14, %v8431_v50  ;;  %v9532_v50 = vld [vmem:[#allocation36_spill] sm:$0xff] }
 0xc35   :  { %3573 = vadd.xlane.f32.xlu2 %v3572_v6  ;;  %v3275_v6 = vmul.f32 0.2, %v3259_v20  ;;  %v3510_v8 = vsel %vm3494_vm15, %v3486_v56, %v3502_v18  ;;  %5635 = vpow2.f32 %v2889_v9  ;;  %v3260_v18 = vadd.f32 %v8373_v58, %v8493_v0 }
 0xc36   :  { %vm3945_vm0 = vcmp.gt.f32.partialorder %v3937_v28, 0.0 }
 0xc37   :  { %v3283_v41 = vsel %vm3267_vm14, %v3259_v20, %v3275_v6  ;;  %v2643_v20 = vpop.xlane.xlu1 %2642  ;;  %v8719_v6 = vpop.permute.xlu2 %3925  ;;  %v3276_v46 = vmul.f32 0.2, %v3260_v18  ;;  %vm3268_vm1 = vcmp.gt.f32.partialorder %v3260_v18, 0.0 }
 0xc38   :  { %2904 = vadd.xlane.f32.xlu1 %v2903_v55  ;;  %v3762_v55 = vsel %vm352_vm3, %v8698_v17, -inf  ;;  %5637 = vrcp.f32 %v2643_v20 }
 0xc3b   :  { %3534 = vmax.xlane.f32.xlu0 %v3533_v22  ;;  %v8708_v22 = vpop.eup %5633 }
 0xc3c   :  { %v3129_v13 = vsel %vm352_vm3, %v8708_v22, 0.0  ;;  %v8728_v56 = vpop.eup %5635 }
 0xc3d   :  { %3344 = vadd.xlane.f32.xlu2 %v3343_v51  ;;  %v9529_v51 = vld [vmem:[#allocation33_spill] sm:$0xff]  ;;  %9531 = vst [vmem:[#allocation31_spill] sm:$0xff] %v8728_v56 }
 0xc3e   :  { %v2437_v30 = vsub.f32 %v9530_v39, %v9529_v51  ;;  %v3100_v51 = vsub.f32 %v9532_v50, %v8385_v3  ;;  %v9533_v3 = vld [vmem:[#allocation13_spill] sm:$0xff]  ;;  %v9534_v50 = vld [vmem:[#allocation23_spill] sm:$0xff] }
 0xc3f   :  { %v2614_v25 = vsub.f32 %v9534_v50, %v9533_v3 }
 0xc40   :  { %2648 = vadd.xlane.f32.xlu1 %v2647_v2  ;;  %v8715_v2 = vadd.f32 %v8569_v12, %v3283_v41  ;;  %v2451_v63 = vmul.f32 1.442695, %v2437_v30  ;;  %v3953_v30 = vmul.f32 0.2, %v3937_v28  ;;  %v3115_v10 = vmul.f32 1.442695, %v3100_v51 }
 0xc42   :  { %v3307_v39 = vsel %vm352_vm3, %v8715_v2, -inf  ;;  %5639 = vpow2.f32 %v2451_v63  ;;  %v2912_v63 = vsel %vm352_vm3, %v8728_v56, 0.0 }
 0xc43   :  { %3763 = vmax.xlane.f32.xlu0 %v3762_v55  ;;  %v8726_v55 = vadd.f32 %v8695_v19, %v3510_v8  ;;  %v5638_v8 = vpop.eup %5637 }
 0xc45   :  { %v3536_v9 = vsel %vm352_vm3, %v8726_v55, -inf }
 0xc48   :  { %3130 = vadd.xlane.f32.xlu1 %v3129_v13  ;;  %v3128_v13 = vpop.xlane.xlu2 %3127  ;;  %v8738_v20 = vpop.eup %5639 }
 0xc4b   :  { %3308 = vmax.xlane.f32.xlu0 %v3307_v39  ;;  %v3961_v39 = vsel %vm3945_vm0, %v3937_v28, %v3953_v30  ;;  %v2473_v28 = vsel %vm352_vm3, %v8738_v20, 0.0 }
 0xc4c   :  { %v8745_v56 = vadd.f32 %v8569_v12, %v3961_v39 }
 0xc4d   :  { %v2640_v41 = vpop.xlane.xlu0 %2639 }
 0xc4e   :  { %5641 = vrcp.f32 %v2640_v41 }
 0xc4f   :  { %5643 = vrcp.f32 %v3128_v13  ;;  %v3284_v13 = vsel %vm3268_vm1, %v3260_v18, %v3276_v46 }
 0xc50   :  { %3537 = vmax.xlane.f32.xlu1 %v3536_v9  ;;  %v2667_v9 = vmul.f32 %v5638_v8, %v8405_v26  ;;  %v3985_v26 = vsel %vm352_vm3, %v8745_v56, -inf  ;;  %v8755_v12 = vadd.f32 %v8695_v19, %v3284_v13 }
 0xc52   :  { %v3310_v39 = vsel %vm352_vm3, %v8755_v12, -inf }
 0xc53   :  { %2913 = vadd.xlane.f32.xlu0 %v2912_v63 }
 0xc54   :  { %v5642_v41 = vpop.eup %5641 }
 0xc55   :  { %v3125_v11 = vpop.xlane.xlu0 %3124  ;;  %v2666_v0 = vmul.f32 %v5642_v41, %v8503_v5  ;;  %v5644_v51 = vpop.eup %5643  ;;  %v2628_v5 = vmul.f32 1.442695, %v2614_v25 }
 0xc56   :  { %5645 = vrcp.f32 %v3125_v11  ;;  %v3713_v11 = vadd.f32 %v8248_v59, %v8480_v42  ;;  %v3152_v63 = vmul.f32 %v5644_v51, %v8473_v54  ;;  %v3975_v42 = vpop.xlane.xlu1 %3974  ;;  %v3262_v54 = vadd.f32 %v8373_v58, %v8712_v61  ;;  %v9535_v51 = vld [vmem:[#allocation28_spill] sm:$0xff] }
 0xc57   :  { %v2681_v30 = vpack.c.bf16 %v2667_v9, %v2666_v0  ;;  %5647 = vpow2.f32 %v3115_v10  ;;  %v3771_v58 = vsub.f32 %v9535_v51, %v8445_v27  ;;  %v3320_v27 = vsub.f32 %v8462_v34, %v8604_v23 }
 0xc58   :  { %2474 = vadd.xlane.f32.xlu1 %v2473_v28  ;;  %5649 = vpow2.f32 %v2628_v5  ;;  %v3729_v25 = vmul.f32 0.2, %v3713_v11  ;;  %vm3721_vm2 = vcmp.gt.f32.partialorder %v3713_v11, 0.0  ;;  %v3278_v28 = vmul.f32 0.2, %v3262_v54 }
 0xc59   :  { %4972 = vmatmul.msk.bf16.gmra.mxu0 %vm352_vm3, %v2681_v30  ;;  %vm3270_vm4 = vcmp.gt.f32.partialorder %v3262_v54, 0.0 }
 0xc5a   :  { %v3286_v5 = vsel %vm3270_vm4, %v3262_v54, %v3278_v28  ;;  %v3329_v28 = vmul.f32 1.442695, %v3320_v27 }
 0xc5b   :  { %3986 = vmax.xlane.f32.xlu0 %v3985_v26  ;;  %v3779_v26 = vmul.f32 1.442695, %v3771_v58 }
 0xc5c   :  { %v5646_v8 = vpop.eup %5645 }
 0xc5d   :  { %v3151_v46 = vmul.f32 %v5646_v8, %v8512_v4  ;;  %v3529_v10 = vpop.xlane.xlu0 %3528  ;;  %v8759_v18 = vpop.eup %5647  ;;  %v3737_v4 = vsel %vm3721_vm2, %v3713_v11, %v3729_v25  ;;  %v5862_v8 = vld [vmem:[%s9273_s1 + $0x38] sm:$0xff]  ;;  %5651 = vpow2.f32 %v3779_v26  ;;  %v3997_v26 = vsub.f32 %v8413_v52, %v3975_v42 }
 0xc5e   :  { %v3138_v0 = vsel %vm352_vm3, %v8759_v18, 0.0  ;;  %v8768_v9 = vpop.eup %5649  ;;  %v8773_v50 = vadd.f32 %v8642_v37, %v3737_v4  ;;  %v8777_v13 = vpop.xlane.xlu1 %3977  ;;  %v3547_v34 = vsub.f32 %v8532_v16, %v3529_v10  ;;  %5653 = vpow2.f32 %v3329_v28 }
 0xc5f   :  { %v3166_v41 = vpack.c.bf16 %v3152_v63, %v3151_v46  ;;  %v2650_v30 = vsel %vm352_vm3, %v8768_v9, 0.0  ;;  %v8786_v63 = vadd.f32 %v5862_v8, %v3286_v5  ;;  %v3487_v46 = vadd.f32 %v8291_v1, %v8443_v62 }
 0xc60   :  { %3311 = vmax.xlane.f32.xlu1 %v3310_v39  ;;  %v3765_v61 = vsel %vm352_vm3, %v8773_v50, -inf  ;;  %v3714_v5 = vadd.f32 %v8248_v59, %v8489_v38  ;;  %v3557_v16 = vmul.f32 1.442695, %v3547_v34 }
 0xc61   :  { %4984 = vmatmul.msk.bf16.gmra.mxu1 %vm352_vm3, %v3166_v41  ;;  %v3316_v41 = vsel %vm352_vm3, %v8786_v63, -inf  ;;  %v3503_v4 = vmul.f32 0.2, %v3487_v46  ;;  %vm3495_vm6 = vcmp.gt.f32.partialorder %v3487_v46, 0.0 }
 0xc62   :  { %vm3722_vm8 = vcmp.gt.f32.partialorder %v3714_v5, 0.0 }
 0xc63   :  { %3139 = vadd.xlane.f32.xlu0 %v3138_v0  ;;  %v8795_v0 = vpop.xlane.xlu2 %3302  ;;  %v8800_v51 = vpop.eup %5651 }
 0xc65   :  { %v8770_v3 = vpop.xlane.xlu0 %3754 }
 0xc68   :  { %2651 = vadd.xlane.f32.xlu1 %v2650_v30 }
 0xc6b   :  { %3766 = vmax.xlane.f32.xlu0 %v3765_v61  ;;  %v3511_v61 = vsel %vm3495_vm6, %v3487_v46, %v3503_v4  ;;  %v3730_v46 = vmul.f32 0.2, %v3714_v5  ;;  %v8814_v59 = vpop.xlane.xlu2 %2907 }
 0xc6c   :  { %v8812_v10 = vadd.f32 %v8642_v37, %v3511_v61 }
 0xc6d   :  { %v3758_v11 = vpop.xlane.xlu0 %3757  ;;  %v3738_v34 = vsel %vm3722_vm8, %v3714_v5, %v3730_v46  ;;  %v9537_v5 = vld [vmem:[#allocation11_spill] sm:$0xff] }
 0xc6e   :  { %v3774_v28 = vsub.f32 %v8562_v45, %v3758_v11  ;;  %v3772_v46 = vsub.f32 %v9537_v5, %v8448_v60 }
 0xc70   :  { %v3922_v25 = vpop.permute.xlu1 %3921 }
 0xc71   :  { %v3938_v39 = vadd.f32 %v8398_v14, %v3922_v25 }
 0xc73   :  { %vm3946_vm5 = vcmp.gt.f32.partialorder %v3938_v39, 0.0  ;;  %v3954_v54 = vmul.f32 0.2, %v3938_v39  ;;  %3317 = vmax.xlane.f32.xlu0 %v3316_v41  ;;  %v8818_v41 = vpop.eup %5653  ;;  %v3981_v45 = vpop.xlane.xlu2 %3980 }
 0xc75   :  { %v2469_v30 = vpop.xlane.xlu0 %2468  ;;  %v3962_v1 = vsel %vm3946_vm5, %v3938_v39, %v3954_v54  ;;  %v4005_v39 = vmul.f32 1.442695, %v3997_v26  ;;  %v9536_v54 = vld [vmem:[#allocation21_spill] sm:$0xff]  ;;  %v3785_v26 = vmul.f32 1.442695, %v3774_v28 }
 0xc76   :  { %v8798_v62 = vadd.f32 %v8695_v19, %v3962_v1  ;;  %v3795_v19 = vsel %vm352_vm3, %v8800_v51, 0.0  ;;  %5655 = vrcp.f32 %v2469_v30  ;;  %v3545_v4 = vsub.f32 %v9536_v54, %v8439_v53 }
 0xc77   :  { %v3539_v30 = vsel %vm352_vm3, %v8812_v10, -inf }
 0xc78   :  { %v3930_v23 = vpop.permute.xlu1 %3929  ;;  %v3988_v58 = vsel %vm352_vm3, %v8798_v62, -inf  ;;  %v3553_v61 = vmul.f32 1.442695, %v3545_v4 }
 0xc79   :  { %v3940_v25 = vadd.f32 %v8398_v14, %v3930_v23  ;;  %3989 = vmax.xlane.f32.xlu1 %v3988_v58  ;;  %v3346_v58 = vsel %vm352_vm3, %v8818_v41, 0.0 }
 0xc7b   :  { %vm3948_vm7 = vcmp.gt.f32.partialorder %v3940_v25, 0.0  ;;  %v3956_v27 = vmul.f32 0.2, %v3940_v25  ;;  %3796 = vadd.xlane.f32.xlu0 %v3795_v19  ;;  %v8851_v4 = vpop.xlane.xlu2 %3133 }
 0xc7c   :  { %v5656_v23 = vpop.eup %5655 }
 0xc7d   :  { %v2472_v52 = vpop.xlane.xlu0 %2471  ;;  %v3964_v38 = vsel %vm3948_vm7, %v3940_v25, %v3956_v27  ;;  %v8829_v25 = vadd.f32 %v5862_v8, %v3738_v34  ;;  %v2491_v11 = vmul.f32 %v5656_v23, %v8580_v47 }
 0xc7e   :  { %5657 = vrcp.f32 %v2472_v52  ;;  %v8816_v42 = vadd.f32 %v5862_v8, %v3964_v38  ;;  %v3999_v52 = vsub.f32 %v8538_v7, %v3981_v45  ;;  %v3781_v38 = vmul.f32 1.442695, %v3772_v46 }
 0xc7f   :  { %5659 = vpow2.f32 %v3557_v16  ;;  %v3768_v8 = vsel %vm352_vm3, %v8829_v25, -inf }
 0xc80   :  { %v3994_v1 = vsel %vm352_vm3, %v8816_v42, -inf  ;;  %5661 = vpow2.f32 %v4005_v39  ;;  %v4009_v60 = vmul.f32 1.442695, %v3999_v52 }
 0xc81   :  { %3540 = vmax.xlane.f32.xlu1 %v3539_v30  ;;  %3995 = vmax.xlane.f32.xlu2 %v3994_v1  ;;  %5663 = vpow2.f32 %v3553_v61  ;;  %v3939_v30 = vadd.f32 %v8398_v14, %v8719_v6 }
 0xc82   :  { %5665 = vpow2.f32 %v3785_v26 }
 0xc83   :  { %3347 = vadd.xlane.f32.xlu0 %v3346_v58  ;;  %5667 = vpow2.f32 %v3781_v38  ;;  %v3955_v23 = vmul.f32 0.2, %v3939_v30  ;;  %vm3947_vm9 = vcmp.gt.f32.partialorder %v3939_v30, 0.0  ;;  %v8867_v45 = vpop.xlane.xlu2 %3760 }
 0xc84   :  { %v5658_v53 = vpop.eup %5657  ;;  %5669 = vpow2.f32 %v4009_v60 }
 0xc85   :  { %v2492_v19 = vmul.f32 %v5658_v53, %v8591_v35  ;;  %v8833_v27 = vpop.eup %5659  ;;  %v3998_v53 = vsub.f32 %v8520_v40, %v8777_v13  ;;  %v3963_v6 = vsel %vm3947_vm9, %v3939_v30, %v3955_v23  ;;  %v3773_v40 = vsub.f32 %v8544_v31, %v8770_v3 }
 0xc86   :  { %v8835_v16 = vpop.eup %5661  ;;  %v3575_v47 = vsel %vm352_vm3, %v8833_v27, 0.0 }
 0xc87   :  { %v2505_v39 = vpack.c.bf16 %v2492_v19, %v2491_v11  ;;  %v4021_v35 = vsel %vm352_vm3, %v8835_v16, 0.0  ;;  %v8847_v54 = vpop.eup %5663  ;;  %v4007_v11 = vmul.f32 1.442695, %v3998_v53  ;;  %v8872_v19 = vadd.f32 %v8642_v37, %v3963_v6 }
 0xc88   :  { %v8849_v7 = vpop.eup %5665  ;;  %v3569_v28 = vsel %vm352_vm3, %v8847_v54, 0.0  ;;  %v3783_v46 = vmul.f32 1.442695, %v3773_v40  ;;  %v3321_v37 = vsub.f32 %v8483_v36, %v8795_v0 }
 0xc89   :  { %4977 = vmatmul.msk.bf16.gmra.mxu2 %vm352_vm3, %v2505_v39  ;;  %3769 = vmax.xlane.f32.xlu1 %v3768_v8  ;;  %v3804_v1 = vsel %vm352_vm3, %v8849_v7, 0.0  ;;  %v8859_v34 = vpop.eup %5667  ;;  %5671 = vpow2.f32 %v4007_v11  ;;  %v3991_v13 = vsel %vm352_vm3, %v8872_v19, -inf }
 0xc8a   :  { %3576 = vadd.xlane.f32.xlu2 %v3575_v47  ;;  %v8861_v58 = vpop.eup %5669  ;;  %v3798_v26 = vsel %vm352_vm3, %v8859_v34, 0.0  ;;  %5673 = vpow2.f32 %v3783_v46  ;;  %v3331_v60 = vmul.f32 1.442695, %v3321_v37 }
 0xc8b   :  { %4022 = vadd.xlane.f32.xlu0 %v4021_v35  ;;  %v4027_v14 = vsel %vm352_vm3, %v8861_v58, 0.0  ;;  %v8878_v39 = vpop.xlane.xlu2 %2477 }
 0xc8f   :  { %v8881_v47 = vpop.eup %5671 }
 0xc90   :  { %v4024_v3 = vsel %vm352_vm3, %v8881_v47, 0.0  ;;  %v8889_v30 = vpop.eup %5673 }
 0xc91   :  { %3570 = vadd.xlane.f32.xlu1 %v3569_v28 }
 0xc92   :  { %3805 = vadd.xlane.f32.xlu2 %v3804_v1 }
 0xc93   :  { %v2911_v1 = vpop.xlane.xlu2 %2910 }
 0xc96   :  { %v3306_v61 = vpop.xlane.xlu0 %3305 }
 0xc97   :  { %v3322_v31 = vsub.f32 %v8622_v32, %v3306_v61 }
 0xc99   :  { %3799 = vadd.xlane.f32.xlu1 %v3798_v26  ;;  %v3333_v28 = vmul.f32 1.442695, %v3322_v31 }
 0xc9a   :  { %4028 = vadd.xlane.f32.xlu2 %v4027_v14 }
 0xc9b   :  { %v8907_v37 = vpop.xlane.xlu2 %2654 }
 0xc9e   :  { %v2646_v5 = vpop.xlane.xlu0 %2645 }
 0xca1   :  { %3992 = vmax.xlane.f32.xlu1 %v3991_v13 }
 0xca3   :  { %v3532_v52 = vpop.xlane.xlu1 %3531 }
 0xca4   :  { %v3548_v8 = vsub.f32 %v8654_v15, %v3532_v52  ;;  %v3775_v52 = vsub.f32 %v8572_v33, %v8867_v45 }
 0xca6   :  { %v3559_v35 = vmul.f32 1.442695, %v3548_v8  ;;  %v3984_v38 = vpop.xlane.xlu0 %3983  ;;  %v3787_v33 = vmul.f32 1.442695, %v3775_v52 }
 0xca7   :  { %v4000_v0 = vsub.f32 %v8661_v24, %v3984_v38 }
 0xca8   :  { %5675 = vpow2.f32 %v3559_v35 }
 0xca9   :  { %4025 = vadd.xlane.f32.xlu1 %v4024_v3  ;;  %5677 = vrcp.f32 %v8814_v59  ;;  %v3801_v59 = vsel %vm352_vm3, %v8889_v30, 0.0  ;;  %v4011_v14 = vmul.f32 1.442695, %v4000_v0 }
 0xcab   :  { %v2905_v15 = vpop.xlane.xlu1 %2904 }
 0xcac   :  { %5679 = vrcp.f32 %v2905_v15 }
 0xcad   :  { %5681 = vpow2.f32 %v3331_v60 }
 0xcae   :  { %v8891_v36 = vpop.eup %5675  ;;  %v3535_v32 = vpop.xlane.xlu0 %3534  ;;  %5683 = vpow2.f32 %v3333_v28 }
 0xcaf   :  { %v3549_v23 = vsub.f32 %v8678_v57, %v3535_v32  ;;  %v3578_v61 = vsel %vm352_vm3, %v8891_v36, 0.0  ;;  %v5678_v53 = vpop.eup %5677  ;;  %5685 = vrcp.f32 %v2646_v5 }
 0xcb0   :  { %3579 = vadd.xlane.f32.xlu0 %v3578_v61  ;;  %v2928_v6 = vmul.f32 %v5678_v53, %v8487_v48 }
 0xcb1   :  { %3802 = vadd.xlane.f32.xlu1 %v3801_v59  ;;  %v3561_v11 = vmul.f32 1.442695, %v3549_v23 }
 0xcb2   :  { %v5680_v26 = vpop.eup %5679 }
 0xcb3   :  { %v2927_v24 = vmul.f32 %v5680_v26, %v8671_v49  ;;  %v2649_v40 = vpop.xlane.xlu1 %2648  ;;  %v8901_v13 = vpop.eup %5681 }
 0xcb4   :  { %5687 = vrcp.f32 %v2649_v40  ;;  %v8903_v57 = vpop.eup %5683  ;;  %v3349_v49 = vsel %vm352_vm3, %v8901_v13, 0.0 }
 0xcb5   :  { %v2941_v46 = vpack.c.bf16 %v2928_v6, %v2927_v24  ;;  %5689 = vpow2.f32 %v4011_v14  ;;  %v5686_v5 = vpop.eup %5685  ;;  %v3352_v35 = vsel %vm352_vm3, %v8903_v57, 0.0 }
 0xcb6   :  { %v3764_v8 = vpop.xlane.xlu0 %3763  ;;  %5691 = vpow2.f32 %v3561_v11  ;;  %v2668_v3 = vmul.f32 %v5686_v5, %v8637_v44  ;;  %v8945_v5 = vpop.f32.mrf.mxu0 }
 0xcb7   :  { %v3776_v48 = vsub.f32 %v8698_v17, %v3764_v8  ;;  %4981 = vmatmul.msk.bf16.gmra.mxu3 %vm352_vm3, %v2941_v46  ;;  %5693 = vrcp.f32 %v8851_v4 }
 0xcb8   :  { %3350 = vadd.xlane.f32.xlu0 %v3349_v49 }
 0xcb9   :  { %3353 = vadd.xlane.f32.xlu1 %v3352_v35  ;;  %v3789_v45 = vmul.f32 1.442695, %v3776_v48  ;;  %v8941_v48 = vpop.f32.mrf.mxu2 }
 0xcba   :  { %v5688_v38 = vpop.eup %5687 }
 0xcbb   :  { %v3131_v31 = vpop.xlane.xlu1 %3130  ;;  %v2669_v17 = vmul.f32 %v5688_v38, %v8688_v43  ;;  %v8918_v60 = vpop.eup %5689  ;;  %v9538_v38 = vld [vmem:[#allocation31_spill] sm:$0xff] }
 0xcbc   :  { %5695 = vrcp.f32 %v3131_v31  ;;  %v8920_v28 = vpop.eup %5691  ;;  %v4030_v4 = vsel %vm352_vm3, %v8918_v60, 0.0  ;;  %v3137_v43 = vpop.xlane.xlu2 %3136 }
 0xcbd   :  { %v2682_v15 = vpack.c.bf16 %v2669_v17, %v2668_v3  ;;  %5697 = vpow2.f32 %v3787_v33  ;;  %v5694_v32 = vpop.eup %5693  ;;  %v3581_v44 = vsel %vm352_vm3, %v8920_v28, 0.0  ;;  %v8952_v17 = vpop.f32.mrf.mxu3 }
 0xcbe   :  { %v3309_v0 = vpop.xlane.xlu0 %3308  ;;  %5699 = vpow2.f32 %v3789_v45  ;;  %v3154_v61 = vmul.f32 %v5694_v32, %v8548_v29 }
 0xcbf   :  { %4973 = vmatmul.msk.bf16.gmra.mxu0 %vm352_vm3, %v2682_v15  ;;  %5701 = vrcp.f32 %v2911_v1  ;;  %v3323_v11 = vsub.f32 %v8715_v2, %v3309_v0  ;;  %v9539_v0 = vld [vmem:[#allocation17_spill] sm:$0xff] }
 0xcc0   :  { %4031 = vadd.xlane.f32.xlu0 %v4030_v4 }
 0xcc1   :  { %3582 = vadd.xlane.f32.xlu1 %v3581_v44 }
 0xcc2   :  { %v5696_v23 = vpop.eup %5695 }
 0xcc3   :  { %v3153_v53 = vmul.f32 %v5696_v23, %v8708_v22  ;;  %v3538_v59 = vpop.xlane.xlu1 %3537  ;;  %v8929_v26 = vpop.eup %5697 }
 0xcc4   :  { %v3550_v14 = vsub.f32 %v8726_v55, %v3538_v59  ;;  %v8932_v6 = vpop.eup %5699  ;;  %v3807_v29 = vsel %vm352_vm3, %v8929_v26, 0.0  ;;  %v3335_v55 = vmul.f32 1.442695, %v3323_v11  ;;  %v3544_v52 = vpop.xlane.xlu2 %3543 }
 0xcc5   :  { %v3167_v24 = vpack.c.bf16 %v3154_v61, %v3153_v53  ;;  %v3810_v22 = vsel %vm352_vm3, %v8932_v6, 0.0  ;;  %v5702_v1 = vpop.eup %5701  ;;  %v3552_v4 = vsub.f32 %v9539_v0, %v3544_v52  ;;  %v8960_v59 = vpop.f32.mrf.mxu1 }
 0xcc6   :  { %v3563_v40 = vmul.f32 1.442695, %v3550_v14  ;;  %v2914_v46 = vpop.xlane.xlu0 %2913  ;;  %v2929_v35 = vmul.f32 %v5702_v1, %v8594_v21  ;;  %v9540_v21 = vld [vmem:[#allocation16_spill] sm:$0xff]  ;;  %v2973_v52 = vpop.f32.mrf.mxu3 }
 0xcc7   :  { %5703 = vrcp.f32 %v2914_v46  ;;  %4985 = vmatmul.msk.bf16.gmra.mxu1 %vm352_vm3, %v3167_v24  ;;  %v2755_v24 = vpop.f32.mrf.mxu2  ;;  %v3567_v11 = vmul.f32 1.442695, %v3552_v4 }
 0xcc8   :  { %5705 = vpow2.f32 %v3563_v40  ;;  %3808 = vadd.xlane.f32.xlu0 %v3807_v29 }
 0xcc9   :  { %3811 = vadd.xlane.f32.xlu1 %v3810_v22  ;;  %5707 = vrcp.f32 %v8878_v39 }
 0xccb   :  { %v2475_v2 = vpop.xlane.xlu1 %2474 }
 0xccc   :  { %5709 = vrcp.f32 %v2475_v2  ;;  %v3315_v40 = vpop.xlane.xlu2 %3314 }
 0xccd   :  { %v5704_v8 = vpop.eup %5703  ;;  %5711 = vpow2.f32 %v3335_v55 }
 0xcce   :  { %v8943_v49 = vpop.eup %5705  ;;  %v2930_v33 = vmul.f32 %v5704_v8, %v9538_v38  ;;  %v3987_v45 = vpop.xlane.xlu0 %3986 }
 0xccf   :  { %v4001_v39 = vsub.f32 %v8745_v56, %v3987_v45  ;;  %v3584_v31 = vsel %vm352_vm3, %v8943_v49, 0.0  ;;  %v5708_v3 = vpop.eup %5707 }
 0xcd0   :  { %3585 = vadd.xlane.f32.xlu2 %v3584_v31  ;;  %v2942_v15 = vpack.c.bf16 %v2930_v33, %v2929_v35  ;;  %v2494_v23 = vmul.f32 %v5708_v3, %v9540_v21  ;;  %v9542_v3 = vld [vmem:[#allocation14_spill] sm:$0xff] }
 0xcd1   :  { %v4013_v32 = vmul.f32 1.442695, %v4001_v39 }
 0xcd2   :  { %v5710_v44 = vpop.eup %5709  ;;  %4982 = vmatmul.msk.bf16.gmra.mxu3 %vm352_vm3, %v2942_v15 }
 0xcd3   :  { %v2493_v61 = vmul.f32 %v5710_v44, %v8738_v20  ;;  %5713 = vpow2.f32 %v4013_v32  ;;  %v3312_v56 = vpop.xlane.xlu1 %3311  ;;  %v8958_v53 = vpop.eup %5711 }
 0xcd4   :  { %v3324_v14 = vsub.f32 %v8755_v12, %v3312_v56  ;;  %5715 = vrcp.f32 %v3137_v43  ;;  %v3355_v20 = vsel %vm352_vm3, %v8958_v53, 0.0  ;;  %v9541_v12 = vld [vmem:[#allocation29_spill] sm:$0xff] }
 0xcd5   :  { %v2506_v46 = vpack.c.bf16 %v2494_v23, %v2493_v61  ;;  %v3325_v43 = vsub.f32 %v9541_v12, %v3315_v40 }
 0xcd6   :  { %v3337_v29 = vmul.f32 1.442695, %v3324_v14  ;;  %v3140_v22 = vpop.xlane.xlu0 %3139  ;;  %v2714_v55 = vpop.f32.mrf.mxu0 }
 0xcd7   :  { %5717 = vrcp.f32 %v3140_v22  ;;  %v2756_v1 = vadd.f32 %v2755_v24, %v2714_v55  ;;  %4978 = vmatmul.msk.bf16.gmra.mxu2 %vm352_vm3, %v2506_v46  ;;  %v3339_v39 = vmul.f32 1.442695, %v3325_v43  ;;  %v3574_v14 = vpop.xlane.xlu2 %3573  ;;  %v9543_v24 = vld [vmem:[#allocation15_spill] sm:$0xff] }
 0xcd8   :  { %5719 = vpow2.f32 %v3337_v29  ;;  %3356 = vadd.xlane.f32.xlu2 %v3355_v20 }
 0xcd9   :  { %v8966_v2 = vpop.eup %5713  ;;  %5721 = vpow2.f32 %v3567_v11  ;;  %v2990_v8 = vadd.f32 %v2973_v52, %v2756_v1 }
 0xcda   :  { %5723 = vrcp.f32 %v8907_v37  ;;  %v4033_v35 = vsel %vm352_vm3, %v8966_v2, 0.0  ;;  %v5716_v38 = vpop.eup %5715 }
 0xcdb   :  { %4034 = vadd.xlane.f32.xlu1 %v4033_v35  ;;  %v2652_v33 = vpop.xlane.xlu1 %2651  ;;  %v3155_v15 = vmul.f32 %v5716_v38, %v9542_v3 }
 0xcdc   :  { %5725 = vrcp.f32 %v2652_v33 }
 0xcdd   :  { %v5718_v45 = vpop.eup %5717  ;;  %5727 = vpow2.f32 %v3339_v39 }
 0xcde   :  { %v8972_v31 = vpop.eup %5719  ;;  %v3156_v0 = vmul.f32 %v5718_v45, %v8759_v18  ;;  %v3199_v4 = vpop.f32.mrf.mxu1 }
 0xcdf   :  { %v3767_v32 = vpop.xlane.xlu0 %3766  ;;  %v8976_v44 = vpop.eup %5721  ;;  %v8978_v37 = vadd.f32 %v3199_v4, %v2990_v8  ;;  %v3358_v21 = vsel %vm352_vm3, %v8972_v31, 0.0 }
 0xce0   :  { %v5724_v23 = vpop.eup %5723  ;;  %3359 = vadd.xlane.f32.xlu0 %v3358_v21  ;;  %v3168_v61 = vpack.c.bf16 %v3156_v0, %v3155_v15  ;;  %v3590_v18 = vsel %vm352_vm3, %v8976_v44, 0.0  ;;  %v3345_v1 = vpop.xlane.xlu2 %3344  ;;  %v3777_v12 = vsub.f32 %v8773_v50, %v3767_v32 }
 0xce1   :  { %v2671_v11 = vmul.f32 %v5724_v23, %v9543_v24 }
 0xce2   :  { %v5726_v56 = vpop.eup %5725  ;;  %4986 = vmatmul.msk.bf16.gmra.mxu1 %vm352_vm3, %v3168_v61  ;;  %v9544_v61 = vld [vmem:[#allocation20_spill] sm:$0xff] }
 0xce3   :  { %v2670_v40 = vmul.f32 %v5726_v56, %v8768_v9  ;;  %3591 = vadd.xlane.f32.xlu1 %v3590_v18  ;;  %v8987_v22 = vpop.eup %5727  ;;  %v3791_v9 = vmul.f32 1.442695, %v3777_v12 }
 0xce4   :  { %v3361_v55 = vsel %vm352_vm3, %v8987_v22, 0.0 }
 0xce5   :  { %v2683_v46 = vpack.c.bf16 %v2671_v11, %v2670_v40 }
 0xce7   :  { %v3318_v29 = vpop.xlane.xlu0 %3317  ;;  %4974 = vmatmul.msk.bf16.gmra.mxu0 %vm352_vm3, %v2683_v46 }
 0xce8   :  { %v3326_v15 = vsub.f32 %v8786_v63, %v3318_v29 }
 0xcea   :  { %v3341_v32 = vmul.f32 1.442695, %v3326_v15 }
 0xceb   :  { %3362 = vadd.xlane.f32.xlu1 %v3361_v55 }
 0xcec   :  { %v3990_v20 = vpop.xlane.xlu1 %3989 }
 0xced   :  { %v4002_v52 = vsub.f32 %v8798_v62, %v3990_v20 }
 0xcef   :  { %v3797_v43 = vpop.xlane.xlu0 %3796  ;;  %v4015_v8 = vmul.f32 1.442695, %v4002_v52 }
 0xcf1   :  { %5729 = vpow2.f32 %v4015_v8 }
 0xcf2   :  { %5731 = vrcp.f32 %v3345_v1 }
 0xcf3   :  { %5733 = vpow2.f32 %v3791_v9  ;;  %v9545_v9 = vld [vmem:[#allocation30_spill] sm:$0xff] }
 0xcf4   :  { %v3996_v35 = vpop.xlane.xlu2 %3995  ;;  %v3541_v38 = vpop.xlane.xlu1 %3540 }
 0xcf5   :  { %v4004_v33 = vsub.f32 %v8816_v42, %v3996_v35  ;;  %v3551_v45 = vsub.f32 %v8812_v10, %v3541_v38 }
 0xcf7   :  { %v3348_v39 = vpop.xlane.xlu0 %3347  ;;  %v8996_v3 = vpop.eup %5729  ;;  %v4019_v62 = vmul.f32 1.442695, %v4004_v33  ;;  %v3565_v0 = vmul.f32 1.442695, %v3551_v45 }
 0xcf8   :  { %5735 = vrcp.f32 %v3348_v39  ;;  %v4036_v50 = vsel %vm352_vm3, %v8996_v3, 0.0  ;;  %v5732_v4 = vpop.eup %5731 }
 0xcf9   :  { %5737 = vpow2.f32 %v4019_v62  ;;  %4037 = vadd.xlane.f32.xlu2 %v4036_v50  ;;  %v9001_v42 = vpop.eup %5733  ;;  %v3375_v56 = vmul.f32 %v5732_v4, %v9544_v61 }
 0xcfa   :  { %5739 = vpow2.f32 %v3565_v0  ;;  %v3813_v29 = vsel %vm352_vm3, %v9001_v42, 0.0 }
 0xcfb   :  { %5741 = vpow2.f32 %v3341_v32 }
 0xcfc   :  { %v3770_v10 = vpop.xlane.xlu1 %3769 }
 0xcfd   :  { %v3778_v23 = vsub.f32 %v8829_v25, %v3770_v10  ;;  %v3577_v4 = vpop.xlane.xlu2 %3576 }
 0xcfe   :  { %v5736_v21 = vpop.eup %5735 }
 0xcff   :  { %v3376_v63 = vmul.f32 %v5736_v21, %v8818_v41  ;;  %v9006_v18 = vpop.eup %5737  ;;  %v3793_v24 = vmul.f32 1.442695, %v3778_v23  ;;  %v4023_v10 = vpop.xlane.xlu0 %4022 }
 0xd00   :  { %v9008_v11 = vpop.eup %5739  ;;  %v4042_v46 = vsel %vm352_vm3, %v9006_v18, 0.0 }
 0xd01   :  { %v3391_v40 = vpack.c.bf16 %v3376_v63, %v3375_v56  ;;  %5743 = vpow2.f32 %v3793_v24  ;;  %4043 = vadd.xlane.f32.xlu1 %v4042_v46  ;;  %3814 = vadd.xlane.f32.xlu2 %v3813_v29  ;;  %v3587_v25 = vsel %vm352_vm3, %v9008_v11, 0.0  ;;  %v9017_v55 = vpop.eup %5741 }
 0xd02   :  { %3588 = vadd.xlane.f32.xlu0 %v3587_v25  ;;  %5745 = vrcp.f32 %v3574_v14  ;;  %v3364_v20 = vsel %vm352_vm3, %v9017_v55, 0.0 }
 0xd03   :  { %4987 = vmatmul.msk.bf16.vlgmr.msra.gmra.mxu0 %vm352_vm3, %v3391_v40 }
 0xd04   :  { %v3571_v41 = vpop.xlane.xlu1 %3570 }
 0xd05   :  { %5747 = vrcp.f32 %v3571_v41  ;;  %v3806_v23 = vpop.xlane.xlu2 %3805 }
 0xd06   :  { %5749 = vrcp.f32 %v3797_v43 }
 0xd07   :  { %v9019_v1 = vpop.eup %5743 }
 0xd08   :  { %v3816_v52 = vsel %vm352_vm3, %v9019_v1, 0.0  ;;  %v5746_v12 = vpop.eup %5745 }
 0xd09   :  { %3365 = vadd.xlane.f32.xlu2 %v3364_v20  ;;  %v3602_v35 = vmul.f32 %v5746_v12, %v9545_v9 }
 0xd0a   :  { %3817 = vadd.xlane.f32.xlu0 %v3816_v52 }
 0xd0b   :  { %v5748_v8 = vpop.eup %5747 }
 0xd0c   :  { %v3601_v14 = vmul.f32 %v5748_v8, %v8847_v54  ;;  %v3800_v38 = vpop.xlane.xlu1 %3799  ;;  %v5750_v45 = vpop.eup %5749 }
 0xd0d   :  { %5751 = vrcp.f32 %v3800_v38  ;;  %v3827_v15 = vmul.f32 %v5750_v45, %v8800_v51  ;;  %v9045_v38 = vpop.f32.mrf.mxu2  ;;  %v9050_v45 = vpop.f32.mrf.mxu0 }
 0xd0e   :  { %v3617_v33 = vpack.c.bf16 %v3602_v35, %v3601_v14  ;;  %v4029_v14 = vpop.xlane.xlu2 %4028 }
 0xd10   :  { %4991 = vmatmul.msk.bf16.vlgmr.msrb.gmra.mxu2 %vm352_vm3, %v3617_v33  ;;  %v9047_v33 = vpop.f32.mrf.mxu3 }
 0xd13   :  { %v5752_v39 = vpop.eup %5751 }
 0xd14   :  { %v3828_v62 = vmul.f32 %v5752_v39, %v8859_v34  ;;  %v3993_v0 = vpop.xlane.xlu1 %3992 }
 0xd15   :  { %v4003_v50 = vsub.f32 %v8872_v19, %v3993_v0 }
 0xd16   :  { %v3843_v43 = vpack.c.bf16 %v3828_v62, %v3827_v15 }
 0xd17   :  { %v4017_v32 = vmul.f32 1.442695, %v4003_v50  ;;  %v2760_v50 = vpop.f32.mrf.mxu2 }
 0xd18   :  { %4995 = vmatmul.msk.bf16.vlgmr.msrb.gmra.mxu3 %vm352_vm3, %v3843_v43  ;;  %v9054_v43 = vpop.f32.mrf.mxu1 }
 0xd19   :  { %5753 = vpow2.f32 %v4017_v32 }
 0xd1a   :  { %5755 = vrcp.f32 %v4023_v10 }
 0xd1c   :  { %v4026_v54 = vpop.xlane.xlu1 %4025 }
 0xd1d   :  { %5757 = vrcp.f32 %v4026_v54 }
 0xd1e   :  { %5759 = vrcp.f32 %v3577_v4 }
 0xd1f   :  { %v9032_v21 = vpop.eup %5753  ;;  %5761 = vrcp.f32 %v3806_v23 }
 0xd20   :  { %v4039_v51 = vsel %vm352_vm3, %v9032_v21, 0.0  ;;  %v5756_v34 = vpop.eup %5755 }
 0xd21   :  { %4040 = vadd.xlane.f32.xlu0 %v4039_v51  ;;  %v4053_v56 = vmul.f32 %v5756_v34, %v8835_v16 }
 0xd23   :  { %v5758_v19 = vpop.eup %5757  ;;  %v3580_v61 = vpop.xlane.xlu0 %3579 }
 0xd24   :  { %v4054_v63 = vmul.f32 %v5758_v19, %v8881_v47  ;;  %5763 = vrcp.f32 %v3580_v61  ;;  %v3803_v24 = vpop.xlane.xlu1 %3802  ;;  %v5760_v46 = vpop.eup %5759 }
 0xd25   :  { %5765 = vrcp.f32 %v3803_v24  ;;  %v5762_v29 = vpop.eup %5761  ;;  %v3603_v20 = vmul.f32 %v5760_v46, %v8833_v27 }
 0xd26   :  { %v4069_v40 = vpack.c.bf16 %v4054_v63, %v4053_v56  ;;  %v3830_v8 = vmul.f32 %v5762_v29, %v8849_v7  ;;  %v2762_v63 = vpop.f32.mrf.mxu2 }
 0xd28   :  { %4999 = vmatmul.msk.bf16.vlgmr.msra.gmra.mxu1 %vm352_vm3, %v4069_v40 }
 0xd2a   :  { %v5764_v25 = vpop.eup %5763 }
 0xd2b   :  { %v5766_v41 = vpop.eup %5765  ;;  %v3604_v52 = vmul.f32 %v5764_v25, %v8891_v36  ;;  %v3351_v12 = vpop.xlane.xlu0 %3350 }
 0xd2c   :  { %v3829_v16 = vmul.f32 %v5766_v41, %v8889_v30  ;;  %5767 = vrcp.f32 %v3351_v12  ;;  %v3354_v47 = vpop.xlane.xlu1 %3353 }
 0xd2d   :  { %5769 = vrcp.f32 %v3354_v47  ;;  %v3618_v9 = vpack.c.bf16 %v3604_v52, %v3603_v20 }
 0xd2e   :  { %v3844_v35 = vpack.c.bf16 %v3830_v8, %v3829_v16  ;;  %5771 = vrcp.f32 %v4029_v14 }
 0xd2f   :  { %4992 = vmatmul.msk.bf16.gmra.mxu2 %vm352_vm3, %v3618_v9 }
 0xd30   :  { %4996 = vmatmul.msk.bf16.gmra.mxu3 %vm352_vm3, %v3844_v35 }
 0xd32   :  { %v5768_v27 = vpop.eup %5767 }
 0xd33   :  { %v5770_v36 = vpop.eup %5769  ;;  %v3377_v7 = vmul.f32 %v5768_v27, %v8901_v13  ;;  %v4032_v30 = vpop.xlane.xlu0 %4031 }
 0xd34   :  { %v3378_v39 = vmul.f32 %v5770_v36, %v8903_v57  ;;  %5773 = vrcp.f32 %v4032_v30  ;;  %v3583_v15 = vpop.xlane.xlu1 %3582  ;;  %v5772_v0 = vpop.eup %5771 }
 0xd35   :  { %v4055_v32 = vmul.f32 %v5772_v0, %v8861_v58 }
 0xd36   :  { %v3392_v62 = vpack.c.bf16 %v3378_v39, %v3377_v7 }
 0xd38   :  { %4988 = vmatmul.msk.bf16.gmra.mxu0 %vm352_vm3, %v3392_v62 }
 0xd3a   :  { %v5774_v4 = vpop.eup %5773  ;;  %v2978_v13 = vpop.f32.mrf.mxu3 }
 0xd3b   :  { %v4056_v10 = vmul.f32 %v5774_v4, %v8918_v60  ;;  %v3809_v54 = vpop.xlane.xlu0 %3808 }
 0xd3c   :  { %5775 = vrcp.f32 %v3809_v54  ;;  %v2719_v23 = vpop.f32.mrf.mxu0  ;;  %v3812_v51 = vpop.xlane.xlu1 %3811 }
 0xd3d   :  { %v2761_v57 = vadd.f32 %v2760_v50, %v2719_v23  ;;  %5777 = vrcp.f32 %v3812_v51  ;;  %v4070_v34 = vpack.c.bf16 %v4056_v10, %v4055_v32  ;;  %v5167_v50 = vld [vmem:[%s9281_s9 + $0x38] sm:$0xff]  ;;  %v5165_v32 = vld [vmem:[%s9281_s9 + $0x28] sm:$0xff] }
 0xd3e   :  { %5779 = vrcp.f32 %v3583_v15  ;;  %4214 = vmatpush.bf16.msrb.mxu0 %v5167_v50 }
 0xd3f   :  { %5000 = vmatmul.msk.bf16.gmra.mxu1 %vm352_vm3, %v4070_v34  ;;  %v2992_v19 = vadd.f32 %v2978_v13, %v2761_v57 }
 0xd42   :  { %v5776_v61 = vpop.eup %5775  ;;  %v2980_v41 = vpop.f32.mrf.mxu3 }
 0xd43   :  { %v5778_v56 = vpop.eup %5777  ;;  %v3831_v24 = vmul.f32 %v5776_v61, %v8929_v26  ;;  %v3586_v58 = vpop.xlane.xlu2 %3585 }
 0xd44   :  { %v3832_v60 = vmul.f32 %v5778_v56, %v8932_v6  ;;  %5781 = vrcp.f32 %v3586_v58  ;;  %v2721_v40 = vpop.f32.mrf.mxu0  ;;  %v3204_v46 = vpop.f32.mrf.mxu1 }
 0xd45   :  { %v2763_v29 = vadd.f32 %v2762_v63, %v2721_v40  ;;  %v9061_v25 = vadd.f32 %v3204_v46, %v2992_v19  ;;  %v5780_v12 = vpop.eup %5779 }
 0xd46   :  { %v3845_v20 = vpack.c.bf16 %v3832_v60, %v3831_v24  ;;  %v3605_v16 = vmul.f32 %v5780_v12, %v8920_v28 }
 0xd47   :  { %v2993_v52 = vadd.f32 %v2980_v41, %v2763_v29 }
 0xd48   :  { %4997 = vmatmul.msk.bf16.gmra.mxu3 %vm352_vm3, %v3845_v20 }
 0xd4a   :  { %v5782_v8 = vpop.eup %5781 }
 0xd4b   :  { %v3606_v26 = vmul.f32 %v5782_v8, %v8943_v49  ;;  %v3357_v35 = vpop.xlane.xlu2 %3356 }
 0xd4c   :  { %v3206_v47 = vpop.f32.mrf.mxu1  ;;  %5783 = vrcp.f32 %v3357_v35 }
 0xd4d   :  { %v9066_v9 = vadd.f32 %v3206_v47, %v2993_v52  ;;  %v3619_v6 = vpack.c.bf16 %v3606_v26, %v3605_v16  ;;  %v5163_v26 = vld [vmem:[%s9281_s9 + $0x18] sm:$0xff] }
 0xd4e   :  { %v4035_v49 = vpop.xlane.xlu1 %4034 }
 0xd4f   :  { %4993 = vmatmul.msk.bf16.gmra.mxu2 %vm352_vm3, %v3619_v6 }
 0xd52   :  { %v5784_v27 = vpop.eup %5783 }
 0xd53   :  { %v3360_v14 = vpop.xlane.xlu0 %3359  ;;  %v3379_v7 = vmul.f32 %v5784_v27, %v8958_v53  ;;  %v5166_v53 = vld [vmem:[%s9281_s9 + $0x30] sm:$0xff] }
 0xd54   :  { %5785 = vrcp.f32 %v3360_v14  ;;  %4215 = vmatpush.bf16.msrb.mxu0 %v5166_v53 }
 0xd55   :  { %v2983_v15 = vpop.f32.mrf.mxu3  ;;  %5787 = vrcp.f32 %v4035_v49 }
 0xd56   :  { %v3592_v23 = vpop.xlane.xlu1 %3591 }
 0xd58   :  { %4216 = vmatpush.bf16.msrb.mxu0 %v5165_v32  ;;  %v2753_v32 = vadd.f32 %v8941_v48, %v8945_v5  ;;  %v9123_v48 = vld [vmem:[%s9280_s8] ss:$0 sm:$0xff] }
 0xd5a   :  { %v5786_v36 = vpop.eup %5785  ;;  %v2765_v28 = vpop.f32.mrf.mxu2 }
 0xd5b   :  { %v3380_v30 = vmul.f32 %v5786_v36, %v8972_v31  ;;  %v5788_v34 = vpop.eup %5787 }
 0xd5c   :  { %v4057_v56 = vmul.f32 %v5788_v34, %v8966_v2  ;;  %v5164_v2 = vld [vmem:[%s9281_s9 + $0x20] sm:$0xff] }
 0xd5d   :  { %v3393_v39 = vpack.c.bf16 %v3380_v30, %v3379_v7  ;;  %v2985_v51 = vpop.f32.mrf.mxu3  ;;  %4217 = vmatpush.bf16.msrb.mxu0 %v5164_v2 }
 0xd5e   :  { %v3363_v46 = vpop.xlane.xlu1 %3362 }
 0xd5f   :  { %4989 = vmatmul.msk.bf16.gmra.mxu0 %vm352_vm3, %v3393_v39  ;;  %v3209_v19 = vpop.f32.mrf.mxu1 }
 0xd61   :  { %4218 = vmatpush.bf16.msrb.mxu0 %v5163_v26 }
 0xd62   :  { %v2767_v31 = vpop.f32.mrf.mxu2 }
 0xd64   :  { %v2724_v62 = vpop.f32.mrf.mxu0 }
 0xd65   :  { %v2766_v0 = vadd.f32 %v2765_v28, %v2724_v62  ;;  %v5162_v28 = vld [vmem:[%s9281_s9 + $0x10] sm:$0xff] }
 0xd66   :  { %4219 = vmatpush.bf16.msrb.mxu0 %v5162_v28 }
 0xd67   :  { %v2994_v4 = vadd.f32 %v2983_v15, %v2766_v0  ;;  %v3211_v41 = vpop.f32.mrf.mxu1 }
 0xd69   :  { %v9083_v58 = vadd.f32 %v3209_v19, %v2994_v4 }
 0xd6c   :  { %v2726_v10 = vpop.f32.mrf.mxu0  ;;  %v4038_v13 = vpop.xlane.xlu2 %4037 }
 0xd6d   :  { %v2768_v54 = vadd.f32 %v2767_v31, %v2726_v10  ;;  %5789 = vrcp.f32 %v4038_v13  ;;  %v2989_v10 = vadd.f32 %v8952_v17, %v2753_v32  ;;  %v9546_v13 = vld [vmem:[#allocation37_spill] sm:$0xff] }
 0xd6e   :  { %5791 = vrcp.f32 %v3592_v23 }
 0xd6f   :  { %v2995_v57 = vadd.f32 %v2985_v51, %v2768_v54 }
 0xd73   :  { %v5790_v61 = vpop.eup %5789 }
 0xd74   :  { %v4058_v63 = vmul.f32 %v5790_v61, %v8996_v3  ;;  %v3815_v24 = vpop.xlane.xlu2 %3814  ;;  %v5792_v29 = vpop.eup %5791  ;;  %v9089_v3 = vadd.f32 %v3211_v41, %v2995_v57  ;;  %v3215_v57 = vadd.f32 %v8960_v59, %v2989_v10 }
 0xd75   :  { %v3589_v60 = vpop.xlane.xlu0 %3588  ;;  %v3608_v12 = vmul.f32 %v5792_v29, %v8976_v44  ;;  %v4044_v49 = vpop.xlane.xlu1 %4043 }
 0xd76   :  { %5793 = vrcp.f32 %v3589_v60  ;;  %v4071_v40 = vpack.c.bf16 %v4058_v63, %v4057_v56 }
 0xd77   :  { %5795 = vrcp.f32 %v3363_v46 }
 0xd78   :  { %5001 = vmatmul.msk.bf16.gmra.mxu1 %vm352_vm3, %v4071_v40  ;;  %5797 = vrcp.f32 %v3815_v24 }
 0xd7c   :  { %v5794_v20 = vpop.eup %5793  ;;  %v3366_v52 = vpop.xlane.xlu2 %3365 }
 0xd7d   :  { %v3607_v8 = vmul.f32 %v5794_v20, %v9008_v11  ;;  %5799 = vrcp.f32 %v3366_v52  ;;  %v3818_v16 = vpop.xlane.xlu0 %3817  ;;  %v5796_v6 = vpop.eup %5795  ;;  %v2758_v52 = vadd.f32 %v9045_v38, %v9050_v45 }
 0xd7e   :  { %5801 = vrcp.f32 %v3818_v16  ;;  %v5798_v35 = vpop.eup %5797  ;;  %v3381_v44 = vmul.f32 %v5796_v6, %v8987_v22 }
 0xd7f   :  { %v3620_v47 = vpack.c.bf16 %v3608_v12, %v3607_v8  ;;  %v3833_v36 = vmul.f32 %v5798_v35, %v9001_v42  ;;  %5803 = vrcp.f32 %v4044_v49  ;;  %v5161_v42 = vld [vmem:[%s9281_s9 + $0x8] sm:$0xff]  ;;  %v2991_v16 = vadd.f32 %v9047_v33, %v2758_v52 }
 0xd80   :  { %4220 = vmatpush.bf16.msrb.mxu0 %v5161_v42  ;;  %v3420_v62 = vpop.f32.mrf.mxu0  ;;  %v5174_v42 = vld [vmem:[%s9282_s10 + $0x30] sm:$0xff] }
 0xd81   :  { %4994 = vmatmul.msk.bf16.gmra.mxu2 %vm352_vm3, %v3620_v47  ;;  %v3440_v54 = vadd.f32 %v3420_v62, %v9546_v13  ;;  %v3217_v26 = vadd.f32 %v9054_v43, %v2991_v16  ;;  %v5175_v43 = vld [vmem:[%s9282_s10 + $0x38] sm:$0xff] }
 0xd82   :  { %4311 = vmatpush.bf16.msra.mxu2 %v5175_v43 }
 0xd83   :  { %v5800_v14 = vpop.eup %5799 }
 0xd84   :  { %v5802_v27 = vpop.eup %5801  ;;  %v3382_v11 = vmul.f32 %v5800_v14, %v9017_v55  ;;  %v5160_v55 = vld [vmem:[%s9281_s9] sm:$0xff] }
 0xd85   :  { %v3834_v7 = vmul.f32 %v5802_v27, %v9019_v1  ;;  %v5804_v1 = vpop.eup %5803  ;;  %4221 = vmatpush.bf16.msrb.mxu0 %v5160_v55 }
 0xd86   :  { %v3394_v30 = vpack.c.bf16 %v3382_v11, %v3381_v44  ;;  %v4060_v0 = vmul.f32 %v5804_v1, %v9006_v18  ;;  %4312 = vmatpush.bf16.msra.mxu2 %v5174_v42 }
 0xd87   :  { %v3846_v39 = vpack.c.bf16 %v3834_v7, %v3833_v36 }
 0xd88   :  { %4990 = vmatmul.msk.bf16.gmra.mxu0 %vm352_vm3, %v3394_v30  ;;  %v3422_v23 = vpop.f32.mrf.mxu0 }
 0xd89   :  { %4998 = vmatmul.msk.bf16.gmra.mxu3 %vm352_vm3, %v3846_v39  ;;  %v3441_v19 = vadd.f32 %v3422_v23, %v3215_v57 }
 0xd93   :  { %v3646_v4 = vpop.f32.mrf.mxu2 }
 0xd94   :  { %v4041_v22 = vpop.xlane.xlu0 %4040  ;;  %v3666_v34 = vadd.f32 %v3646_v4, %v3440_v54  ;;  %v5173_v4 = vld [vmem:[%s9282_s10 + $0x28] sm:$0xff] }
 0xd95   :  { %5805 = vrcp.f32 %v4041_v22  ;;  %4313 = vmatpush.bf16.msra.mxu2 %v5173_v4 }
 0xd9b   :  { %v5806_v15 = vpop.eup %5805  ;;  %v3872_v31 = vpop.f32.mrf.mxu3 }
 0xd9c   :  { %v4059_v50 = vmul.f32 %v5806_v15, %v9032_v21  ;;  %v3648_v18 = vpop.f32.mrf.mxu2  ;;  %v3892_v21 = vadd.f32 %v3872_v31, %v3666_v34 }
 0xd9d   :  { %v3667_v56 = vadd.f32 %v3648_v18, %v3441_v19  ;;  %v5172_v18 = vld [vmem:[%s9282_s10 + $0x20] sm:$0xff] }
 0xd9e   :  { %v4072_v53 = vpack.c.bf16 %v4060_v0, %v4059_v50  ;;  %4314 = vmatpush.bf16.msra.mxu2 %v5172_v18 }
 0xda0   :  { %5002 = vmatmul.msk.bf16.gmra.mxu1 %vm352_vm3, %v4072_v53 }
 0xda3   :  { %v3874_v61 = vpop.f32.mrf.mxu3 }
 0xda4   :  { %v3893_v5 = vadd.f32 %v3874_v61, %v3667_v56  ;;  %v5170_v61 = vld [vmem:[%s9282_s10 + $0x10] sm:$0xff] }
 0xda5   :  { %v4098_v51 = vpop.f32.mrf.mxu1 }
 0xda6   :  { %v4118_v63 = vadd.f32 %v4098_v51, %v3892_v21  ;;  %v5171_v21 = vld [vmem:[%s9282_s10 + $0x18] sm:$0xff] }
 0xda7   :  { %4315 = vmatpush.bf16.msra.mxu2 %v5171_v21 }
 0xda8   :  { %v4130_v24 = vadd.f32 %v9123_v48, %v4118_v63  ;;  %v5169_v63 = vld [vmem:[%s9282_s10 + $0x8] sm:$0xff] }
 0xdaa   :  { %v4138_v59 = vmax.f32 %v4130_v24, 0.0 }
 0xdab   :  { %4316 = vmatpush.bf16.msra.mxu2 %v5170_v61 }
 0xdad   :  { %v4100_v17 = vpop.f32.mrf.mxu1 }
 0xdae   :  { %v4119_v60 = vadd.f32 %v4100_v17, %v3893_v5 }
 0xdaf   :  { %4317 = vmatpush.bf16.msra.mxu2 %v5169_v63 }
 0xdb0   :  { %v4131_v40 = vadd.f32 %v9123_v48, %v4119_v60 }
 0xdb2   :  { %v4139_v46 = vmax.f32 %v4131_v40, 0.0  ;;  %v3651_v41 = vpop.f32.mrf.mxu2  ;;  %v5168_v40 = vld [vmem:[%s9282_s10] sm:$0xff] }
 0xdb3   :  { %v3877_v12 = vpop.f32.mrf.mxu3  ;;  %4318 = vmatpush.bf16.msra.mxu2 %v5168_v40 }
 0xdb4   :  { %v4146_v29 = vpack.c.bf16 %v4139_v46, %v4138_v59 }
 0xdb5   :  { %v3425_v20 = vpop.f32.mrf.mxu0 }
 0xdb6   :  { %v3442_v2 = vadd.f32 %v3425_v20, %v8978_v37  ;;  %4222 = vmatmul.bf16.vlgmr.msrb.gmra.mxu0 %v4146_v29 }
 0xdb8   :  { %v3668_v8 = vadd.f32 %v3651_v41, %v3442_v2 }
 0xdba   :  { %v3894_v6 = vadd.f32 %v3877_v12, %v3668_v8  ;;  %v3653_v27 = vpop.f32.mrf.mxu2 }
 0xdbb   :  { %v3879_v11 = vpop.f32.mrf.mxu3 }
 0xdbc   :  { %v4103_v47 = vpop.f32.mrf.mxu1 }
 0xdbd   :  { %v3427_v35 = vpop.f32.mrf.mxu0  ;;  %v4120_v36 = vadd.f32 %v4103_v47, %v3894_v6 }
 0xdbe   :  { %v3443_v14 = vadd.f32 %v3427_v35, %v3217_v26 }
 0xdbf   :  { %v4132_v38 = vadd.f32 %v9123_v48, %v4120_v36 }
 0xdc0   :  { %v3669_v44 = vadd.f32 %v3653_v27, %v3443_v14 }
 0xdc1   :  { %v4140_v39 = vmax.f32 %v4132_v38, 0.0 }
 0xdc2   :  { %v3895_v7 = vadd.f32 %v3879_v11, %v3669_v44 }
 0xdc4   :  { %v4105_v30 = vpop.f32.mrf.mxu1 }
 0xdc5   :  { %v4121_v37 = vadd.f32 %v4105_v30, %v3895_v7 }
 0xdc7   :  { %v4133_v45 = vadd.f32 %v9123_v48, %v4121_v37 }
 0xdc9   :  { %v4141_v28 = vmax.f32 %v4133_v45, 0.0  ;;  %v5934_v45 = vmov 1  }
 0xdca   :  { %5287 = vset.pattern.permute.xlu2 %v5934_v45  ;;  %5288 = vset.pattern.permute.xlu0 %v5934_v45 }
 0xdcb   :  { %v4147_v33 = vpack.c.bf16 %v4141_v28, %v4140_v39  ;;  %v3882_v1 = vpop.f32.mrf.mxu3  ;;  %5289 = vset.pattern.permute.xlu1 %v5934_v45  ;;  %v5869_v45 = vld [vmem:[%s9273_s1 + $0x28] sm:$0xff] }
 0xdcd   :  { %4227 = vmatmul.bf16.gmra.mxu0 %v4147_v33 }
 0xdd2   :  { %v3656_v22 = vpop.f32.mrf.mxu2 }
 0xdd3   :  { %v3884_v13 = vpop.f32.mrf.mxu3 }
 0xdda   :  { %v3658_v53 = vpop.f32.mrf.mxu2 }
 0xddc   :  { %v3430_v49 = vpop.f32.mrf.mxu0 }
 0xddd   :  { %v3444_v55 = vadd.f32 %v3430_v49, %v9061_v25 }
 0xddf   :  { %v3670_v62 = vadd.f32 %v3656_v22, %v3444_v55 }
 0xde1   :  { %v3896_v32 = vadd.f32 %v3882_v1, %v3670_v62 }
 0xde4   :  { %v3432_v15 = vpop.f32.mrf.mxu0 }
 0xde5   :  { %v3445_v0 = vadd.f32 %v3432_v15, %v9066_v9 }
 0xde7   :  { %v3671_v31 = vadd.f32 %v3658_v53, %v3445_v0 }
 0xde9   :  { %v3897_v54 = vadd.f32 %v3884_v13, %v3671_v31 }
 0xdf5   :  { %v4108_v50 = vpop.f32.mrf.mxu1 }
 0xdf6   :  { %v4122_v10 = vadd.f32 %v4108_v50, %v3896_v32 }
 0xdf8   :  { %v4134_v25 = vadd.f32 %v9123_v48, %v4122_v10 }
 0xdfa   :  { %v4142_v34 = vmax.f32 %v4134_v25, 0.0  ;;  %v5863_v25 = vld [vmem:[%s9273_s1 + $0x8] sm:$0xff] }
 0xdfd   :  { %v4110_v23 = vpop.f32.mrf.mxu1 }
 0xdfe   :  { %v4123_v51 = vadd.f32 %v4110_v23, %v3897_v54 }
 0xe00   :  { %v4135_v57 = vadd.f32 %v9123_v48, %v4123_v51 }
 0xe02   :  { %v4143_v9 = vmax.f32 %v4135_v57, 0.0  ;;  %v5864_v57 = vld [vmem:[%s9273_s1] sm:$0xff] }
 0xe04   :  { %v4148_v19 = vpack.c.bf16 %v4143_v9, %v4142_v34  ;;  %v3661_v5 = vpop.f32.mrf.mxu2 }
 0xe05   :  { %v3435_v56 = vpop.f32.mrf.mxu0 }
 0xe06   :  { %4232 = vmatmul.bf16.gmra.mxu0 %v4148_v19  ;;  %v3446_v24 = vadd.f32 %v3435_v56, %v9083_v58  ;;  %v5865_v56 = vld [vmem:[%s9273_s1 + $0x10] sm:$0xff] }
 0xe08   :  { %v3672_v46 = vadd.f32 %v3661_v5, %v3446_v24 }
 0xe0c   :  { %v3887_v17 = vpop.f32.mrf.mxu3  ;;  %v3663_v20 = vpop.f32.mrf.mxu2 }
 0xe0d   :  { %v3437_v60 = vpop.f32.mrf.mxu0  ;;  %v3898_v41 = vadd.f32 %v3887_v17, %v3672_v46 }
 0xe0e   :  { %v3447_v29 = vadd.f32 %v3437_v60, %v9089_v3 }
 0xe10   :  { %v3673_v2 = vadd.f32 %v3663_v20, %v3447_v29  ;;  %v5866_v29 = vld [vmem:[%s9273_s1 + $0x18] sm:$0xff] }
 0xe14   :  { %v3889_v52 = vpop.f32.mrf.mxu3 }
 0xe15   :  { %v3899_v8 = vadd.f32 %v3889_v52, %v3673_v2 }
 0xe1d   :  { %v4113_v59 = vpop.f32.mrf.mxu1 }
 0xe1e   :  { %v4124_v12 = vadd.f32 %v4113_v59, %v3898_v41 }
 0xe20   :  { %v4136_v26 = vadd.f32 %v9123_v48, %v4124_v12 }
 0xe22   :  { %v4144_v6 = vmax.f32 %v4136_v26, 0.0 }
 0xe25   :  { %v4115_v16 = vpop.f32.mrf.mxu1 }
 0xe26   :  { %v4125_v58 = vadd.f32 %v4115_v16, %v3899_v8 }
 0xe28   :  { %v4137_v47 = vadd.f32 %v9123_v48, %v4125_v58 }
 0xe2a   :  { %v4145_v35 = vmax.f32 %v4137_v47, 0.0 }
 0xe2c   :  { %v4149_v14 = vpack.c.bf16 %v4145_v35, %v4144_v6  ;;  %v5867_v35 = vld [vmem:[%s9273_s1 + $0x20] sm:$0xff] }
 0xe2e   :  { %4237 = vmatmul.bf16.gmra.mxu0 %v4149_v14 }
 0xe33   :  { %v4223_v27 = vpop.f32.mrf.mxu0 }
 0xe3b   :  { %v4225_v44 = vpop.f32.mrf.mxu0 }
 0xe3c   :  { %v4243_v3 = vpack.c.bf16 %v4225_v44, %v4223_v27 }
 0xe3e   :  { %4319 = vmatmul.bf16.vlgmr.msra.gmra.mxu2 %v4243_v3 }
 0xe4a   :  { %v4228_v11 = vpop.f32.mrf.mxu0 }
 0xe52   :  { %v4230_v36 = vpop.f32.mrf.mxu0 }
 0xe53   :  { %v4244_v7 = vpack.c.bf16 %v4230_v36, %v4228_v11  ;;  %v5868_v36 = vld [vmem:[%s9273_s1 + $0x30] sm:$0xff] }
 0xe55   :  { %4324 = vmatmul.bf16.gmra.mxu2 %v4244_v7 }
 0xe83   :  { %v4233_v30 = vpop.f32.mrf.mxu0 }
 0xe8b   :  { %v4235_v38 = vpop.f32.mrf.mxu0 }
 0xe8c   :  { %v4245_v37 = vpack.c.bf16 %v4235_v38, %v4233_v30 }
 0xe8e   :  { %4329 = vmatmul.bf16.gmra.mxu2 %v4245_v37 }
 0xeab   :  { %v4238_v48 = vpop.f32.mrf.mxu0 }
 0xeb3   :  { %v4240_v39 = vpop.f32.mrf.mxu0 }
 0xeb4   :  { %v4246_v28 = vpack.c.bf16 %v4240_v39, %v4238_v48 }
 0xeb6   :  { %4334 = vmatmul.bf16.gmra.mxu2 %v4246_v28  ;;  %4565 = vmatpush.bf16.msra.mxu3 %v4246_v28 }
 0xeba   :  { %4566 = vmatpush.bf16.msra.mxu3 %v4245_v37 }
 0xebe   :  { %4567 = vmatpush.bf16.msra.mxu3 %v4244_v7 }
 0xec1   :  { %v4320_v33 = vpop.f32.mrf.mxu2 }
 0xec2   :  { %4374 = vperm.xlu2 %5287, %v4320_v33   ;;  %4568 = vmatpush.bf16.msra.mxu3 %v4243_v3 }
 0xec9   :  { %v4322_v43 = vpop.f32.mrf.mxu2 }
 0xeca   :  { %4379 = vperm.xlu0 %5288, %v4322_v43  }
 0xed8   :  { %v4325_v49 = vpop.f32.mrf.mxu2 }
 0xed9   :  { %4384 = vperm.xlu1 %5289, %v4325_v49  }
 0xee0   :  { %v4327_v22 = vpop.f32.mrf.mxu2 }
 0xf0e   :  { %4340 = vxpose.xlu1.b32.start [1/8] (short) (narrow) %v4320_v33, 8 }
 0xf11   :  { %v4330_v42 = vpop.f32.mrf.mxu2 }
 0xf16   :  { %4341 = vxpose.xlu1.b32.cont [2/8] (short) (narrow) %v4322_v43, 8 }
 0xf19   :  { %v4332_v55 = vpop.f32.mrf.mxu2 }
 0xf1c   :  { %v4375_v4 = vpop.permute.xlu2 %4374 }
 0xf1e   :  { %4342 = vxpose.xlu1.b32.cont [3/8] (short) (narrow) %v4325_v49, 8 }
 0xf26   :  { %4343 = vxpose.xlu1.b32.cont [4/8] (short) (narrow) %v4327_v22, 8 }
 0xf2e   :  { %4344 = vxpose.xlu1.b32.cont [5/8] (short) (narrow) %v4330_v42, 8 }
 0xf36   :  { %4345 = vxpose.xlu1.b32.cont [6/8] (short) (narrow) %v4332_v55, 8 }
 0xf39   :  { %v4335_v1 = vpop.f32.mrf.mxu2 }
 0xf3c   :  { %v4380_v53 = vpop.permute.xlu0 %4379 }
 0xf3e   :  { %4346 = vxpose.xlu1.b32.cont [7/8] (short) (narrow) %v4335_v1, 8 }
 0xf41   :  { %v4337_v15 = vpop.f32.mrf.mxu2 }
 0xf46   :  { %4347 = vxpose.xlu1.b32.end [8/8] (short) (narrow) %v4337_v15, 8 }
 0xf4b   :  { %v4385_v62 = vpop.permute.xlu1 %4384 }
 0xfb2   :  { %v4356_v0 = vpop.trf.xlu1 }
 0xfb3   :  { %v9166_v50 = vperm.slane %v4356_v0, 0 }
 0xfb5   :  { %v4414_v31 = vadd.f32 %v9166_v50, %v4380_v53  ;;  %v4413_v32 = vadd.f32 %v9166_v50, %v4375_v4  ;;  %v4415_v19 = vadd.f32 %v9166_v50, %v4385_v62 }
 0xfb7   :  { %vm4422_vm10 = vcmp.gt.f32.partialorder %v4414_v31, 0.0  ;;  %v4430_v10 = vmul.f32 0.2, %v4414_v31  ;;  %vm4421_vm11 = vcmp.gt.f32.partialorder %v4413_v32, 0.0  ;;  %v4429_v13 = vmul.f32 0.2, %v4413_v32 }
 0xfb8   :  { %v4431_v21 = vmul.f32 0.2, %v4415_v19  ;;  %vm4423_vm12 = vcmp.gt.f32.partialorder %v4415_v19, 0.0 }
 0xfb9   :  { %v4438_v54 = vsel %vm4422_vm10, %v4414_v31, %v4430_v10  ;;  %v4437_v23 = vsel %vm4421_vm11, %v4413_v32, %v4429_v13 }
 0xfba   :  { %v9173_v51 = vadd.f32 %v5863_v25, %v4438_v54  ;;  %v4445_v34 = vadd.f32 %v5864_v57, %v4437_v23  ;;  %v4439_v61 = vsel %vm4423_vm12, %v4415_v19, %v4431_v21 }
 0xfbb   :  { %v9185_v63 = vadd.f32 %v5865_v56, %v4439_v61 }
 0xfbc   :  { %v4456_v9 = vsel %vm352_vm3, %v9173_v51, -inf  ;;  %v4453_v18 = vsel %vm352_vm3, %v4445_v34, -inf }
 0xfbd   :  { %4457 = vmax.xlane.f32.xlu2 %v4456_v9  ;;  %4454 = vmax.xlane.f32.xlu0 %v4453_v18  ;;  %v4459_v5 = vsel %vm352_vm3, %v9185_v63, -inf }
 0xfd1   :  { %4404 = vperm.xlu0 %5288, %v4335_v1  }
 0xfd5   :  { %4389 = vperm.xlu2 %5287, %v4327_v22  }
 0xfdd   :  { %4394 = vperm.xlu2 %5287, %v4330_v42  }
 0xfe5   :  { %4399 = vperm.xlu2 %5287, %v4332_v55  }
 0xfed   :  { %4409 = vperm.xlu2 %5287, %v4337_v15   ;;  %v5870_v15 = vld [vmem:[%s9273_s1 + $0x38] sm:$0xff] }
 0xffb   :  { %4460 = vmax.xlane.f32.xlu0 %v4459_v5 }
0x1030   :  { %v4458_v17 = vpop.xlane.xlu2 %4457  ;;  %v4455_v40 = vpop.xlane.xlu0 %4454 }
0x1031   :  { %v4477_v12 = vsub.f32 %v4445_v34, %v4455_v40  ;;  %v4478_v39 = vsub.f32 %v9173_v51, %v4458_v17 }
0x1033   :  { %v4485_v47 = vmul.f32 1.442695, %v4477_v12  ;;  %v4487_v22 = vmul.f32 1.442695, %v4478_v39  ;;  %v5179_v39 = vld [vmem:[%s9284_s12 + $0x18] sm:$0xff] }
0x1035   :  { %5807 = vpow2.f32 %v4485_v47 }
0x1036   :  { %5809 = vpow2.f32 %v4487_v22 }
0x1038   :  { %v4390_v24 = vpop.permute.xlu2 %4389 }
0x1039   :  { %v4416_v60 = vadd.f32 %v9166_v50, %v4390_v24 }
0x103b   :  { %vm4424_vm13 = vcmp.gt.f32.partialorder %v4416_v60, 0.0  ;;  %v4432_v59 = vmul.f32 0.2, %v4416_v60  ;;  %v9209_v28 = vpop.eup %5807 }
0x103c   :  { %v4501_v55 = vsel %vm352_vm3, %v9209_v28, 0.0  ;;  %v5810_v4 = vpop.eup %5809 }
0x103d   :  { %v4440_v46 = vsel %vm4424_vm13, %v4416_v60, %v4432_v59 }
0x103e   :  { %v4448_v41 = vadd.f32 %v5866_v29, %v4440_v46 }
0x1040   :  { %v4395_v20 = vpop.permute.xlu2 %4394  ;;  %v4462_v52 = vsel %vm352_vm3, %v4448_v41, -inf }
0x1041   :  { %v4417_v2 = vadd.f32 %v9166_v50, %v4395_v20  ;;  %4463 = vmax.xlane.f32.xlu2 %v4462_v52 }
0x1043   :  { %vm4425_vm14 = vcmp.gt.f32.partialorder %v4417_v2, 0.0  ;;  %v4433_v8 = vmul.f32 0.2, %v4417_v2  ;;  %v4405_v16 = vpop.permute.xlu0 %4404 }
0x1044   :  { %v4419_v26 = vadd.f32 %v9166_v50, %v4405_v16 }
0x1045   :  { %v4441_v58 = vsel %vm4425_vm14, %v4417_v2, %v4433_v8 }
0x1046   :  { %vm4427_vm15 = vcmp.gt.f32.partialorder %v4419_v26, 0.0  ;;  %v4435_v6 = vmul.f32 0.2, %v4419_v26  ;;  %v4449_v14 = vadd.f32 %v5867_v35, %v4441_v58 }
0x1048   :  { %v4400_v27 = vpop.permute.xlu2 %4399  ;;  %v4465_v44 = vsel %vm352_vm3, %v4449_v14, -inf  ;;  %v4443_v3 = vsel %vm4427_vm15, %v4419_v26, %v4435_v6 }
0x1049   :  { %v4418_v11 = vadd.f32 %v9166_v50, %v4400_v27  ;;  %4466 = vmax.xlane.f32.xlu1 %v4465_v44  ;;  %v4451_v7 = vadd.f32 %v5868_v36, %v4443_v3  ;;  %v5183_v27 = vld [vmem:[%s9284_s12 + $0x38] sm:$0xff]  ;;  %v5182_v44 = vld [vmem:[%s9284_s12 + $0x30] sm:$0xff] }
0x104a   :  { %4670 = vmatpush.bf16.msrb.mxu1 %v5183_v27 }
0x104b   :  { %vm4426_vm0 = vcmp.gt.f32.partialorder %v4418_v11, 0.0  ;;  %v4434_v30 = vmul.f32 0.2, %v4418_v11  ;;  %v4471_v38 = vsel %vm352_vm3, %v4451_v7, -inf }
0x104c   :  { %4472 = vmax.xlane.f32.xlu2 %v4471_v38 }
0x104d   :  { %v4442_v37 = vsel %vm4426_vm0, %v4418_v11, %v4434_v30  ;;  %v5181_v11 = vld [vmem:[%s9284_s12 + $0x28] sm:$0xff] }
0x104e   :  { %v4450_v48 = vadd.f32 %v5869_v45, %v4442_v37  ;;  %4671 = vmatpush.bf16.msrb.mxu1 %v5182_v44  ;;  %v5180_v37 = vld [vmem:[%s9284_s12 + $0x20] sm:$0xff] }
0x104f   :  { %v5293_v44 = vld [vmem:[%s9285_s13] ss:$0 sm:$0xff] }
0x1050   :  { %v4410_v33 = vpop.permute.xlu2 %4409  ;;  %v4468_v43 = vsel %vm352_vm3, %v4450_v48, -inf }
0x1051   :  { %v4420_v49 = vadd.f32 %v9166_v50, %v4410_v33  ;;  %4469 = vmax.xlane.f32.xlu0 %v4468_v43  ;;  %v4504_v50 = vsel %vm352_vm3, %v5810_v4, 0.0 }
0x1052   :  { %4672 = vmatpush.bf16.msrb.mxu1 %v5181_v11 }
0x1053   :  { %vm4428_vm1 = vcmp.gt.f32.partialorder %v4420_v49, 0.0  ;;  %v4436_v42 = vmul.f32 0.2, %v4420_v49 }
0x1054   :  { %4502 = vadd.xlane.f32.xlu2 %v4501_v55 }
0x1055   :  { %v4444_v1 = vsel %vm4428_vm1, %v4420_v49, %v4436_v42 }
0x1056   :  { %v4452_v62 = vadd.f32 %v5870_v15, %v4444_v1  ;;  %4673 = vmatpush.bf16.msrb.mxu1 %v5180_v37  ;;  %v5177_v1 = vld [vmem:[%s9284_s12 + $0x8] sm:$0xff] }
0x1058   :  { %v4474_v0 = vsel %vm352_vm3, %v4452_v62, -inf }
0x1059   :  { %4475 = vmax.xlane.f32.xlu0 %v4474_v0 }
0x105a   :  { %4674 = vmatpush.bf16.msrb.mxu1 %v5179_v39 }
0x1061   :  { %4505 = vadd.xlane.f32.xlu0 %v4504_v50 }
0x106e   :  { %v4461_v53 = vpop.xlane.xlu0 %4460 }
0x106f   :  { %v4479_v31 = vsub.f32 %v9185_v63, %v4461_v53 }
0x1071   :  { %v4489_v32 = vmul.f32 1.442695, %v4479_v31 }
0x1073   :  { %5811 = vpow2.f32 %v4489_v32 }
0x1079   :  { %v5812_v10 = vpop.eup %5811 }
0x107a   :  { %v4507_v13 = vsel %vm352_vm3, %v5812_v10, 0.0 }
0x107b   :  { %4508 = vadd.xlane.f32.xlu2 %v4507_v13 }
0x10b4   :  { %v4464_v54 = vpop.xlane.xlu2 %4463 }
0x10b5   :  { %v4480_v23 = vsub.f32 %v4448_v41, %v4464_v54 }
0x10b7   :  { %v4491_v25 = vmul.f32 1.442695, %v4480_v23 }
0x10b9   :  { %5813 = vpow2.f32 %v4491_v25 }
0x10bc   :  { %v4467_v51 = vpop.xlane.xlu1 %4466 }
0x10bd   :  { %v4481_v57 = vsub.f32 %v4449_v14, %v4467_v51 }
0x10bf   :  { %v5814_v34 = vpop.eup %5813  ;;  %v4493_v9 = vmul.f32 1.442695, %v4481_v57  ;;  %v4473_v18 = vpop.xlane.xlu2 %4472 }
0x10c0   :  { %v4483_v19 = vsub.f32 %v4451_v7, %v4473_v18  ;;  %v4510_v21 = vsel %vm352_vm3, %v5814_v34, 0.0  ;;  %v5190_v18 = vld [vmem:[#allocation2 + $0x30] sm:$0xff] }
0x10c1   :  { %5815 = vpow2.f32 %v4493_v9  ;;  %4511 = vadd.xlane.f32.xlu0 %v4510_v21 }
0x10c2   :  { %v4497_v61 = vmul.f32 1.442695, %v4483_v19  ;;  %v5189_v19 = vld [vmem:[#allocation2 + $0x28] sm:$0xff] }
0x10c4   :  { %v4470_v56 = vpop.xlane.xlu0 %4469  ;;  %5817 = vpow2.f32 %v4497_v61 }
0x10c5   :  { %v4482_v63 = vsub.f32 %v4450_v48, %v4470_v56 }
0x10c7   :  { %v5816_v5 = vpop.eup %5815  ;;  %v4495_v17 = vmul.f32 1.442695, %v4482_v63  ;;  %v4503_v41 = vpop.xlane.xlu2 %4502 }
0x10c8   :  { %v4513_v24 = vsel %vm352_vm3, %v5816_v5, 0.0 }
0x10c9   :  { %5819 = vpow2.f32 %v4495_v17  ;;  %4514 = vadd.xlane.f32.xlu2 %v4513_v24  ;;  %v5188_v24 = vld [vmem:[#allocation2 + $0x20] sm:$0xff] }
0x10ca   :  { %v9224_v40 = vpop.eup %5817 }
0x10cb   :  { %v4519_v20 = vsel %vm352_vm3, %v9224_v40, 0.0 }
0x10cc   :  { %v4476_v60 = vpop.xlane.xlu0 %4475 }
0x10cd   :  { %v4484_v59 = vsub.f32 %v4452_v62, %v4476_v60  ;;  %v5176_v62 = vld [vmem:[%s9284_s12] sm:$0xff]  ;;  %v5187_v60 = vld [vmem:[#allocation2 + $0x18] sm:$0xff] }
0x10cf   :  { %v5820_v46 = vpop.eup %5819  ;;  %v4499_v29 = vmul.f32 1.442695, %v4484_v59  ;;  %v5186_v59 = vld [vmem:[#allocation2 + $0x10] sm:$0xff] }
0x10d0   :  { %v4516_v52 = vsel %vm352_vm3, %v5820_v46, 0.0 }
0x10d1   :  { %5821 = vpow2.f32 %v4499_v29  ;;  %4520 = vadd.xlane.f32.xlu2 %v4519_v20  ;;  %4517 = vadd.xlane.f32.xlu0 %v4516_v52 }
0x10d2   :  { %5823 = vrcp.f32 %v4503_v41  ;;  %v5185_v41 = vld [vmem:[#allocation2 + $0x8] sm:$0xff] }
0x10d4   :  { %v4506_v2 = vpop.xlane.xlu0 %4505 }
0x10d5   :  { %5825 = vrcp.f32 %v4506_v2 }
0x10d7   :  { %v5822_v12 = vpop.eup %5821 }
0x10d8   :  { %v4522_v8 = vsel %vm352_vm3, %v5822_v12, 0.0  ;;  %v5824_v16 = vpop.eup %5823 }
0x10d9   :  { %4523 = vadd.xlane.f32.xlu0 %v4522_v8  ;;  %v4533_v58 = vmul.f32 %v5824_v16, %v9209_v28  ;;  %v5178_v28 = vld [vmem:[%s9284_s12 + $0x10] sm:$0xff] }
0x10da   :  { %4675 = vmatpush.bf16.msrb.mxu1 %v5178_v28 }
0x10db   :  { %v5826_v26 = vpop.eup %5825 }
0x10dc   :  { %v4534_v47 = vmul.f32 %v5826_v26, %v5810_v4 }
0x10de   :  { %v4541_v6 = vpack.c.bf16 %v4534_v47, %v4533_v58  ;;  %4676 = vmatpush.bf16.msrb.mxu1 %v5177_v1 }
0x10e0   :  { %5067 = vmatmul.msk.bf16.vlgmr.msra.gmra.mxu3 %vm352_vm3, %v4541_v6 }
0x10e2   :  { %4677 = vmatpush.bf16.msrb.mxu1 %v5176_v62 }
0x10ee   :  { %v4509_v35 = vpop.xlane.xlu2 %4508 }
0x10ef   :  { %5827 = vrcp.f32 %v4509_v35 }
0x10f5   :  { %v5828_v3 = vpop.eup %5827 }
0x10f6   :  { %v4535_v7 = vmul.f32 %v5828_v3, %v5812_v10  ;;  %v5292_v10 = vld [vmem:[%s9283_s11] ss:$0 sm:$0xff] }
0x1134   :  { %v4512_v14 = vpop.xlane.xlu0 %4511 }
0x1135   :  { %5829 = vrcp.f32 %v4512_v14 }
0x113b   :  { %v5830_v36 = vpop.eup %5829 }
0x113c   :  { %v4536_v30 = vmul.f32 %v5830_v36, %v5814_v34  ;;  %v4515_v45 = vpop.xlane.xlu2 %4514  ;;  %v5191_v34 = vld [vmem:[#allocation2 + $0x38] sm:$0xff] }
0x113d   :  { %5831 = vrcp.f32 %v4515_v45  ;;  %4779 = vmatpush.bf16.msra.mxu0 %v5191_v34 }
0x113e   :  { %v4542_v38 = vpack.c.bf16 %v4536_v30, %v4535_v7 }
0x1140   :  { %5068 = vmatmul.msk.bf16.gmra.mxu3 %vm352_vm3, %v4542_v38 }
0x1141   :  { %4780 = vmatpush.bf16.msra.mxu0 %v5190_v18 }
0x1143   :  { %v5832_v33 = vpop.eup %5831 }
0x1144   :  { %v4518_v48 = vpop.xlane.xlu0 %4517  ;;  %v4537_v49 = vmul.f32 %v5832_v33, %v5816_v5  ;;  %v4521_v15 = vpop.xlane.xlu2 %4520 }
0x1145   :  { %5833 = vrcp.f32 %v4518_v48  ;;  %4781 = vmatpush.bf16.msra.mxu0 %v5189_v19 }
0x1149   :  { %4782 = vmatpush.bf16.msra.mxu0 %v5188_v24 }
0x114b   :  { %v5834_v43 = vpop.eup %5833 }
0x114c   :  { %v4538_v22 = vmul.f32 %v5834_v43, %v5820_v46  ;;  %v4524_v42 = vpop.xlane.xlu0 %4523 }
0x114d   :  { %5835 = vrcp.f32 %v4524_v42  ;;  %4783 = vmatpush.bf16.msra.mxu0 %v5187_v60 }
0x114e   :  { %v4543_v55 = vpack.c.bf16 %v4538_v22, %v4537_v49  ;;  %5837 = vrcp.f32 %v4521_v15 }
0x1150   :  { %5069 = vmatmul.msk.bf16.gmra.mxu3 %vm352_vm3, %v4543_v55 }
0x1151   :  { %4784 = vmatpush.bf16.msra.mxu0 %v5186_v59 }
0x1153   :  { %v5836_v0 = vpop.eup %5835 }
0x1154   :  { %v5838_v4 = vpop.eup %5837  ;;  %v4540_v50 = vmul.f32 %v5836_v0, %v5822_v12  ;;  %v5184_v12 = vld [vmem:[#allocation2] sm:$0xff] }
0x1155   :  { %v4539_v53 = vmul.f32 %v5838_v4, %v9224_v40  ;;  %4785 = vmatpush.bf16.msra.mxu0 %v5185_v41 }
0x1157   :  { %v4544_v31 = vpack.c.bf16 %v4540_v50, %v4539_v53  ;;  %v5294_v53 = vld [vmem:[%s9287_s15] ss:$0 sm:$0xff]  ;;  %s5935_s15 = smov [#allocation5]  }
0x1158   :  { %s4820_s8 = sshll.u32 %s5935_s15, 4  ;;  %s4821_s8 = int_to_ptr.vmem [resolvable:$true] %s4820_s8 }
0x1159   :  { %4786 = vmatpush.bf16.msra.mxu0 %v5184_v12 }
0x1160   :  { %5070 = vmatmul.msk.bf16.gmra.mxu3 %vm352_vm3, %v4544_v31 }
0x1163   :  { %v4570_v32 = vpop.f32.mrf.mxu3 }
0x1164   :  { %v4571_v13 = vadd.f32 %v5292_v10, %v4570_v32 }
0x1166   :  { %v4590_v25 = vmax.f32 %v4571_v13, 0.0 }
0x116b   :  { %v4572_v54 = vpop.f32.mrf.mxu3 }
0x116c   :  { %v4573_v23 = vadd.f32 %v5292_v10, %v4572_v54 }
0x116e   :  { %v4591_v51 = vmax.f32 %v4573_v23, 0.0 }
0x1170   :  { %v4598_v57 = vpack.c.bf16 %v4591_v51, %v4590_v25 }
0x1172   :  { %4678 = vmatmul.bf16.vlgmr.msrb.gmra.mxu1 %v4598_v57 }
0x11c3   :  { %v4575_v9 = vpop.f32.mrf.mxu3 }
0x11c4   :  { %v4576_v21 = vadd.f32 %v5292_v10, %v4575_v9 }
0x11c6   :  { %v4592_v63 = vmax.f32 %v4576_v21, 0.0 }
0x11cb   :  { %v4577_v61 = vpop.f32.mrf.mxu3 }
0x11cc   :  { %v4578_v56 = vadd.f32 %v5292_v10, %v4577_v61 }
0x11ce   :  { %v4593_v5 = vmax.f32 %v4578_v56, 0.0 }
0x11d0   :  { %v4599_v17 = vpack.c.bf16 %v4593_v5, %v4592_v63 }
0x11d2   :  { %4683 = vmatmul.bf16.gmra.mxu1 %v4599_v17 }
0x11d3   :  { %v4580_v40 = vpop.f32.mrf.mxu3 }
0x11d4   :  { %v4581_v46 = vadd.f32 %v5292_v10, %v4580_v40 }
0x11d6   :  { %v4594_v52 = vmax.f32 %v4581_v46, 0.0 }
0x11db   :  { %v4582_v29 = vpop.f32.mrf.mxu3 }
0x11dc   :  { %v4583_v20 = vadd.f32 %v5292_v10, %v4582_v29 }
0x11de   :  { %v4595_v2 = vmax.f32 %v4583_v20, 0.0 }
0x11e0   :  { %v4600_v8 = vpack.c.bf16 %v4595_v2, %v4594_v52 }
0x11e2   :  { %4688 = vmatmul.bf16.gmra.mxu1 %v4600_v8 }
0x11e3   :  { %v4585_v16 = vpop.f32.mrf.mxu3 }
0x11e4   :  { %v4586_v26 = vadd.f32 %v5292_v10, %v4585_v16 }
0x11e6   :  { %v4596_v6 = vmax.f32 %v4586_v26, 0.0 }
0x11eb   :  { %v4587_v58 = vpop.f32.mrf.mxu3 }
0x11ec   :  { %v4588_v47 = vadd.f32 %v5292_v10, %v4587_v58 }
0x11ee   :  { %v4597_v35 = vmax.f32 %v4588_v47, 0.0 }
0x11ef   :  { %v4679_v14 = vpop.f32.mrf.mxu1 }
0x11f0   :  { %v4601_v27 = vpack.c.bf16 %v4597_v35, %v4596_v6  ;;  %v4680_v3 = vadd.f32 %v5293_v44, %v4679_v14 }
0x11f2   :  { %4693 = vmatmul.bf16.gmra.mxu1 %v4601_v27  ;;  %v4699_v7 = vmax.f32 %v4680_v3, 0.0 }
0x11f7   :  { %v4681_v11 = vpop.f32.mrf.mxu1 }
0x11f8   :  { %v4682_v36 = vadd.f32 %v5293_v44, %v4681_v11 }
0x11fa   :  { %v4700_v30 = vmax.f32 %v4682_v36, 0.0 }
0x11fc   :  { %v4707_v38 = vpack.c.bf16 %v4700_v30, %v4699_v7 }
0x11fe   :  { %4787 = vmatmul.bf16.vlgmr.msra.gmra.mxu0 %v4707_v38 }
0x124f   :  { %v4684_v37 = vpop.f32.mrf.mxu1 }
0x1250   :  { %v4685_v45 = vadd.f32 %v5293_v44, %v4684_v37 }
0x1252   :  { %v4701_v28 = vmax.f32 %v4685_v45, 0.0 }
0x1257   :  { %v4686_v48 = vpop.f32.mrf.mxu1 }
0x1258   :  { %v4687_v39 = vadd.f32 %v5293_v44, %v4686_v48 }
0x125a   :  { %v4702_v33 = vmax.f32 %v4687_v39, 0.0 }
0x125c   :  { %v4708_v43 = vpack.c.bf16 %v4702_v33, %v4701_v28 }
0x125e   :  { %4792 = vmatmul.bf16.gmra.mxu0 %v4708_v43 }
0x125f   :  { %v4689_v49 = vpop.f32.mrf.mxu1 }
0x1260   :  { %v4690_v22 = vadd.f32 %v5293_v44, %v4689_v49 }
0x1262   :  { %v4703_v1 = vmax.f32 %v4690_v22, 0.0 }
0x1267   :  { %v4691_v42 = vpop.f32.mrf.mxu1 }
0x1268   :  { %v4692_v55 = vadd.f32 %v5293_v44, %v4691_v42 }
0x126a   :  { %v4704_v15 = vmax.f32 %v4692_v55, 0.0 }
0x126c   :  { %v4709_v62 = vpack.c.bf16 %v4704_v15, %v4703_v1 }
0x126e   :  { %4797 = vmatmul.bf16.gmra.mxu0 %v4709_v62 }
0x126f   :  { %v4694_v0 = vpop.f32.mrf.mxu1 }
0x1270   :  { %v4695_v4 = vadd.f32 %v5293_v44, %v4694_v0 }
0x1272   :  { %v4705_v32 = vmax.f32 %v4695_v4, 0.0 }
0x1277   :  { %v4696_v50 = vpop.f32.mrf.mxu1 }
0x1278   :  { %v4697_v31 = vadd.f32 %v5293_v44, %v4696_v50 }
0x127a   :  { %v4706_v10 = vmax.f32 %v4697_v31, 0.0 }
0x127b   :  { %v4788_v13 = vpop.f32.mrf.mxu0 }
0x127c   :  { %v4789_v54 = vadd.f32 %v5294_v53, %v4788_v13  ;;  %v4710_v23 = vpack.c.bf16 %v4706_v10, %v4705_v32 }
0x127e   :  { %4808 = vst [vmem:[#allocation5] sm:$0xff] %v4789_v54  ;;  %4802 = vmatmul.bf16.gmra.mxu0 %v4710_v23 }
0x1283   :  { %v4790_v25 = vpop.f32.mrf.mxu0 }
0x1284   :  { %v4791_v51 = vadd.f32 %v5294_v53, %v4790_v25 }
0x1286   :  { %4809 = vst [vmem:[#allocation5 + $0x8] sm:$0xff] %v4791_v51 }
0x12db   :  { %v4793_v57 = vpop.f32.mrf.mxu0 }
0x12dc   :  { %v4794_v34 = vadd.f32 %v5294_v53, %v4793_v57 }
0x12de   :  { %4810 = vst [vmem:[#allocation5 + $0x10] sm:$0xff] %v4794_v34 }
0x12e3   :  { %v4795_v9 = vpop.f32.mrf.mxu0 }
0x12e4   :  { %v4796_v18 = vadd.f32 %v5294_v53, %v4795_v9 }
0x12e6   :  { %4811 = vst [vmem:[#allocation5 + $0x18] sm:$0xff] %v4796_v18 }
0x12eb   :  { %v4798_v19 = vpop.f32.mrf.mxu0 }
0x12ec   :  { %v4799_v21 = vadd.f32 %v5294_v53, %v4798_v19 }
0x12ee   :  { %4812 = vst [vmem:[#allocation5 + $0x20] sm:$0xff] %v4799_v21 }
0x12f3   :  { %v4800_v61 = vpop.f32.mrf.mxu0 }
0x12f4   :  { %v4801_v56 = vadd.f32 %v5294_v53, %v4800_v61 }
0x12f6   :  { %4813 = vst [vmem:[#allocation5 + $0x28] sm:$0xff] %v4801_v56 }
0x12fb   :  { %v4803_v63 = vpop.f32.mrf.mxu0 }
0x12fc   :  { %v4804_v5 = vadd.f32 %v5294_v53, %v4803_v63 }
0x12fe   :  { %4814 = vst [vmem:[#allocation5 + $0x30] sm:$0xff] %v4804_v5 }
0x1303   :  { %v4805_v17 = vpop.f32.mrf.mxu0 }
0x1304   :  { %v4806_v24 = vadd.f32 %v5294_v53, %v4805_v17 }
0x1306   :  { %4815 = vst [vmem:[#allocation5 + $0x38] sm:$0xff] %v4806_v24 }
0x1307   :  { %4828 = dma.vmem_to_hbm [thread:$0]  %s4821_s8, 1024, %s4823_s17, [#allocation4], %s5936_s5, %s5936_s5, %s5937_s26  }
0x1308   :  { %5921 = dma.done.wait [#allocation4], 1024  }
0x1309   :  { %5922 = vsyncadd [#allocation4], 4294966272 }
0x130a   :  { %4833 = vsyncpa [#allocation3], 1 }
0x130b   :  { %4834 = vsyncpa [#allocation4], 1 }

</bundles_post_ra>
